<compile_context>
chip_gen: v5e
topology: v5e:2x2
jax: 0.10.0
libtpu: 0.0.40
codegen_flags: <defaults>
</compile_context>

<pallas_src>
import functools

import jax
import jax.numpy as jnp
import numpy as np
from jax.experimental import pallas as pl
from jax.experimental.pallas import tpu as pltpu

EPS = 1e-5
NEG_SLOPE = 0.2

# MXU-input dtype.  bf16 inputs with f32 accumulation give ~2-3x matmul
# throughput on v5e/v6e/v7x and halve weight + pad/col VMEM and weight DMA.
# Set to jnp.float32 to recover bit-comparable f32 numerics (and tighten the
# test tolerances back to ~5e-4).
MXU_DTYPE = jnp.bfloat16

# Use the 9-tap accumulated matmul (no im2col scratch) once the per-tap
# contraction depth K = C keeps the MXU full; below this, the single deep
# (H*W, 9C) x (9C, C) im2col matmul is kept (its scratch is tiny at small C).
PER_TAP_MIN_C = 128


def _resblock_kernel(x_ref, w_ref, b_ref, o_ref, pad_ref, work_ref, *, per_tap):
    """One ResBlock for one batch element; grid = (batch, num_blocks).

    x_ref   : (1, H, W, C)   f32   input block (resident across the blk axis)
    w_ref   : (1, 2, 9*C, C) bf16  im2col weights of THIS block (conv1, conv2)
    b_ref   : (1, 2, 1, C)   f32   conv biases of this block
    o_ref   : (1, H, W, C)   f32   output block; its index is constant over
                                   the blk axis -> stays resident in VMEM and
                                   carries the activation from block to block.
    pad_ref : VMEM (H+2, W+2, C) MXU_DTYPE  zero-padded activation scratch
    work_ref: VMEM (H*W, C)  f32        accumulator     (per_tap=True)
              VMEM (H*W, 9C) MXU_DTYPE  im2col matrix   (per_tap=False)
    """
    blk = pl.program_id(1)
    _, H, W, C = x_ref.shape
    cdt = pad_ref.dtype
    inv_hw = 1.0 / float(H * W)

    # Once per batch element: zero the 1-pixel halo (nothing else ever writes
    # it; the interior is always fully overwritten before it is read) and pull
    # the HBM input into the resident output block, which acts as the
    # activation carrier for all subsequent blocks.
    @pl.when(blk == 0)
    def _():
        zrow = jnp.zeros((1, W + 2, C), cdt)
        zcol = jnp.zeros((H + 2, 1, C), cdt)
        pad_ref[0:1, :, :] = zrow
        pad_ref[H + 1:H + 2, :, :] = zrow
        pad_ref[:, 0:1, :] = zcol
        pad_ref[:, W + 1:W + 2, :] = zcol
        o_ref[0] = x_ref[0]

    def conv3x3(j):
        """3x3 conv of the activation currently in pad_ref's interior."""
        bias = b_ref[0, j]                                      # (1, C) f32
        if per_tap:
            # 9 shifted matmuls accumulated into an f32 VMEM accumulator: no
            # (H*W, 9C) materialization (9x less scratch + store traffic).
            for dy in range(3):
                for dx in range(3):
                    t = dy * 3 + dx
                    lhs = pad_ref[dy:dy + H, dx:dx + W, :].reshape(H * W, C)
                    contrib = jnp.dot(
                        lhs, w_ref[0, j, t * C:(t + 1) * C, :],
                        preferred_element_type=jnp.float32)
                    if t == 0:
                        work_ref[...] = contrib
                    else:
                        work_ref[...] += contrib
            y = work_ref[...]
        else:
            # Small C: one deep (H*W, 9C) x (9C, C) matmul keeps the MXU
            # contraction full; the bf16 col matrix is tiny at this size.
            for dy in range(3):
                for dx in range(3):
                    t = dy * 3 + dx
                    work_ref[:, t * C:(t + 1) * C] = (
                        pad_ref[dy:dy + H, dx:dx + W, :].reshape(H * W, C))
            y = jnp.dot(work_ref[...], w_ref[0, j],
                        preferred_element_type=jnp.float32)
        return y + bias                                          # (H*W, C) f32

    def instance_norm(y):
        # Two-pass: mean, then centered second moment (biased variance).
        mu = jnp.sum(y, axis=0, keepdims=True) * inv_hw
        d = y - mu
        var = jnp.sum(d * d, axis=0, keepdims=True) * inv_hw
        return d * jax.lax.rsqrt(var + EPS)

    residual = o_ref[0].reshape(H * W, C)                        # f32

    # conv1 -> IN -> LeakyReLU(0.2)
    pad_ref[1:H + 1, 1:W + 1, :] = o_ref[0].astype(cdt)
    y = conv3x3(0)
    y = instance_norm(y)
    y = jnp.where(y > 0, y, NEG_SLOPE * y)

    # conv2 -> IN -> + residual
    pad_ref[1:H + 1, 1:W + 1, :] = y.reshape(H, W, C).astype(cdt)
    y = conv3x3(1)
    y = instance_norm(y)

    o_ref[0] = (y + residual).reshape(H, W, C).astype(o_ref.dtype)


def _vmem_limit_bytes(H, W, C, per_tap):
    """Actual VMEM footprint (+ headroom), clamped to 3/4 of physical VMEM."""
    f32 = 4
    mxb = jnp.dtype(MXU_DTYPE).itemsize
    pad = (H + 2) * (W + 2) * C * mxb
    work = H * W * C * f32 if per_tap else H * W * 9 * C * mxb
    io_blocks = 2 * (H * W * C * f32) * 2          # x and o blocks, 2x buffered
    w_blocks = 2 * (2 * 9 * C * C * mxb)           # per-block weights, 2x buffered
    b_blocks = 2 * (2 * C * f32)
    est = pad + work + io_blocks + w_blocks + b_blocks
    try:
        cap = pltpu.get_tpu_info().vmem_capacity_bytes
    except Exception:
        cap = 64 * 1024 * 1024                     # v7x has the smallest VMEM
    limit = max(32 * 1024 * 1024, int(est * 1.25) + (4 << 20))
    return int(min(limit, (cap * 3) // 4))


def _resblocks_pallas(x_nhwc, w_all, b_all):
    N, H, W, C = x_nhwc.shape
    NB = w_all.shape[0]
    per_tap = C >= PER_TAP_MIN_C

    if per_tap:
        work_scratch = pltpu.VMEM((H * W, C), jnp.float32)        # f32 accumulator
    else:
        work_scratch = pltpu.VMEM((H * W, 9 * C), MXU_DTYPE)      # im2col matrix

    grid_spec = pltpu.PrefetchScalarGridSpec(
        num_scalar_prefetch=0,
        grid=(N, NB),
        in_specs=[
            pl.BlockSpec((1, H, W, C), lambda n, b: (n, 0, 0, 0)),      # x (resident over blk)
            pl.BlockSpec((1, 2, 9 * C, C), lambda n, b: (b, 0, 0, 0)),  # per-block weights
            pl.BlockSpec((1, 2, 1, C), lambda n, b: (b, 0, 0, 0)),      # per-block biases
        ],
        out_specs=pl.BlockSpec((1, H, W, C), lambda n, b: (n, 0, 0, 0)),
        scratch_shapes=[
            pltpu.VMEM((H + 2, W + 2, C), MXU_DTYPE),   # zero-padded activation
            work_scratch,
        ],
    )
    return pl.pallas_call(
        functools.partial(_resblock_kernel, per_tap=per_tap),
        out_shape=jax.ShapeDtypeStruct((N, H, W, C), jnp.float32),
        grid_spec=grid_spec,
        compiler_params=pltpu.CompilerParams(
            # Batch axis: megacore sharding on v7x; block axis is a serial
            # accumulator-style loop with weight prefetch.
            dimension_semantics=("parallel", "arbitrary"),
            vmem_limit_bytes=_vmem_limit_bytes(H, W, C, per_tap),
        ),
    )(x_nhwc, w_all, b_all)


@jax.jit
def resblocks_forward(x_nchw, w_all, b_all):
    """ResBlocks.forward. Input/output layout: NCHW (PyTorch convention)."""
    x = jnp.transpose(x_nchw, (0, 2, 3, 1)).astype(jnp.float32)   # -> NHWC
    y = _resblocks_pallas(x, w_all, b_all)
    return jnp.transpose(y, (0, 3, 1, 2))                         # -> NCHW


def make_params(key, num_blocks, dim):
    """Deterministic synthetic params: per block two 3x3 convs (OIHW) + biases."""
    params = []
    for _ in range(num_blocks):
        k1, k2, k3, k4, key = jax.random.split(key, 5)
        w1 = jax.random.normal(k1, (dim, dim, 3, 3), jnp.float32) * 0.1
        b1 = jax.random.normal(k2, (dim,), jnp.float32) * 0.1
        w2 = jax.random.normal(k3, (dim, dim, 3, 3), jnp.float32) * 0.1
        b2 = jax.random.normal(k4, (dim,), jnp.float32) * 0.1
        params.append((w1, b1, w2, b2))
    return params


def prepare_params(params):
    """One-time conversion (hoisted out of the forward pass).

    Returns:
      w_all: (num_blocks, 2, 9*C, C) MXU_DTYPE with
             w_all[blk, j, t*C + ic, oc] = weight[oc, ic, dy, dx], t = dy*3+dx
      b_all: (num_blocks, 2, 1, C) f32
    """
    w_stack, b_stack = [], []
    for (w1, b1, w2, b2) in params:
        dim = w1.shape[0]
        w_stack.append(jnp.stack([
            jnp.transpose(w1, (2, 3, 1, 0)).reshape(9 * dim, dim),
            jnp.transpose(w2, (2, 3, 1, 0)).reshape(9 * dim, dim),
        ]).astype(MXU_DTYPE))
        b_stack.append(jnp.stack([b1.reshape(1, -1),
                                  b2.reshape(1, -1)]).astype(jnp.float32))
    return jnp.stack(w_stack), jnp.stack(b_stack)


# ---------------------------------------------------------------------------
# Pure-JAX f32 reference (correctness check only).
# ---------------------------------------------------------------------------
def _ref_forward(x_nchw, params):
    x = x_nchw.astype(jnp.float32)

    def conv(x, w, b):
        y = jax.lax.conv_general_dilated(
            x, w, window_strides=(1, 1), padding=((1, 1), (1, 1)),
            dimension_numbers=("NCHW", "OIHW", "NCHW"))
        return y + b[None, :, None, None]

    def inorm(x):
        mu = jnp.mean(x, axis=(2, 3), keepdims=True)
        var = jnp.mean((x - mu) ** 2, axis=(2, 3), keepdims=True)
        return (x - mu) * jax.lax.rsqrt(var + EPS)

    for (w1, b1, w2, b2) in params:
        res = x
        y = conv(x, w1, b1)
        y = inorm(y)
        y = jnp.where(y > 0, y, NEG_SLOPE * y)
        y = conv(y, w2, b2)
        y = inorm(y)
        x = y + res
    return x


if __name__ == "__main__":
    key = jax.random.PRNGKey(0)
    kx1, kp1, kx2, kp2 = jax.random.split(key, 4)

    # Config 1: small channels -> im2col path.
    num_blocks, batch, dim, H, W = 2, 2, 8, 16, 16
    x1 = jax.random.normal(kx1, (batch, dim, H, W), jnp.float32)
    params1 = make_params(kp1, num_blocks, dim)
    w1_all, b1_all = prepare_params(params1)
    out1 = jax.block_until_ready(resblocks_forward(x1, w1_all, b1_all))
    ref1 = jax.block_until_ready(_ref_forward(x1, params1))
    # bf16 MXU inputs (f32 accumulation) -> relaxed tolerance vs f32 reference.
    np.testing.assert_allclose(np.asarray(out1), np.asarray(ref1),
                               rtol=5e-2, atol=5e-2)

    # Config 2: wide channels -> per-tap accumulated-matmul path.
    x2 = jax.random.normal(kx2, (1, 128, 8, 8), jnp.float32)
    params2 = make_params(kp2, 1, 128)
    w2_all, b2_all = prepare_params(params2)
    out2 = jax.block_until_ready(resblocks_forward(x2, w2_all, b2_all))
    ref2 = jax.block_until_ready(_ref_forward(x2, params2))
    np.testing.assert_allclose(np.asarray(out2), np.asarray(ref2),
                               rtol=5e-2, atol=5e-2)

    print("KERNEL_OK")
</pallas_src>

<mosaic_0001>
module attributes {stable_mosaic.version = 11 : i64} {
  func.func @_resblock_kernel(%arg0: i32, %arg1: i32, %arg2: memref<1x16x16x8xf32, #tpu.memory_space<vmem>>, %arg3: memref<1x2x72x8xbf16, #tpu.memory_space<vmem>>, %arg4: memref<1x2x1x8xf32, #tpu.memory_space<vmem>>, %arg5: memref<1x16x16x8xf32, #tpu.memory_space<vmem>>, %arg6: memref<18x18x8xbf16, #tpu.memory_space<vmem>>, %arg7: memref<256x72xbf16, #tpu.memory_space<vmem>>) attributes {dimension_semantics = [#tpu.dimension_semantics<parallel>, #tpu.dimension_semantics<arbitrary>], iteration_bounds = array<i64: 2, 2>, scalar_prefetch = 0 : i64, scratch_operands = 2 : i64, tpu.core_type = #tpu.core_type<tc>, window_params = [{transform_indices = @transform_0, window_bounds = array<i64: 1, 16, 16, 8>}, {transform_indices = @transform_1, window_bounds = array<i64: 1, 2, 72, 8>}, {transform_indices = @transform_2, window_bounds = array<i64: 1, 2, 1, 8>}, {transform_indices = @transform_3, window_bounds = array<i64: 1, 16, 16, 8>}]} {
    %c0_i32 = arith.constant 0 : i32
    %0 = arith.cmpi eq, %arg1, %c0_i32 : i32
    %1 = arith.extui %0 : i1 to i32
    %c0_i32_0 = arith.constant 0 : i32
    %2 = arith.cmpi ne, %1, %c0_i32_0 : i32
    scf.if %2 {
      %cst_131 = arith.constant 0.000000e+00 : bf16
      %125 = vector.broadcast %cst_131 : bf16 to vector<1x18x8xbf16>
      %cst_132 = arith.constant 0.000000e+00 : bf16
      %126 = vector.broadcast %cst_132 : bf16 to vector<18x1x8xbf16>
      %c0_133 = arith.constant 0 : index
      %c0_134 = arith.constant 0 : index
      %c0_135 = arith.constant 0 : index
      %127 = vector.load %arg6[%c0_133, %c0_134, %c0_135] : memref<18x18x8xbf16, #tpu.memory_space<vmem>>, vector<1x18x8xbf16>
      tpu.vector_store %arg6[%c0_133, %c0_134, %c0_135], %125 {strides = array<i32>} : memref<18x18x8xbf16, #tpu.memory_space<vmem>>, vector<1x18x8xbf16>,
      %c17 = arith.constant 17 : index
      %c0_136 = arith.constant 0 : index
      %c0_137 = arith.constant 0 : index
      %128 = vector.load %arg6[%c17, %c0_136, %c0_137] : memref<18x18x8xbf16, #tpu.memory_space<vmem>>, vector<1x18x8xbf16>
      tpu.vector_store %arg6[%c17, %c0_136, %c0_137], %125 {strides = array<i32>} : memref<18x18x8xbf16, #tpu.memory_space<vmem>>, vector<1x18x8xbf16>,
      %c0_138 = arith.constant 0 : index
      %c0_139 = arith.constant 0 : index
      %c0_140 = arith.constant 0 : index
      %129 = vector.load %arg6[%c0_138, %c0_139, %c0_140] : memref<18x18x8xbf16, #tpu.memory_space<vmem>>, vector<18x1x8xbf16>
      tpu.vector_store %arg6[%c0_138, %c0_139, %c0_140], %126 {strides = array<i32>} : memref<18x18x8xbf16, #tpu.memory_space<vmem>>, vector<18x1x8xbf16>,
      %c0_141 = arith.constant 0 : index
      %c17_142 = arith.constant 17 : index
      %c0_143 = arith.constant 0 : index
      %130 = vector.load %arg6[%c0_141, %c17_142, %c0_143] : memref<18x18x8xbf16, #tpu.memory_space<vmem>>, vector<18x1x8xbf16>
      tpu.vector_store %arg6[%c0_141, %c17_142, %c0_143], %126 {strides = array<i32>} : memref<18x18x8xbf16, #tpu.memory_space<vmem>>, vector<18x1x8xbf16>,
      %c0_144 = arith.constant 0 : index
      %c0_145 = arith.constant 0 : index
      %c0_146 = arith.constant 0 : index
      %c0_147 = arith.constant 0 : index
      %131 = vector.load %arg2[%c0_144, %c0_145, %c0_146, %c0_147] : memref<1x16x16x8xf32, #tpu.memory_space<vmem>>, vector<1x16x16x8xf32>
      %132 = vector.shape_cast %131 : vector<1x16x16x8xf32> to vector<16x16x8xf32>
      %c0_148 = arith.constant 0 : index
      %c0_149 = arith.constant 0 : index
      %c0_150 = arith.constant 0 : index
      %c0_151 = arith.constant 0 : index
      %133 = vector.load %arg5[%c0_148, %c0_149, %c0_150, %c0_151] : memref<1x16x16x8xf32, #tpu.memory_space<vmem>>, vector<1x16x16x8xf32>
      %134 = vector.shape_cast %133 : vector<1x16x16x8xf32> to vector<16x16x8xf32>
      %135 = vector.shape_cast %132 : vector<16x16x8xf32> to vector<1x16x16x8xf32>
      tpu.vector_store %arg5[%c0_148, %c0_149, %c0_150, %c0_151], %135 {strides = array<i32>} : memref<1x16x16x8xf32, #tpu.memory_space<vmem>>, vector<1x16x16x8xf32>,
    } else {
    }
    %c0 = arith.constant 0 : index
    %c0_1 = arith.constant 0 : index
    %c0_2 = arith.constant 0 : index
    %c0_3 = arith.constant 0 : index
    %3 = vector.load %arg5[%c0, %c0_1, %c0_2, %c0_3] : memref<1x16x16x8xf32, #tpu.memory_space<vmem>>, vector<1x16x16x8xf32>
    %4 = vector.shape_cast %3 : vector<1x16x16x8xf32> to vector<16x16x8xf32>
    %5 = vector.shape_cast %4 : vector<16x16x8xf32> to vector<256x8xf32>
    %c0_4 = arith.constant 0 : index
    %c0_5 = arith.constant 0 : index
    %c0_6 = arith.constant 0 : index
    %c0_7 = arith.constant 0 : index
    %6 = vector.load %arg5[%c0_4, %c0_5, %c0_6, %c0_7] : memref<1x16x16x8xf32, #tpu.memory_space<vmem>>, vector<1x16x16x8xf32>
    %7 = vector.shape_cast %6 : vector<1x16x16x8xf32> to vector<16x16x8xf32>
    %8 = arith.truncf %7 : vector<16x16x8xf32> to vector<16x16x8xbf16>
    %c1 = arith.constant 1 : index
    %c1_8 = arith.constant 1 : index
    %c0_9 = arith.constant 0 : index
    %9 = vector.load %arg6[%c1, %c1_8, %c0_9] : memref<18x18x8xbf16, #tpu.memory_space<vmem>>, vector<16x16x8xbf16>
    tpu.vector_store %arg6[%c1, %c1_8, %c0_9], %8 {strides = array<i32>} : memref<18x18x8xbf16, #tpu.memory_space<vmem>>, vector<16x16x8xbf16>,
    %c0_10 = arith.constant 0 : index
    %c0_11 = arith.constant 0 : index
    %c0_12 = arith.constant 0 : index
    %c0_13 = arith.constant 0 : index
    %10 = vector.load %arg4[%c0_10, %c0_11, %c0_12, %c0_13] : memref<1x2x1x8xf32, #tpu.memory_space<vmem>>, vector<1x1x1x8xf32>
    %11 = vector.shape_cast %10 : vector<1x1x1x8xf32> to vector<1x8xf32>
    %c0_14 = arith.constant 0 : index
    %c0_15 = arith.constant 0 : index
    %c0_16 = arith.constant 0 : index
    %12 = vector.load %arg6[%c0_14, %c0_15, %c0_16] : memref<18x18x8xbf16, #tpu.memory_space<vmem>>, vector<16x16x8xbf16>
    %13 = vector.shape_cast %12 : vector<16x16x8xbf16> to vector<256x8xbf16>
    %c0_17 = arith.constant 0 : index
    %c0_18 = arith.constant 0 : index
    %14 = vector.load %arg7[%c0_17, %c0_18] : memref<256x72xbf16, #tpu.memory_space<vmem>>, vector<256x8xbf16>
    tpu.vector_store %arg7[%c0_17, %c0_18], %13 {strides = array<i32>} : memref<256x72xbf16, #tpu.memory_space<vmem>>, vector<256x8xbf16>,
    %c0_19 = arith.constant 0 : index
    %c1_20 = arith.constant 1 : index
    %c0_21 = arith.constant 0 : index
    %15 = vector.load %arg6[%c0_19, %c1_20, %c0_21] : memref<18x18x8xbf16, #tpu.memory_space<vmem>>, vector<16x16x8xbf16>
    %16 = vector.shape_cast %15 : vector<16x16x8xbf16> to vector<256x8xbf16>
    %c0_22 = arith.constant 0 : index
    %c8 = arith.constant 8 : index
    %17 = vector.load %arg7[%c0_22, %c8] : memref<256x72xbf16, #tpu.memory_space<vmem>>, vector<256x8xbf16>
    tpu.vector_store %arg7[%c0_22, %c8], %16 {strides = array<i32>} : memref<256x72xbf16, #tpu.memory_space<vmem>>, vector<256x8xbf16>,
    %c0_23 = arith.constant 0 : index
    %c2 = arith.constant 2 : index
    %c0_24 = arith.constant 0 : index
    %18 = vector.load %arg6[%c0_23, %c2, %c0_24] : memref<18x18x8xbf16, #tpu.memory_space<vmem>>, vector<16x16x8xbf16>
    %19 = vector.shape_cast %18 : vector<16x16x8xbf16> to vector<256x8xbf16>
    %c0_25 = arith.constant 0 : index
    %c16 = arith.constant 16 : index
    %20 = vector.load %arg7[%c0_25, %c16] : memref<256x72xbf16, #tpu.memory_space<vmem>>, vector<256x8xbf16>
    tpu.vector_store %arg7[%c0_25, %c16], %19 {strides = array<i32>} : memref<256x72xbf16, #tpu.memory_space<vmem>>, vector<256x8xbf16>,
    %c1_26 = arith.constant 1 : index
    %c0_27 = arith.constant 0 : index
    %c0_28 = arith.constant 0 : index
    %21 = vector.load %arg6[%c1_26, %c0_27, %c0_28] : memref<18x18x8xbf16, #tpu.memory_space<vmem>>, vector<16x16x8xbf16>
    %22 = vector.shape_cast %21 : vector<16x16x8xbf16> to vector<256x8xbf16>
    %c0_29 = arith.constant 0 : index
    %c24 = arith.constant 24 : index
    %23 = vector.load %arg7[%c0_29, %c24] : memref<256x72xbf16, #tpu.memory_space<vmem>>, vector<256x8xbf16>
    tpu.vector_store %arg7[%c0_29, %c24], %22 {strides = array<i32>} : memref<256x72xbf16, #tpu.memory_space<vmem>>, vector<256x8xbf16>,
    %c1_30 = arith.constant 1 : index
    %c1_31 = arith.constant 1 : index
    %c0_32 = arith.constant 0 : index
    %24 = vector.load %arg6[%c1_30, %c1_31, %c0_32] : memref<18x18x8xbf16, #tpu.memory_space<vmem>>, vector<16x16x8xbf16>
    %25 = vector.shape_cast %24 : vector<16x16x8xbf16> to vector<256x8xbf16>
    %c0_33 = arith.constant 0 : index
    %c32 = arith.constant 32 : index
    %26 = vector.load %arg7[%c0_33, %c32] : memref<256x72xbf16, #tpu.memory_space<vmem>>, vector<256x8xbf16>
    tpu.vector_store %arg7[%c0_33, %c32], %25 {strides = array<i32>} : memref<256x72xbf16, #tpu.memory_space<vmem>>, vector<256x8xbf16>,
    %c1_34 = arith.constant 1 : index
    %c2_35 = arith.constant 2 : index
    %c0_36 = arith.constant 0 : index
    %27 = vector.load %arg6[%c1_34, %c2_35, %c0_36] : memref<18x18x8xbf16, #tpu.memory_space<vmem>>, vector<16x16x8xbf16>
    %28 = vector.shape_cast %27 : vector<16x16x8xbf16> to vector<256x8xbf16>
    %c0_37 = arith.constant 0 : index
    %c40 = arith.constant 40 : index
    %29 = vector.load %arg7[%c0_37, %c40] : memref<256x72xbf16, #tpu.memory_space<vmem>>, vector<256x8xbf16>
    tpu.vector_store %arg7[%c0_37, %c40], %28 {strides = array<i32>} : memref<256x72xbf16, #tpu.memory_space<vmem>>, vector<256x8xbf16>,
    %c2_38 = arith.constant 2 : index
    %c0_39 = arith.constant 0 : index
    %c0_40 = arith.constant 0 : index
    %30 = vector.load %arg6[%c2_38, %c0_39, %c0_40] : memref<18x18x8xbf16, #tpu.memory_space<vmem>>, vector<16x16x8xbf16>
    %31 = vector.shape_cast %30 : vector<16x16x8xbf16> to vector<256x8xbf16>
    %c0_41 = arith.constant 0 : index
    %c48 = arith.constant 48 : index
    %32 = vector.load %arg7[%c0_41, %c48] : memref<256x72xbf16, #tpu.memory_space<vmem>>, vector<256x8xbf16>
    tpu.vector_store %arg7[%c0_41, %c48], %31 {strides = array<i32>} : memref<256x72xbf16, #tpu.memory_space<vmem>>, vector<256x8xbf16>,
    %c2_42 = arith.constant 2 : index
    %c1_43 = arith.constant 1 : index
    %c0_44 = arith.constant 0 : index
    %33 = vector.load %arg6[%c2_42, %c1_43, %c0_44] : memref<18x18x8xbf16, #tpu.memory_space<vmem>>, vector<16x16x8xbf16>
    %34 = vector.shape_cast %33 : vector<16x16x8xbf16> to vector<256x8xbf16>
    %c0_45 = arith.constant 0 : index
    %c56 = arith.constant 56 : index
    %35 = vector.load %arg7[%c0_45, %c56] : memref<256x72xbf16, #tpu.memory_space<vmem>>, vector<256x8xbf16>
    tpu.vector_store %arg7[%c0_45, %c56], %34 {strides = array<i32>} : memref<256x72xbf16, #tpu.memory_space<vmem>>, vector<256x8xbf16>,
    %c2_46 = arith.constant 2 : index
    %c2_47 = arith.constant 2 : index
    %c0_48 = arith.constant 0 : index
    %36 = vector.load %arg6[%c2_46, %c2_47, %c0_48] : memref<18x18x8xbf16, #tpu.memory_space<vmem>>, vector<16x16x8xbf16>
    %37 = vector.shape_cast %36 : vector<16x16x8xbf16> to vector<256x8xbf16>
    %c0_49 = arith.constant 0 : index
    %c64 = arith.constant 64 : index
    %38 = vector.load %arg7[%c0_49, %c64] : memref<256x72xbf16, #tpu.memory_space<vmem>>, vector<256x8xbf16>
    tpu.vector_store %arg7[%c0_49, %c64], %37 {strides = array<i32>} : memref<256x72xbf16, #tpu.memory_space<vmem>>, vector<256x8xbf16>,
    %c0_50 = arith.constant 0 : index
    %c0_51 = arith.constant 0 : index
    %39 = vector.load %arg7[%c0_50, %c0_51] : memref<256x72xbf16, #tpu.memory_space<vmem>>, vector<256x72xbf16>
    %c0_52 = arith.constant 0 : index
    %c0_53 = arith.constant 0 : index
    %c0_54 = arith.constant 0 : index
    %c0_55 = arith.constant 0 : index
    %40 = vector.load %arg3[%c0_52, %c0_53, %c0_54, %c0_55] : memref<1x2x72x8xbf16, #tpu.memory_space<vmem>>, vector<1x1x72x8xbf16>
    %41 = vector.shape_cast %40 : vector<1x1x72x8xbf16> to vector<72x8xbf16>
    %cst = arith.constant dense<0.000000e+00> : vector<256x8xf32>
    %42 = tpu.matmul %39, %41, %cst {dimension_numbers = #tpu.dot_dimension_numbers<[1], [0], [0], [1], [0, 0, 1, 1], [], []>} : vector<256x72xbf16>, vector<72x8xbf16>, vector<256x8xf32> -> vector<256x8xf32>
    %43 = vector.broadcast %11 : vector<1x8xf32> to vector<256x8xf32>
    %44 = arith.addf %42, %43 : vector<256x8xf32>
    %cst_56 = arith.constant dense<0.000000e+00> : vector<8xf32>
    %45 = vector.multi_reduction <add>, %44, %cst_56 [0] : vector<256x8xf32> to vector<8xf32>
    %46 = vector.shape_cast %45 : vector<8xf32> to vector<1x8xf32>
    %cst_57 = arith.constant 3.906250e-03 : f32
    %47 = vector.broadcast %cst_57 : f32 to vector<1x8xf32>
    %48 = arith.mulf %46, %47 : vector<1x8xf32>
    %49 = vector.broadcast %48 : vector<1x8xf32> to vector<256x8xf32>
    %50 = arith.subf %44, %49 : vector<256x8xf32>
    %51 = arith.mulf %50, %50 : vector<256x8xf32>
    %cst_58 = arith.constant dense<0.000000e+00> : vector<8xf32>
    %52 = vector.multi_reduction <add>, %51, %cst_58 [0] : vector<256x8xf32> to vector<8xf32>
    %53 = vector.shape_cast %52 : vector<8xf32> to vector<1x8xf32>
    %cst_59 = arith.constant 3.906250e-03 : f32
    %54 = vector.broadcast %cst_59 : f32 to vector<1x8xf32>
    %55 = arith.mulf %53, %54 : vector<1x8xf32>
    %cst_60 = arith.constant 9.99999974E-6 : f32
    %56 = vector.broadcast %cst_60 : f32 to vector<1x8xf32>
    %57 = arith.addf %55, %56 : vector<1x8xf32>
    %58 = math.rsqrt %57 : vector<1x8xf32>
    %59 = vector.broadcast %58 : vector<1x8xf32> to vector<256x8xf32>
    %60 = arith.mulf %50, %59 : vector<256x8xf32>
    %cst_61 = arith.constant 0.000000e+00 : f32
    %61 = vector.broadcast %cst_61 : f32 to vector<256x8xf32>
    %62 = arith.cmpf ogt, %60, %61 : vector<256x8xf32>
    %cst_62 = arith.constant 2.000000e-01 : f32
    %63 = vector.broadcast %cst_62 : f32 to vector<256x8xf32>
    %64 = arith.mulf %63, %60 : vector<256x8xf32>
    %65 = arith.select %62, %60, %64 : vector<256x8xi1>, vector<256x8xf32>
    %66 = vector.shape_cast %65 : vector<256x8xf32> to vector<16x16x8xf32>
    %67 = arith.truncf %66 : vector<16x16x8xf32> to vector<16x16x8xbf16>
    %c1_63 = arith.constant 1 : index
    %c1_64 = arith.constant 1 : index
    %c0_65 = arith.constant 0 : index
    %68 = vector.load %arg6[%c1_63, %c1_64, %c0_65] : memref<18x18x8xbf16, #tpu.memory_space<vmem>>, vector<16x16x8xbf16>
    tpu.vector_store %arg6[%c1_63, %c1_64, %c0_65], %67 {strides = array<i32>} : memref<18x18x8xbf16, #tpu.memory_space<vmem>>, vector<16x16x8xbf16>,
    %c0_66 = arith.constant 0 : index
    %c1_67 = arith.constant 1 : index
    %c0_68 = arith.constant 0 : index
    %c0_69 = arith.constant 0 : index
    %69 = vector.load %arg4[%c0_66, %c1_67, %c0_68, %c0_69] : memref<1x2x1x8xf32, #tpu.memory_space<vmem>>, vector<1x1x1x8xf32>
    %70 = vector.shape_cast %69 : vector<1x1x1x8xf32> to vector<1x8xf32>
    %c0_70 = arith.constant 0 : index
    %c0_71 = arith.constant 0 : index
    %c0_72 = arith.constant 0 : index
    %71 = vector.load %arg6[%c0_70, %c0_71, %c0_72] : memref<18x18x8xbf16, #tpu.memory_space<vmem>>, vector<16x16x8xbf16>
    %72 = vector.shape_cast %71 : vector<16x16x8xbf16> to vector<256x8xbf16>
    %c0_73 = arith.constant 0 : index
    %c0_74 = arith.constant 0 : index
    %73 = vector.load %arg7[%c0_73, %c0_74] : memref<256x72xbf16, #tpu.memory_space<vmem>>, vector<256x8xbf16>
    tpu.vector_store %arg7[%c0_73, %c0_74], %72 {strides = array<i32>} : memref<256x72xbf16, #tpu.memory_space<vmem>>, vector<256x8xbf16>,
    %c0_75 = arith.constant 0 : index
    %c1_76 = arith.constant 1 : index
    %c0_77 = arith.constant 0 : index
    %74 = vector.load %arg6[%c0_75, %c1_76, %c0_77] : memref<18x18x8xbf16, #tpu.memory_space<vmem>>, vector<16x16x8xbf16>
    %75 = vector.shape_cast %74 : vector<16x16x8xbf16> to vector<256x8xbf16>
    %c0_78 = arith.constant 0 : index
    %c8_79 = arith.constant 8 : index
    %76 = vector.load %arg7[%c0_78, %c8_79] : memref<256x72xbf16, #tpu.memory_space<vmem>>, vector<256x8xbf16>
    tpu.vector_store %arg7[%c0_78, %c8_79], %75 {strides = array<i32>} : memref<256x72xbf16, #tpu.memory_space<vmem>>, vector<256x8xbf16>,
    %c0_80 = arith.constant 0 : index
    %c2_81 = arith.constant 2 : index
    %c0_82 = arith.constant 0 : index
    %77 = vector.load %arg6[%c0_80, %c2_81, %c0_82] : memref<18x18x8xbf16, #tpu.memory_space<vmem>>, vector<16x16x8xbf16>
    %78 = vector.shape_cast %77 : vector<16x16x8xbf16> to vector<256x8xbf16>
    %c0_83 = arith.constant 0 : index
    %c16_84 = arith.constant 16 : index
    %79 = vector.load %arg7[%c0_83, %c16_84] : memref<256x72xbf16, #tpu.memory_space<vmem>>, vector<256x8xbf16>
    tpu.vector_store %arg7[%c0_83, %c16_84], %78 {strides = array<i32>} : memref<256x72xbf16, #tpu.memory_space<vmem>>, vector<256x8xbf16>,
    %c1_85 = arith.constant 1 : index
    %c0_86 = arith.constant 0 : index
    %c0_87 = arith.constant 0 : index
    %80 = vector.load %arg6[%c1_85, %c0_86, %c0_87] : memref<18x18x8xbf16, #tpu.memory_space<vmem>>, vector<16x16x8xbf16>
    %81 = vector.shape_cast %80 : vector<16x16x8xbf16> to vector<256x8xbf16>
    %c0_88 = arith.constant 0 : index
    %c24_89 = arith.constant 24 : index
    %82 = vector.load %arg7[%c0_88, %c24_89] : memref<256x72xbf16, #tpu.memory_space<vmem>>, vector<256x8xbf16>
    tpu.vector_store %arg7[%c0_88, %c24_89], %81 {strides = array<i32>} : memref<256x72xbf16, #tpu.memory_space<vmem>>, vector<256x8xbf16>,
    %c1_90 = arith.constant 1 : index
    %c1_91 = arith.constant 1 : index
    %c0_92 = arith.constant 0 : index
    %83 = vector.load %arg6[%c1_90, %c1_91, %c0_92] : memref<18x18x8xbf16, #tpu.memory_space<vmem>>, vector<16x16x8xbf16>
    %84 = vector.shape_cast %83 : vector<16x16x8xbf16> to vector<256x8xbf16>
    %c0_93 = arith.constant 0 : index
    %c32_94 = arith.constant 32 : index
    %85 = vector.load %arg7[%c0_93, %c32_94] : memref<256x72xbf16, #tpu.memory_space<vmem>>, vector<256x8xbf16>
    tpu.vector_store %arg7[%c0_93, %c32_94], %84 {strides = array<i32>} : memref<256x72xbf16, #tpu.memory_space<vmem>>, vector<256x8xbf16>,
    %c1_95 = arith.constant 1 : index
    %c2_96 = arith.constant 2 : index
    %c0_97 = arith.constant 0 : index
    %86 = vector.load %arg6[%c1_95, %c2_96, %c0_97] : memref<18x18x8xbf16, #tpu.memory_space<vmem>>, vector<16x16x8xbf16>
    %87 = vector.shape_cast %86 : vector<16x16x8xbf16> to vector<256x8xbf16>
    %c0_98 = arith.constant 0 : index
    %c40_99 = arith.constant 40 : index
    %88 = vector.load %arg7[%c0_98, %c40_99] : memref<256x72xbf16, #tpu.memory_space<vmem>>, vector<256x8xbf16>
    tpu.vector_store %arg7[%c0_98, %c40_99], %87 {strides = array<i32>} : memref<256x72xbf16, #tpu.memory_space<vmem>>, vector<256x8xbf16>,
    %c2_100 = arith.constant 2 : index
    %c0_101 = arith.constant 0 : index
    %c0_102 = arith.constant 0 : index
    %89 = vector.load %arg6[%c2_100, %c0_101, %c0_102] : memref<18x18x8xbf16, #tpu.memory_space<vmem>>, vector<16x16x8xbf16>
    %90 = vector.shape_cast %89 : vector<16x16x8xbf16> to vector<256x8xbf16>
    %c0_103 = arith.constant 0 : index
    %c48_104 = arith.constant 48 : index
    %91 = vector.load %arg7[%c0_103, %c48_104] : memref<256x72xbf16, #tpu.memory_space<vmem>>, vector<256x8xbf16>
    tpu.vector_store %arg7[%c0_103, %c48_104], %90 {strides = array<i32>} : memref<256x72xbf16, #tpu.memory_space<vmem>>, vector<256x8xbf16>,
    %c2_105 = arith.constant 2 : index
    %c1_106 = arith.constant 1 : index
    %c0_107 = arith.constant 0 : index
    %92 = vector.load %arg6[%c2_105, %c1_106, %c0_107] : memref<18x18x8xbf16, #tpu.memory_space<vmem>>, vector<16x16x8xbf16>
    %93 = vector.shape_cast %92 : vector<16x16x8xbf16> to vector<256x8xbf16>
    %c0_108 = arith.constant 0 : index
    %c56_109 = arith.constant 56 : index
    %94 = vector.load %arg7[%c0_108, %c56_109] : memref<256x72xbf16, #tpu.memory_space<vmem>>, vector<256x8xbf16>
    tpu.vector_store %arg7[%c0_108, %c56_109], %93 {strides = array<i32>} : memref<256x72xbf16, #tpu.memory_space<vmem>>, vector<256x8xbf16>,
    %c2_110 = arith.constant 2 : index
    %c2_111 = arith.constant 2 : index
    %c0_112 = arith.constant 0 : index
    %95 = vector.load %arg6[%c2_110, %c2_111, %c0_112] : memref<18x18x8xbf16, #tpu.memory_space<vmem>>, vector<16x16x8xbf16>
    %96 = vector.shape_cast %95 : vector<16x16x8xbf16> to vector<256x8xbf16>
    %c0_113 = arith.constant 0 : index
    %c64_114 = arith.constant 64 : index
    %97 = vector.load %arg7[%c0_113, %c64_114] : memref<256x72xbf16, #tpu.memory_space<vmem>>, vector<256x8xbf16>
    tpu.vector_store %arg7[%c0_113, %c64_114], %96 {strides = array<i32>} : memref<256x72xbf16, #tpu.memory_space<vmem>>, vector<256x8xbf16>,
    %c0_115 = arith.constant 0 : index
    %c0_116 = arith.constant 0 : index
    %98 = vector.load %arg7[%c0_115, %c0_116] : memref<256x72xbf16, #tpu.memory_space<vmem>>, vector<256x72xbf16>
    %c0_117 = arith.constant 0 : index
    %c1_118 = arith.constant 1 : index
    %c0_119 = arith.constant 0 : index
    %c0_120 = arith.constant 0 : index
    %99 = vector.load %arg3[%c0_117, %c1_118, %c0_119, %c0_120] : memref<1x2x72x8xbf16, #tpu.memory_space<vmem>>, vector<1x1x72x8xbf16>
    %100 = vector.shape_cast %99 : vector<1x1x72x8xbf16> to vector<72x8xbf16>
    %cst_121 = arith.constant dense<0.000000e+00> : vector<256x8xf32>
    %101 = tpu.matmul %98, %100, %cst_121 {dimension_numbers = #tpu.dot_dimension_numbers<[1], [0], [0], [1], [0, 0, 1, 1], [], []>} : vector<256x72xbf16>, vector<72x8xbf16>, vector<256x8xf32> -> vector<256x8xf32>
    %102 = vector.broadcast %70 : vector<1x8xf32> to vector<256x8xf32>
    %103 = arith.addf %101, %102 : vector<256x8xf32>
    %cst_122 = arith.constant dense<0.000000e+00> : vector<8xf32>
    %104 = vector.multi_reduction <add>, %103, %cst_122 [0] : vector<256x8xf32> to vector<8xf32>
    %105 = vector.shape_cast %104 : vector<8xf32> to vector<1x8xf32>
    %cst_123 = arith.constant 3.906250e-03 : f32
    %106 = vector.broadcast %cst_123 : f32 to vector<1x8xf32>
    %107 = arith.mulf %105, %106 : vector<1x8xf32>
    %108 = vector.broadcast %107 : vector<1x8xf32> to vector<256x8xf32>
    %109 = arith.subf %103, %108 : vector<256x8xf32>
    %110 = arith.mulf %109, %109 : vector<256x8xf32>
    %cst_124 = arith.constant dense<0.000000e+00> : vector<8xf32>
    %111 = vector.multi_reduction <add>, %110, %cst_124 [0] : vector<256x8xf32> to vector<8xf32>
    %112 = vector.shape_cast %111 : vector<8xf32> to vector<1x8xf32>
    %cst_125 = arith.constant 3.906250e-03 : f32
    %113 = vector.broadcast %cst_125 : f32 to vector<1x8xf32>
    %114 = arith.mulf %112, %113 : vector<1x8xf32>
    %cst_126 = arith.constant 9.99999974E-6 : f32
    %115 = vector.broadcast %cst_126 : f32 to vector<1x8xf32>
    %116 = arith.addf %114, %115 : vector<1x8xf32>
    %117 = math.rsqrt %116 : vector<1x8xf32>
    %118 = vector.broadcast %117 : vector<1x8xf32> to vector<256x8xf32>
    %119 = arith.mulf %109, %118 : vector<256x8xf32>
    %120 = arith.addf %119, %5 : vector<256x8xf32>
    %121 = vector.shape_cast %120 : vector<256x8xf32> to vector<16x16x8xf32>
    %c0_127 = arith.constant 0 : index
    %c0_128 = arith.constant 0 : index
    %c0_129 = arith.constant 0 : index
    %c0_130 = arith.constant 0 : index
    %122 = vector.load %arg5[%c0_127, %c0_128, %c0_129, %c0_130] : memref<1x16x16x8xf32, #tpu.memory_space<vmem>>, vector<1x16x16x8xf32>
    %123 = vector.shape_cast %122 : vector<1x16x16x8xf32> to vector<16x16x8xf32>
    %124 = vector.shape_cast %121 : vector<16x16x8xf32> to vector<1x16x16x8xf32>
    tpu.vector_store %arg5[%c0_127, %c0_128, %c0_129, %c0_130], %124 {strides = array<i32>} : memref<1x16x16x8xf32, #tpu.memory_space<vmem>>, vector<1x16x16x8xf32>,
    return
  }
  func.func @transform_0(%arg0: i32, %arg1: i32) -> (i32, i32, i32, i32) {
    %c0_i32 = arith.constant 0 : i32
    %c0_i32_0 = arith.constant 0 : i32
    %c0_i32_1 = arith.constant 0 : i32
    %c0_i32_2 = arith.constant 0 : i32
    return %arg0, %c0_i32, %c0_i32_0, %c0_i32_1 : i32, i32, i32, i32
  }
  func.func @transform_1(%arg0: i32, %arg1: i32) -> (i32, i32, i32, i32) {
    %c0_i32 = arith.constant 0 : i32
    %c0_i32_0 = arith.constant 0 : i32
    %c0_i32_1 = arith.constant 0 : i32
    %c0_i32_2 = arith.constant 0 : i32
    return %arg1, %c0_i32, %c0_i32_0, %c0_i32_1 : i32, i32, i32, i32
  }
  func.func @transform_2(%arg0: i32, %arg1: i32) -> (i32, i32, i32, i32) {
    %c0_i32 = arith.constant 0 : i32
    %c0_i32_0 = arith.constant 0 : i32
    %c0_i32_1 = arith.constant 0 : i32
    %c0_i32_2 = arith.constant 0 : i32
    return %arg1, %c0_i32, %c0_i32_0, %c0_i32_1 : i32, i32, i32, i32
  }
  func.func @transform_3(%arg0: i32, %arg1: i32) -> (i32, i32, i32, i32) {
    %c0_i32 = arith.constant 0 : i32
    %c0_i32_0 = arith.constant 0 : i32
    %c0_i32_1 = arith.constant 0 : i32
    %c0_i32_2 = arith.constant 0 : i32
    return %arg0, %c0_i32, %c0_i32_0, %c0_i32_1 : i32, i32, i32, i32
  }
}

</mosaic_0001>

<bundles_post_ra>
// kernel: resblocks_forward.1
= control target key start
LH: loop header
LB: loop body
LE: loop exit
PB: predicated region body
PF: predicated region fallthrough
CT: control target
= control target key end

     0   :  { %s9523_s12 = smov 0   ;;  %s9525_s13 = smov 0   ;;  %s14213_s0 = inlined_call_operand.vmem [shape: f32[2,16,16,8], index: 0, kind: input, shape index: {}]   ;;  %s14214_s1 = inlined_call_operand.vmem [shape: bf16[2,2,72,8], index: 1, kind: input, shape index: {}]   ;;  %s14215_s2 = inlined_call_operand.vmem [shape: f32[2,2,1,8], index: 2, kind: input, shape index: {}]   ;;  %s14216_s3 = inlined_call_operand.vmem [shape: f32[2,16,16,8], index: 3, kind: output, shape index: {}]  }
   0x1   :  { %s9527_s14 = smov 0   ;;  %s9529_s15 = smov 0  }
   0x2   :  { %s9531_s16 = smov 0  }
   0x3 LB: > { %s22_s17 = sadd.s32 1, %s9484_s14  ;;  %s25_s18 = sadd.s32 1, %s9488_s15  ;;  %s9492_s16 = sphi %s9531_s16, %s13_s16   ;;  %s9488_s15 = sphi %s9529_s15, %s14748_s15   ;;  %s9484_s14 = sphi %s9527_s14, %s14747_s14   ;;  %s9480_s13 = sphi %s9525_s13, %s14746_s13   ;;  %s9476_s12 = sphi %s9523_s12, %s14745_s12  }
   0x4   : > { %p23_p0 = scmp.ge.s32.totalorder %s22_s17, 2  ;;  %p9006_p1 = scmp.ge.s32.totalorder %s9492_s16, 1 }
   0x5   : > { %p168_p2 = scmp.lt.s32.totalorder %s9492_s16, 5 }
   0x6   : > { %s14750_s17 = smov (%p23_p0, %s22_s17), 0  ;;  %s14752_s18 = smov (!%p23_p0, %s25_s18), %s9488_s15 }
   0x7   : > { %p169_p3 = pnand %p9006_p1, %p168_p2  ;;  %p27_p4 = scmp.ge.s32.totalorder %s14752_s18, 2 }
   0x9   : > { %s14754_s18 = smov (%p27_p4, %s14752_s18), 0  ;;  %172 = sbr.rel (%p169_p3) target bundleno = 2411 (0x96b), region = 32 }
   0xe   : > { %p201_p5 = scmp.lt.s32.totalorder %s9480_s13, 1  ;;  %p206_p6 = scmp.lt.s32.totalorder %s9476_s12, 1 }
   0xf   : > { %p9013_p7 = scmp.ne.s32.totalorder %s9476_s12, 0 }
  0x10   : > { %s14756_s13 = smov (!%p201_p5, %s9480_s13), 1 }
  0x11   : > { %s207_s19 = scalar_select %p206_p6, %s9476_s12, 1 }
  0x12   : > { %s9314_s20 = sshll.u32 %s14756_s13, 8  ;;  %224 = sbr.rel (%p9013_p7) target bundleno = 98 (0x62), region = 36 }
  0x13   : > { %s9556_s23 = scalar_lea.vmem %s14213_s0, %s9314_s20  ;;  %s9366_s24 = smul.u32 72, %s207_s19 }
  0x14   : > { %s9010_s25 = sshll.u32 %s207_s19, 1  ;;  %s9561_s28 = scalar_lea.vmem %s14216_s3, %s9314_s20 }
  0x15   : > { %s9566_s4 = scalar_lea.vmem %s14214_s1, %s9366_s24  ;;  %s9571_s7 = scalar_lea.vmem %s14215_s2, %s9010_s25 }
  0x17   : > { %vm225_vm0 = vcmask 60416   ;;  %vm228_vm1 = vcmask 57344   ;;  %vm235_vm2 = vsmask.f32 256  ;;  %v9494_v0 = vmov 0   ;;  %v371_v35 = vld [vmem:[%s9556_s23 + $0xc0] sm:$0xff] }
  0x18   : > { %226 = vst.msk [vmem:[#allocation2] sm:$0xf] %vm225_vm0, %v9494_v0  ;;  %vm9574_vm3 = vmand %vm228_vm1, %vm235_vm2  ;;  %v240_v2 = vld [vmem:[#allocation2 + $0xc] sm:$0x1]  ;;  %v243_v3 = vld [vmem:[#allocation2 + $0x18] sm:$0x1] }
  0x19   : > { %227 = vst.msk [vmem:[#allocation2 + $0x4] sm:$0xf] %vm225_vm0, %v9494_v0  ;;  %v246_v4 = vld [vmem:[#allocation2 + $0x24] sm:$0x1]  ;;  %v241_v5 = vsel %vm9574_vm3, 0, %v240_v2  ;;  %v244_v7 = vsel %vm9574_vm3, 0, %v243_v3 }
  0x1a   : > { %231 = vst.msk [vmem:[#allocation2 + $0xcc] sm:$0xf] %vm225_vm0, %v9494_v0  ;;  %v249_v6 = vld [vmem:[#allocation2 + $0x30] sm:$0x1]  ;;  %v247_v8 = vsel %vm9574_vm3, 0, %v246_v4  ;;  %vm379_vm6 = vcmask 64512  }
  0x1b   : > { %232 = vst.msk [vmem:[#allocation2 + $0xd0] sm:$0xf] %vm225_vm0, %v9494_v0  ;;  %v252_v9 = vld [vmem:[#allocation2 + $0x3c] sm:$0x1]  ;;  %v250_v10 = vsel %vm9574_vm3, 0, %v249_v6 }
  0x1c   : > { %229 = vst.msk [vmem:[#allocation2 + $0x8] sm:$0x1] %vm228_vm1, %v9494_v0  ;;  %v255_v11 = vld [vmem:[#allocation2 + $0x48] sm:$0x1]  ;;  %vm291_vm4 = vsmask.f32 7938 }
  0x1d   : > { %233 = vst.msk [vmem:[#allocation2 + $0xd4] sm:$0x1] %vm228_vm1, %v9494_v0  ;;  %v258_v13 = vld [vmem:[#allocation2 + $0x54] sm:$0x1]  ;;  %v253_v15 = vsel %vm9574_vm3, 0, %v252_v9  ;;  %v256_v17 = vsel %vm9574_vm3, 0, %v255_v11  ;;  %vm9612_vm5 = vmand %vm228_vm1, %vm291_vm4 }
  0x1e   : > { %242 = vst [vmem:[#allocation2 + $0xc] sm:$0x1] %v241_v5  ;;  %v261_v16 = vld [vmem:[#allocation2 + $0x60] sm:$0x1]  ;;  %v264_v18 = vld [vmem:[#allocation2 + $0x6c] sm:$0x1] }
  0x1f   : > { %v237_v12 = vld [vmem:[#allocation2] sm:$0x1]  ;;  %245 = vst [vmem:[#allocation2 + $0x18] sm:$0x1] %v244_v7  ;;  %v259_v19 = vsel %vm9574_vm3, 0, %v258_v13  ;;  %v262_v21 = vsel %vm9574_vm3, 0, %v261_v16 }
  0x20   : > { %v238_v14 = vsel %vm9574_vm3, 0, %v237_v12  ;;  %248 = vst [vmem:[#allocation2 + $0x24] sm:$0x1] %v247_v8  ;;  %v267_v20 = vld [vmem:[#allocation2 + $0x78] sm:$0x1]  ;;  %v265_v23 = vsel %vm9574_vm3, 0, %v264_v18 }
  0x21   : > { %239 = vst [vmem:[#allocation2] sm:$0x1] %v238_v14  ;;  %v270_v22 = vld [vmem:[#allocation2 + $0x84] sm:$0x1]  ;;  %v273_v24 = vld [vmem:[#allocation2 + $0x90] sm:$0x1] }
  0x22   : > { %251 = vst [vmem:[#allocation2 + $0x30] sm:$0x1] %v250_v10  ;;  %v268_v25 = vsel %vm9574_vm3, 0, %v267_v20  ;;  %v276_v26 = vld [vmem:[#allocation2 + $0x9c] sm:$0x1]  ;;  %v271_v27 = vsel %vm9574_vm3, 0, %v270_v22 }
  0x23   : > { %254 = vst [vmem:[#allocation2 + $0x3c] sm:$0x1] %v253_v15  ;;  %v279_v28 = vld [vmem:[#allocation2 + $0xa8] sm:$0x1]  ;;  %v274_v29 = vsel %vm9574_vm3, 0, %v273_v24  ;;  %v277_v31 = vsel %vm9574_vm3, 0, %v276_v26 }
  0x24   : > { %257 = vst [vmem:[#allocation2 + $0x48] sm:$0x1] %v256_v17  ;;  %v282_v30 = vld [vmem:[#allocation2 + $0xb4] sm:$0x1]  ;;  %v285_v32 = vld [vmem:[#allocation2 + $0xc0] sm:$0x1] }
  0x25   : > { %260 = vst [vmem:[#allocation2 + $0x54] sm:$0x1] %v259_v19  ;;  %v280_v33 = vsel %vm9574_vm3, 0, %v279_v28  ;;  %v288_v34 = vld [vmem:[#allocation2 + $0xcc] sm:$0x1]  ;;  %v283_v36 = vsel %vm9574_vm3, 0, %v282_v30 }
  0x26   : > { %263 = vst [vmem:[#allocation2 + $0x60] sm:$0x1] %v262_v21  ;;  %v293_v37 = vld [vmem:[#allocation2 + $0x8] sm:$0x1]  ;;  %v286_v38 = vsel %vm9574_vm3, 0, %v285_v32  ;;  %v289_v40 = vsel %vm9574_vm3, 0, %v288_v34 }
  0x27   : > { %266 = vst [vmem:[#allocation2 + $0x6c] sm:$0x1] %v265_v23  ;;  %v296_v39 = vld [vmem:[#allocation2 + $0x14] sm:$0x1]  ;;  %v299_v41 = vld [vmem:[#allocation2 + $0x20] sm:$0x1] }
  0x28   : > { %269 = vst [vmem:[#allocation2 + $0x78] sm:$0x1] %v268_v25  ;;  %v294_v42 = vsel %vm9612_vm5, 0, %v293_v37  ;;  %v302_v43 = vld [vmem:[#allocation2 + $0x2c] sm:$0x1]  ;;  %v297_v44 = vsel %vm9612_vm5, 0, %v296_v39 }
  0x29   : > { %272 = vst [vmem:[#allocation2 + $0x84] sm:$0x1] %v271_v27  ;;  %v305_v45 = vld [vmem:[#allocation2 + $0x38] sm:$0x1]  ;;  %v300_v46 = vsel %vm9612_vm5, 0, %v299_v41  ;;  %v303_v48 = vsel %vm9612_vm5, 0, %v302_v43 }
  0x2a   : > { %275 = vst [vmem:[#allocation2 + $0x90] sm:$0x1] %v274_v29  ;;  %v308_v47 = vld [vmem:[#allocation2 + $0x44] sm:$0x1]  ;;  %v311_v49 = vld [vmem:[#allocation2 + $0x50] sm:$0x1] }
  0x2b   : > { %278 = vst [vmem:[#allocation2 + $0x9c] sm:$0x1] %v277_v31  ;;  %v306_v50 = vsel %vm9612_vm5, 0, %v305_v45  ;;  %v314_v51 = vld [vmem:[#allocation2 + $0x5c] sm:$0x1]  ;;  %v309_v52 = vsel %vm9612_vm5, 0, %v308_v47 }
  0x2c   : > { %281 = vst [vmem:[#allocation2 + $0xa8] sm:$0x1] %v280_v33  ;;  %v317_v53 = vld [vmem:[#allocation2 + $0x68] sm:$0x1]  ;;  %v312_v54 = vsel %vm9612_vm5, 0, %v311_v49  ;;  %v315_v56 = vsel %vm9612_vm5, 0, %v314_v51 }
  0x2d   : > { %284 = vst [vmem:[#allocation2 + $0xb4] sm:$0x1] %v283_v36  ;;  %v320_v55 = vld [vmem:[#allocation2 + $0x74] sm:$0x1]  ;;  %v323_v57 = vld [vmem:[#allocation2 + $0x80] sm:$0x1] }
  0x2e   : > { %287 = vst [vmem:[#allocation2 + $0xc0] sm:$0x1] %v286_v38  ;;  %v318_v58 = vsel %vm9612_vm5, 0, %v317_v53  ;;  %v326_v59 = vld [vmem:[#allocation2 + $0x8c] sm:$0x1]  ;;  %v321_v60 = vsel %vm9612_vm5, 0, %v320_v55 }
  0x2f   : > { %290 = vst [vmem:[#allocation2 + $0xcc] sm:$0x1] %v289_v40  ;;  %v329_v61 = vld [vmem:[#allocation2 + $0x98] sm:$0x1]  ;;  %v324_v62 = vsel %vm9612_vm5, 0, %v323_v57  ;;  %v327_v0 = vsel %vm9612_vm5, 0, %v326_v59 }
  0x30   : > { %295 = vst [vmem:[#allocation2 + $0x8] sm:$0x1] %v294_v42  ;;  %v332_v63 = vld [vmem:[#allocation2 + $0xa4] sm:$0x1]  ;;  %v335_v1 = vld [vmem:[#allocation2 + $0xb0] sm:$0x1] }
  0x31   : > { %298 = vst [vmem:[#allocation2 + $0x14] sm:$0x1] %v297_v44  ;;  %v330_v2 = vsel %vm9612_vm5, 0, %v329_v61  ;;  %v338_v3 = vld [vmem:[#allocation2 + $0xbc] sm:$0x1]  ;;  %v333_v4 = vsel %vm9612_vm5, 0, %v332_v63 }
  0x32   : > { %301 = vst [vmem:[#allocation2 + $0x20] sm:$0x1] %v300_v46  ;;  %v341_v5 = vld [vmem:[#allocation2 + $0xc8] sm:$0x1]  ;;  %v336_v6 = vsel %vm9612_vm5, 0, %v335_v1  ;;  %v339_v8 = vsel %vm9612_vm5, 0, %v338_v3 }
  0x33   : > { %304 = vst [vmem:[#allocation2 + $0x2c] sm:$0x1] %v303_v48  ;;  %v344_v7 = vld [vmem:[#allocation2 + $0xd4] sm:$0x1]  ;;  %v342_v9 = vsel %vm9612_vm5, 0, %v341_v5  ;;  %v347_v11 = vld [vmem:[%s9556_s23] sm:$0xff] }
  0x34   : > { %307 = vst [vmem:[#allocation2 + $0x38] sm:$0x1] %v306_v50  ;;  %v345_v10 = vsel %vm9612_vm5, 0, %v344_v7  ;;  %v348_v12 = vld [vmem:[%s9556_s23 + $0x8] sm:$0xff]  ;;  %v349_v13 = vld [vmem:[%s9556_s23 + $0x10] sm:$0xff]  ;;  %v350_v14 = vld [vmem:[%s9556_s23 + $0x18] sm:$0xff] }
  0x35   : > { %310 = vst [vmem:[#allocation2 + $0x44] sm:$0x1] %v309_v52  ;;  %v351_v15 = vld [vmem:[%s9556_s23 + $0x20] sm:$0xff]  ;;  %v352_v16 = vld [vmem:[%s9556_s23 + $0x28] sm:$0xff]  ;;  %v353_v17 = vld [vmem:[%s9556_s23 + $0x30] sm:$0xff] }
  0x36   : > { %313 = vst [vmem:[#allocation2 + $0x50] sm:$0x1] %v312_v54  ;;  %v354_v18 = vld [vmem:[%s9556_s23 + $0x38] sm:$0xff]  ;;  %v355_v19 = vld [vmem:[%s9556_s23 + $0x40] sm:$0xff]  ;;  %v356_v20 = vld [vmem:[%s9556_s23 + $0x48] sm:$0xff] }
  0x37   : > { %316 = vst [vmem:[#allocation2 + $0x5c] sm:$0x1] %v315_v56  ;;  %v357_v21 = vld [vmem:[%s9556_s23 + $0x50] sm:$0xff]  ;;  %v358_v22 = vld [vmem:[%s9556_s23 + $0x58] sm:$0xff]  ;;  %v359_v23 = vld [vmem:[%s9556_s23 + $0x60] sm:$0xff] }
  0x38   : > { %319 = vst [vmem:[#allocation2 + $0x68] sm:$0x1] %v318_v58  ;;  %v360_v24 = vld [vmem:[%s9556_s23 + $0x68] sm:$0xff]  ;;  %v361_v25 = vld [vmem:[%s9556_s23 + $0x70] sm:$0xff]  ;;  %v362_v26 = vld [vmem:[%s9556_s23 + $0x78] sm:$0xff] }
  0x39   : > { %322 = vst [vmem:[#allocation2 + $0x74] sm:$0x1] %v321_v60  ;;  %v363_v27 = vld [vmem:[%s9556_s23 + $0x80] sm:$0xff]  ;;  %v364_v28 = vld [vmem:[%s9556_s23 + $0x88] sm:$0xff]  ;;  %v365_v29 = vld [vmem:[%s9556_s23 + $0x90] sm:$0xff] }
  0x3a   : > { %325 = vst [vmem:[#allocation2 + $0x80] sm:$0x1] %v324_v62  ;;  %v366_v30 = vld [vmem:[%s9556_s23 + $0x98] sm:$0xff]  ;;  %v367_v31 = vld [vmem:[%s9556_s23 + $0xa0] sm:$0xff]  ;;  %v368_v32 = vld [vmem:[%s9556_s23 + $0xa8] sm:$0xff] }
  0x3b   : > { %328 = vst [vmem:[#allocation2 + $0x8c] sm:$0x1] %v327_v0  ;;  %v369_v33 = vld [vmem:[%s9556_s23 + $0xb0] sm:$0xff]  ;;  %v370_v34 = vld [vmem:[%s9556_s23 + $0xb8] sm:$0xff]  ;;  %v372_v36 = vld [vmem:[%s9556_s23 + $0xc8] sm:$0xff] }
  0x3c   : > { %331 = vst [vmem:[#allocation2 + $0x98] sm:$0x1] %v330_v2  ;;  %v373_v37 = vld [vmem:[%s9556_s23 + $0xd0] sm:$0xff]  ;;  %v374_v38 = vld [vmem:[%s9556_s23 + $0xd8] sm:$0xff]  ;;  %v375_v39 = vld [vmem:[%s9556_s23 + $0xe0] sm:$0xff] }
  0x3d   : > { %334 = vst [vmem:[#allocation2 + $0xa4] sm:$0x1] %v333_v4  ;;  %v376_v40 = vld [vmem:[%s9556_s23 + $0xe8] sm:$0xff]  ;;  %v377_v41 = vld [vmem:[%s9556_s23 + $0xf0] sm:$0xff]  ;;  %v378_v42 = vld [vmem:[%s9556_s23 + $0xf8] sm:$0xff] }
  0x3e   : > { %337 = vst [vmem:[#allocation2 + $0xb0] sm:$0x1] %v336_v6 }
  0x3f   : > { %340 = vst [vmem:[#allocation2 + $0xbc] sm:$0x1] %v339_v8 }
  0x40   : > { %343 = vst [vmem:[#allocation2 + $0xc8] sm:$0x1] %v342_v9 }
  0x41   : > { %346 = vst [vmem:[#allocation2 + $0xd4] sm:$0x1] %v345_v10 }
  0x42   : > { %380 = vst.msk [vmem:[%s9561_s28] sm:$0xff] %vm379_vm6, %v347_v11 }
  0x43   : > { %381 = vst.msk [vmem:[%s9561_s28 + $0x8] sm:$0xff] %vm379_vm6, %v348_v12 }
  0x44   : > { %382 = vst.msk [vmem:[%s9561_s28 + $0x10] sm:$0xff] %vm379_vm6, %v349_v13 }
  0x45   : > { %383 = vst.msk [vmem:[%s9561_s28 + $0x18] sm:$0xff] %vm379_vm6, %v350_v14 }
  0x46   : > { %384 = vst.msk [vmem:[%s9561_s28 + $0x20] sm:$0xff] %vm379_vm6, %v351_v15 }
  0x47   : > { %385 = vst.msk [vmem:[%s9561_s28 + $0x28] sm:$0xff] %vm379_vm6, %v352_v16 }
  0x48   : > { %386 = vst.msk [vmem:[%s9561_s28 + $0x30] sm:$0xff] %vm379_vm6, %v353_v17 }
  0x49   : > { %387 = vst.msk [vmem:[%s9561_s28 + $0x38] sm:$0xff] %vm379_vm6, %v354_v18 }
  0x4a   : > { %388 = vst.msk [vmem:[%s9561_s28 + $0x40] sm:$0xff] %vm379_vm6, %v355_v19 }
  0x4b   : > { %389 = vst.msk [vmem:[%s9561_s28 + $0x48] sm:$0xff] %vm379_vm6, %v356_v20 }
  0x4c   : > { %390 = vst.msk [vmem:[%s9561_s28 + $0x50] sm:$0xff] %vm379_vm6, %v357_v21 }
  0x4d   : > { %391 = vst.msk [vmem:[%s9561_s28 + $0x58] sm:$0xff] %vm379_vm6, %v358_v22 }
  0x4e   : > { %392 = vst.msk [vmem:[%s9561_s28 + $0x60] sm:$0xff] %vm379_vm6, %v359_v23 }
  0x4f   : > { %393 = vst.msk [vmem:[%s9561_s28 + $0x68] sm:$0xff] %vm379_vm6, %v360_v24 }
  0x50   : > { %394 = vst.msk [vmem:[%s9561_s28 + $0x70] sm:$0xff] %vm379_vm6, %v361_v25 }
  0x51   : > { %395 = vst.msk [vmem:[%s9561_s28 + $0x78] sm:$0xff] %vm379_vm6, %v362_v26 }
  0x52   : > { %396 = vst.msk [vmem:[%s9561_s28 + $0x80] sm:$0xff] %vm379_vm6, %v363_v27 }
  0x53   : > { %397 = vst.msk [vmem:[%s9561_s28 + $0x88] sm:$0xff] %vm379_vm6, %v364_v28 }
  0x54   : > { %398 = vst.msk [vmem:[%s9561_s28 + $0x90] sm:$0xff] %vm379_vm6, %v365_v29 }
  0x55   : > { %399 = vst.msk [vmem:[%s9561_s28 + $0x98] sm:$0xff] %vm379_vm6, %v366_v30 }
  0x56   : > { %400 = vst.msk [vmem:[%s9561_s28 + $0xa0] sm:$0xff] %vm379_vm6, %v367_v31 }
  0x57   : > { %401 = vst.msk [vmem:[%s9561_s28 + $0xa8] sm:$0xff] %vm379_vm6, %v368_v32 }
  0x58   : > { %402 = vst.msk [vmem:[%s9561_s28 + $0xb0] sm:$0xff] %vm379_vm6, %v369_v33 }
  0x59   : > { %403 = vst.msk [vmem:[%s9561_s28 + $0xb8] sm:$0xff] %vm379_vm6, %v370_v34 }
  0x5a   : > { %404 = vst.msk [vmem:[%s9561_s28 + $0xc0] sm:$0xff] %vm379_vm6, %v371_v35 }
  0x5b   : > { %405 = vst.msk [vmem:[%s9561_s28 + $0xc8] sm:$0xff] %vm379_vm6, %v372_v36 }
  0x5c   : > { %406 = vst.msk [vmem:[%s9561_s28 + $0xd0] sm:$0xff] %vm379_vm6, %v373_v37 }
  0x5d   : > { %407 = vst.msk [vmem:[%s9561_s28 + $0xd8] sm:$0xff] %vm379_vm6, %v374_v38 }
  0x5e   : > { %408 = vst.msk [vmem:[%s9561_s28 + $0xe0] sm:$0xff] %vm379_vm6, %v375_v39 }
  0x5f   : > { %409 = vst.msk [vmem:[%s9561_s28 + $0xe8] sm:$0xff] %vm379_vm6, %v376_v40 }
  0x60   : > { %410 = vst.msk [vmem:[%s9561_s28 + $0xf0] sm:$0xff] %vm379_vm6, %v377_v41 }
  0x61   : > { %411 = vst.msk [vmem:[%s9561_s28 + $0xf8] sm:$0xff] %vm379_vm6, %v378_v42 }
  0x62 PF: > { %v983_v43 = vld [vmem:[#allocation2] sm:$0xf]  ;;  %v984_v44 = vld [vmem:[#allocation2 + $0x4] sm:$0xf]  ;;  %vm1031_vm7 = vsmask.f32 3328 }
  0x63   : > { %vm1032_vm8 = vsmask.f32 7440  ;;  %v1035_v45 = vshrl.u32 %v983_v43, 16  ;;  %v1038_v46 = vshll.u32 %v983_v43, 16  ;;  %v1044_v47 = vshll.u32 %v984_v44, 16  ;;  %v412_v49 = vld [vmem:[%s9561_s28] sm:$0xff] }
  0x64   : > { %v1048_v48 = vshrl.u32 %v984_v44, 16  ;;  %v413_v50 = vld [vmem:[%s9561_s28 + $0x8] sm:$0xff]  ;;  %vm476_vm9 = vsmask.f32 256  ;;  %vm14228_vm10 = vcmask 60416   ;;  %v444_v54 = vpack.c.bf16 %v412_v49, %v412_v49  ;;  %v416_v55 = vld [vmem:[%s9561_s28 + $0x20] sm:$0xff]  ;;  %vm9761_vm14 = vmor %vm1031_vm7, %vm1032_vm8 }
  0x65   : > { %v1037_v51 = vrot.slane %v1035_v45, 4  ;;  %v1040_v52 = vrot.slane %v1038_v46, 5  ;;  %v1046_v53 = vrot.slane %v1044_v47, 5  ;;  %v445_v57 = vpack.c.bf16 %v413_v50, %v413_v50  ;;  %v417_v58 = vld [vmem:[%s9561_s28 + $0x28] sm:$0xff]  ;;  %v418_v63 = vld [vmem:[%s9561_s28 + $0x30] sm:$0xff]  ;;  %v419_v22 = vld [vmem:[%s9561_s28 + $0x38] sm:$0xff] }
  0x66   : > { %v1050_v56 = vrot.slane %v1048_v48, 4  ;;  %vm477_vm11 = vsmask.f32 4368  ;;  %vm801_vm12 = vsmask.f32 7938  ;;  %v480_v60 = vshrl.u32 %v444_v54, 16 }
  0x67   : > { %v1041_v59 = vor.u32 %v1040_v52, %v1037_v51  ;;  %v483_v61 = vshll.u32 %v444_v54, 16  ;;  %v985_v62 = vld [vmem:[#allocation2 + $0x8] sm:$0x1]  ;;  %vm808_vm13 = vcmask 57344   ;;  %v14249_v0 = vmov 0  ;;  %vm9767_vm15 = vmor %vm476_vm9, %vm477_vm11  ;;  %s9495_s8 = smov 8  }
  0x68   : > { %v14250_v0 = vsel %vm9761_vm14, 4294967295, %v14249_v0  ;;  %v488_v1 = vshrl.u32 %v445_v57, 16  ;;  %v491_v2 = vshll.u32 %v445_v57, 16  ;;  %v1051_v3 = vor.u32 %v1050_v56, %v1046_v53  ;;  %vm9773_vm0 = vmand %vm14228_vm10, %vm801_vm12  ;;  %v803_v12 = vld [vmem:[#allocation2 + $0xc] sm:$0xf]  ;;  %v414_v27 = vld [vmem:[%s9561_s28 + $0x10] sm:$0xff] }
  0x69   : > { %14251 = vst [vmem:[#allocation4_spill] sm:$0xff] %v14250_v0  ;;  %v1054_v4 = vshll.u32 %v985_v62, 16  ;;  %v1042_v5 = vrot.slane %v1041_v59, 4  ;;  %v14252_v6 = vmov 0  ;;  %v482_v7 = vrot.slane %v480_v60, 7  ;;  %vm9783_vm1 = vmand %vm808_vm13, %vm476_vm9  ;;  %v415_v33 = vld [vmem:[%s9561_s28 + $0x18] sm:$0xff] }
  0x6a   : > { %v14253_v6 = vsel %vm9767_vm15, 4294967295, %v14252_v6  ;;  %v448_v8 = vpack.c.bf16 %v416_v55, %v416_v55  ;;  %v449_v9 = vpack.c.bf16 %v417_v58, %v417_v58  ;;  %v490_v10 = vrot.slane %v488_v1, 7  ;;  %v810_v20 = vld [vmem:[#allocation2 + $0x14] sm:$0x1]  ;;  %v820_v32 = vld [vmem:[#allocation2 + $0x24] sm:$0xf] }
  0x6b   : > { %14254 = vst [vmem:[#allocation5_spill] sm:$0xff] %v14253_v6  ;;  %v1052_v13 = vrot.slane %v1051_v3, 4  ;;  %v1056_v14 = vrot.slane %v1054_v4, 5  ;;  %v9777_v15 = vpack.c.bf16 %v418_v63, %v418_v63  ;;  %v1047_v16 = vsel %vm9761_vm14, %v1042_v5, %v1046_v53  ;;  %v824_v36 = vld [vmem:[#allocation2 + $0x2c] sm:$0x1]  ;;  %v420_v47 = vld [vmem:[%s9561_s28 + $0x40] sm:$0xff] }
  0x6c   : > { %v485_v17 = vor.u32 %v483_v61, %v482_v7  ;;  %v486_v18 = vrot.slane %v482_v7, 4  ;;  %v14257_v19 = vmov 0  ;;  %v514_v21 = vshrl.u32 %v448_v8, 16  ;;  %1418 = vrot.lane.b32.xlu0 %v1047_v16, %s9495_s8  ;;  %v421_v52 = vld [vmem:[%s9561_s28 + $0x48] sm:$0xff]  ;;  %v422_v53 = vld [vmem:[%s9561_s28 + $0x50] sm:$0xff]  ;;  %s9496_s9 = smov 16  }
  0x6d   : > { %v14258_v19 = vsel %vm9783_vm1, 4294967295, %v14257_v19  ;;  %v493_v23 = vor.u32 %v491_v2, %v490_v10  ;;  %v1057_v24 = vsel %vm9761_vm14, %v1052_v13, %v1056_v14  ;;  %v495_v25 = vrot.slane %v490_v10, 4  ;;  %v831_v60 = vld [vmem:[#allocation2 + $0x38] sm:$0x1]  ;;  %s9497_s10 = smov 24   ;;  %s9498_s11 = smov 32  }
  0x6e   : > { %14259 = vst [vmem:[#allocation6_spill] sm:$0xff] %v14258_v19  ;;  %v517_v26 = vshll.u32 %v448_v8, 16  ;;  %v804_v28 = vsel %vm9773_vm0, %v485_v17, %v803_v12  ;;  %v516_v29 = vrot.slane %v514_v21, 7  ;;  %v522_v30 = vshrl.u32 %v449_v9, 16  ;;  %v813_v3 = vld [vmem:[#allocation2 + $0x18] sm:$0xf] }
  0x6f   : > { %v525_v31 = vshll.u32 %v449_v9, 16  ;;  %v494_v34 = vsel %vm9767_vm15, %v486_v18, %v493_v23  ;;  %805 = vst [vmem:[#allocation2 + $0xc] sm:$0xf] %v804_v28  ;;  %v811_v35 = vsel %vm9783_vm1, %v495_v25, %v810_v20  ;;  %v451_v37 = vpack.c.bf16 %v419_v22, %v419_v22  ;;  %v423_v18 = vld [vmem:[%s9561_s28 + $0x58] sm:$0xff]  ;;  %s9499_s12 = smov 40   ;;  %s9500_s13 = smov 48  }
  0x70   : > { %v531_v38 = vshrl.u32 %v9777_v15, 16  ;;  %807 = vst.msk [vmem:[#allocation2 + $0x10] sm:$0xf] %vm14228_vm10, %v494_v34  ;;  %v519_v39 = vor.u32 %v517_v26, %v516_v29  ;;  %v520_v40 = vrot.slane %v516_v29, 4  ;;  %v524_v41 = vrot.slane %v522_v30, 7  ;;  %s9501_s19 = smov 56  }
  0x71   : > { %v446_v42 = vpack.c.bf16 %v414_v27, %v414_v27  ;;  %812 = vst [vmem:[#allocation2 + $0x14] sm:$0x1] %v811_v35  ;;  %v539_v44 = vshrl.u32 %v451_v37, 16  ;;  %v542_v45 = vshll.u32 %v451_v37, 16  ;;  %v447_v46 = vpack.c.bf16 %v415_v33, %v415_v33  ;;  %s9502_s20 = smov 64  }
  0x72   : > { %v9801_v43 = vrot.slane %v531_v38, 7  ;;  %v527_v48 = vor.u32 %v525_v31, %v524_v41  ;;  %v821_v49 = vsel %vm9773_vm0, %v519_v39, %v820_v32  ;;  %v529_v50 = vrot.slane %v524_v41, 4 }
  0x73   : > { %v497_v51 = vshrl.u32 %v446_v42, 16  ;;  %822 = vst [vmem:[#allocation2 + $0x24] sm:$0xf] %v821_v49  ;;  %v541_v55 = vrot.slane %v539_v44, 7  ;;  %v500_v56 = vshll.u32 %v446_v42, 16  ;;  %v505_v57 = vshrl.u32 %v447_v46, 16 }
  0x74   : > { %v537_v54 = vrot.slane %v9801_v43, 4  ;;  %v528_v58 = vsel %vm9767_vm15, %v520_v40, %v527_v48  ;;  %v825_v59 = vsel %vm9783_vm1, %v529_v50, %v824_v36  ;;  %v508_v62 = vshll.u32 %v447_v46, 16  ;;  %1420 = vrot.lane.b32.xlu0 %v1057_v24, %s9495_s8 }
  0x75   : > { %v499_v61 = vrot.slane %v497_v51, 7  ;;  %823 = vst.msk [vmem:[#allocation2 + $0x28] sm:$0xf] %vm14228_vm10, %v528_v58  ;;  %v544_v63 = vor.u32 %v542_v45, %v541_v55  ;;  %v546_v1 = vrot.slane %v541_v55, 4  ;;  %v9815_v2 = vrot.slane %v505_v57, 7 }
  0x76   : > { %v452_v4 = vpack.c.bf16 %v420_v47, %v420_v47  ;;  %v986_v5 = vld [vmem:[#allocation2 + $0xc] sm:$0xf]  ;;  %826 = vst [vmem:[#allocation2 + $0x2c] sm:$0x1] %v825_v59  ;;  %v9817_v9 = vpack.c.bf16 %v421_v52, %v421_v52  ;;  %v9819_v10 = vpack.c.bf16 %v422_v53, %v422_v53  ;;  %v9832_v33 = vpack.c.bf16 %v423_v18, %v423_v18 }
  0x77   : > { %v502_v7 = vor.u32 %v500_v56, %v499_v61  ;;  %v503_v8 = vrot.slane %v499_v61, 4  ;;  %v987_v12 = vld [vmem:[#allocation2 + $0x10] sm:$0xf]  ;;  %v1059_v13 = vshrl.u32 %v986_v5, 16  ;;  %v1062_v14 = vshll.u32 %v986_v5, 16 }
  0x78   : > { %v545_v16 = vsel %vm9767_vm15, %v537_v54, %v544_v63  ;;  %v832_v17 = vsel %vm9783_vm1, %v546_v1, %v831_v60  ;;  %v1068_v20 = vshll.u32 %v987_v12, 16  ;;  %v988_v21 = vld [vmem:[#allocation2 + $0x14] sm:$0x1]  ;;  %v1072_v22 = vshrl.u32 %v987_v12, 16  ;;  %v834_v63 = vld [vmem:[#allocation2 + $0x3c] sm:$0xf] }
  0x79   : > { %830 = vst.msk [vmem:[#allocation2 + $0x34] sm:$0xf] %vm14228_vm10, %v545_v16  ;;  %v510_v23 = vor.u32 %v508_v62, %v9815_v2  ;;  %v814_v24 = vsel %vm9773_vm0, %v502_v7, %v813_v3  ;;  %v1061_v25 = vrot.slane %v1059_v13, 4  ;;  %v1064_v26 = vrot.slane %v1062_v14, 5 }
  0x7a   : > { %v1078_v27 = vshll.u32 %v988_v21, 16  ;;  %833 = vst [vmem:[#allocation2 + $0x38] sm:$0x1] %v832_v17  ;;  %v548_v28 = vshrl.u32 %v452_v4, 16  ;;  %v1070_v29 = vrot.slane %v1068_v20, 5  ;;  %v1074_v30 = vrot.slane %v1072_v22, 4 }
  0x7b   : > { %v992_v31 = vld [vmem:[#allocation2 + $0x24] sm:$0xf]  ;;  %v511_v32 = vsel %vm9767_vm15, %v503_v8, %v510_v23  ;;  %815 = vst [vmem:[#allocation2 + $0x18] sm:$0xf] %v814_v24  ;;  %v1065_v34 = vor.u32 %v1064_v26, %v1061_v25  ;;  %v551_v41 = vshll.u32 %v452_v4, 16  ;;  %v556_v42 = vshrl.u32 %v9817_v9, 16 }
  0x7c   : > { %v9834_v35 = vrot.slane %v1078_v27, 5  ;;  %v1107_v36 = vshrl.u32 %v992_v31, 16  ;;  %v1110_v37 = vshll.u32 %v992_v31, 16  ;;  %816 = vst.msk [vmem:[#allocation2 + $0x1c] sm:$0xf] %vm14228_vm10, %v511_v32  ;;  %v1075_v38 = vor.u32 %v1074_v30, %v1070_v29 }
  0x7d   : > { %v993_v39 = vld [vmem:[#allocation2 + $0x28] sm:$0xf]  ;;  %v550_v40 = vrot.slane %v548_v28, 7  ;;  %v1066_v44 = vrot.slane %v1065_v34, 4  ;;  %v994_v48 = vld [vmem:[#allocation2 + $0x2c] sm:$0x1] }
  0x7e   : > { %v1109_v45 = vrot.slane %v1107_v36, 4  ;;  %v1112_v46 = vrot.slane %v1110_v37, 5  ;;  %v1116_v47 = vshll.u32 %v993_v39, 16  ;;  %v1076_v49 = vrot.slane %v1075_v38, 4  ;;  %v424_v34 = vld [vmem:[%s9561_s28 + $0x60] sm:$0xff] }
  0x7f   : > { %v1120_v50 = vshrl.u32 %v993_v39, 16  ;;  %v1126_v51 = vshll.u32 %v994_v48, 16  ;;  %v553_v52 = vor.u32 %v551_v41, %v550_v40  ;;  %v1071_v53 = vsel %vm9761_vm14, %v1066_v44, %v1070_v29  ;;  %v817_v39 = vld [vmem:[#allocation2 + $0x20] sm:$0x1] }
  0x80   : > { %v1113_v54 = vor.u32 %v1112_v46, %v1109_v45  ;;  %v1118_v55 = vrot.slane %v1116_v47, 5  ;;  %v996_v56 = vld [vmem:[#allocation2 + $0x34] sm:$0xf]  ;;  %v554_v57 = vrot.slane %v550_v40, 4  ;;  %1422 = vrot.lane.b32.xlu1 %v1071_v53, %s9495_s8  ;;  %v1081_v58 = vsel %vm9761_vm14, %v1076_v49, %v9834_v35 }
  0x81   : > { %v1122_v59 = vrot.slane %v1120_v50, 4  ;;  %v9844_v60 = vrot.slane %v1126_v51, 5  ;;  %v997_v61 = vld [vmem:[#allocation2 + $0x38] sm:$0x1]  ;;  %v1140_v62 = vshll.u32 %v996_v56, 16  ;;  %v1144_v3 = vshrl.u32 %v996_v56, 16 }
  0x82   : > { %v1114_v1 = vrot.slane %v1113_v54, 4  ;;  %v1150_v4 = vshll.u32 %v997_v61, 16  ;;  %v989_v5 = vld [vmem:[#allocation2 + $0x18] sm:$0xf]  ;;  %v9846_v7 = vrot.slane %v556_v42, 7  ;;  %v559_v25 = vshll.u32 %v9817_v9, 16 }
  0x83   : > { %v1123_v8 = vor.u32 %v1122_v59, %v1118_v55  ;;  %v9848_v12 = vrot.slane %v1140_v62, 5  ;;  %v990_v13 = vld [vmem:[#allocation2 + $0x1c] sm:$0xf]  ;;  %v1083_v14 = vshrl.u32 %v989_v5, 16  ;;  %v1086_v16 = vshll.u32 %v989_v5, 16  ;;  %v426_v49 = vld [vmem:[%s9561_s28 + $0x70] sm:$0xff] }
  0x84   : > { %v1119_v17 = vsel %vm9761_vm14, %v1114_v1, %v1118_v55  ;;  %v1146_v18 = vrot.slane %v1144_v3, 4  ;;  %v1152_v20 = vrot.slane %v1150_v4, 5  ;;  %v1092_v21 = vshll.u32 %v990_v13, 16  ;;  %v841_v42 = vld [vmem:[#allocation2 + $0x48] sm:$0xf]  ;;  %v427_v61 = vld [vmem:[%s9561_s28 + $0x78] sm:$0xff] }
  0x85   : > { %1430 = vrot.lane.b32.xlu0 %v1119_v17, %s9495_s8  ;;  %v9853_v22 = vrot.slane %v1123_v8, 4  ;;  %v1085_v23 = vrot.slane %v1083_v14, 4  ;;  %v1088_v24 = vrot.slane %v1086_v16, 5  ;;  %v835_v28 = vsel %vm9773_vm0, %v553_v52, %v834_v63  ;;  %v827_v8 = vld [vmem:[#allocation2 + $0x30] sm:$0xf] }
  0x86   : > { %v1147_v26 = vor.u32 %v1146_v18, %v9848_v12  ;;  %v1094_v27 = vrot.slane %v1092_v21, 5  ;;  %v565_v29 = vshrl.u32 %v9819_v10, 16  ;;  %v561_v32 = vor.u32 %v559_v25, %v9846_v7  ;;  %836 = vst [vmem:[#allocation2 + $0x3c] sm:$0xf] %v835_v28 }
  0x87   : > { %v1129_v30 = vsel %vm9761_vm14, %v9853_v22, %v9844_v60  ;;  %v1089_v31 = vor.u32 %v1088_v24, %v1085_v23  ;;  %v568_v9 = vshll.u32 %v9819_v10, 16  ;;  %v573_v37 = vshrl.u32 %v9832_v33, 16  ;;  %v425_v10 = vld [vmem:[%s9561_s28 + $0x68] sm:$0xff] }
  0x88   : > { %v1148_v35 = vrot.slane %v1147_v26, 4  ;;  %v567_v36 = vrot.slane %v565_v29, 7  ;;  %v576_v38 = vshll.u32 %v9832_v33, 16  ;;  %1424 = vrot.lane.b32.xlu1 %v1081_v58, %s9495_s8  ;;  %v562_v41 = vsel %vm9767_vm15, %v554_v57, %v561_v32 }
  0x89   : > { %v1090_v40 = vrot.slane %v1089_v31, 4  ;;  %v512_v44 = vrot.slane %v9815_v2, 4  ;;  %v1096_v45 = vshrl.u32 %v990_v13, 16  ;;  %837 = vst.msk [vmem:[#allocation2 + $0x40] sm:$0xf] %vm14228_vm10, %v562_v41  ;;  %v575_v33 = vrot.slane %v573_v37, 7 }
  0x8a   : > { %v1153_v46 = vsel %vm9761_vm14, %v1148_v35, %v1152_v20  ;;  %v570_v47 = vor.u32 %v568_v9, %v567_v36  ;;  %v571_v48 = vrot.slane %v567_v36, 4  ;;  %v845_v2 = vld [vmem:[#allocation2 + $0x50] sm:$0x1]  ;;  %v9882_v53 = vpack.c.bf16 %v424_v34, %v424_v34  ;;  %v428_v13 = vld [vmem:[%s9561_s28 + $0x80] sm:$0xff]  ;;  %v852_v20 = vld [vmem:[#allocation2 + $0x5c] sm:$0x1] }
  0x8b   : > { %v1095_v50 = vsel %vm9761_vm14, %v1090_v40, %v1094_v27  ;;  %v818_v51 = vsel %vm9783_vm1, %v512_v44, %v817_v39  ;;  %v1098_v52 = vrot.slane %v1096_v45, 4  ;;  %v578_v54 = vor.u32 %v576_v38, %v575_v33  ;;  %v430_v34 = vld [vmem:[%s9561_s28 + $0x90] sm:$0xff]  ;;  %v855_v45 = vld [vmem:[#allocation2 + $0x60] sm:$0xf] }
  0x8c   : > { %1426 = vrot.lane.b32.xlu2 %v1095_v50, %s9495_s8  ;;  %v842_v55 = vsel %vm9773_vm0, %v570_v47, %v841_v42  ;;  %819 = vst [vmem:[#allocation2 + $0x20] sm:$0x1] %v818_v51  ;;  %v580_v56 = vrot.slane %v575_v33, 4  ;;  %v457_v57 = vpack.c.bf16 %v425_v10, %v425_v10  ;;  %v582_v59 = vshrl.u32 %v9882_v53, 16  ;;  %v431_v33 = vld [vmem:[%s9561_s28 + $0x98] sm:$0xff] }
  0x8d   : > { %1436 = vrot.lane.b32.xlu0 %v1153_v46, %s9495_s8  ;;  %843 = vst [vmem:[#allocation2 + $0x48] sm:$0xf] %v842_v55  ;;  %v1099_v58 = vor.u32 %v1098_v52, %v1094_v27  ;;  %v534_v60 = vshll.u32 %v9777_v15, 16  ;;  %v458_v62 = vpack.c.bf16 %v426_v49, %v426_v49  ;;  %v998_v63 = vld [vmem:[#allocation2 + $0x3c] sm:$0xf]  ;;  %v579_v1 = vsel %vm9767_vm15, %v571_v48, %v578_v54 }
  0x8e   : > { %v846_v3 = vsel %vm9783_vm1, %v580_v56, %v845_v2  ;;  %v590_v4 = vshrl.u32 %v457_v57, 16  ;;  %v593_v5 = vshll.u32 %v457_v57, 16  ;;  %v1155_v14 = vshrl.u32 %v998_v63, 16  ;;  %844 = vst.msk [vmem:[#allocation2 + $0x4c] sm:$0xf] %vm14228_vm10, %v579_v1 }
  0x8f   : > { %v1158_v16 = vshll.u32 %v998_v63, 16  ;;  %v1100_v17 = vrot.slane %v1099_v58, 4  ;;  %v9897_v18 = vrot.slane %v582_v59, 7  ;;  %847 = vst [vmem:[#allocation2 + $0x50] sm:$0x1] %v846_v3  ;;  %v536_v21 = vor.u32 %v534_v60, %v9801_v43  ;;  %v429_v43 = vld [vmem:[%s9561_s28 + $0x88] sm:$0xff] }
  0x90   : > { %v592_v15 = vrot.slane %v590_v4, 7  ;;  %v9900_v22 = vpack.c.bf16 %v427_v61, %v427_v61  ;;  %v599_v23 = vshrl.u32 %v458_v62, 16  ;;  %1432 = vrot.lane.b32.xlu1 %v1129_v30, %s9495_s8  ;;  %v9903_v24 = vld [vmem:[#allocation2 + $0x40] sm:$0xf]  ;;  %v1157_v25 = vrot.slane %v1155_v14, 4 }
  0x91   : > { %v1160_v26 = vrot.slane %v1158_v16, 5  ;;  %v588_v27 = vrot.slane %v9897_v18, 4  ;;  %v602_v28 = vshll.u32 %v458_v62, 16  ;;  %v1164_v29 = vshll.u32 %v9903_v24, 16  ;;  %v432_v59 = vld [vmem:[%s9561_s28 + $0xa0] sm:$0xff] }
  0x92   : > { %v595_v31 = vor.u32 %v593_v5, %v592_v15  ;;  %v597_v32 = vrot.slane %v592_v15, 4  ;;  %v828_v9 = vsel %vm9773_vm0, %v536_v21, %v827_v8  ;;  %v9911_v30 = vrot.slane %v599_v23, 7 }
  0x93   : > { %v1161_v35 = vor.u32 %v1160_v26, %v1157_v25  ;;  %v991_v36 = vld [vmem:[#allocation2 + $0x20] sm:$0x1]  ;;  %829 = vst [vmem:[#allocation2 + $0x30] sm:$0xf] %v828_v9  ;;  %v607_v37 = vshrl.u32 %v9900_v22, 16  ;;  %v9914_v38 = vpack.c.bf16 %v428_v13, %v428_v13  ;;  %v9916_v39 = vrot.slane %v1164_v29, 5 }
  0x94   : > { %v1001_v40 = vld [vmem:[#allocation2 + $0x48] sm:$0xf]  ;;  %v1102_v41 = vshll.u32 %v991_v36, 16  ;;  %v596_v42 = vsel %vm9767_vm15, %v588_v27, %v595_v31  ;;  %v853_v44 = vsel %vm9783_vm1, %v597_v32, %v852_v20  ;;  %v604_v48 = vor.u32 %v602_v28, %v9911_v30 }
  0x95   : > { %v1162_v10 = vrot.slane %v1161_v35, 4  ;;  %v1179_v46 = vshrl.u32 %v1001_v40, 16  ;;  %v1182_v47 = vshll.u32 %v1001_v40, 16  ;;  %851 = vst.msk [vmem:[#allocation2 + $0x58] sm:$0xf] %vm14228_vm10, %v596_v42  ;;  %v605_v51 = vrot.slane %v9911_v30, 4 }
  0x96   : > { %v1002_v49 = vld [vmem:[#allocation2 + $0x4c] sm:$0xf]  ;;  %v1104_v50 = vrot.slane %v1102_v41, 5  ;;  %854 = vst [vmem:[#allocation2 + $0x5c] sm:$0x1] %v853_v44  ;;  %v9926_v52 = vpack.c.bf16 %v429_v43, %v429_v43  ;;  %v9928_v2 = vpack.c.bf16 %v430_v34, %v430_v34  ;;  %v9936_v63 = vrot.slane %v607_v37, 7 }
  0x97   : > { %v1167_v54 = vsel %vm9761_vm14, %v1162_v10, %v9916_v39  ;;  %v1181_v55 = vrot.slane %v1179_v46, 4  ;;  %v1184_v56 = vrot.slane %v1182_v47, 5  ;;  %v1188_v57 = vshll.u32 %v1002_v49, 16  ;;  %v1003_v58 = vld [vmem:[#allocation2 + $0x50] sm:$0x1] }
  0x98   : > { %v1105_v60 = vsel %vm9761_vm14, %v1100_v17, %v1104_v50  ;;  %v1192_v61 = vshrl.u32 %v1002_v49, 16  ;;  %v1198_v62 = vshll.u32 %v1003_v58, 16  ;;  %1438 = vrot.lane.b32.xlu1 %v1167_v54, %s9495_s8  ;;  %v610_v4 = vshll.u32 %v9900_v22, 16  ;;  %v862_v46 = vld [vmem:[#allocation2 + $0x6c] sm:$0xf] }
  0x99   : > { %v1185_v1 = vor.u32 %v1184_v56, %v1181_v55  ;;  %v1190_v3 = vrot.slane %v1188_v57, 5  ;;  %1428 = vrot.lane.b32.xlu2 %v1105_v60, %s9495_s8  ;;  %v856_v5 = vsel %vm9773_vm0, %v604_v48, %v855_v45  ;;  %v9943_v16 = vpack.c.bf16 %v431_v33, %v431_v33  ;;  %v838_v47 = vld [vmem:[#allocation2 + $0x44] sm:$0x1] }
  0x9a   : > { %v1194_v8 = vrot.slane %v1192_v61, 4  ;;  %v1200_v13 = vrot.slane %v1198_v62, 5  ;;  %v995_v14 = vld [vmem:[#allocation2 + $0x30] sm:$0xf]  ;;  %857 = vst [vmem:[#allocation2 + $0x60] sm:$0xf] %v856_v5  ;;  %v9945_v17 = vpack.c.bf16 %v432_v59, %v432_v59  ;;  %v612_v23 = vor.u32 %v610_v4, %v9936_v63 }
  0x9b   : > { %v1186_v15 = vrot.slane %v1185_v1, 4  ;;  %v1131_v20 = vshrl.u32 %v995_v14, 16  ;;  %v1134_v21 = vshll.u32 %v995_v14, 16  ;;  %v616_v22 = vshrl.u32 %v9914_v38, 16  ;;  %v433_v61 = vld [vmem:[%s9561_s28 + $0xa8] sm:$0xff] }
  0x9c   : > { %v1195_v25 = vor.u32 %v1194_v8, %v1190_v3  ;;  %v1005_v26 = vld [vmem:[#allocation2 + $0x58] sm:$0xf]  ;;  %v619_v27 = vshll.u32 %v9914_v38, 16  ;;  %v624_v28 = vshrl.u32 %v9926_v52, 16  ;;  %v613_v30 = vsel %vm9767_vm15, %v605_v51, %v612_v23  ;;  %v866_v4 = vld [vmem:[#allocation2 + $0x74] sm:$0x1] }
  0x9d   : > { %v1191_v29 = vsel %vm9761_vm14, %v1186_v15, %v1190_v3  ;;  %v1006_v31 = vld [vmem:[#allocation2 + $0x5c] sm:$0x1]  ;;  %v1212_v32 = vshll.u32 %v1005_v26, 16  ;;  %v1216_v9 = vshrl.u32 %v1005_v26, 16  ;;  %v1133_v43 = vrot.slane %v1131_v20, 4 }
  0x9e   : > { %1442 = vrot.lane.b32.xlu0 %v1191_v29, %s9495_s8  ;;  %v1196_v34 = vrot.slane %v1195_v25, 4  ;;  %v1222_v35 = vshll.u32 %v1006_v31, 16  ;;  %v1136_v36 = vrot.slane %v1134_v21, 5  ;;  %858 = vst.msk [vmem:[#allocation2 + $0x64] sm:$0xf] %vm14228_vm10, %v613_v30  ;;  %v618_v40 = vrot.slane %v616_v22, 7 }
  0x9f   : > { %v9956_v37 = vrot.slane %v1212_v32, 5  ;;  %v1218_v38 = vrot.slane %v1216_v9, 4  ;;  %v626_v41 = vrot.slane %v624_v28, 7  ;;  %v627_v10 = vshll.u32 %v9926_v52, 16 }
  0xa0   : > { %v1201_v42 = vsel %vm9761_vm14, %v1196_v34, %v1200_v13  ;;  %v1224_v44 = vrot.slane %v1222_v35, 5  ;;  %v1137_v45 = vor.u32 %v1136_v36, %v1133_v43  ;;  %v621_v49 = vor.u32 %v619_v27, %v618_v40  ;;  %v434_v27 = vld [vmem:[%s9561_s28 + $0xb0] sm:$0xff] }
  0xa1   : > { %1444 = vrot.lane.b32.xlu1 %v1201_v42, %s9495_s8  ;;  %v1219_v48 = vor.u32 %v1218_v38, %v9956_v37  ;;  %v1007_v33 = vld [vmem:[#allocation2 + $0x60] sm:$0xf]  ;;  %v622_v50 = vrot.slane %v618_v40, 4  ;;  %v563_v51 = vrot.slane %v9846_v7, 4  ;;  %v629_v57 = vor.u32 %v627_v10, %v626_v41  ;;  %v848_v38 = vld [vmem:[#allocation2 + $0x54] sm:$0xf] }
  0xa2   : > { %v1138_v54 = vrot.slane %v1137_v45, 4  ;;  %v1227_v55 = vshrl.u32 %v1007_v33, 16  ;;  %v1230_v56 = vshll.u32 %v1007_v33, 16  ;;  %v863_v52 = vsel %vm9773_vm0, %v621_v49, %v862_v46  ;;  %v435_v45 = vld [vmem:[%s9561_s28 + $0xb8] sm:$0xff]  ;;  %v876_v33 = vld [vmem:[#allocation2 + $0x84] sm:$0xf] }
  0xa3   : > { %v1220_v58 = vrot.slane %v1219_v48, 4  ;;  %v839_v59 = vsel %vm9783_vm1, %v563_v51, %v838_v47  ;;  %v1168_v60 = vshrl.u32 %v9903_v24, 16  ;;  %v630_v3 = vsel %vm9767_vm15, %v622_v50, %v629_v57  ;;  %864 = vst [vmem:[#allocation2 + $0x6c] sm:$0xf] %v863_v52 }
  0xa4   : > { %v1143_v62 = vsel %vm9761_vm14, %v1138_v54, %v9848_v12  ;;  %v1229_v1 = vrot.slane %v1227_v55, 4  ;;  %v1232_v7 = vrot.slane %v1230_v56, 5  ;;  %865 = vst.msk [vmem:[#allocation2 + $0x70] sm:$0xf] %vm14228_vm10, %v630_v3  ;;  %v631_v8 = vrot.slane %v626_v41, 4 }
  0xa5   : > { %v1225_v5 = vsel %vm9761_vm14, %v1220_v58, %v1224_v44  ;;  %1434 = vrot.lane.b32.xlu2 %v1143_v62, %s9495_s8  ;;  %v1170_v24 = vrot.slane %v1168_v60, 4  ;;  %v633_v13 = vshrl.u32 %v9928_v2, 16  ;;  %v9982_v12 = vld [vmem:[#allocation2 + $0x64] sm:$0xf]  ;;  %840 = vst [vmem:[#allocation2 + $0x44] sm:$0x1] %v839_v59  ;;  %v9986_v21 = vpack.c.bf16 %v433_v61, %v433_v61 }
  0xa6   : > { %1448 = vrot.lane.b32.xlu0 %v1225_v5, %s9495_s8  ;;  %v1233_v14 = vor.u32 %v1232_v7, %v1229_v1  ;;  %v641_v15 = vshrl.u32 %v9943_v16, 16  ;;  %v644_v20 = vshll.u32 %v9943_v16, 16  ;;  %v1236_v23 = vshll.u32 %v9982_v12, 16 }
  0xa7   : > { %v1171_v25 = vor.u32 %v1170_v24, %v9916_v39  ;;  %v867_v26 = vsel %vm9783_vm1, %v631_v8, %v866_v4  ;;  %v9992_v22 = vrot.slane %v633_v13, 7  ;;  %v585_v31 = vshll.u32 %v9882_v53, 16  ;;  %v873_v39 = vld [vmem:[#allocation2 + $0x80] sm:$0x1] }
  0xa8   : > { %v1234_v28 = vrot.slane %v1233_v14, 4  ;;  %868 = vst [vmem:[#allocation2 + $0x74] sm:$0x1] %v867_v26  ;;  %v643_v29 = vrot.slane %v641_v15, 7  ;;  %v650_v16 = vshrl.u32 %v9945_v17, 16  ;;  %v9997_v32 = vrot.slane %v1236_v23, 5 }
  0xa9   : > { %v1172_v9 = vrot.slane %v1171_v25, 4  ;;  %v639_v43 = vrot.slane %v9992_v22, 4  ;;  %v653_v34 = vshll.u32 %v9945_v17, 16  ;;  %v587_v30 = vor.u32 %v585_v31, %v9897_v18 }
  0xaa   : > { %v646_v35 = vor.u32 %v644_v20, %v643_v29  ;;  %v648_v36 = vrot.slane %v643_v29, 4  ;;  %v652_v40 = vrot.slane %v650_v16, 7  ;;  %v1239_v53 = vsel %vm9761_vm14, %v1234_v28, %v9997_v32  ;;  %v1010_v41 = vld [vmem:[#allocation2 + $0x6c] sm:$0xf]  ;;  %v859_v29 = vld [vmem:[#allocation2 + $0x68] sm:$0x1] }
  0xab   : > { %v658_v42 = vshrl.u32 %v9986_v21, 16  ;;  %v661_v44 = vshll.u32 %v9986_v21, 16  ;;  %v466_v10 = vpack.c.bf16 %v434_v27, %v434_v27  ;;  %1450 = vrot.lane.b32.xlu1 %v1239_v53, %s9495_s8  ;;  %v1011_v17 = vld [vmem:[#allocation2 + $0x70] sm:$0xf]  ;;  %v1251_v46 = vshrl.u32 %v1010_v41, 16 }
  0xac   : > { %v1254_v47 = vshll.u32 %v1010_v41, 16  ;;  %v647_v18 = vsel %vm9767_vm15, %v639_v43, %v646_v35  ;;  %v874_v48 = vsel %vm9783_vm1, %v648_v36, %v873_v39  ;;  %v1260_v49 = vshll.u32 %v1011_v17, 16  ;;  %v1000_v50 = vld [vmem:[#allocation2 + $0x44] sm:$0x1]  ;;  %v883_v39 = vld [vmem:[#allocation2 + $0x90] sm:$0xf] }
  0xad   : > { %v1264_v51 = vshrl.u32 %v1011_v17, 16  ;;  %872 = vst.msk [vmem:[#allocation2 + $0x7c] sm:$0xf] %vm14228_vm10, %v647_v18  ;;  %v849_v54 = vsel %vm9773_vm0, %v587_v30, %v848_v38  ;;  %v655_v55 = vor.u32 %v653_v34, %v652_v40  ;;  %v1253_v56 = vrot.slane %v1251_v46, 4 }
  0xae   : > { %v1256_v57 = vrot.slane %v1254_v47, 5  ;;  %v1174_v58 = vshll.u32 %v1000_v50, 16  ;;  %875 = vst [vmem:[#allocation2 + $0x80] sm:$0x1] %v874_v48  ;;  %v656_v52 = vrot.slane %v652_v40, 4  ;;  %v1262_v59 = vrot.slane %v1260_v49, 5 }
  0xaf   : > { %v1012_v60 = vld [vmem:[#allocation2 + $0x74] sm:$0x1]  ;;  %v1266_v61 = vrot.slane %v1264_v51, 4  ;;  %850 = vst [vmem:[#allocation2 + $0x54] sm:$0xf] %v849_v54  ;;  %v877_v62 = vsel %vm9773_vm0, %v655_v55, %v876_v33  ;;  %v467_v1 = vpack.c.bf16 %v435_v45, %v435_v45  ;;  %v10018_v5 = vrot.slane %v658_v42, 7 }
  0xb0   : > { %v1257_v7 = vor.u32 %v1256_v57, %v1253_v56  ;;  %v1176_v3 = vrot.slane %v1174_v58, 5  ;;  %v1270_v4 = vshll.u32 %v1012_v60, 16  ;;  %878 = vst [vmem:[#allocation2 + $0x84] sm:$0xf] %v877_v62  ;;  %v667_v8 = vshrl.u32 %v466_v10, 16  ;;  %v437_v50 = vld [vmem:[%s9561_s28 + $0xc8] sm:$0xff] }
  0xb1   : > { %v1267_v24 = vor.u32 %v1266_v61, %v1262_v59  ;;  %v670_v13 = vshll.u32 %v466_v10, 16  ;;  %v675_v14 = vshrl.u32 %v467_v1, 16  ;;  %v663_v23 = vor.u32 %v661_v44, %v10018_v5  ;;  %v436_v44 = vld [vmem:[%s9561_s28 + $0xc0] sm:$0xff]  ;;  %v887_v57 = vld [vmem:[#allocation2 + $0x98] sm:$0x1] }
  0xb2   : > { %v1258_v15 = vrot.slane %v1257_v7, 4  ;;  %v1177_v20 = vsel %vm9761_vm14, %v1172_v9, %v1176_v3  ;;  %v1272_v21 = vrot.slane %v1270_v4, 5  ;;  %v669_v26 = vrot.slane %v667_v8, 7 }
  0xb3   : > { %1440 = vrot.lane.b32.xlu2 %v1177_v20, %s9495_s8  ;;  %v1268_v25 = vrot.slane %v1267_v24, 4  ;;  %v677_v27 = vrot.slane %v675_v14, 7  ;;  %v678_v28 = vshll.u32 %v467_v1, 16  ;;  %v664_v43 = vsel %vm9767_vm15, %v656_v52, %v663_v23  ;;  %v438_v14 = vld [vmem:[%s9561_s28 + $0xd0] sm:$0xff] }
  0xb4   : > { %v1263_v31 = vsel %vm9761_vm14, %v1258_v15, %v1262_v59  ;;  %v1014_v16 = vld [vmem:[#allocation2 + $0x7c] sm:$0xf]  ;;  %v614_v9 = vrot.slane %v9936_v63, 4  ;;  %v1240_v34 = vshrl.u32 %v9982_v12, 16  ;;  %879 = vst.msk [vmem:[#allocation2 + $0x88] sm:$0xf] %vm14228_vm10, %v664_v43  ;;  %v672_v40 = vor.u32 %v670_v13, %v669_v26 }
  0xb5   : > { %1454 = vrot.lane.b32.xlu0 %v1263_v31, %s9495_s8  ;;  %v1273_v35 = vsel %vm9761_vm14, %v1268_v25, %v1272_v21  ;;  %v1015_v36 = vld [vmem:[#allocation2 + $0x80] sm:$0x1]  ;;  %v1284_v30 = vshll.u32 %v1014_v16, 16  ;;  %v1288_v38 = vshrl.u32 %v1014_v16, 16  ;;  %v673_v42 = vrot.slane %v669_v26, 4  ;;  %v439_v25 = vld [vmem:[%s9561_s28 + $0xd8] sm:$0xff] }
  0xb6   : > { %1456 = vrot.lane.b32.xlu1 %v1273_v35, %s9495_s8  ;;  %v1294_v53 = vshll.u32 %v1015_v36, 16  ;;  %v1004_v41 = vld [vmem:[#allocation2 + $0x54] sm:$0xf]  ;;  %v680_v63 = vor.u32 %v678_v28, %v677_v27  ;;  %v860_v12 = vsel %vm9783_vm1, %v614_v9, %v859_v29  ;;  %v884_v56 = vsel %vm9773_vm0, %v672_v40, %v883_v39  ;;  %v869_v35 = vld [vmem:[#allocation2 + $0x78] sm:$0xf] }
  0xb7   : > { %v10038_v45 = vrot.slane %v1284_v30, 5  ;;  %v1290_v10 = vrot.slane %v1288_v38, 4  ;;  %v1203_v17 = vshrl.u32 %v1004_v41, 16  ;;  %v1206_v46 = vshll.u32 %v1004_v41, 16  ;;  %v1016_v47 = vld [vmem:[#allocation2 + $0x84] sm:$0xf] }
  0xb8   : > { %v1296_v18 = vrot.slane %v1294_v53, 5  ;;  %v1299_v48 = vshrl.u32 %v1016_v47, 16  ;;  %v1302_v33 = vshll.u32 %v1016_v47, 16  ;;  %v681_v49 = vsel %vm9767_vm15, %v673_v42, %v680_v63  ;;  %861 = vst [vmem:[#allocation2 + $0x68] sm:$0x1] %v860_v12 }
  0xb9   : > { %v1291_v51 = vor.u32 %v1290_v10, %v10038_v45  ;;  %v1205_v54 = vrot.slane %v1203_v17, 4  ;;  %v1208_v55 = vrot.slane %v1206_v46, 5  ;;  %886 = vst.msk [vmem:[#allocation2 + $0x94] sm:$0xf] %vm14228_vm10, %v681_v49  ;;  %v1242_v59 = vrot.slane %v1240_v34, 4 }
  0xba   : > { %v1301_v58 = vrot.slane %v1299_v48, 4  ;;  %v1304_v52 = vrot.slane %v1302_v33, 5  ;;  %885 = vst [vmem:[#allocation2 + $0x90] sm:$0xf] %v884_v56  ;;  %v682_v60 = vrot.slane %v677_v27, 4  ;;  %v10047_v1 = vpack.c.bf16 %v436_v44, %v436_v44 }
  0xbb   : > { %v1292_v61 = vrot.slane %v1291_v51, 4  ;;  %v1209_v62 = vor.u32 %v1208_v55, %v1205_v54  ;;  %v469_v7 = vpack.c.bf16 %v437_v50, %v437_v50  ;;  %v10049_v3 = vld [vmem:[#allocation2 + $0x88] sm:$0xf]  ;;  %v1243_v24 = vor.u32 %v1242_v59, %v9997_v32  ;;  %v894_v44 = vld [vmem:[#allocation2 + $0xa4] sm:$0x1] }
  0xbc   : > { %v1305_v4 = vor.u32 %v1304_v52, %v1301_v58  ;;  %v888_v8 = vsel %vm9783_vm1, %v682_v60, %v887_v57  ;;  %v636_v13 = vshll.u32 %v9928_v2, 16  ;;  %v1308_v21 = vshll.u32 %v10049_v3, 16  ;;  %v441_v58 = vld [vmem:[%s9561_s28 + $0xe8] sm:$0xff] }
  0xbd   : > { %v1297_v15 = vsel %vm9761_vm14, %v1292_v61, %v1296_v18  ;;  %v1210_v20 = vrot.slane %v1209_v62, 4  ;;  %889 = vst [vmem:[#allocation2 + $0x98] sm:$0x1] %v888_v8  ;;  %v684_v23 = vshrl.u32 %v10047_v1, 16  ;;  %v1244_v32 = vrot.slane %v1243_v24, 4  ;;  %v440_v18 = vld [vmem:[%s9561_s28 + $0xe0] sm:$0xff] }
  0xbe   : > { %1460 = vrot.lane.b32.xlu0 %v1297_v15, %s9495_s8  ;;  %v1306_v26 = vrot.slane %v1305_v4, 4  ;;  %v692_v27 = vshrl.u32 %v469_v7, 16  ;;  %v695_v28 = vshll.u32 %v469_v7, 16  ;;  %v10065_v29 = vrot.slane %v1308_v21, 5  ;;  %v897_v24 = vld [vmem:[#allocation2 + $0xa8] sm:$0xf] }
  0xbf   : > { %v1215_v2 = vsel %vm9761_vm14, %v1210_v20, %v9956_v37  ;;  %v1009_v31 = vld [vmem:[#allocation2 + $0x68] sm:$0x1]  ;;  %v10067_v16 = vrot.slane %v684_v23, 7  ;;  %v638_v43 = vor.u32 %v636_v13, %v9992_v22  ;;  %v470_v36 = vpack.c.bf16 %v438_v14, %v438_v14  ;;  %v880_v21 = vld [vmem:[#allocation2 + $0x8c] sm:$0x1] }
  0xc0   : > { %1446 = vrot.lane.b32.xlu2 %v1215_v2, %s9495_s8  ;;  %v1020_v39 = vld [vmem:[#allocation2 + $0x94] sm:$0xf]  ;;  %v1246_v9 = vshll.u32 %v1009_v31, 16  ;;  %v694_v34 = vrot.slane %v692_v27, 7  ;;  %v471_v30 = vpack.c.bf16 %v439_v25, %v439_v25  ;;  %v1311_v37 = vsel %vm9761_vm14, %v1306_v26, %v10065_v29 }
  0xc1   : > { %v1019_v38 = vld [vmem:[#allocation2 + $0x90] sm:$0xf]  ;;  %v1332_v40 = vshll.u32 %v1020_v39, 16  ;;  %v1336_v53 = vshrl.u32 %v1020_v39, 16  ;;  %v690_v41 = vrot.slane %v10067_v16, 4  ;;  %1462 = vrot.lane.b32.xlu1 %v1311_v37, %s9495_s8  ;;  %v870_v47 = vsel %vm9773_vm0, %v638_v43, %v869_v35 }
  0xc2   : > { %v1323_v22 = vshrl.u32 %v1019_v38, 16  ;;  %v1326_v42 = vshll.u32 %v1019_v38, 16  ;;  %v1248_v63 = vrot.slane %v1246_v9, 5  ;;  %v697_v12 = vor.u32 %v695_v28, %v694_v34  ;;  %871 = vst [vmem:[#allocation2 + $0x78] sm:$0xf] %v870_v47 }
  0xc3   : > { %v1334_v10 = vrot.slane %v1332_v40, 5  ;;  %v1338_v17 = vrot.slane %v1336_v53, 4  ;;  %v699_v46 = vrot.slane %v694_v34, 4  ;;  %v701_v57 = vshrl.u32 %v470_v36, 16  ;;  %v904_v34 = vld [vmem:[#allocation2 + $0xb4] sm:$0xf] }
  0xc4   : > { %v1325_v48 = vrot.slane %v1323_v22, 4  ;;  %v1328_v33 = vrot.slane %v1326_v42, 5  ;;  %v1249_v49 = vsel %vm9761_vm14, %v1244_v32, %v1248_v63  ;;  %v1021_v50 = vld [vmem:[#allocation2 + $0x98] sm:$0x1]  ;;  %v698_v51 = vsel %vm9767_vm15, %v690_v41, %v697_v12 }
  0xc5   : > { %v1339_v54 = vor.u32 %v1338_v17, %v1334_v10  ;;  %v1342_v55 = vshll.u32 %v1021_v50, 16  ;;  %893 = vst.msk [vmem:[#allocation2 + $0xa0] sm:$0xf] %vm14228_vm10, %v698_v51  ;;  %v895_v56 = vsel %vm9783_vm1, %v699_v46, %v894_v44  ;;  %v704_v59 = vshll.u32 %v470_v36, 16 }
  0xc6   : > { %v1329_v52 = vor.u32 %v1328_v33, %v1325_v48  ;;  %896 = vst [vmem:[#allocation2 + $0xa4] sm:$0x1] %v895_v56  ;;  %v709_v60 = vshrl.u32 %v471_v30, 16  ;;  %v712_v61 = vshll.u32 %v471_v30, 16  ;;  %v703_v4 = vrot.slane %v701_v57, 7 }
  0xc7   : > { %v1340_v62 = vrot.slane %v1339_v54, 4  ;;  %v1344_v7 = vrot.slane %v1342_v55, 5  ;;  %v472_v8 = vpack.c.bf16 %v440_v18, %v440_v18  ;;  %v473_v15 = vpack.c.bf16 %v441_v58, %v441_v58  ;;  %v908_v33 = vld [vmem:[#allocation2 + $0xbc] sm:$0x1] }
  0xc8   : > { %v1330_v13 = vrot.slane %v1329_v52, 4  ;;  %1452 = vrot.lane.b32.xlu2 %v1249_v49, %s9495_s8  ;;  %v10088_v14 = vrot.slane %v709_v60, 7  ;;  %v665_v20 = vrot.slane %v10018_v5, 4  ;;  %v706_v25 = vor.u32 %v704_v59, %v703_v4 }
  0xc9   : > { %v1345_v23 = vsel %vm9761_vm14, %v1340_v62, %v1344_v7  ;;  %v707_v26 = vrot.slane %v703_v4, 4  ;;  %v718_v32 = vshrl.u32 %v472_v8, 16  ;;  %v721_v2 = vshll.u32 %v472_v8, 16  ;;  %v1013_v43 = vld [vmem:[#allocation2 + $0x78] sm:$0xf] }
  0xca   : > { %v1335_v27 = vsel %vm9761_vm14, %v1330_v13, %v1334_v10  ;;  %1468 = vrot.lane.b32.xlu1 %v1345_v23, %s9495_s8  ;;  %v714_v28 = vor.u32 %v712_v61, %v10088_v14  ;;  %v726_v31 = vshrl.u32 %v473_v15, 16  ;;  %v898_v5 = vsel %vm9773_vm0, %v706_v25, %v897_v24  ;;  %v890_v61 = vld [vmem:[#allocation2 + $0x9c] sm:$0xf] }
  0xcb   : > { %1466 = vrot.lane.b32.xlu0 %v1335_v27, %s9495_s8  ;;  %v720_v39 = vrot.slane %v718_v32, 7  ;;  %v729_v9 = vshll.u32 %v473_v15, 16  ;;  %v881_v35 = vsel %vm9783_vm1, %v665_v20, %v880_v21  ;;  %v1275_v30 = vshrl.u32 %v1013_v43, 16  ;;  %899 = vst [vmem:[#allocation2 + $0xa8] sm:$0xf] %v898_v5 }
  0xcc   : > { %v1023_v36 = vld [vmem:[#allocation2 + $0xa0] sm:$0xf]  ;;  %v1278_v37 = vshll.u32 %v1013_v43, 16  ;;  %v715_v38 = vsel %vm9767_vm15, %v707_v26, %v714_v28  ;;  %882 = vst [vmem:[#allocation2 + $0x8c] sm:$0x1] %v881_v35  ;;  %v728_v46 = vrot.slane %v726_v31, 7 }
  0xcd   : > { %v1024_v40 = vld [vmem:[#allocation2 + $0xa4] sm:$0x1]  ;;  %v1356_v53 = vshll.u32 %v1023_v36, 16  ;;  %v1360_v41 = vshrl.u32 %v1023_v36, 16  ;;  %900 = vst.msk [vmem:[#allocation2 + $0xac] sm:$0xf] %vm14228_vm10, %v715_v38  ;;  %v723_v22 = vor.u32 %v721_v2, %v720_v39 }
  0xce   : > { %v1366_v42 = vshll.u32 %v1024_v40, 16  ;;  %v1277_v63 = vrot.slane %v1275_v30, 4  ;;  %v1280_v12 = vrot.slane %v1278_v37, 5  ;;  %v724_v44 = vrot.slane %v720_v39, 4  ;;  %v901_v32 = vld [vmem:[#allocation2 + $0xb0] sm:$0x1] }
  0xcf   : > { %v10105_v10 = vrot.slane %v1356_v53, 5  ;;  %v1362_v17 = vrot.slane %v1360_v41, 4  ;;  %v905_v47 = vsel %vm9773_vm0, %v723_v22, %v904_v34  ;;  %v1312_v48 = vshrl.u32 %v10049_v3, 16  ;;  %v10136_v34 = vld [vmem:[#allocation2 + $0x4] sm:$0xf] }
  0xd0   : > { %v1281_v18 = vor.u32 %v1280_v12, %v1277_v63  ;;  %906 = vst [vmem:[#allocation2 + $0xb4] sm:$0xf] %v905_v47  ;;  %v1368_v50 = vrot.slane %v1366_v42, 5  ;;  %v731_v51 = vor.u32 %v729_v9, %v728_v46  ;;  %v733_v54 = vrot.slane %v728_v46, 4  ;;  %v1549_v12 = vld [vmem:[#allocation2 + $0x8] sm:$0x1] }
  0xd1   : > { %v1363_v49 = vor.u32 %v1362_v17, %v10105_v10  ;;  %v1314_v56 = vrot.slane %v1312_v48, 4  ;;  %v687_v60 = vshll.u32 %v10047_v1, 16  ;;  %v1648_v41 = vrot.slane %v10136_v34, 5  ;;  %v927_v34 = vld [vmem:[#allocation2 + $0x30] sm:$0xf] }
  0xd2   : > { %v1282_v55 = vrot.slane %v1281_v18, 4  ;;  %v1025_v58 = vld [vmem:[#allocation2 + $0xa8] sm:$0xf]  ;;  %v732_v52 = vsel %vm9767_vm15, %v724_v44, %v731_v51  ;;  %v909_v59 = vsel %vm9783_vm1, %v733_v54, %v908_v33  ;;  %vm1643_vm2 = vcmask 1042432   ;;  %v1550_v51 = vld [vmem:[#allocation2 + $0xc] sm:$0xe] }
  0xd3   : > { %v1364_v57 = vrot.slane %v1363_v49, 4  ;;  %v1371_v7 = vshrl.u32 %v1025_v58, 16  ;;  %v1374_v4 = vshll.u32 %v1025_v58, 16  ;;  %907 = vst.msk [vmem:[#allocation2 + $0xb8] sm:$0xf] %vm14228_vm10, %v732_v52  ;;  %v1315_v24 = vor.u32 %v1314_v56, %v10065_v29 }
  0xd4   : > { %v1287_v3 = vsel %vm9761_vm14, %v1282_v55, %v10038_v45  ;;  %v10119_v62 = vld [vmem:[#allocation2 + $0xac] sm:$0xf]  ;;  %910 = vst [vmem:[#allocation2 + $0xbc] sm:$0x1] %v909_v59  ;;  %v689_v15 = vor.u32 %v687_v60, %v10067_v16  ;;  %v716_v16 = vrot.slane %v10088_v14, 4  ;;  %vm1644_vm3 = vcmask 1046532  }
  0xd5   : > { %v1369_v8 = vsel %vm9761_vm14, %v1364_v57, %v1368_v50  ;;  %1458 = vrot.lane.b32.xlu2 %v1287_v3, %s9495_s8  ;;  %v1380_v1 = vshll.u32 %v10119_v62, 16  ;;  %v1018_v13 = vld [vmem:[#allocation2 + $0x8c] sm:$0x1]  ;;  %v1373_v45 = vrot.slane %v1371_v7, 4  ;;  %v1376_v20 = vrot.slane %v1374_v4, 5  ;;  %vm10152_vm4 = vmor %vm1643_vm2, %vm1644_vm3 }
  0xd6   : > { %1472 = vrot.lane.b32.xlu0 %v1369_v8, %s9495_s8  ;;  %v1316_v21 = vrot.slane %v1315_v24, 4  ;;  %v1318_v23 = vshll.u32 %v1018_v13, 16  ;;  %v891_v26 = vsel %vm9773_vm0, %v689_v15, %v890_v61  ;;  %v902_v36 = vsel %vm9783_vm1, %v716_v16, %v901_v32  ;;  %v919_v54 = vld [vmem:[#allocation2] sm:$0xf]  ;;  %v10157_v59 = vld [vmem:[#allocation2 + $0x10] sm:$0xf] }
  0xd7   : > { %v10129_v25 = vrot.slane %v1380_v1, 5  ;;  %v1028_v29 = vld [vmem:[#allocation2 + $0xb4] sm:$0xf]  ;;  %v1377_v27 = vor.u32 %v1376_v20, %v1373_v45  ;;  %892 = vst [vmem:[#allocation2 + $0x9c] sm:$0xf] %v891_v26  ;;  %v1384_v44 = vshrl.u32 %v10119_v62, 16 }
  0xd8   : > { %v1395_v28 = vshrl.u32 %v1028_v29, 16  ;;  %v1398_v2 = vshll.u32 %v1028_v29, 16  ;;  %v1320_v31 = vrot.slane %v1318_v23, 5  ;;  %903 = vst [vmem:[#allocation2 + $0xb0] sm:$0x1] %v902_v36  ;;  %v1650_v49 = vrot.slane %v1648_v41, 4 }
  0xd9   : > { %v1378_v43 = vrot.slane %v1377_v27, 4  ;;  %v1651_v50 = vrot.slane %v1549_v12, 5  ;;  %v14260_v56 = vmov 0  ;;  %v1386_v52 = vrot.slane %v1384_v44, 4  ;;  %951 = vst.msk [vmem:[#allocation3] sm:$0xf] %vm14228_vm10, %v919_v54 }
  0xda   : > { %v1397_v5 = vrot.slane %v1395_v28, 4  ;;  %v1400_v39 = vrot.slane %v1398_v2, 5  ;;  %v1321_v9 = vsel %vm9761_vm14, %v1316_v21, %v1320_v31  ;;  %v1029_v35 = vld [vmem:[#allocation2 + $0xb8] sm:$0xf]  ;;  %v14261_v56 = vsel %vm10152_vm4, 4294967295, %v14260_v56 }
  0xdb   : > { %v1383_v30 = vsel %vm9761_vm14, %v1378_v43, %v10129_v25  ;;  %v1404_v38 = vshll.u32 %v1029_v35, 16  ;;  %v1030_v40 = vld [vmem:[#allocation2 + $0xbc] sm:$0x1]  ;;  %v1408_v14 = vshrl.u32 %v1029_v35, 16  ;;  %14262 = vst [vmem:[#allocation7_spill] sm:$0xff] %v14261_v56  ;;  %v1652_v7 = vsel %vm10152_vm4, %v1650_v49, %v1651_v50 }
  0xdc   : > { %v1401_v37 = vor.u32 %v1400_v39, %v1397_v5  ;;  %1474 = vrot.lane.b32.xlu1 %v1383_v30, %s9495_s8  ;;  %v1414_v53 = vshll.u32 %v1030_v40, 16  ;;  %v9015_v4 = vrot.slane %v1550_v51, 9  ;;  %v1553_v24 = vld [vmem:[#allocation2 + $0x18] sm:$0xe]  ;;  %v1554_v8 = vld [vmem:[#allocation2 + $0x1c] sm:$0xf]  ;;  %v1387_v15 = vor.u32 %v1386_v52, %v10129_v25 }
  0xdd   : > { %1464 = vrot.lane.b32.xlu2 %v1321_v9, %s9495_s8  ;;  %v1406_v42 = vrot.slane %v1404_v38, 5  ;;  %v1410_v63 = vrot.slane %v1408_v14, 4  ;;  %vm14227_vm5 = vcmask 126016   ;;  %v1655_v13 = vrot.slane %v10157_v59, 5  ;;  %v923_v29 = vld [vmem:[#allocation2 + $0x18] sm:$0xf] }
  0xde   : > { %v1402_v22 = vrot.slane %v1401_v37, 4  ;;  %v1416_v17 = vrot.slane %v1414_v53, 5  ;;  %v1022_v46 = vld [vmem:[#allocation2 + $0x9c] sm:$0xf]  ;;  %v1419_v61 = vpop.permute.xlu0 %1418  ;;  %v9016_v21 = vrot.slane %v1553_v24, 9  ;;  %v1662_v23 = vrot.slane %v1554_v8, 5 }
  0xdf   : > { %v1411_v18 = vor.u32 %v1410_v63, %v1406_v42  ;;  %v1347_v48 = vshrl.u32 %v1022_v46, 16  ;;  %v1350_v33 = vshll.u32 %v1022_v46, 16  ;;  %v1027_v60 = vld [vmem:[#allocation2 + $0xb0] sm:$0x1]  ;;  %1515 = vst.msk [vmem:[#allocation3] sm:$0xf] %vm14227_vm5, %v1419_v61  ;;  %v1656_v25 = vsel %vm10152_vm4, %v9015_v4, %v1655_v13 }
  0xe0   : > { %v1407_v47 = vsel %vm9761_vm14, %v1402_v22, %v1406_v42  ;;  %v1390_v45 = vshll.u32 %v1027_v60, 16  ;;  %v921_v26 = vld [vmem:[#allocation2 + $0xc] sm:$0xf]  ;;  %v1388_v32 = vrot.slane %v1387_v15, 4  ;;  %955 = vst.msk [vmem:[#allocation3 + $0x10] sm:$0xf] %vm14228_vm10, %v923_v29  ;;  %v1663_v16 = vsel %vm10152_vm4, %v9016_v21, %v1662_v23 }
  0xe1   : > { %1478 = vrot.lane.b32.xlu0 %v1407_v47, %s9495_s8  ;;  %v1412_v55 = vrot.slane %v1411_v18, 4  ;;  %v1349_v57 = vrot.slane %v1347_v48, 4  ;;  %v1352_v58 = vrot.slane %v1350_v33, 5  ;;  %v1555_v2 = vld [vmem:[#allocation2 + $0x20] sm:$0x1]  ;;  %v1664_v39 = vrot.slane %v1662_v23, 4 }
  0xe2   : > { %v1392_v27 = vrot.slane %v1390_v45, 5  ;;  %v10177_v31 = vld [vmem:[#allocation2 + $0x28] sm:$0xf]  ;;  %953 = vst.msk [vmem:[#allocation3 + $0x8] sm:$0xf] %vm14228_vm10, %v921_v26  ;;  %v1665_v9 = vrot.slane %v1555_v2, 5 }
  0xe3   : > { %v1417_v3 = vsel %vm9761_vm14, %v1412_v55, %v1416_v17  ;;  %v1353_v62 = vor.u32 %v1352_v58, %v1349_v57  ;;  %v1669_v35 = vrot.slane %v10177_v31, 5  ;;  %v1558_v36 = vld [vmem:[#allocation2 + $0x2c] sm:$0x1]  ;;  %v1547_v30 = vld [vmem:[#allocation2] sm:$0xe]  ;;  %v1657_v58 = vrot.slane %v1655_v13, 4 }
  0xe4   : > { %1480 = vrot.lane.b32.xlu1 %v1417_v3, %s9495_s8  ;;  %v1393_v5 = vsel %vm9761_vm14, %v1388_v32, %v1392_v27  ;;  %v1559_v37 = vld [vmem:[#allocation2 + $0x30] sm:$0xe]  ;;  %v924_v38 = vld [vmem:[#allocation2 + $0x1c] sm:$0xf]  ;;  %v1666_v14 = vsel %vm10152_vm4, %v1664_v39, %v1665_v9  ;;  %v1672_v22 = vrot.slane %v1558_v36, 5  ;;  %v9014_v42 = vrot.slane %v1547_v30, 9 }
  0xe5   : > { %v1354_v1 = vrot.slane %v1353_v62, 4  ;;  %v922_v40 = vld [vmem:[#allocation2 + $0x10] sm:$0xf]  ;;  %v1671_v53 = vrot.slane %v1669_v35, 4  ;;  %956 = vst.msk [vmem:[#allocation3 + $0x14] sm:$0xf] %vm14228_vm10, %v924_v38 }
  0xe6   : > { %v1427_v28 = vpop.permute.xlu2 %1426  ;;  %v1421_v43 = vpop.permute.xlu0 %1420  ;;  %v10196_v63 = vld [vmem:[#allocation2 + $0x34] sm:$0xf]  ;;  %954 = vst.msk [vmem:[#allocation3 + $0xc] sm:$0xf] %vm14228_vm10, %v922_v40  ;;  %v925_v44 = vld [vmem:[#allocation2 + $0x24] sm:$0xf]  ;;  %v1649_v18 = vsel %vm10152_vm4, %v9014_v42, %v1648_v41 }
  0xe7   : > { %v1359_v20 = vsel %vm9761_vm14, %v1354_v1, %v10105_v10  ;;  %v920_v10 = vld [vmem:[#allocation2 + $0x4] sm:$0xf]  ;;  %1519 = vst.msk [vmem:[#allocation3 + $0x10] sm:$0xf] %vm14227_vm5, %v1427_v28  ;;  %v1562_v46 = vld [vmem:[#allocation2 + $0x3c] sm:$0xe]  ;;  %v1673_v47 = vsel %vm10152_vm4, %v1671_v53, %v1672_v22 }
  0xe8   : > { %1470 = vrot.lane.b32.xlu2 %v1359_v20, %s9495_s8  ;;  %952 = vst.msk [vmem:[#allocation3 + $0x4] sm:$0xf] %vm14228_vm10, %v920_v10  ;;  %v9018_v48 = vrot.slane %v1559_v37, 9  ;;  %v1676_v33 = vrot.slane %v10196_v63, 5  ;;  %v1563_v49 = vld [vmem:[#allocation2 + $0x40] sm:$0xf] }
  0xe9   : > { %1760 = vrot.lane.b32.xlu0 %v1652_v7, %s9496_s9  ;;  %1516 = vst.msk [vmem:[#allocation3 + $0x4] sm:$0xf] %vm14227_vm5, %v1421_v43  ;;  %v1552_v50 = vld [vmem:[#allocation2 + $0x14] sm:$0x1]  ;;  %v9019_v54 = vrot.slane %v1562_v46, 9  ;;  %v1683_v55 = vrot.slane %v1563_v49, 5 }
  0xea   : > { %957 = vst.msk [vmem:[#allocation3 + $0x18] sm:$0xf] %vm14228_vm10, %v925_v44  ;;  %v926_v57 = vld [vmem:[#allocation2 + $0x28] sm:$0xf]  ;;  %v1677_v41 = vsel %vm10152_vm4, %v9018_v48, %v1676_v33  ;;  %v1658_v52 = vrot.slane %v1552_v50, 5  ;;  %vm14226_vm6 = vcmask 191616  }
  0xeb   : > { %959 = vst.msk [vmem:[#allocation3 + $0x20] sm:$0xf] %vm14228_vm10, %v927_v34  ;;  %v928_v60 = vld [vmem:[#allocation2 + $0x34] sm:$0xf]  ;;  %v1564_v61 = vld [vmem:[#allocation2 + $0x44] sm:$0x1]  ;;  %v1684_v7 = vsel %vm10152_vm4, %v9019_v54, %v1683_v55 }
  0xec   : > { %1762 = vrot.lane.b32.xlu1 %v1656_v25, %s9496_s9  ;;  %v10220_v3 = vld [vmem:[#allocation2 + $0x4c] sm:$0xf]  ;;  %958 = vst.msk [vmem:[#allocation3 + $0x1c] sm:$0xf] %vm14228_vm10, %v926_v57  ;;  %v1567_v4 = vld [vmem:[#allocation2 + $0x50] sm:$0x1]  ;;  %v1659_v59 = vsel %vm10152_vm4, %v1657_v58, %v1658_v52 }
  0xed   : > { %960 = vst.msk [vmem:[#allocation3 + $0x24] sm:$0xf] %vm14228_vm10, %v928_v60  ;;  %v1685_v24 = vrot.slane %v1683_v55, 4  ;;  %v1686_v8 = vrot.slane %v1564_v61, 5  ;;  %v1690_v1 = vrot.slane %v10220_v3, 5  ;;  %v1693_v45 = vrot.slane %v1567_v4, 5 }
  0xee   : > { %v1556_v13 = vld [vmem:[#allocation2 + $0x24] sm:$0xe]  ;;  %v930_v21 = vld [vmem:[#allocation2 + $0x40] sm:$0xf]  ;;  %v929_v23 = vld [vmem:[#allocation2 + $0x3c] sm:$0xf] }
  0xef   : > { %v1687_v29 = vsel %vm10152_vm4, %v1685_v24, %v1686_v8  ;;  %v1692_v26 = vrot.slane %v1690_v1, 4  ;;  %v9017_v25 = vrot.slane %v1556_v13, 9  ;;  %962 = vst.msk [vmem:[#allocation3 + $0x2c] sm:$0xf] %vm14228_vm10, %v930_v21  ;;  %v931_v32 = vld [vmem:[#allocation2 + $0x48] sm:$0xf] }
  0xf0   : > { %1476 = vrot.lane.b32.xlu2 %v1393_v5, %s9495_s8  ;;  %v1568_v27 = vld [vmem:[#allocation2 + $0x54] sm:$0xe]  ;;  %v10240_v28 = vld [vmem:[#allocation2 + $0x58] sm:$0xf]  ;;  %961 = vst.msk [vmem:[#allocation3 + $0x28] sm:$0xf] %vm14228_vm10, %v929_v23 }
  0xf1   : > { %1766 = vrot.lane.b32.xlu0 %v1663_v16, %s9496_s9  ;;  %963 = vst.msk [vmem:[#allocation3 + $0x30] sm:$0xf] %vm14228_vm10, %v931_v32  ;;  %v1694_v2 = vsel %vm10152_vm4, %v1692_v26, %v1693_v45  ;;  %v1670_v16 = vsel %vm10152_vm4, %v9017_v25, %v1669_v35  ;;  %v9021_v43 = vrot.slane %v1568_v27, 9  ;;  %v1697_v5 = vrot.slane %v10240_v28, 5  ;;  %v1571_v39 = vld [vmem:[#allocation2 + $0x60] sm:$0xe] }
  0xf2   : > { %v1423_v12 = vpop.permute.xlu1 %1422  ;;  %v1572_v9 = vld [vmem:[#allocation2 + $0x64] sm:$0xf]  ;;  %v1561_v36 = vld [vmem:[#allocation2 + $0x38] sm:$0x1]  ;;  %v9022_v30 = vrot.slane %v1571_v39, 9  ;;  %v1678_v35 = vrot.slane %v1676_v33, 4 }
  0xf3   : > { %1517 = vst.msk [vmem:[#allocation3 + $0x8] sm:$0xf] %vm14227_vm5, %v1423_v12  ;;  %v1429_v17 = vpop.permute.xlu2 %1428  ;;  %v1704_v37 = vrot.slane %v1572_v9, 5  ;;  %v933_v38 = vld [vmem:[#allocation2 + $0x54] sm:$0xf]  ;;  %v1698_v31 = vsel %vm10152_vm4, %v9021_v43, %v1697_v5  ;;  %vm14225_vm7 = vcmask 257216  }
  0xf4   : > { %1768 = vrot.lane.b32.xlu1 %v1666_v14, %s9496_s9  ;;  %1520 = vst.msk [vmem:[#allocation3 + $0x14] sm:$0xf] %vm14227_vm5, %v1429_v17  ;;  %v932_v40 = vld [vmem:[#allocation2 + $0x4c] sm:$0xf]  ;;  %v1679_v14 = vrot.slane %v1561_v36, 5  ;;  %vm14224_vm8 = vcmask 322816  }
  0xf5   : > { %965 = vst.msk [vmem:[#allocation3 + $0x38] sm:$0xf] %vm14228_vm10, %v933_v38  ;;  %v934_v53 = vld [vmem:[#allocation2 + $0x58] sm:$0xf]  ;;  %v1573_v22 = vld [vmem:[#allocation2 + $0x68] sm:$0x1]  ;;  %v1705_v44 = vsel %vm10152_vm4, %v9022_v30, %v1704_v37 }
  0xf6   : > { %v10262_v42 = vld [vmem:[#allocation2 + $0x70] sm:$0xf]  ;;  %964 = vst.msk [vmem:[#allocation3 + $0x34] sm:$0xf] %vm14228_vm10, %v932_v40  ;;  %v1576_v17 = vld [vmem:[#allocation2 + $0x74] sm:$0x1]  ;;  %v1680_v46 = vsel %vm10152_vm4, %v1678_v35, %v1679_v14 }
  0xf7   : > { %v1431_v51 = vpop.permute.xlu0 %1430  ;;  %966 = vst.msk [vmem:[#allocation3 + $0x3c] sm:$0xf] %vm14228_vm10, %v934_v53  ;;  %v1711_v48 = vrot.slane %v10262_v42, 5  ;;  %v1565_v33 = vld [vmem:[#allocation2 + $0x48] sm:$0xe]  ;;  %v1714_v49 = vrot.slane %v1576_v17, 5 }
  0xf8   : > { %1521 = vst.msk [vmem:[#allocation3 + $0x18] sm:$0xf] %vm14227_vm5, %v1431_v51  ;;  %1758 = vrot.lane.b32.xlu2 %v1649_v18, %s9496_s9  ;;  %v1707_v18 = vrot.slane %v1573_v22, 5  ;;  %v936_v51 = vld [vmem:[#allocation2 + $0x64] sm:$0xf]  ;;  %v9020_v57 = vrot.slane %v1565_v33, 9 }
  0xf9   : > { %1772 = vrot.lane.b32.xlu0 %v1673_v47, %s9496_s9  ;;  %v1706_v47 = vrot.slane %v1704_v37, 4  ;;  %v935_v54 = vld [vmem:[#allocation2 + $0x60] sm:$0xf]  ;;  %v1713_v34 = vrot.slane %v1711_v48, 4  ;;  %968 = vst.msk [vmem:[#allocation3 + $0x44] sm:$0xf] %vm14228_vm10, %v936_v51 }
  0xfa   : > { %v1425_v62 = vpop.permute.xlu1 %1424  ;;  %v1577_v58 = vld [vmem:[#allocation2 + $0x78] sm:$0xe]  ;;  %v10282_v52 = vld [vmem:[#allocation2 + $0x7c] sm:$0xf]  ;;  %967 = vst.msk [vmem:[#allocation3 + $0x40] sm:$0xf] %vm14228_vm10, %v935_v54  ;;  %v1691_v4 = vsel %vm10152_vm4, %v9020_v57, %v1690_v1 }
  0xfb   : > { %1518 = vst.msk [vmem:[#allocation3 + $0xc] sm:$0xf] %vm14227_vm5, %v1425_v62  ;;  %v1708_v55 = vsel %vm10152_vm4, %v1706_v47, %v1707_v18  ;;  %v1580_v61 = vld [vmem:[#allocation2 + $0x84] sm:$0xe]  ;;  %v1581_v62 = vld [vmem:[#allocation2 + $0x88] sm:$0xf] }
  0xfc   : > { %1774 = vrot.lane.b32.xlu1 %v1677_v41, %s9496_s9  ;;  %v937_v41 = vld [vmem:[#allocation2 + $0x6c] sm:$0xf]  ;;  %v1718_v24 = vrot.slane %v10282_v52, 5  ;;  %v1570_v8 = vld [vmem:[#allocation2 + $0x5c] sm:$0x1]  ;;  %v9025_v13 = vrot.slane %v1580_v61, 9 }
  0xfd   : > { %969 = vst.msk [vmem:[#allocation3 + $0x48] sm:$0xf] %vm14228_vm10, %v937_v41  ;;  %v938_v21 = vld [vmem:[#allocation2 + $0x70] sm:$0xf]  ;;  %v1699_v1 = vrot.slane %v1697_v5, 4  ;;  %v1700_v23 = vrot.slane %v1570_v8, 5 }
  0xfe   : > { %v940_v26 = vld [vmem:[#allocation2 + $0x7c] sm:$0xf]  ;;  %v1582_v25 = vld [vmem:[#allocation2 + $0x8c] sm:$0x1]  ;;  %v10305_v32 = vld [vmem:[#allocation2 + $0x94] sm:$0xf] }
  0xff   : > { %v1435_v15 = vpop.permute.xlu2 %1434  ;;  %v1437_v20 = vpop.permute.xlu0 %1436  ;;  %970 = vst.msk [vmem:[#allocation3 + $0x4c] sm:$0xf] %vm14228_vm10, %v938_v21  ;;  %v1701_v28 = vsel %vm10152_vm4, %v1699_v1, %v1700_v23  ;;  %v1732_v43 = vrot.slane %v10305_v32, 5  ;;  %v1574_v39 = vld [vmem:[#allocation2 + $0x6c] sm:$0xe]  ;;  %v1720_v54 = vrot.slane %v1718_v24, 4 }
 0x100   : > { %1523 = vst.msk [vmem:[#allocation3 + $0x20] sm:$0xf] %vm14227_vm5, %v1435_v15  ;;  %1764 = vrot.lane.b32.xlu2 %v1659_v59, %s9496_s9  ;;  %v9024_v59 = vrot.slane %v1577_v58, 9  ;;  %v1725_v15 = vrot.slane %v1581_v62, 5  ;;  %v942_v36 = vld [vmem:[#allocation2 + $0x88] sm:$0xf] }
 0x101   : > { %1778 = vrot.lane.b32.xlu0 %v1684_v7, %s9496_s9  ;;  %1524 = vst.msk [vmem:[#allocation3 + $0x24] sm:$0xf] %vm14227_vm5, %v1437_v20  ;;  %v1715_v7 = vsel %vm10152_vm4, %v1713_v34, %v1714_v49  ;;  %v939_v20 = vld [vmem:[#allocation2 + $0x78] sm:$0xf]  ;;  %v941_v30 = vld [vmem:[#allocation2 + $0x84] sm:$0xf] }
 0x102   : > { %v1433_v10 = vpop.permute.xlu1 %1432  ;;  %v1719_v3 = vsel %vm10152_vm4, %v9024_v59, %v1718_v24  ;;  %971 = vst.msk [vmem:[#allocation3 + $0x50] sm:$0xf] %vm14228_vm10, %v939_v20  ;;  %v1726_v27 = vsel %vm10152_vm4, %v9025_v13, %v1725_v15  ;;  %v1734_v38 = vrot.slane %v1732_v43, 4  ;;  %v9023_v40 = vrot.slane %v1574_v39, 9  ;;  %v943_v35 = vld [vmem:[#allocation2 + $0x90] sm:$0xf] }
 0x103   : > { %1522 = vst.msk [vmem:[#allocation3 + $0x1c] sm:$0xf] %vm14227_vm5, %v1433_v10  ;;  %v1727_v10 = vrot.slane %v1725_v15, 4  ;;  %v1586_v14 = vld [vmem:[#allocation2 + $0x9c] sm:$0xe]  ;;  %vm14223_vm9 = vcmask 388416  }
 0x104   : > { %1780 = vrot.lane.b32.xlu1 %v1687_v29, %s9496_s9  ;;  %972 = vst.msk [vmem:[#allocation3 + $0x54] sm:$0xf] %vm14228_vm10, %v940_v26  ;;  %v10324_v53 = vld [vmem:[#allocation2 + $0xa0] sm:$0xf]  ;;  %v1589_v22 = vld [vmem:[#allocation2 + $0xa8] sm:$0xe]  ;;  %v1712_v17 = vsel %vm10152_vm4, %v9023_v40, %v1711_v48 }
 0x105   : > { %974 = vst.msk [vmem:[#allocation3 + $0x5c] sm:$0xf] %vm14228_vm10, %v942_v36  ;;  %v1579_v18 = vld [vmem:[#allocation2 + $0x80] sm:$0x1]  ;;  %v9028_v33 = vrot.slane %v1589_v22, 9  ;;  %vm14221_vm11 = vcmask 454016  }
 0x106   : > { %973 = vst.msk [vmem:[#allocation3 + $0x58] sm:$0xf] %vm14228_vm10, %v941_v30  ;;  %v945_v42 = vld [vmem:[#allocation2 + $0x9c] sm:$0xf]  ;;  %v944_v51 = vld [vmem:[#allocation2 + $0x94] sm:$0xf] }
 0x107   : > { %975 = vst.msk [vmem:[#allocation3 + $0x60] sm:$0xf] %vm14228_vm10, %v943_v35  ;;  %v946_v34 = vld [vmem:[#allocation2 + $0xa0] sm:$0xf]  ;;  %v1591_v57 = vld [vmem:[#allocation2 + $0xb0] sm:$0x1] }
 0x108   : > { %1770 = vrot.lane.b32.xlu2 %v1670_v16, %s9496_s9  ;;  %v1585_v16 = vld [vmem:[#allocation2 + $0x98] sm:$0x1]  ;;  %977 = vst.msk [vmem:[#allocation3 + $0x68] sm:$0xf] %vm14228_vm10, %v945_v42  ;;  %v1749_v62 = vrot.slane %v1591_v57, 5  ;;  %vm14222_vm12 = vcmask 1043456  }
 0x109   : > { %1784 = vrot.lane.b32.xlu0 %v1694_v2, %s9496_s9  ;;  %v1728_v2 = vrot.slane %v1582_v25, 5  ;;  %v1735_v9 = vrot.slane %v1585_v16, 5  ;;  %v1593_v41 = vld [vmem:[#allocation2 + $0xb8] sm:$0xf]  ;;  %976 = vst.msk [vmem:[#allocation3 + $0x64] sm:$0xf] %vm14228_vm10, %v944_v51 }
 0x10a   : > { %v1439_v12 = vpop.permute.xlu1 %1438  ;;  %978 = vst.msk [vmem:[#allocation3 + $0x6c] sm:$0xf] %vm14228_vm10, %v946_v34  ;;  %v1583_v59 = vld [vmem:[#allocation2 + $0x90] sm:$0xe]  ;;  %v948_v13 = vld [vmem:[#allocation2 + $0xac] sm:$0xf] }
 0x10b   : > { %1525 = vst.msk [vmem:[#allocation3 + $0x28] sm:$0xf] %vm14227_vm5, %v1439_v12  ;;  %v1729_v37 = vsel %vm10152_vm4, %v1727_v10, %v1728_v2  ;;  %v1590_v12 = vld [vmem:[#allocation2 + $0xac] sm:$0xf]  ;;  %v947_v15 = vld [vmem:[#allocation2 + $0xa8] sm:$0xf] }
 0x10c   : > { %1786 = vrot.lane.b32.xlu1 %v1698_v31, %s9496_s9  ;;  %v1746_v49 = vrot.slane %v1590_v12, 5  ;;  %v9026_v21 = vrot.slane %v1583_v59, 9  ;;  %980 = vst.msk [vmem:[#allocation3 + $0x74] sm:$0xf] %vm14228_vm10, %v948_v13  ;;  %v1588_v25 = vld [vmem:[#allocation2 + $0xa4] sm:$0x1] }
 0x10d   : > { %v1441_v63 = vpop.permute.xlu2 %1440  ;;  %979 = vst.msk [vmem:[#allocation3 + $0x70] sm:$0xf] %vm14228_vm10, %v947_v15  ;;  %v1742_v2 = vrot.slane %v1588_v25, 5  ;;  %v1592_v39 = vld [vmem:[#allocation2 + $0xb4] sm:$0xe]  ;;  %vm14220_vm13 = vcmask 519616  }
 0x10e   : > { %1526 = vst.msk [vmem:[#allocation3 + $0x2c] sm:$0xf] %vm14227_vm5, %v1441_v63  ;;  %v9027_v63 = vrot.slane %v1586_v14, 9  ;;  %v1747_v58 = vsel %vm10152_vm4, %v9028_v33, %v1746_v49  ;;  %v1748_v61 = vrot.slane %v1746_v49, 4  ;;  %v9029_v36 = vrot.slane %v1592_v39, 9  ;;  %v442_v51 = vld [vmem:[%s9561_s28 + $0xf0] sm:$0xff] }
 0x10f   : > { %v1895_v14 = vld [vmem:[#allocation2 + $0x3c] sm:$0xf]  ;;  %v1896_v12 = vld [vmem:[#allocation2 + $0x40] sm:$0xf]  ;;  %v1894_v42 = vld [vmem:[#allocation2 + $0x34] sm:$0xf] }
 0x110   : > { %v1443_v50 = vpop.permute.xlu0 %1442  ;;  %1776 = vrot.lane.b32.xlu2 %v1680_v46, %s9496_s9  ;;  %v1739_v46 = vrot.slane %v10324_v53, 5  ;;  %v1888_v53 = vld [vmem:[#allocation2 + $0x10] sm:$0xf]  ;;  %v1902_v34 = vld [vmem:[#allocation2 + $0x64] sm:$0xf]  ;;  %vm14219_vm2 = vcmask 585216  }
 0x111   : > { %1790 = vrot.lane.b32.xlu0 %v1705_v44, %s9496_s9  ;;  %1527 = vst.msk [vmem:[#allocation3 + $0x30] sm:$0xf] %vm14227_vm5, %v1443_v50  ;;  %v1736_v44 = vsel %vm10152_vm4, %v1734_v38, %v1735_v9  ;;  %v1890_v9 = vld [vmem:[#allocation2 + $0x1c] sm:$0xf]  ;;  %v1907_v15 = vld [vmem:[#allocation2 + $0x84] sm:$0xf] }
 0x112   : > { %v1740_v48 = vsel %vm10152_vm4, %v9027_v63, %v1739_v46  ;;  %v1741_v10 = vrot.slane %v1739_v46, 4  ;;  %v1898_v63 = vld [vmem:[#allocation2 + $0x4c] sm:$0xf]  ;;  %v1891_v46 = vld [vmem:[#allocation2 + $0x24] sm:$0xf]  ;;  %vm14217_vm3 = vcmask 588800  }
 0x113   : > { %v1445_v60 = vpop.permute.xlu1 %1444 }
 0x114   : > { %1528 = vst.msk [vmem:[#allocation3 + $0x34] sm:$0xf] %vm14227_vm5, %v1445_v60  ;;  %1792 = vrot.lane.b32.xlu1 %v1708_v55, %s9496_s9  ;;  %v1721_v55 = vrot.slane %v1579_v18, 5  ;;  %v1594_v60 = vld [vmem:[#allocation2 + $0xbc] sm:$0x1] }
 0x115   : > { %v1756_v24 = vrot.slane %v1594_v60, 5  ;;  %v1899_v18 = vld [vmem:[#allocation2 + $0x54] sm:$0xf] }
 0x116   : > { %v1722_v52 = vsel %vm10152_vm4, %v1720_v54, %v1721_v55  ;;  %v474_v54 = vpack.c.bf16 %v442_v51, %v442_v51  ;;  %v2082_v51 = vld [vmem:[#allocation2 + $0x14] sm:$0x1] }
 0x118   : > { %v1449_v45 = vpop.permute.xlu0 %1448  ;;  %1782 = vrot.lane.b32.xlu2 %v1691_v4, %s9496_s9  ;;  %v735_v55 = vshrl.u32 %v474_v54, 16  ;;  %v738_v60 = vshll.u32 %v474_v54, 16 }
 0x119   : > { %1796 = vrot.lane.b32.xlu0 %v1715_v7, %s9496_s9  ;;  %1530 = vst.msk [vmem:[#allocation3 + $0x3c] sm:$0xf] %vm14227_vm5, %v1449_v45  ;;  %v1753_v7 = vrot.slane %v1593_v41, 5  ;;  %v1750_v45 = vsel %vm10152_vm4, %v1748_v61, %v1749_v62  ;;  %v1904_v61 = vld [vmem:[#allocation2 + $0x70] sm:$0xf] }
 0x11a   : > { %v1447_v29 = vpop.permute.xlu2 %1446  ;;  %v1897_v62 = vld [vmem:[#allocation2 + $0x48] sm:$0xf] }
 0x11b   : > { %1529 = vst.msk [vmem:[#allocation3 + $0x38] sm:$0xf] %vm14227_vm5, %v1447_v29  ;;  %v1755_v20 = vrot.slane %v1753_v7, 4  ;;  %v1733_v29 = vsel %vm10152_vm4, %v9026_v21, %v1732_v43  ;;  %v1889_v43 = vld [vmem:[#allocation2 + $0x18] sm:$0xf]  ;;  %v1754_v38 = vsel %vm10152_vm4, %v9029_v36, %v1753_v7 }
 0x11c   : > { %1798 = vrot.lane.b32.xlu1 %v1719_v3, %s9496_s9  ;;  %v949_v3 = vld [vmem:[#allocation2 + $0xb4] sm:$0xf]  ;;  %v911_v7 = vld [vmem:[#allocation2 + $0xc0] sm:$0xf]  ;;  %v1908_v21 = vld [vmem:[#allocation2 + $0x88] sm:$0xf] }
 0x11d   : > { %v1451_v5 = vpop.permute.xlu1 %1450  ;;  %981 = vst.msk [vmem:[#allocation3 + $0x78] sm:$0xf] %vm14228_vm10, %v949_v3  ;;  %v1757_v23 = vsel %vm10152_vm4, %v1755_v20, %v1756_v24  ;;  %v1905_v24 = vld [vmem:[#allocation2 + $0x78] sm:$0xf] }
 0x11e   : > { %1531 = vst.msk [vmem:[#allocation3 + $0x40] sm:$0xf] %vm14227_vm5, %v1451_v5  ;;  %v1743_v5 = vsel %vm10152_vm4, %v1741_v10, %v1742_v2  ;;  %v1911_v2 = vld [vmem:[#allocation2 + $0x9c] sm:$0xf] }
 0x120   : > { %1788 = vrot.lane.b32.xlu2 %v1701_v28, %s9496_s9  ;;  %v1887_v28 = vld [vmem:[#allocation2 + $0xc] sm:$0xf] }
 0x121   : > { %1802 = vrot.lane.b32.xlu0 %v1726_v27, %s9496_s9  ;;  %v950_v27 = vld [vmem:[#allocation2 + $0xb8] sm:$0xf] }
 0x122   : > { %v1453_v31 = vpop.permute.xlu2 %1452  ;;  %982 = vst.msk [vmem:[#allocation3 + $0x7c] sm:$0xf] %vm14228_vm10, %v950_v27 }
 0x123   : > { %1532 = vst.msk [vmem:[#allocation3 + $0x44] sm:$0xf] %vm14227_vm5, %v1453_v31  ;;  %v1893_v31 = vld [vmem:[#allocation2 + $0x30] sm:$0xf] }
 0x124   : > { %1804 = vrot.lane.b32.xlu1 %v1729_v37, %s9496_s9  ;;  %v1892_v37 = vld [vmem:[#allocation2 + $0x28] sm:$0xf] }
 0x127   : > { %v1455_v47 = vpop.permute.xlu0 %1454 }
 0x128   : > { %1533 = vst.msk [vmem:[#allocation3 + $0x48] sm:$0xf] %vm14227_vm5, %v1455_v47  ;;  %v1457_v50 = vpop.permute.xlu1 %1456  ;;  %1794 = vrot.lane.b32.xlu2 %v1712_v17, %s9496_s9 }
 0x129   : > { %1808 = vrot.lane.b32.xlu0 %v1736_v44, %s9496_s9  ;;  %1534 = vst.msk [vmem:[#allocation3 + $0x4c] sm:$0xf] %vm14227_vm5, %v1457_v50  ;;  %v1901_v50 = vld [vmem:[#allocation2 + $0x60] sm:$0xf] }
 0x12c   : > { %1810 = vrot.lane.b32.xlu1 %v1740_v48, %s9496_s9 }
 0x12f   : > { %v1459_v4 = vpop.permute.xlu2 %1458 }
 0x130   : > { %1535 = vst.msk [vmem:[#allocation3 + $0x50] sm:$0xf] %vm14227_vm5, %v1459_v4  ;;  %v1461_v8 = vpop.permute.xlu0 %1460  ;;  %1800 = vrot.lane.b32.xlu2 %v1722_v52, %s9496_s9 }
 0x131   : > { %1814 = vrot.lane.b32.xlu0 %v1747_v58, %s9496_s9  ;;  %1536 = vst.msk [vmem:[#allocation3 + $0x54] sm:$0xf] %vm14227_vm5, %v1461_v8  ;;  %v737_v58 = vrot.slane %v735_v55, 7  ;;  %v2086_v55 = vld [vmem:[#allocation2 + $0x24] sm:$0xf] }
 0x133   : > { %v1463_v1 = vpop.permute.xlu1 %1462  ;;  %v740_v52 = vor.u32 %v738_v60, %v737_v58  ;;  %v741_v36 = vrot.slane %v737_v58, 4 }
 0x134   : > { %1816 = vrot.lane.b32.xlu1 %v1750_v45, %s9496_s9  ;;  %1537 = vst.msk [vmem:[#allocation3 + $0x58] sm:$0xf] %vm14227_vm5, %v1463_v1  ;;  %v1900_v45 = vld [vmem:[#allocation2 + $0x58] sm:$0xf] }
 0x135   : > { %v912_v59 = vsel %vm9773_vm0, %v740_v52, %v911_v7  ;;  %v2148_v52 = vshll.u32 %v2082_v51, 16  ;;  %v2180_v7 = vshll.u32 %v2086_v55, 16  ;;  %v2098_v51 = vld [vmem:[#allocation2 + $0x54] sm:$0xf] }
 0x136   : > { %913 = vst [vmem:[#allocation2 + $0xc0] sm:$0xf] %v912_v59 }
 0x137   : > { %v1465_v26 = vpop.permute.xlu2 %1464 }
 0x138   : > { %1538 = vst.msk [vmem:[#allocation3 + $0x5c] sm:$0xf] %vm14227_vm5, %v1465_v26  ;;  %1806 = vrot.lane.b32.xlu2 %v1733_v29, %s9496_s9  ;;  %v1903_v29 = vld [vmem:[#allocation2 + $0x6c] sm:$0xf]  ;;  %v443_v26 = vld [vmem:[%s9561_s28 + $0xf8] sm:$0xff] }
 0x139   : > { %1820 = vrot.lane.b32.xlu0 %v1757_v23, %s9496_s9  ;;  %v1910_v23 = vld [vmem:[#allocation2 + $0x94] sm:$0xf]  ;;  %v475_v27 = vpack.c.bf16 %v443_v26, %v443_v26 }
 0x13b   : > { %v743_v10 = vshrl.u32 %v475_v27, 16 }
 0x13c   : > { %v1469_v16 = vpop.permute.xlu1 %1468  ;;  %1951 = vrot.lane.b32.xlu1 %v1887_v28, %s9497_s10  ;;  %v2080_v28 = vld [vmem:[#allocation2 + $0xc] sm:$0xf] }
 0x13d   : > { %v1467_v32 = vpop.permute.xlu0 %1466  ;;  %1540 = vst.msk [vmem:[#allocation3 + $0x64] sm:$0xf] %vm14227_vm5, %v1469_v16  ;;  %v2129_v39 = vshrl.u32 %v2080_v28, 16 }
 0x13e   : > { %1539 = vst.msk [vmem:[#allocation3 + $0x60] sm:$0xf] %vm14227_vm5, %v1467_v32 }
 0x140   : > { %1812 = vrot.lane.b32.xlu2 %v1743_v5, %s9496_s9  ;;  %v746_v5 = vshll.u32 %v475_v27, 16  ;;  %v2090_v27 = vld [vmem:[#allocation2 + $0x34] sm:$0xf] }
 0x141   : > { %1955 = vrot.lane.b32.xlu0 %v1889_v43, %s9497_s10  ;;  %v10427_v43 = vrot.slane %v743_v10, 7 }
 0x142   : > { %v1471_v30 = vpop.permute.xlu2 %1470 }
 0x143   : > { %1541 = vst.msk [vmem:[#allocation3 + $0x68] sm:$0xf] %vm14227_vm5, %v1471_v30  ;;  %v748_v30 = vor.u32 %v746_v5, %v10427_v43 }
 0x144   : > { %1957 = vrot.lane.b32.xlu1 %v1890_v9, %s9497_s10  ;;  %v2132_v9 = vshll.u32 %v2080_v28, 16 }
 0x148   : > { %v1473_v40 = vpop.permute.xlu0 %1472  ;;  %1818 = vrot.lane.b32.xlu2 %v1754_v38, %s9496_s9  ;;  %v1906_v38 = vld [vmem:[#allocation2 + $0x7c] sm:$0xf] }
 0x149   : > { %1961 = vrot.lane.b32.xlu0 %v1892_v37, %s9497_s10  ;;  %1542 = vst.msk [vmem:[#allocation3 + $0x6c] sm:$0xf] %vm14227_vm5, %v1473_v40  ;;  %v1913_v37 = vld [vmem:[#allocation2 + $0xa8] sm:$0xf] }
 0x14a   : > { %v1477_v35 = vpop.permute.xlu2 %1476 }
 0x14b   : > { %1544 = vst.msk [vmem:[#allocation3 + $0x74] sm:$0xf] %vm14227_vm5, %v1477_v35  ;;  %v2081_v35 = vld [vmem:[#allocation2 + $0x10] sm:$0xf] }
 0x14c   : > { %1963 = vrot.lane.b32.xlu1 %v1893_v31, %s9497_s10  ;;  %v749_v31 = vsel %vm9767_vm15, %v741_v36, %v748_v30  ;;  %v2214_v36 = vshrl.u32 %v2090_v27, 16  ;;  %v2083_v30 = vld [vmem:[#allocation2 + $0x18] sm:$0xf] }
 0x14d   : > { %914 = vst.msk [vmem:[#allocation2 + $0xc4] sm:$0xf] %vm14228_vm10, %v749_v31 }
 0x14e   : > { %v1475_v22 = vpop.permute.xlu1 %1474 }
 0x14f   : > { %1543 = vst.msk [vmem:[#allocation3 + $0x70] sm:$0xf] %vm14227_vm5, %v1475_v22  ;;  %v2142_v22 = vshrl.u32 %v2081_v35, 16 }
 0x150   : > { %1953 = vrot.lane.b32.xlu2 %v1888_v53, %s9497_s10  ;;  %v2134_v53 = vrot.slane %v2132_v9, 5 }
 0x151   : > { %1967 = vrot.lane.b32.xlu0 %v1895_v14, %s9497_s10  ;;  %v2131_v14 = vrot.slane %v2129_v39, 4 }
 0x152   : > { %v1759_v17 = vpop.permute.xlu2 %1758 }
 0x153   : > { %v1479_v44 = vpop.permute.xlu0 %1478  ;;  %1855 = vst.msk [vmem:[#allocation3] sm:$0xf] %vm14226_vm6, %v1759_v17 }
 0x154   : > { %1545 = vst.msk [vmem:[#allocation3 + $0x78] sm:$0xf] %vm14227_vm5, %v1479_v44  ;;  %1969 = vrot.lane.b32.xlu1 %v1896_v12, %s9497_s10  ;;  %v2084_v12 = vld [vmem:[#allocation2 + $0x1c] sm:$0xf]  ;;  %v1914_v44 = vld [vmem:[#allocation2 + $0xac] sm:$0xf] }
 0x156   : > { %v1481_v47 = vpop.permute.xlu1 %1480 }
 0x157   : > { %1546 = vst.msk [vmem:[#allocation3 + $0x7c] sm:$0xf] %vm14227_vm5, %v1481_v47  ;;  %v2162_v47 = vshll.u32 %v2084_v12, 16 }
 0x158   : > { %1959 = vrot.lane.b32.xlu2 %v1891_v46, %s9497_s10  ;;  %v2138_v46 = vshll.u32 %v2081_v35, 16 }
 0x159   : > { %1973 = vrot.lane.b32.xlu0 %v1898_v63, %s9497_s10 }
 0x15a   : > { %v1765_v49 = vpop.permute.xlu2 %1764  ;;  %v2140_v54 = vrot.slane %v2138_v46, 5 }
 0x15b   : > { %v1761_v33 = vpop.permute.xlu0 %1760  ;;  %1858 = vst.msk [vmem:[#allocation3 + $0xc] sm:$0xf] %vm14226_vm6, %v1765_v49  ;;  %v2144_v49 = vrot.slane %v2142_v22, 4  ;;  %v2156_v22 = vshll.u32 %v2083_v30, 16 }
 0x15c   : > { %1856 = vst.msk [vmem:[#allocation3 + $0x4] sm:$0xf] %vm14226_vm6, %v1761_v33  ;;  %1975 = vrot.lane.b32.xlu1 %v1899_v18, %s9497_s10  ;;  %v2166_v18 = vshrl.u32 %v2084_v12, 16  ;;  %v2135_v33 = vor.u32 %v2134_v53, %v2131_v14  ;;  %v2153_v53 = vshrl.u32 %v2083_v30, 16  ;;  %v2095_v12 = vld [vmem:[#allocation2 + $0x48] sm:$0xf] }
 0x15d   : > { %v2145_v60 = vor.u32 %v2144_v49, %v2140_v54  ;;  %v2091_v49 = vld [vmem:[#allocation2 + $0x38] sm:$0x1] }
 0x15e   : > { %v1763_v48 = vpop.permute.xlu1 %1762  ;;  %v2136_v58 = vrot.slane %v2135_v33, 4 }
 0x15f   : > { %1857 = vst.msk [vmem:[#allocation3 + $0x8] sm:$0xf] %vm14226_vm6, %v1763_v48 }
 0x160   : > { %1965 = vrot.lane.b32.xlu2 %v1894_v42, %s9497_s10  ;;  %v1909_v42 = vld [vmem:[#allocation2 + $0x90] sm:$0xf] }
 0x161   : > { %1979 = vrot.lane.b32.xlu0 %v1901_v50, %s9497_s10  ;;  %v1916_v50 = vld [vmem:[#allocation2 + $0xb8] sm:$0xf] }
 0x162   : > { %v1771_v41 = vpop.permute.xlu2 %1770 }
 0x163   : > { %v1767_v57 = vpop.permute.xlu0 %1766  ;;  %1861 = vst.msk [vmem:[#allocation3 + $0x18] sm:$0xf] %vm14226_vm6, %v1771_v41  ;;  %v1917_v41 = vld [vmem:[#allocation2 + $0xc0] sm:$0xf] }
 0x164   : > { %1859 = vst.msk [vmem:[#allocation3 + $0x10] sm:$0xf] %vm14226_vm6, %v1767_v57  ;;  %1981 = vrot.lane.b32.xlu1 %v1902_v34, %s9497_s10  ;;  %v10443_v34 = vrot.slane %v2162_v47, 5  ;;  %v2168_v57 = vrot.slane %v2166_v18, 4  ;;  %v2216_v47 = vrot.slane %v2214_v36, 4 }
 0x165   : > { %v2102_v36 = vld [vmem:[#allocation2 + $0x64] sm:$0xf] }
 0x166   : > { %v1769_v4 = vpop.permute.xlu1 %1768 }
 0x167   : > { %1860 = vst.msk [vmem:[#allocation3 + $0x14] sm:$0xf] %vm14226_vm6, %v1769_v4  ;;  %v2089_v4 = vld [vmem:[#allocation2 + $0x30] sm:$0xf] }
 0x168   : > { %1971 = vrot.lane.b32.xlu2 %v1897_v62, %s9497_s10  ;;  %v2177_v62 = vshrl.u32 %v2086_v55, 16  ;;  %v2155_v55 = vrot.slane %v2153_v53, 4 }
 0x169   : > { %1985 = vrot.lane.b32.xlu0 %v1904_v61, %s9497_s10  ;;  %v2085_v61 = vld [vmem:[#allocation2 + $0x20] sm:$0x1] }
 0x16a   : > { %v1777_v13 = vpop.permute.xlu2 %1776 }
 0x16b   : > { %v1773_v8 = vpop.permute.xlu0 %1772  ;;  %1864 = vst.msk [vmem:[#allocation3 + $0x24] sm:$0xf] %vm14226_vm6, %v1777_v13  ;;  %v2146_v13 = vrot.slane %v2145_v60, 4 }
 0x16c   : > { %1862 = vst.msk [vmem:[#allocation3 + $0x1c] sm:$0xf] %vm14226_vm6, %v1773_v8  ;;  %1987 = vrot.lane.b32.xlu1 %v1905_v24, %s9497_s10  ;;  %v2169_v8 = vor.u32 %v2168_v57, %v10443_v34  ;;  %v2158_v57 = vrot.slane %v2156_v22, 5 }
 0x16e   : > { %v1775_v20 = vpop.permute.xlu1 %1774  ;;  %v2170_v10 = vrot.slane %v2169_v8, 4 }
 0x16f   : > { %1863 = vst.msk [vmem:[#allocation3 + $0x20] sm:$0xf] %vm14226_vm6, %v1775_v20  ;;  %v2201_v20 = vshrl.u32 %v2089_v4, 16 }
 0x170   : > { %1977 = vrot.lane.b32.xlu2 %v1900_v45, %s9497_s10  ;;  %v2172_v45 = vshll.u32 %v2085_v61, 16  ;;  %v2094_v61 = vld [vmem:[#allocation2 + $0x44] sm:$0x1] }
 0x171   : > { %1991 = vrot.lane.b32.xlu0 %v1907_v15, %s9497_s10  ;;  %v2150_v15 = vrot.slane %v2148_v52, 5  ;;  %v2220_v52 = vshll.u32 %v2091_v49, 16 }
 0x172   : > { %v1783_v1 = vpop.permute.xlu2 %1782 }
 0x173   : > { %v1779_v3 = vpop.permute.xlu0 %1778  ;;  %1867 = vst.msk [vmem:[#allocation3 + $0x30] sm:$0xf] %vm14226_vm6, %v1783_v1  ;;  %v2179_v1 = vrot.slane %v2177_v62, 4  ;;  %v2151_v28 = vsel %vm9761_vm14, %v2146_v13, %v2150_v15  ;;  %v2244_v15 = vshll.u32 %v2094_v61, 16 }
 0x174   : > { %1865 = vst.msk [vmem:[#allocation3 + $0x28] sm:$0xf] %vm14226_vm6, %v1779_v3  ;;  %1993 = vrot.lane.b32.xlu1 %v1908_v21, %s9497_s10  ;;  %v2141_v21 = vsel %vm9761_vm14, %v2136_v58, %v2140_v54  ;;  %v1912_v3 = vld [vmem:[#allocation2 + $0xa0] sm:$0xf] }
 0x176   : > { %v1781_v25 = vpop.permute.xlu1 %1780 }
 0x177   : > { %1866 = vst.msk [vmem:[#allocation3 + $0x2c] sm:$0xf] %vm14226_vm6, %v1781_v25  ;;  %v10453_v25 = vld [vmem:[#allocation2 + $0x28] sm:$0xf] }
 0x178   : > { %1983 = vrot.lane.b32.xlu2 %v1903_v29, %s9497_s10  ;;  %v2204_v29 = vshll.u32 %v2089_v4, 16  ;;  %v2186_v39 = vshll.u32 %v10453_v25, 16  ;;  %v2273_v4 = vshrl.u32 %v2098_v51, 16 }
 0x179   : > { %1997 = vrot.lane.b32.xlu0 %v1910_v23, %s9497_s10  ;;  %v2182_v23 = vrot.slane %v2180_v7, 5 }
 0x17a   : > { %v1789_v32 = vpop.permute.xlu2 %1788  ;;  %v2206_v9 = vrot.slane %v2204_v29, 5  ;;  %v2190_v29 = vshrl.u32 %v10453_v25, 16 }
 0x17b   : > { %v1785_v16 = vpop.permute.xlu0 %1784  ;;  %1870 = vst.msk [vmem:[#allocation3 + $0x3c] sm:$0xf] %vm14226_vm6, %v1789_v32  ;;  %v2093_v32 = vld [vmem:[#allocation2 + $0x40] sm:$0xf]  ;;  %v2183_v5 = vor.u32 %v2182_v23, %v2179_v1  ;;  %v2222_v23 = vrot.slane %v2220_v52, 5 }
 0x17c   : > { %1868 = vst.msk [vmem:[#allocation3 + $0x34] sm:$0xf] %vm14226_vm6, %v1785_v16  ;;  %1999 = vrot.lane.b32.xlu1 %v1911_v2, %s9497_s10  ;;  %v2174_v2 = vrot.slane %v2172_v45, 5  ;;  %v2203_v16 = vrot.slane %v2201_v20, 4  ;;  %v2234_v31 = vshll.u32 %v2093_v32, 16  ;;  %v2238_v35 = vshrl.u32 %v2093_v32, 16 }
 0x17d   : > { %v2159_v45 = vor.u32 %v2158_v57, %v2155_v55  ;;  %v10480_v20 = vld [vmem:[#allocation2 + $0x4c] sm:$0xf]  ;;  %v2192_v30 = vrot.slane %v2190_v29, 4 }
 0x17e   : > { %v1787_v40 = vpop.permute.xlu1 %1786  ;;  %v2175_v14 = vsel %vm9761_vm14, %v2170_v10, %v2174_v2  ;;  %v2207_v46 = vor.u32 %v2206_v9, %v2203_v16  ;;  %v2240_v54 = vrot.slane %v2238_v35, 4  ;;  %v2258_v2 = vshll.u32 %v10480_v20, 16  ;;  %v2099_v16 = vld [vmem:[#allocation2 + $0x58] sm:$0xf]  ;;  %v2088_v35 = vld [vmem:[#allocation2 + $0x2c] sm:$0x1] }
 0x17f   : > { %1869 = vst.msk [vmem:[#allocation3 + $0x38] sm:$0xf] %vm14226_vm6, %v1787_v40  ;;  %v2210_v40 = vshll.u32 %v2090_v27, 16  ;;  %v2275_v27 = vrot.slane %v2273_v4, 4  ;;  %v2286_v9 = vshrl.u32 %v2099_v16, 16  ;;  %v2196_v49 = vshll.u32 %v2088_v35, 16 }
 0x180   : > { %1989 = vrot.lane.b32.xlu2 %v1906_v38, %s9497_s10  ;;  %v2208_v58 = vrot.slane %v2207_v46, 4  ;;  %v10492_v22 = vrot.slane %v2258_v2, 5 }
 0x181   : > { %2003 = vrot.lane.b32.xlu0 %v1913_v37, %s9497_s10  ;;  %v2212_v33 = vrot.slane %v2210_v40, 5  ;;  %v2288_v46 = vrot.slane %v2286_v9, 4  ;;  %v2198_v4 = vrot.slane %v2196_v49, 5 }
 0x182   : > { %v1795_v63 = vpop.permute.xlu2 %1794 }
 0x183   : > { %v1791_v17 = vpop.permute.xlu0 %1790  ;;  %1873 = vst.msk [vmem:[#allocation3 + $0x48] sm:$0xf] %vm14226_vm6, %v1795_v63  ;;  %v10466_v63 = vrot.slane %v2186_v39, 5  ;;  %v2217_v60 = vor.u32 %v2216_v47, %v2212_v33  ;;  %v2160_v39 = vrot.slane %v2159_v45, 4  ;;  %v2310_v47 = vshrl.u32 %v2102_v36, 16 }
 0x184   : > { %1871 = vst.msk [vmem:[#allocation3 + $0x40] sm:$0xf] %vm14226_vm6, %v1791_v17  ;;  %2005 = vrot.lane.b32.xlu1 %v1914_v44, %s9497_s10  ;;  %v1915_v44 = vld [vmem:[#allocation2 + $0xb4] sm:$0xf]  ;;  %v2184_v17 = vrot.slane %v2183_v5, 4  ;;  %v2246_v5 = vrot.slane %v2244_v15, 5 }
 0x185   : > { %v2218_v1 = vrot.slane %v2217_v60, 4  ;;  %v2107_v60 = vld [vmem:[#allocation2 + $0x78] sm:$0xf] }
 0x186   : > { %v1793_v48 = vpop.permute.xlu1 %1792  ;;  %v2345_v45 = vshrl.u32 %v2107_v60, 16 }
 0x187   : > { %1872 = vst.msk [vmem:[#allocation3 + $0x44] sm:$0xf] %vm14226_vm6, %v1793_v48  ;;  %v10471_v48 = vrot.slane %v2234_v31, 5  ;;  %v2223_v25 = vsel %vm9761_vm14, %v2218_v1, %v2222_v23  ;;  %v2282_v31 = vshll.u32 %v2099_v16, 16 }
 0x188   : > { %1995 = vrot.lane.b32.xlu2 %v1909_v42, %s9497_s10  ;;  %v2252_v42 = vshll.u32 %v2095_v12, 16  ;;  %v2347_v9 = vrot.slane %v2345_v45, 4  ;;  %v915_v45 = vld [vmem:[#allocation2 + $0xc8] sm:$0x1] }
 0x189   : > { %2009 = vrot.lane.b32.xlu0 %v1916_v50, %s9497_s10  ;;  %v2249_v50 = vshrl.u32 %v2095_v12, 16  ;;  %v2241_v13 = vor.u32 %v2240_v54, %v10471_v48  ;;  %v2306_v12 = vshll.u32 %v2102_v36, 16  ;;  %v2284_v57 = vrot.slane %v2282_v31, 5 }
 0x18a   : > { %v1801_v24 = vpop.permute.xlu2 %1800  ;;  %v2254_v8 = vrot.slane %v2252_v42, 5 }
 0x18b   : > { %v1797_v59 = vpop.permute.xlu0 %1796  ;;  %1876 = vst.msk [vmem:[#allocation3 + $0x54] sm:$0xf] %vm14226_vm6, %v1801_v24  ;;  %v2251_v24 = vrot.slane %v2249_v50, 4  ;;  %v2242_v32 = vrot.slane %v2241_v13, 4  ;;  %v2100_v50 = vld [vmem:[#allocation2 + $0x5c] sm:$0x1] }
 0x18c   : > { %1874 = vst.msk [vmem:[#allocation3 + $0x4c] sm:$0xf] %vm14226_vm6, %v1797_v59  ;;  %2011 = vrot.lane.b32.xlu1 %v1917_v41, %s9497_s10  ;;  %v2189_v41 = vsel %vm9761_vm14, %v2184_v17, %v10466_v63  ;;  %v2276_v59 = vshll.u32 %v2098_v51, 16  ;;  %v2165_v17 = vsel %vm9761_vm14, %v2160_v39, %v10443_v34  ;;  %v2292_v52 = vshll.u32 %v2100_v50, 16 }
 0x18d   : > { %v2255_v10 = vor.u32 %v2254_v8, %v2251_v24  ;;  %v10508_v61 = vrot.slane %v2306_v12, 5 }
 0x18e   : > { %v1799_v26 = vpop.permute.xlu1 %1798  ;;  %v2294_v16 = vrot.slane %v2292_v52, 5 }
 0x18f   : > { %1875 = vst.msk [vmem:[#allocation3 + $0x50] sm:$0xf] %vm14226_vm6, %v1799_v26  ;;  %v2256_v53 = vrot.slane %v2255_v10, 4 }
 0x190   : > { %2001 = vrot.lane.b32.xlu2 %v1912_v3, %s9497_s10  ;;  %v1918_v3 = vld [vmem:[#allocation2 + $0xc4] sm:$0xf] }
 0x191   : > { %2512 = vrot.lane.b32.xlu0 %v2141_v21, %s9498_s11  ;;  %v2213_v21 = vsel %vm9761_vm14, %v2208_v58, %v2212_v33  ;;  %v2193_v33 = vor.u32 %v2192_v30, %v10466_v63  ;;  %v2289_v63 = vor.u32 %v2288_v46, %v2284_v57  ;;  %v2108_v30 = vld [vmem:[#allocation2 + $0x7c] sm:$0xf]  ;;  %v2097_v46 = vld [vmem:[#allocation2 + $0x50] sm:$0x1] }
 0x192   : > { %v1807_v38 = vpop.permute.xlu2 %1806  ;;  %v2358_v31 = vshrl.u32 %v2108_v30, 16 }
 0x193   : > { %v1803_v37 = vpop.permute.xlu0 %1802  ;;  %1879 = vst.msk [vmem:[#allocation3 + $0x60] sm:$0xf] %vm14226_vm6, %v1807_v38  ;;  %v2290_v2 = vrot.slane %v2289_v63, 4 }
 0x194   : > { %1877 = vst.msk [vmem:[#allocation3 + $0x58] sm:$0xf] %vm14226_vm6, %v1803_v37  ;;  %2514 = vrot.lane.b32.xlu1 %v2151_v28, %s9498_s11  ;;  %v2278_v28 = vrot.slane %v2276_v59, 5  ;;  %v2103_v59 = vld [vmem:[#allocation2 + $0x68] sm:$0x1] }
 0x195   : > { %v2295_v35 = vsel %vm9761_vm14, %v2290_v2, %v2294_v16 }
 0x196   : > { %v1805_v18 = vpop.permute.xlu1 %1804  ;;  %v2279_v40 = vor.u32 %v2278_v28, %v2275_v27  ;;  %v2316_v27 = vshll.u32 %v2103_v59, 16  ;;  %v2262_v28 = vshrl.u32 %v10480_v20, 16 }
 0x197   : > { %1878 = vst.msk [vmem:[#allocation3 + $0x5c] sm:$0xf] %vm14226_vm6, %v1805_v18  ;;  %v2104_v18 = vld [vmem:[#allocation2 + $0x6c] sm:$0xf] }
 0x198   : > { %2007 = vrot.lane.b32.xlu2 %v1915_v44, %s9497_s10  ;;  %v2247_v44 = vsel %vm9761_vm14, %v2242_v32, %v2246_v5  ;;  %v2280_v55 = vrot.slane %v2279_v40, 4  ;;  %v2321_v58 = vshrl.u32 %v2104_v18, 16  ;;  %v2324_v34 = vshll.u32 %v2104_v18, 16  ;;  %v2101_v18 = vld [vmem:[#allocation2 + $0x60] sm:$0xf] }
 0x199   : > { %2518 = vrot.lane.b32.xlu0 %v2175_v14, %s9498_s11  ;;  %v2092_v14 = vld [vmem:[#allocation2 + $0x3c] sm:$0xf]  ;;  %v2264_v40 = vrot.slane %v2262_v28, 4 }
 0x19a   : > { %v1813_v7 = vpop.permute.xlu2 %1812  ;;  %v2225_v42 = vshrl.u32 %v2092_v14, 16  ;;  %v2228_v51 = vshll.u32 %v2092_v14, 16  ;;  %v2323_v1 = vrot.slane %v2321_v58, 4  ;;  %v2326_v23 = vrot.slane %v2324_v34, 5  ;;  %v2109_v58 = vld [vmem:[#allocation2 + $0x80] sm:$0x1] }
 0x19b   : > { %v1809_v62 = vpop.permute.xlu0 %1808  ;;  %1882 = vst.msk [vmem:[#allocation3 + $0x6c] sm:$0xf] %vm14226_vm6, %v1813_v7  ;;  %v2194_v7 = vrot.slane %v2193_v33, 4  ;;  %v2285_v29 = vsel %vm9761_vm14, %v2280_v55, %v2284_v57  ;;  %v750_v33 = vrot.slane %v10427_v43, 4  ;;  %v2113_v57 = vld [vmem:[#allocation2 + $0x90] sm:$0xf] }
 0x19c   : > { %1880 = vst.msk [vmem:[#allocation3 + $0x64] sm:$0xf] %vm14226_vm6, %v1809_v62  ;;  %2520 = vrot.lane.b32.xlu1 %v2189_v41, %s9498_s11  ;;  %v2261_v41 = vsel %vm9761_vm14, %v2256_v53, %v10492_v22  ;;  %v2312_v62 = vrot.slane %v2310_v47, 4  ;;  %v2227_v24 = vrot.slane %v2225_v42, 4  ;;  %v2230_v8 = vrot.slane %v2228_v51, 5 }
 0x19d   : > { %v2199_v10 = vsel %vm9761_vm14, %v2194_v7, %v2198_v4  ;;  %v2265_v51 = vor.u32 %v2264_v40, %v10492_v22  ;;  %v2297_v34 = vshrl.u32 %v2101_v18, 16  ;;  %v2393_v4 = vshrl.u32 %v2113_v57, 16 }
 0x19e   : > { %v1811_v26 = vpop.permute.xlu1 %1810  ;;  %v2231_v32 = vor.u32 %v2230_v8, %v2227_v24  ;;  %v2396_v59 = vshll.u32 %v2113_v57, 16  ;;  %v2116_v24 = vld [vmem:[#allocation2 + $0x9c] sm:$0xf] }
 0x19f   : > { %1881 = vst.msk [vmem:[#allocation3 + $0x68] sm:$0xf] %vm14226_vm6, %v1811_v26  ;;  %v2313_v26 = vor.u32 %v2312_v62, %v10508_v61  ;;  %v2395_v2 = vrot.slane %v2393_v4, 4 }
 0x1a0   : > { %2013 = vrot.lane.b32.xlu2 %v1918_v3, %s9497_s10  ;;  %v10511_v3 = vld [vmem:[#allocation2 + $0x70] sm:$0xf]  ;;  %v2232_v14 = vrot.slane %v2231_v32, 4  ;;  %v2398_v16 = vrot.slane %v2396_v59, 5  ;;  %v2420_v32 = vshll.u32 %v2116_v24, 16 }
 0x1a1   : > { %2524 = vrot.lane.b32.xlu0 %v2213_v21, %s9498_s11  ;;  %v2348_v21 = vshll.u32 %v2107_v60, 16  ;;  %v2330_v39 = vshll.u32 %v10511_v3, 16  ;;  %v2314_v20 = vrot.slane %v2313_v26, 4  ;;  %v2300_v60 = vshll.u32 %v2101_v18, 16 }
 0x1a2   : > { %v1819_v38 = vpop.permute.xlu2 %1818  ;;  %v2237_v43 = vsel %vm9761_vm14, %v2232_v14, %v10471_v48  ;;  %v2266_v48 = vrot.slane %v2265_v51, 4  ;;  %v916_v26 = vsel %vm9783_vm1, %v750_v33, %v915_v45 }
 0x1a3   : > { %v1815_v37 = vpop.permute.xlu0 %1814  ;;  %1885 = vst.msk [vmem:[#allocation3 + $0x78] sm:$0xf] %vm14226_vm6, %v1819_v38  ;;  %v2350_v36 = vrot.slane %v2348_v21, 5  ;;  %v2318_v38 = vrot.slane %v2316_v27, 5  ;;  %v10529_v50 = vrot.slane %v2330_v39, 5 }
 0x1a4   : > { %1883 = vst.msk [vmem:[#allocation3 + $0x70] sm:$0xf] %vm14226_vm6, %v1815_v37  ;;  %2526 = vrot.lane.b32.xlu1 %v2223_v25, %s9498_s11  ;;  %v2327_v25 = vor.u32 %v2326_v23, %v2323_v1  ;;  %v2111_v37 = vld [vmem:[#allocation2 + $0x88] sm:$0xf]  ;;  %v2112_v1 = vld [vmem:[#allocation2 + $0x8c] sm:$0x1] }
 0x1a5   : > { %v2378_v47 = vshll.u32 %v2111_v37, 16  ;;  %v2319_v42 = vsel %vm9761_vm14, %v2314_v20, %v2318_v38  ;;  %v2382_v55 = vshrl.u32 %v2111_v37, 16  ;;  %v2299_v23 = vrot.slane %v2297_v34, 4  ;;  %917 = vst [vmem:[#allocation2 + $0xc8] sm:$0x1] %v916_v26 }
 0x1a6   : > { %v1817_v54 = vpop.permute.xlu1 %1816  ;;  %v2328_v49 = vrot.slane %v2327_v25, 4  ;;  %v10555_v25 = vld [vmem:[#allocation2 + $0x94] sm:$0xf]  ;;  %v2334_v38 = vshrl.u32 %v10511_v3, 16 }
 0x1a7   : > { %1884 = vst.msk [vmem:[#allocation3 + $0x74] sm:$0xf] %vm14226_vm6, %v1817_v54  ;;  %v2360_v54 = vrot.slane %v2358_v31, 4  ;;  %v10539_v7 = vrot.slane %v2378_v47, 5  ;;  %v2402_v14 = vshll.u32 %v10555_v25, 16 }
 0x1a8   : > { %2516 = vrot.lane.b32.xlu2 %v2165_v17, %s9498_s11  ;;  %v2354_v17 = vshll.u32 %v2108_v30, 16  ;;  %v2333_v22 = vsel %vm9761_vm14, %v2328_v49, %v10529_v50  ;;  %v2336_v18 = vrot.slane %v2334_v38, 4  ;;  %v2110_v49 = vld [vmem:[#allocation2 + $0x84] sm:$0xf]  ;;  %v10591_v38 = vld [vmem:[#allocation2 + $0xb8] sm:$0xf] }
 0x1a9   : > { %2530 = vrot.lane.b32.xlu0 %v2247_v44, %s9498_s11  ;;  %v2351_v44 = vor.u32 %v2350_v36, %v2347_v9  ;;  %v2388_v36 = vshll.u32 %v2112_v1, 16 }
 0x1aa   : > { %v1954_v15 = vpop.permute.xlu2 %1953  ;;  %v2356_v62 = vrot.slane %v2354_v17, 5 }
 0x1ab   : > { %v1821_v13 = vpop.permute.xlu0 %1820  ;;  %2049 = vst.msk [vmem:[#allocation3 + $0x4] sm:$0xf] %vm14225_vm7, %v1954_v15  ;;  %v2352_v52 = vrot.slane %v2351_v44, 4  ;;  %v2384_v15 = vrot.slane %v2382_v55, 4  ;;  %v2390_v17 = vrot.slane %v2388_v36, 5 }
 0x1ac   : > { %1886 = vst.msk [vmem:[#allocation3 + $0x7c] sm:$0xf] %vm14226_vm6, %v1821_v13  ;;  %2532 = vrot.lane.b32.xlu1 %v2261_v41, %s9498_s11  ;;  %v2268_v41 = vshll.u32 %v2097_v46, 16  ;;  %v2361_v8 = vor.u32 %v2360_v54, %v2356_v62  ;;  %v2364_v13 = vshll.u32 %v2109_v58, 16  ;;  %v2117_v46 = vld [vmem:[#allocation2 + $0xa0] sm:$0xf] }
 0x1ad   : > { %v2385_v9 = vor.u32 %v2384_v15, %v10539_v7  ;;  %v2430_v33 = vshrl.u32 %v2117_v46, 16  ;;  %v2106_v54 = vld [vmem:[#allocation2 + $0x74] sm:$0x1]  ;;  %v2426_v34 = vshll.u32 %v2117_v46, 16 }
 0x1ae   : > { %v1952_v5 = vpop.permute.xlu1 %1951  ;;  %v2270_v21 = vrot.slane %v2268_v41, 5  ;;  %v2362_v39 = vrot.slane %v2361_v8, 4  ;;  %v2366_v37 = vrot.slane %v2364_v13, 5  ;;  %v10567_v41 = vrot.slane %v2402_v14, 5  ;;  %v2118_v8 = vld [vmem:[#allocation2 + $0xa4] sm:$0x1] }
 0x1af   : > { %2048 = vst.msk [vmem:[#allocation3] sm:$0xf] %vm14225_vm7, %v1952_v5  ;;  %v2357_v5 = vsel %vm9761_vm14, %v2352_v52, %v2356_v62  ;;  %v2386_v44 = vrot.slane %v2385_v9, 4  ;;  %v2372_v52 = vshll.u32 %v2110_v49, 16  ;;  %v2340_v4 = vshll.u32 %v2106_v54, 16 }
 0x1b0   : > { %2522 = vrot.lane.b32.xlu2 %v2199_v10, %s9498_s11  ;;  %v2417_v10 = vshrl.u32 %v2116_v24, 16  ;;  %v2271_v30 = vsel %vm9761_vm14, %v2266_v48, %v2270_v21  ;;  %v2367_v47 = vsel %vm9761_vm14, %v2362_v39, %v2366_v37  ;;  %v2432_v59 = vrot.slane %v2430_v33, 4  ;;  %v2122_v24 = vld [vmem:[#allocation2 + $0xb4] sm:$0xf] }
 0x1b1   : > { %2536 = vrot.lane.b32.xlu0 %v2285_v29, %s9498_s11  ;;  %v2302_v29 = vrot.slane %v2300_v60, 5  ;;  %v2391_v60 = vsel %vm9761_vm14, %v2386_v44, %v2390_v17  ;;  %v2428_v1 = vrot.slane %v2426_v34, 5  ;;  %v2468_v26 = vshll.u32 %v2122_v24, 16  ;;  %v2119_v34 = vld [vmem:[#allocation2 + $0xa8] sm:$0xf] }
 0x1b2   : > { %v1960_v12 = vpop.permute.xlu2 %1959  ;;  %v2419_v31 = vrot.slane %v2417_v10, 4  ;;  %v2342_v10 = vrot.slane %v2340_v4, 5 }
 0x1b3   : > { %v1956_v53 = vpop.permute.xlu0 %1955  ;;  %2052 = vst.msk [vmem:[#allocation3 + $0x10] sm:$0xf] %vm14225_vm7, %v1960_v12  ;;  %v2303_v20 = vor.u32 %v2302_v29, %v2299_v23  ;;  %v2120_v12 = vld [vmem:[#allocation2 + $0xac] sm:$0xf]  ;;  %v2121_v23 = vld [vmem:[#allocation2 + $0xb0] sm:$0x1] }
 0x1b4   : > { %2050 = vst.msk [vmem:[#allocation3 + $0x8] sm:$0xf] %vm14225_vm7, %v1956_v53  ;;  %2538 = vrot.lane.b32.xlu1 %v2295_v35, %s9498_s11  ;;  %v2399_v35 = vor.u32 %v2398_v16, %v2395_v2  ;;  %v2422_v53 = vrot.slane %v2420_v32, 5  ;;  %v2450_v55 = vshll.u32 %v2120_v12, 16  ;;  %v2454_v57 = vshrl.u32 %v2120_v12, 16 }
 0x1b5   : > { %v2304_v3 = vrot.slane %v2303_v20, 4  ;;  %v2465_v29 = vshrl.u32 %v2122_v24, 16  ;;  %v2433_v2 = vor.u32 %v2432_v59, %v2428_v1  ;;  %v2436_v16 = vshll.u32 %v2118_v8, 16 }
 0x1b6   : > { %v1958_v63 = vpop.permute.xlu1 %1957  ;;  %v2423_v58 = vor.u32 %v2422_v53, %v2419_v31  ;;  %v10577_v13 = vrot.slane %v2450_v55, 5  ;;  %v2456_v15 = vrot.slane %v2454_v57, 4  ;;  %v2460_v9 = vshll.u32 %v2121_v23, 16 }
 0x1b7   : > { %2051 = vst.msk [vmem:[#allocation3 + $0xc] sm:$0xf] %vm14225_vm7, %v1958_v63  ;;  %v2369_v63 = vshrl.u32 %v2110_v49, 16  ;;  %v2309_v62 = vsel %vm9761_vm14, %v2304_v3, %v10508_v61  ;;  %v2470_v31 = vrot.slane %v2468_v26, 5  ;;  %v2434_v14 = vrot.slane %v2433_v2, 4 }
 0x1b8   : > { %2528 = vrot.lane.b32.xlu2 %v2237_v43, %s9498_s11  ;;  %v2400_v43 = vrot.slane %v2399_v35, 4  ;;  %v2424_v21 = vrot.slane %v2423_v58, 4  ;;  %v2457_v39 = vor.u32 %v2456_v15, %v10577_v13  ;;  %v2438_v53 = vrot.slane %v2436_v16, 5  ;;  %v2126_v3 = vld [vmem:[#allocation2 + $0xc4] sm:$0xf] }
 0x1b9   : > { %2542 = vrot.lane.b32.xlu0 %v2319_v42, %s9498_s11  ;;  %v2371_v61 = vrot.slane %v2369_v63, 4  ;;  %v2406_v12 = vshrl.u32 %v10555_v25, 16  ;;  %v2462_v46 = vrot.slane %v2460_v9, 5  ;;  %v2115_v58 = vld [vmem:[#allocation2 + $0x98] sm:$0x1]  ;;  %v2441_v8 = vshrl.u32 %v2119_v34, 16 }
 0x1ba   : > { %v1966_v28 = vpop.permute.xlu2 %1965  ;;  %v2405_v45 = vsel %vm9761_vm14, %v2400_v43, %v10567_v41  ;;  %v2429_v37 = vsel %vm9761_vm14, %v2424_v21, %v2428_v1  ;;  %v2458_v17 = vrot.slane %v2457_v39, 4  ;;  %v2439_v25 = vsel %vm9761_vm14, %v2434_v14, %v2438_v53  ;;  %v2643_v9 = vld [vmem:[#allocation2 + $0x14] sm:$0x1]  ;;  %v2644_v14 = vld [vmem:[#allocation2 + $0x18] sm:$0xe] }
 0x1bb   : > { %v1962_v27 = vpop.permute.xlu0 %1961  ;;  %2055 = vst.msk [vmem:[#allocation3 + $0x1c] sm:$0xf] %vm14225_vm7, %v1966_v28  ;;  %v2408_v54 = vrot.slane %v2406_v12, 4  ;;  %v2498_v43 = vshll.u32 %v2126_v3, 16  ;;  %v2412_v24 = vshll.u32 %v2115_v58, 16  ;;  %v2444_v15 = vshll.u32 %v2119_v34, 16 }
 0x1bc   : > { %2053 = vst.msk [vmem:[#allocation3 + $0x14] sm:$0xf] %vm14225_vm7, %v1962_v27  ;;  %2544 = vrot.lane.b32.xlu1 %v2333_v22, %s9498_s11  ;;  %v2337_v22 = vor.u32 %v2336_v18, %v10529_v50  ;;  %v2374_v50 = vrot.slane %v2372_v52, 5  ;;  %v2125_v27 = vld [vmem:[#allocation2 + $0xc0] sm:$0xf]  ;;  %v2443_v26 = vrot.slane %v2441_v8, 4 }
 0x1bd   : > { %v2489_v36 = vshrl.u32 %v2125_v27, 16  ;;  %v2409_v59 = vor.u32 %v2408_v54, %v10567_v41  ;;  %v2500_v21 = vrot.slane %v2498_v43, 5  ;;  %v2641_v8 = vld [vmem:[#allocation2 + $0xc] sm:$0xe] }
 0x1be   : > { %v1964_v40 = vpop.permute.xlu1 %1963  ;;  %v2338_v28 = vrot.slane %v2337_v22, 4  ;;  %v2375_v20 = vor.u32 %v2374_v50, %v2371_v61  ;;  %v2414_v50 = vrot.slane %v2412_v24, 5 }
 0x1bf   : > { %2054 = vst.msk [vmem:[#allocation3 + $0x18] sm:$0xf] %vm14225_vm7, %v1964_v40  ;;  %v2467_v40 = vrot.slane %v2465_v29, 4  ;;  %v2491_v18 = vrot.slane %v2489_v36, 4  ;;  %v2410_v41 = vrot.slane %v2409_v59, 4 }
 0x1c0   : > { %2534 = vrot.lane.b32.xlu2 %v2271_v30, %s9498_s11  ;;  %v2492_v30 = vshll.u32 %v2125_v27, 16  ;;  %v2343_v35 = vsel %vm9761_vm14, %v2338_v28, %v2342_v10  ;;  %v2376_v33 = vrot.slane %v2375_v20, 4  ;;  %v10619_v29 = vld [vmem:[#allocation2 + $0x10] sm:$0xf]  ;;  %v2446_v27 = vrot.slane %v2444_v15, 5 }
 0x1c1   : > { %2548 = vrot.lane.b32.xlu0 %v2357_v5, %s9498_s11  ;;  %v2471_v49 = vor.u32 %v2470_v31, %v2467_v40  ;;  %v2742_v40 = vrot.slane %v2643_v9, 5 }
 0x1c2   : > { %v1972_v51 = vpop.permute.xlu2 %1971  ;;  %v2381_v52 = vsel %vm9761_vm14, %v2376_v33, %v10539_v7  ;;  %v2447_v36 = vor.u32 %v2446_v27, %v2443_v26  ;;  %v2647_v33 = vld [vmem:[#allocation2 + $0x24] sm:$0xe] }
 0x1c3   : > { %v1968_v42 = vpop.permute.xlu0 %1967  ;;  %2058 = vst.msk [vmem:[#allocation3 + $0x28] sm:$0xf] %vm14225_vm7, %v1972_v51  ;;  %v2502_v51 = vshrl.u32 %v2126_v3, 16  ;;  %v9032_v54 = vrot.slane %v2647_v33, 9 }
 0x1c4   : > { %2056 = vst.msk [vmem:[#allocation3 + $0x20] sm:$0xf] %vm14225_vm7, %v1968_v42  ;;  %2550 = vrot.lane.b32.xlu1 %v2367_v47, %s9498_s11  ;;  %v2474_v47 = vshll.u32 %v10591_v38, 16  ;;  %v2494_v42 = vrot.slane %v2492_v30, 5  ;;  %v2478_v30 = vshrl.u32 %v10591_v38, 16 }
 0x1c5   : > { %v2504_v4 = vrot.slane %v2502_v51, 4  ;;  %v10637_v38 = vld [vmem:[#allocation2 + $0x1c] sm:$0xf] }
 0x1c6   : > { %v1970_v48 = vpop.permute.xlu1 %1969  ;;  %v10605_v63 = vrot.slane %v2474_v47, 5  ;;  %v2495_v22 = vor.u32 %v2494_v42, %v2491_v18  ;;  %v2480_v53 = vrot.slane %v2478_v30, 4  ;;  %v9031_v47 = vrot.slane %v2644_v14, 9 }
 0x1c7   : > { %2057 = vst.msk [vmem:[#allocation3 + $0x24] sm:$0xf] %vm14225_vm7, %v1970_v48  ;;  %v2127_v48 = vld [vmem:[#allocation2 + $0xc8] sm:$0x1]  ;;  %v2505_v23 = vor.u32 %v2504_v4, %v2500_v21  ;;  %v2746_v18 = vrot.slane %v10637_v38, 5 }
 0x1c8   : > { %2540 = vrot.lane.b32.xlu2 %v2309_v62, %s9498_s11  ;;  %v2472_v62 = vrot.slane %v2471_v49, 4  ;;  %v2496_v1 = vrot.slane %v2495_v22, 4  ;;  %v2508_v61 = vshll.u32 %v2127_v48, 16  ;;  %v2648_v49 = vld [vmem:[#allocation2 + $0x28] sm:$0xf]  ;;  %v2481_v42 = vor.u32 %v2480_v53, %v10605_v63 }
 0x1c9   : > { %2554 = vrot.lane.b32.xlu0 %v2391_v60, %s9498_s11  ;;  %v2463_v60 = vsel %vm9761_vm14, %v2458_v17, %v2462_v46  ;;  %v2506_v16 = vrot.slane %v2505_v23, 4  ;;  %v2124_v17 = vld [vmem:[#allocation2 + $0xbc] sm:$0x1]  ;;  %v2652_v48 = vld [vmem:[#allocation2 + $0x38] sm:$0x1] }
 0x1ca   : > { %v1978_v5 = vpop.permute.xlu2 %1977  ;;  %v2477_v7 = vsel %vm9761_vm14, %v2472_v62, %v10605_v63  ;;  %v2501_v2 = vsel %vm9761_vm14, %v2496_v1, %v2500_v21  ;;  %v2510_v39 = vrot.slane %v2508_v61, 5  ;;  %v2484_v51 = vshll.u32 %v2124_v17, 16  ;;  %v10654_v63 = vld [vmem:[#allocation2 + $0x34] sm:$0xf]  ;;  %v2653_v61 = vld [vmem:[#allocation2 + $0x3c] sm:$0xe] }
 0x1cb   : > { %v1974_v32 = vpop.permute.xlu0 %1973  ;;  %2061 = vst.msk [vmem:[#allocation3 + $0x34] sm:$0xf] %vm14225_vm7, %v1978_v5  ;;  %v2415_v5 = vsel %vm9761_vm14, %v2410_v41, %v2414_v50  ;;  %v2760_v59 = vrot.slane %v10654_v63, 5  ;;  %v2763_v21 = vrot.slane %v2652_v48, 5  ;;  %v10671_v41 = vld [vmem:[#allocation2 + $0x40] sm:$0xf] }
 0x1cc   : > { %2059 = vst.msk [vmem:[#allocation3 + $0x2c] sm:$0xf] %vm14225_vm7, %v1974_v32  ;;  %2556 = vrot.lane.b32.xlu1 %v2405_v45, %s9498_s11  ;;  %v2739_v32 = vrot.slane %v10619_v29, 5  ;;  %v2511_v31 = vsel %vm9761_vm14, %v2506_v16, %v2510_v39  ;;  %v2486_v43 = vrot.slane %v2484_v51, 5  ;;  %v9034_v27 = vrot.slane %v2653_v61, 9 }
 0x1cd   : > { %v2661_v38 = vld [vmem:[#allocation2 + $0x5c] sm:$0x1]  ;;  %v2650_v17 = vld [vmem:[#allocation2 + $0x30] sm:$0xe]  ;;  %v10705_v51 = vld [vmem:[#allocation2 + $0x64] sm:$0xf] }
 0x1ce   : > { %v1976_v44 = vpop.permute.xlu1 %1975  ;;  %v2741_v20 = vrot.slane %v2739_v32, 4  ;;  %v10722_v48 = vld [vmem:[#allocation2 + $0x7c] sm:$0xf]  ;;  %v2659_v61 = vld [vmem:[#allocation2 + $0x54] sm:$0xe] }
 0x1cf   : > { %2060 = vst.msk [vmem:[#allocation3 + $0x30] sm:$0xf] %vm14225_vm7, %v1976_v44 }
 0x1d0   : > { %2546 = vrot.lane.b32.xlu2 %v2343_v35, %s9498_s11  ;;  %v2448_v35 = vrot.slane %v2447_v36, 4  ;;  %v2743_v46 = vsel %vm10152_vm4, %v2741_v20, %v2742_v40  ;;  %v2748_v36 = vrot.slane %v2746_v18, 4  ;;  %v2658_v20 = vld [vmem:[#allocation2 + $0x50] sm:$0x1]  ;;  %v10688_v40 = vld [vmem:[#allocation2 + $0x58] sm:$0xf] }
 0x1d1   : > { %2560 = vrot.lane.b32.xlu0 %v2429_v37, %s9498_s11  ;;  %v2777_v53 = vrot.slane %v2658_v20, 5 }
 0x1d2   : > { %v1984_v57 = vpop.permute.xlu2 %1983  ;;  %v2453_v3 = vsel %vm9761_vm14, %v2448_v35, %v10577_v13  ;;  %v2747_v13 = vsel %vm10152_vm4, %v9031_v47, %v2746_v18  ;;  %v9033_v18 = vrot.slane %v2650_v17, 9 }
 0x1d3   : > { %v1980_v55 = vpop.permute.xlu0 %1979  ;;  %2064 = vst.msk [vmem:[#allocation3 + $0x40] sm:$0xf] %vm14225_vm7, %v1984_v57  ;;  %v2482_v57 = vrot.slane %v2481_v42, 4  ;;  %v2662_v42 = vld [vmem:[#allocation2 + $0x60] sm:$0xe] }
 0x1d4   : > { %2062 = vst.msk [vmem:[#allocation3 + $0x38] sm:$0xf] %vm14225_vm7, %v1980_v55  ;;  %2562 = vrot.lane.b32.xlu1 %v2439_v25, %s9498_s11  ;;  %v2753_v55 = vrot.slane %v2648_v49, 5 }
 0x1d5   : > { %v2487_v62 = vsel %vm9761_vm14, %v2482_v57, %v2486_v43  ;;  %v2665_v57 = vld [vmem:[#allocation2 + $0x6c] sm:$0xe]  ;;  %v2666_v43 = vld [vmem:[#allocation2 + $0x70] sm:$0xf] }
 0x1d6   : > { %v1982_v45 = vpop.permute.xlu1 %1981  ;;  %v2755_v22 = vrot.slane %v2753_v55, 4 }
 0x1d7   : > { %2063 = vst.msk [vmem:[#allocation3 + $0x3c] sm:$0xf] %vm14225_vm7, %v1982_v45  ;;  %v2762_v45 = vrot.slane %v2760_v59, 4 }
 0x1d8   : > { %2552 = vrot.lane.b32.xlu2 %v2381_v52, %s9498_s11  ;;  %v2754_v52 = vsel %vm10152_vm4, %v9032_v54, %v2753_v55  ;;  %v2761_v54 = vsel %vm10152_vm4, %v9033_v18, %v2760_v59  ;;  %v9037_v55 = vrot.slane %v2662_v42, 9  ;;  %v2668_v42 = vld [vmem:[#allocation2 + $0x78] sm:$0xe] }
 0x1d9   : > { %2566 = vrot.lane.b32.xlu0 %v2463_v60, %s9498_s11  ;;  %v2649_v60 = vld [vmem:[#allocation2 + $0x2c] sm:$0x1]  ;;  %v2764_v50 = vsel %vm10152_vm4, %v2762_v45, %v2763_v21 }
 0x1da   : > { %v1990_v10 = vpop.permute.xlu2 %1989  ;;  %v2756_v4 = vrot.slane %v2649_v60, 5  ;;  %v9038_v60 = vrot.slane %v2665_v57, 9 }
 0x1db   : > { %v1986_v28 = vpop.permute.xlu0 %1985  ;;  %2067 = vst.msk [vmem:[#allocation3 + $0x4c] sm:$0xf] %vm14225_vm7, %v1990_v10  ;;  %v2656_v10 = vld [vmem:[#allocation2 + $0x48] sm:$0xe] }
 0x1dc   : > { %2065 = vst.msk [vmem:[#allocation3 + $0x44] sm:$0xf] %vm14225_vm7, %v1986_v28  ;;  %2568 = vrot.lane.b32.xlu1 %v2477_v7, %s9498_s11  ;;  %v2757_v15 = vsel %vm10152_vm4, %v2755_v22, %v2756_v4  ;;  %v9030_v7 = vrot.slane %v2641_v8, 9  ;;  %v2767_v28 = vrot.slane %v10671_v41, 5  ;;  %v9035_v39 = vrot.slane %v2656_v10, 9 }
 0x1de   : > { %v1988_v37 = vpop.permute.xlu1 %1987  ;;  %v2740_v26 = vsel %vm10152_vm4, %v9030_v7, %v2739_v32  ;;  %v2768_v29 = vsel %vm10152_vm4, %v9034_v27, %v2767_v28  ;;  %v2802_v7 = vrot.slane %v10722_v48, 5  ;;  %v9036_v27 = vrot.slane %v2659_v61, 9 }
 0x1df   : > { %2066 = vst.msk [vmem:[#allocation3 + $0x48] sm:$0xf] %vm14225_vm7, %v1988_v37 }
 0x1e0   : > { %2558 = vrot.lane.b32.xlu2 %v2415_v5, %s9498_s11  ;;  %v2646_v5 = vld [vmem:[#allocation2 + $0x20] sm:$0x1] }
 0x1e1   : > { %2572 = vrot.lane.b32.xlu0 %v2501_v2, %s9498_s11  ;;  %v2657_v2 = vld [vmem:[#allocation2 + $0x4c] sm:$0xf]  ;;  %v2749_v32 = vrot.slane %v2646_v5, 5 }
 0x1e2   : > { %v1996_v44 = vpop.permute.xlu2 %1995  ;;  %v2774_v9 = vrot.slane %v2657_v2, 5  ;;  %v2671_v2 = vld [vmem:[#allocation2 + $0x84] sm:$0xe] }
 0x1e3   : > { %v1992_v12 = vpop.permute.xlu0 %1991  ;;  %2070 = vst.msk [vmem:[#allocation3 + $0x58] sm:$0xf] %vm14225_vm7, %v1996_v44  ;;  %v2750_v35 = vsel %vm10152_vm4, %v2748_v36, %v2749_v32  ;;  %v2674_v36 = vld [vmem:[#allocation2 + $0x90] sm:$0xe]  ;;  %v2675_v32 = vld [vmem:[#allocation2 + $0x94] sm:$0xf] }
 0x1e4   : > { %2068 = vst.msk [vmem:[#allocation3 + $0x50] sm:$0xf] %vm14225_vm7, %v1992_v12  ;;  %2574 = vrot.lane.b32.xlu1 %v2511_v31, %s9498_s11  ;;  %v2775_v31 = vsel %vm10152_vm4, %v9035_v39, %v2774_v9  ;;  %v2776_v14 = vrot.slane %v2774_v9, 4  ;;  %v2781_v12 = vrot.slane %v10688_v40, 5  ;;  %v9040_v9 = vrot.slane %v2671_v2, 9 }
 0x1e5   : > { %v9041_v20 = vrot.slane %v2674_v36, 9  ;;  %v2677_v2 = vld [vmem:[#allocation2 + $0x9c] sm:$0xe] }
 0x1e6   : > { %v1994_v25 = vpop.permute.xlu1 %1993  ;;  %v2783_v47 = vrot.slane %v2781_v12, 4  ;;  %v2782_v39 = vsel %vm10152_vm4, %v9036_v27, %v2781_v12 }
 0x1e7   : > { %2069 = vst.msk [vmem:[#allocation3 + $0x54] sm:$0xf] %vm14225_vm7, %v1994_v25 }
 0x1e8   : > { %2564 = vrot.lane.b32.xlu2 %v2453_v3, %s9498_s11  ;;  %v2784_v3 = vrot.slane %v2661_v38, 5  ;;  %v10756_v38 = vld [vmem:[#allocation2 + $0xa0] sm:$0xf] }
 0x1e9   : > { %2851 = vrot.lane.b32.xlu0 %v2743_v46, %s9499_s12  ;;  %v2778_v46 = vsel %vm10152_vm4, %v2776_v14, %v2777_v53  ;;  %v2823_v18 = vrot.slane %v10756_v38, 5 }
 0x1ea   : > { %v2002_v34 = vpop.permute.xlu2 %2001  ;;  %v2785_v25 = vsel %vm10152_vm4, %v2783_v47, %v2784_v3 }
 0x1eb   : > { %v1998_v58 = vpop.permute.xlu0 %1997  ;;  %2073 = vst.msk [vmem:[#allocation3 + $0x64] sm:$0xf] %vm14225_vm7, %v2002_v34  ;;  %v2655_v34 = vld [vmem:[#allocation2 + $0x44] sm:$0x1] }
 0x1ec   : > { %2071 = vst.msk [vmem:[#allocation3 + $0x5c] sm:$0xf] %vm14225_vm7, %v1998_v58  ;;  %2853 = vrot.lane.b32.xlu1 %v2747_v13, %s9499_s12  ;;  %v2788_v13 = vrot.slane %v10705_v51, 5  ;;  %v2770_v22 = vrot.slane %v2655_v34, 5 }
 0x1ee   : > { %v2000_v24 = vpop.permute.xlu1 %1999  ;;  %v2789_v63 = vsel %vm10152_vm4, %v9037_v55, %v2788_v13  ;;  %v9039_v55 = vrot.slane %v2668_v42, 9 }
 0x1ef   : > { %2072 = vst.msk [vmem:[#allocation3 + $0x60] sm:$0xf] %vm14225_vm7, %v2000_v24  ;;  %v2667_v24 = vld [vmem:[#allocation2 + $0x74] sm:$0x1] }
 0x1f0   : > { %2570 = vrot.lane.b32.xlu2 %v2487_v62, %s9498_s11  ;;  %v2769_v62 = vrot.slane %v2767_v28, 4  ;;  %v2798_v21 = vrot.slane %v2667_v24, 5 }
 0x1f1   : > { %2857 = vrot.lane.b32.xlu0 %v2754_v52, %s9499_s12  ;;  %v2795_v52 = vrot.slane %v2666_v43, 5  ;;  %v2680_v43 = vld [vmem:[#allocation2 + $0xa8] sm:$0xe] }
 0x1f2   : > { %v2008_v23 = vpop.permute.xlu2 %2007 }
 0x1f3   : > { %v2004_v1 = vpop.permute.xlu0 %2003  ;;  %2076 = vst.msk [vmem:[#allocation3 + $0x70] sm:$0xf] %vm14225_vm7, %v2008_v23  ;;  %v2796_v8 = vsel %vm10152_vm4, %v9038_v60, %v2795_v52  ;;  %v2797_v45 = vrot.slane %v2795_v52, 4  ;;  %v2670_v23 = vld [vmem:[#allocation2 + $0x80] sm:$0x1]  ;;  %v2803_v60 = vsel %vm10152_vm4, %v9039_v55, %v2802_v7  ;;  %v9043_v52 = vrot.slane %v2680_v43, 9 }
 0x1f4   : > { %2074 = vst.msk [vmem:[#allocation3 + $0x68] sm:$0xf] %vm14225_vm7, %v2004_v1  ;;  %2859 = vrot.lane.b32.xlu1 %v2757_v15, %s9499_s12  ;;  %v2771_v15 = vsel %vm10152_vm4, %v2769_v62, %v2770_v22  ;;  %v2683_v62 = vld [vmem:[#allocation2 + $0xb4] sm:$0xe]  ;;  %v2684_v22 = vld [vmem:[#allocation2 + $0xb8] sm:$0xf] }
 0x1f5   : > { %v2799_v41 = vsel %vm10152_vm4, %v2797_v45, %v2798_v21  ;;  %v9044_v24 = vrot.slane %v2683_v62, 9  ;;  %v2987_v55 = vld [vmem:[#allocation2 + $0x48] sm:$0xf]  ;;  %v2988_v43 = vld [vmem:[#allocation2 + $0x4c] sm:$0xf] }
 0x1f6   : > { %v2006_v16 = vpop.permute.xlu1 %2005  ;;  %v2991_v62 = vld [vmem:[#allocation2 + $0x60] sm:$0xf] }
 0x1f7   : > { %2075 = vst.msk [vmem:[#allocation3 + $0x6c] sm:$0xf] %vm14225_vm7, %v2006_v16  ;;  %v10739_v16 = vld [vmem:[#allocation2 + $0x88] sm:$0xf] }
 0x1f8   : > { %2849 = vrot.lane.b32.xlu2 %v2740_v26, %s9499_s12  ;;  %v2805_v26 = vrot.slane %v2670_v23, 5  ;;  %v2687_v23 = vld [vmem:[#allocation2 + $0xc4] sm:$0xf] }
 0x1f9   : > { %2863 = vrot.lane.b32.xlu0 %v2764_v50, %s9499_s12  ;;  %v2804_v50 = vrot.slane %v2802_v7, 4  ;;  %v2844_v27 = vrot.slane %v2687_v23, 5  ;;  %v2997_v23 = vld [vmem:[#allocation2 + $0x84] sm:$0xf] }
 0x1fa   : > { %v2014_v37 = vpop.permute.xlu2 %2013 }
 0x1fb   : > { %v2010_v30 = vpop.permute.xlu0 %2009  ;;  %2079 = vst.msk [vmem:[#allocation3 + $0x7c] sm:$0xf] %vm14225_vm7, %v2014_v37  ;;  %v2806_v5 = vsel %vm10152_vm4, %v2804_v50, %v2805_v26  ;;  %v2664_v37 = vld [vmem:[#allocation2 + $0x68] sm:$0x1] }
 0x1fc   : > { %2077 = vst.msk [vmem:[#allocation3 + $0x74] sm:$0xf] %vm14225_vm7, %v2010_v30  ;;  %2865 = vrot.lane.b32.xlu1 %v2768_v29, %s9499_s12  ;;  %v2809_v29 = vrot.slane %v10739_v16, 5  ;;  %v2791_v14 = vrot.slane %v2664_v37, 5 }
 0x1fe   : > { %v2012_v44 = vpop.permute.xlu1 %2011  ;;  %v2810_v40 = vsel %vm10152_vm4, %v9040_v9, %v2809_v29  ;;  %v9042_v9 = vrot.slane %v2677_v2, 9 }
 0x1ff   : > { %2078 = vst.msk [vmem:[#allocation3 + $0x78] sm:$0xf] %vm14225_vm7, %v2012_v44  ;;  %v2676_v44 = vld [vmem:[#allocation2 + $0x98] sm:$0x1] }
 0x200   : > { %2855 = vrot.lane.b32.xlu2 %v2750_v35, %s9499_s12  ;;  %v2790_v35 = vrot.slane %v2788_v13, 4  ;;  %v2819_v3 = vrot.slane %v2676_v44, 5 }
 0x201   : > { %2869 = vrot.lane.b32.xlu0 %v2775_v31, %s9499_s12  ;;  %v2816_v31 = vrot.slane %v2675_v32, 5 }
 0x202   : > { %v2517_v49 = vpop.permute.xlu2 %2516 }
 0x203   : > { %v2513_v33 = vpop.permute.xlu0 %2512  ;;  %2611 = vst.msk [vmem:[#allocation3 + $0x8] sm:$0xf] %vm14224_vm8, %v2517_v49  ;;  %v2817_v17 = vsel %vm10152_vm4, %v9041_v20, %v2816_v31  ;;  %v2818_v47 = vrot.slane %v2816_v31, 4  ;;  %v2679_v49 = vld [vmem:[#allocation2 + $0xa4] sm:$0x1] }
 0x204   : > { %2609 = vst.msk [vmem:[#allocation3] sm:$0xf] %vm14224_vm8, %v2513_v33  ;;  %2871 = vrot.lane.b32.xlu1 %v2778_v46, %s9499_s12  ;;  %v2792_v46 = vsel %vm10152_vm4, %v2790_v35, %v2791_v14  ;;  %v2682_v20 = vld [vmem:[#allocation2 + $0xb0] sm:$0x1]  ;;  %v2979_v31 = vld [vmem:[#allocation2 + $0x18] sm:$0xf] }
 0x205   : > { %v2820_v51 = vsel %vm10152_vm4, %v2818_v47, %v2819_v3  ;;  %v2833_v35 = vrot.slane %v2682_v20, 5  ;;  %v3005_v20 = vld [vmem:[#allocation2 + $0xb4] sm:$0xf] }
 0x206   : > { %v2515_v58 = vpop.permute.xlu1 %2514 }
 0x207   : > { %2610 = vst.msk [vmem:[#allocation3 + $0x4] sm:$0xf] %vm14224_vm8, %v2515_v58  ;;  %v2681_v58 = vld [vmem:[#allocation2 + $0xac] sm:$0xf] }
 0x208   : > { %2861 = vrot.lane.b32.xlu2 %v2761_v54, %s9499_s12  ;;  %v2826_v54 = vrot.slane %v2679_v49, 5 }
 0x209   : > { %2875 = vrot.lane.b32.xlu0 %v2785_v25, %s9499_s12  ;;  %v2825_v25 = vrot.slane %v2823_v18, 4 }
 0x20a   : > { %v2523_v59 = vpop.permute.xlu2 %2522 }
 0x20b   : > { %v2519_v4 = vpop.permute.xlu0 %2518  ;;  %2614 = vst.msk [vmem:[#allocation3 + $0x14] sm:$0xf] %vm14224_vm8, %v2523_v59  ;;  %v2827_v34 = vsel %vm10152_vm4, %v2825_v25, %v2826_v54  ;;  %v2673_v59 = vld [vmem:[#allocation2 + $0x8c] sm:$0x1] }
 0x20c   : > { %2612 = vst.msk [vmem:[#allocation3 + $0xc] sm:$0xf] %vm14224_vm8, %v2519_v4  ;;  %2877 = vrot.lane.b32.xlu1 %v2789_v63, %s9499_s12  ;;  %v2830_v63 = vrot.slane %v2681_v58, 5  ;;  %v2812_v45 = vrot.slane %v2673_v59, 5  ;;  %v2993_v59 = vld [vmem:[#allocation2 + $0x6c] sm:$0xf] }
 0x20e   : > { %v2521_v1 = vpop.permute.xlu1 %2520  ;;  %v2831_v48 = vsel %vm10152_vm4, %v9043_v52, %v2830_v63  ;;  %v2983_v52 = vld [vmem:[#allocation2 + $0x30] sm:$0xf] }
 0x20f   : > { %2613 = vst.msk [vmem:[#allocation3 + $0x10] sm:$0xf] %vm14224_vm8, %v2521_v1  ;;  %v2685_v1 = vld [vmem:[#allocation2 + $0xbc] sm:$0x1] }
 0x210   : > { %2867 = vrot.lane.b32.xlu2 %v2771_v15, %s9499_s12  ;;  %v2811_v15 = vrot.slane %v2809_v29, 4  ;;  %v2840_v26 = vrot.slane %v2685_v1, 5 }
 0x211   : > { %2881 = vrot.lane.b32.xlu0 %v2796_v8, %s9499_s12  ;;  %v2837_v8 = vrot.slane %v2684_v22, 5 }
 0x212   : > { %v2529_v10 = vpop.permute.xlu2 %2528 }
 0x213   : > { %v2525_v28 = vpop.permute.xlu0 %2524  ;;  %2617 = vst.msk [vmem:[#allocation3 + $0x20] sm:$0xf] %vm14224_vm8, %v2529_v10  ;;  %v2838_v61 = vsel %vm10152_vm4, %v9044_v24, %v2837_v8  ;;  %v2839_v50 = vrot.slane %v2837_v8, 4  ;;  %v2688_v10 = vld [vmem:[#allocation2 + $0xc8] sm:$0x1] }
 0x214   : > { %2615 = vst.msk [vmem:[#allocation3 + $0x18] sm:$0xf] %vm14224_vm8, %v2525_v28  ;;  %2883 = vrot.lane.b32.xlu1 %v2799_v41, %s9499_s12  ;;  %v2813_v41 = vsel %vm10152_vm4, %v2811_v15, %v2812_v45  ;;  %v2986_v24 = vld [vmem:[#allocation2 + $0x40] sm:$0xf] }
 0x215   : > { %v2841_v16 = vsel %vm10152_vm4, %v2839_v50, %v2840_v26  ;;  %v2999_v50 = vld [vmem:[#allocation2 + $0x90] sm:$0xf]  ;;  %v2992_v26 = vld [vmem:[#allocation2 + $0x64] sm:$0xf] }
 0x216   : > { %v2527_v30 = vpop.permute.xlu1 %2526 }
 0x217   : > { %2616 = vst.msk [vmem:[#allocation3 + $0x1c] sm:$0xf] %vm14224_vm8, %v2527_v30  ;;  %v2824_v30 = vsel %vm10152_vm4, %v9042_v9, %v2823_v18  ;;  %v3172_v9 = vld [vmem:[#allocation2 + $0x18] sm:$0xf] }
 0x218   : > { %2873 = vrot.lane.b32.xlu2 %v2782_v39, %s9499_s12  ;;  %v2847_v39 = vrot.slane %v2688_v10, 5 }
 0x219   : > { %2887 = vrot.lane.b32.xlu0 %v2806_v5, %s9499_s12  ;;  %v2846_v5 = vrot.slane %v2844_v27, 4 }
 0x21a   : > { %v2535_v12 = vpop.permute.xlu2 %2534 }
 0x21b   : > { %v2531_v53 = vpop.permute.xlu0 %2530  ;;  %2620 = vst.msk [vmem:[#allocation3 + $0x2c] sm:$0xf] %vm14224_vm8, %v2535_v12  ;;  %v2848_v32 = vsel %vm10152_vm4, %v2846_v5, %v2847_v39  ;;  %v2981_v12 = vld [vmem:[#allocation2 + $0x24] sm:$0xf]  ;;  %v2995_v5 = vld [vmem:[#allocation2 + $0x78] sm:$0xf] }
 0x21c   : > { %2618 = vst.msk [vmem:[#allocation3 + $0x24] sm:$0xf] %vm14224_vm8, %v2531_v53  ;;  %2889 = vrot.lane.b32.xlu1 %v2810_v40, %s9499_s12  ;;  %v2832_v40 = vrot.slane %v2830_v63, 4 }
 0x21e   : > { %v2533_v33 = vpop.permute.xlu1 %2532  ;;  %v2834_v44 = vsel %vm10152_vm4, %v2832_v40, %v2833_v35 }
 0x21f   : > { %2619 = vst.msk [vmem:[#allocation3 + $0x28] sm:$0xf] %vm14224_vm8, %v2533_v33  ;;  %v2984_v33 = vld [vmem:[#allocation2 + $0x34] sm:$0xf] }
 0x220   : > { %2879 = vrot.lane.b32.xlu2 %v2792_v46, %s9499_s12  ;;  %v2982_v46 = vld [vmem:[#allocation2 + $0x28] sm:$0xf] }
 0x221   : > { %2893 = vrot.lane.b32.xlu0 %v2817_v17, %s9499_s12  ;;  %v2686_v17 = vld [vmem:[#allocation2 + $0xc0] sm:$0xe] }
 0x222   : > { %v2541_v57 = vpop.permute.xlu2 %2540  ;;  %v9045_v47 = vrot.slane %v2686_v17, 9 }
 0x223   : > { %v2537_v13 = vpop.permute.xlu0 %2536  ;;  %2623 = vst.msk [vmem:[#allocation3 + $0x38] sm:$0xf] %vm14224_vm8, %v2541_v57 }
 0x224   : > { %2621 = vst.msk [vmem:[#allocation3 + $0x30] sm:$0xf] %vm14224_vm8, %v2537_v13  ;;  %2895 = vrot.lane.b32.xlu1 %v2820_v51, %s9499_s12  ;;  %v2845_v49 = vsel %vm10152_vm4, %v9045_v47, %v2844_v27  ;;  %v2985_v51 = vld [vmem:[#allocation2 + $0x3c] sm:$0xf] }
 0x225   : > { %v2980_v13 = vld [vmem:[#allocation2 + $0x1c] sm:$0xf] }
 0x226   : > { %v2539_v4 = vpop.permute.xlu1 %2538 }
 0x227   : > { %2622 = vst.msk [vmem:[#allocation3 + $0x34] sm:$0xf] %vm14224_vm8, %v2539_v4 }
 0x228   : > { %2885 = vrot.lane.b32.xlu2 %v2803_v60, %s9499_s12  ;;  %v2990_v60 = vld [vmem:[#allocation2 + $0x58] sm:$0xf] }
 0x229   : > { %2899 = vrot.lane.b32.xlu0 %v2827_v34, %s9499_s12 }
 0x22a   : > { %v2547_v7 = vpop.permute.xlu2 %2546 }
 0x22b   : > { %v2543_v21 = vpop.permute.xlu0 %2542  ;;  %2626 = vst.msk [vmem:[#allocation3 + $0x44] sm:$0xf] %vm14224_vm8, %v2547_v7  ;;  %v2989_v7 = vld [vmem:[#allocation2 + $0x54] sm:$0xf] }
 0x22c   : > { %2624 = vst.msk [vmem:[#allocation3 + $0x3c] sm:$0xf] %vm14224_vm8, %v2543_v21  ;;  %2901 = vrot.lane.b32.xlu1 %v2831_v48, %s9499_s12  ;;  %v2994_v48 = vld [vmem:[#allocation2 + $0x70] sm:$0xf]  ;;  %v2996_v21 = vld [vmem:[#allocation2 + $0x7c] sm:$0xf] }
 0x22e   : > { %v2545_v28 = vpop.permute.xlu1 %2544 }
 0x22f   : > { %2625 = vst.msk [vmem:[#allocation3 + $0x40] sm:$0xf] %vm14224_vm8, %v2545_v28  ;;  %v3000_v28 = vld [vmem:[#allocation2 + $0x94] sm:$0xf] }
 0x230   : > { %2891 = vrot.lane.b32.xlu2 %v2813_v41, %s9499_s12 }
 0x231   : > { %2905 = vrot.lane.b32.xlu0 %v2838_v61, %s9499_s12 }
 0x232   : > { %v2553_v36 = vpop.permute.xlu2 %2552 }
 0x233   : > { %v2549_v29 = vpop.permute.xlu0 %2548  ;;  %2629 = vst.msk [vmem:[#allocation3 + $0x50] sm:$0xf] %vm14224_vm8, %v2553_v36 }
 0x234   : > { %2627 = vst.msk [vmem:[#allocation3 + $0x48] sm:$0xf] %vm14224_vm8, %v2549_v29  ;;  %2907 = vrot.lane.b32.xlu1 %v2841_v16, %s9499_s12  ;;  %v3002_v16 = vld [vmem:[#allocation2 + $0xa0] sm:$0xf]  ;;  %v3003_v29 = vld [vmem:[#allocation2 + $0xa8] sm:$0xf] }
 0x236   : > { %v2551_v37 = vpop.permute.xlu1 %2550 }
 0x237   : > { %2628 = vst.msk [vmem:[#allocation3 + $0x4c] sm:$0xf] %vm14224_vm8, %v2551_v37  ;;  %v3224_v37 = vshll.u32 %v3172_v9, 16 }
 0x238   : > { %2897 = vrot.lane.b32.xlu2 %v2824_v30, %s9499_s12  ;;  %v3221_v30 = vshrl.u32 %v3172_v9, 16 }
 0x239   : > { %2911 = vrot.lane.b32.xlu0 %v2848_v32, %s9499_s12 }
 0x23a   : > { %v2559_v53 = vpop.permute.xlu2 %2558  ;;  %v3223_v35 = vrot.slane %v3221_v30, 4  ;;  %v3175_v30 = vld [vmem:[#allocation2 + $0x24] sm:$0xf] }
 0x23b   : > { %v2555_v14 = vpop.permute.xlu0 %2554  ;;  %2632 = vst.msk [vmem:[#allocation3 + $0x5c] sm:$0xf] %vm14224_vm8, %v2559_v53  ;;  %v3173_v53 = vld [vmem:[#allocation2 + $0x1c] sm:$0xf] }
 0x23c   : > { %2630 = vst.msk [vmem:[#allocation3 + $0x54] sm:$0xf] %vm14224_vm8, %v2555_v14  ;;  %3043 = vrot.lane.b32.xlu1 %v2979_v31, %s9500_s13  ;;  %v2998_v31 = vld [vmem:[#allocation2 + $0x88] sm:$0xf]  ;;  %v3226_v14 = vrot.slane %v3224_v37, 5 }
 0x23e   : > { %v2557_v38 = vpop.permute.xlu1 %2556  ;;  %v3227_v47 = vor.u32 %v3226_v14, %v3223_v35  ;;  %v3007_v14 = vld [vmem:[#allocation2 + $0xc0] sm:$0xf] }
 0x23f   : > { %2631 = vst.msk [vmem:[#allocation3 + $0x58] sm:$0xf] %vm14224_vm8, %v2557_v38 }
 0x240   : > { %2903 = vrot.lane.b32.xlu2 %v2834_v44, %s9499_s12  ;;  %v3234_v44 = vshrl.u32 %v3173_v53, 16 }
 0x241   : > { %3047 = vrot.lane.b32.xlu0 %v2981_v12, %s9500_s13  ;;  %v3006_v12 = vld [vmem:[#allocation2 + $0xb8] sm:$0xf] }
 0x242   : > { %v2565_v18 = vpop.permute.xlu2 %2564 }
 0x243   : > { %v2561_v3 = vpop.permute.xlu0 %2560  ;;  %2635 = vst.msk [vmem:[#allocation3 + $0x68] sm:$0xf] %vm14224_vm8, %v2565_v18  ;;  %v3008_v18 = vld [vmem:[#allocation2 + $0xc4] sm:$0xf] }
 0x244   : > { %2633 = vst.msk [vmem:[#allocation3 + $0x60] sm:$0xf] %vm14224_vm8, %v2561_v3  ;;  %3049 = vrot.lane.b32.xlu1 %v2982_v46, %s9500_s13  ;;  %v3176_v46 = vld [vmem:[#allocation2 + $0x28] sm:$0xf]  ;;  %v3230_v3 = vshll.u32 %v3173_v53, 16 }
 0x246   : > { %v2563_v42 = vpop.permute.xlu1 %2562 }
 0x247   : > { %2634 = vst.msk [vmem:[#allocation3 + $0x64] sm:$0xf] %vm14224_vm8, %v2563_v42  ;;  %v3254_v42 = vshll.u32 %v3176_v46, 16 }
 0x248   : > { %2909 = vrot.lane.b32.xlu2 %v2845_v49, %s9499_s12  ;;  %v3236_v49 = vrot.slane %v3234_v44, 4  ;;  %v3248_v44 = vshll.u32 %v3175_v30, 16 }
 0x249   : > { %3053 = vrot.lane.b32.xlu0 %v2984_v33, %s9500_s13  ;;  %v3001_v33 = vld [vmem:[#allocation2 + $0x9c] sm:$0xf] }
 0x24a   : > { %v2571_v54 = vpop.permute.xlu2 %2570 }
 0x24b   : > { %v2567_v25 = vpop.permute.xlu0 %2566  ;;  %2638 = vst.msk [vmem:[#allocation3 + $0x74] sm:$0xf] %vm14224_vm8, %v2571_v54 }
 0x24c   : > { %2636 = vst.msk [vmem:[#allocation3 + $0x6c] sm:$0xf] %vm14224_vm8, %v2567_v25  ;;  %3055 = vrot.lane.b32.xlu1 %v2985_v51, %s9500_s13  ;;  %v3258_v51 = vshrl.u32 %v3176_v46, 16  ;;  %v3178_v25 = vld [vmem:[#allocation2 + $0x30] sm:$0xf] }
 0x24e   : > { %v2569_v57 = vpop.permute.xlu1 %2568 }
 0x24f   : > { %2637 = vst.msk [vmem:[#allocation3 + $0x70] sm:$0xf] %vm14224_vm8, %v2569_v57  ;;  %v3232_v57 = vrot.slane %v3230_v3, 5 }
 0x250   : > { %3045 = vrot.lane.b32.xlu2 %v2980_v13, %s9500_s13  ;;  %v3228_v13 = vrot.slane %v3227_v47, 4 }
 0x251   : > { %3059 = vrot.lane.b32.xlu0 %v2987_v55, %s9500_s13  ;;  %v3174_v55 = vld [vmem:[#allocation2 + $0x20] sm:$0x1] }
 0x252   : > { %v2850_v34 = vpop.permute.xlu2 %2849 }
 0x253   : > { %v2573_v58 = vpop.permute.xlu0 %2572  ;;  %2946 = vst.msk [vmem:[#allocation3] sm:$0xf] %vm14223_vm9, %v2850_v34  ;;  %v3272_v34 = vshll.u32 %v3178_v25, 16 }
 0x254   : > { %2639 = vst.msk [vmem:[#allocation3 + $0x78] sm:$0xf] %vm14224_vm8, %v2573_v58  ;;  %3061 = vrot.lane.b32.xlu1 %v2988_v43, %s9500_s13  ;;  %v3009_v43 = vld [vmem:[#allocation2 + $0xcc] sm:$0xf]  ;;  %v3269_v58 = vshrl.u32 %v3178_v25, 16 }
 0x256   : > { %v2575_v63 = vpop.permute.xlu1 %2574 }
 0x257   : > { %2640 = vst.msk [vmem:[#allocation3 + $0x7c] sm:$0xf] %vm14224_vm8, %v2575_v63  ;;  %v10875_v63 = vrot.slane %v3254_v42, 5  ;;  %v3250_v42 = vrot.slane %v3248_v44, 5 }
 0x258   : > { %3051 = vrot.lane.b32.xlu2 %v2983_v52, %s9500_s13  ;;  %v3240_v52 = vshll.u32 %v3174_v55, 16  ;;  %v3733_v55 = vld [vmem:[#allocation2 + $0x18] sm:$0xe] }
 0x259   : > { %3065 = vrot.lane.b32.xlu0 %v2990_v60, %s9500_s13  ;;  %v3237_v60 = vor.u32 %v3236_v49, %v3232_v57 }
 0x25a   : > { %v2856_v4 = vpop.permute.xlu2 %2855 }
 0x25b   : > { %v2852_v22 = vpop.permute.xlu0 %2851  ;;  %2949 = vst.msk [vmem:[#allocation3 + $0xc] sm:$0xf] %vm14223_vm9, %v2856_v4 }
 0x25c   : > { %2947 = vst.msk [vmem:[#allocation3 + $0x4] sm:$0xf] %vm14223_vm9, %v2852_v22  ;;  %3067 = vrot.lane.b32.xlu1 %v2991_v62, %s9500_s13  ;;  %v3260_v62 = vrot.slane %v3258_v51, 4  ;;  %v3181_v22 = vld [vmem:[#allocation2 + $0x3c] sm:$0xf] }
 0x25d   : > { %v3187_v51 = vld [vmem:[#allocation2 + $0x54] sm:$0xf] }
 0x25e   : > { %v2854_v8 = vpop.permute.xlu1 %2853 }
 0x25f   : > { %2948 = vst.msk [vmem:[#allocation3 + $0x8] sm:$0xf] %vm14223_vm9, %v2854_v8  ;;  %v3233_v8 = vsel %vm9761_vm14, %v3228_v13, %v3232_v57  ;;  %v3734_v57 = vld [vmem:[#allocation2 + $0x1c] sm:$0xf] }
 0x260   : > { %3057 = vrot.lane.b32.xlu2 %v2986_v24, %s9500_s13  ;;  %v3177_v24 = vld [vmem:[#allocation2 + $0x2c] sm:$0x1] }
 0x261   : > { %3071 = vrot.lane.b32.xlu0 %v2993_v59, %s9500_s13 }
 0x262   : > { %v2862_v45 = vpop.permute.xlu2 %2861 }
 0x263   : > { %v2858_v15 = vpop.permute.xlu0 %2857  ;;  %2952 = vst.msk [vmem:[#allocation3 + $0x18] sm:$0xf] %vm14223_vm9, %v2862_v45  ;;  %v3274_v45 = vrot.slane %v3272_v34, 5  ;;  %v3010_v34 = vld [vmem:[#allocation2 + $0xd0] sm:$0xf] }
 0x264   : > { %2950 = vst.msk [vmem:[#allocation3 + $0x10] sm:$0xf] %vm14223_vm9, %v2858_v15  ;;  %3073 = vrot.lane.b32.xlu1 %v2994_v48, %s9500_s13  ;;  %v3004_v48 = vld [vmem:[#allocation2 + $0xac] sm:$0xf]  ;;  %v3271_v15 = vrot.slane %v3269_v58, 4  ;;  %v3344_v58 = vshll.u32 %v3187_v51, 16 }
 0x266   : > { %v2860_v1 = vpop.permute.xlu1 %2859 }
 0x267   : > { %2951 = vst.msk [vmem:[#allocation3 + $0x14] sm:$0xf] %vm14223_vm9, %v2860_v1  ;;  %v3238_v1 = vrot.slane %v3237_v60, 4 }
 0x268   : > { %3063 = vrot.lane.b32.xlu2 %v2989_v7, %s9500_s13  ;;  %v3296_v7 = vshll.u32 %v3181_v22, 16 }
 0x269   : > { %3077 = vrot.lane.b32.xlu0 %v2996_v21, %s9500_s13  ;;  %v3293_v21 = vshrl.u32 %v3181_v22, 16 }
 0x26a   : > { %v2868_v41 = vpop.permute.xlu2 %2867 }
 0x26b   : > { %v2864_v61 = vpop.permute.xlu0 %2863  ;;  %2955 = vst.msk [vmem:[#allocation3 + $0x24] sm:$0xf] %vm14223_vm9, %v2868_v41  ;;  %v3264_v41 = vshll.u32 %v3177_v24, 16  ;;  %v3831_v24 = vrot.slane %v3734_v57, 5  ;;  %v3197_v57 = vld [vmem:[#allocation2 + $0x7c] sm:$0xf] }
 0x26c   : > { %2953 = vst.msk [vmem:[#allocation3 + $0x1c] sm:$0xf] %vm14223_vm9, %v2864_v61  ;;  %3079 = vrot.lane.b32.xlu1 %v2997_v23, %s9500_s13  ;;  %v3242_v23 = vrot.slane %v3240_v52, 5  ;;  %v3261_v61 = vor.u32 %v3260_v62, %v10875_v63 }
 0x26d   : > { %v3266_v9 = vrot.slane %v3264_v41, 5 }
 0x26e   : > { %v2866_v27 = vpop.permute.xlu1 %2865 }
 0x26f   : > { %2954 = vst.msk [vmem:[#allocation3 + $0x20] sm:$0xf] %vm14223_vm9, %v2866_v27  ;;  %v3275_v27 = vor.u32 %v3274_v45, %v3271_v15  ;;  %v3346_v45 = vrot.slane %v3344_v58, 5 }
 0x270   : > { %3069 = vrot.lane.b32.xlu2 %v2992_v26, %s9500_s13 }
 0x271   : > { %3083 = vrot.lane.b32.xlu0 %v2999_v50, %s9500_s13  ;;  %v10883_v50 = vld [vmem:[#allocation2 + $0x34] sm:$0xf] }
 0x272   : > { %v2874_v2 = vpop.permute.xlu2 %2873  ;;  %v3282_v22 = vshrl.u32 %v10883_v50, 16 }
 0x273   : > { %v2870_v10 = vpop.permute.xlu0 %2869  ;;  %2958 = vst.msk [vmem:[#allocation3 + $0x30] sm:$0xf] %vm14223_vm9, %v2874_v2  ;;  %v3295_v2 = vrot.slane %v3293_v21, 4 }
 0x274   : > { %2956 = vst.msk [vmem:[#allocation3 + $0x28] sm:$0xf] %vm14223_vm9, %v2870_v10  ;;  %3085 = vrot.lane.b32.xlu1 %v3000_v28, %s9500_s13  ;;  %v3278_v28 = vshll.u32 %v10883_v50, 16  ;;  %v3182_v10 = vld [vmem:[#allocation2 + $0x40] sm:$0xf] }
 0x275   : > { %v3302_v37 = vshll.u32 %v3182_v10, 16 }
 0x276   : > { %v2872_v39 = vpop.permute.xlu1 %2871 }
 0x277   : > { %2957 = vst.msk [vmem:[#allocation3 + $0x2c] sm:$0xf] %vm14223_vm9, %v2872_v39  ;;  %v3262_v39 = vrot.slane %v3261_v61, 4  ;;  %v3304_v46 = vrot.slane %v3302_v37, 5  ;;  %v3184_v61 = vld [vmem:[#allocation2 + $0x48] sm:$0xf] }
 0x278   : > { %3075 = vrot.lane.b32.xlu2 %v2995_v5, %s9500_s13  ;;  %v3243_v5 = vsel %vm9761_vm14, %v3238_v1, %v3242_v23  ;;  %v3284_v1 = vrot.slane %v3282_v22, 4  ;;  %v3189_v37 = vld [vmem:[#allocation2 + $0x5c] sm:$0x1] }
 0x279   : > { %3089 = vrot.lane.b32.xlu0 %v3002_v16, %s9500_s13  ;;  %v3298_v16 = vrot.slane %v3296_v7, 5  ;;  %v3267_v35 = vsel %vm9761_vm14, %v3262_v39, %v3266_v9  ;;  %v3320_v39 = vshll.u32 %v3184_v61, 16 }
 0x27a   : > { %v2880_v32 = vpop.permute.xlu2 %2879 }
 0x27b   : > { %v2876_v36 = vpop.permute.xlu0 %2875  ;;  %2961 = vst.msk [vmem:[#allocation3 + $0x3c] sm:$0xf] %vm14223_vm9, %v2880_v32 }
 0x27c   : > { %2959 = vst.msk [vmem:[#allocation3 + $0x34] sm:$0xf] %vm14223_vm9, %v2876_v36  ;;  %3091 = vrot.lane.b32.xlu1 %v3003_v29, %s9500_s13  ;;  %v3306_v29 = vshrl.u32 %v3182_v10, 16 }
 0x27e   : > { %v2878_v40 = vpop.permute.xlu1 %2877  ;;  %v3308_v53 = vrot.slane %v3306_v29, 4 }
 0x27f   : > { %2960 = vst.msk [vmem:[#allocation3 + $0x38] sm:$0xf] %vm14223_vm9, %v2878_v40  ;;  %v3299_v40 = vor.u32 %v3298_v16, %v3295_v2 }
 0x280   : > { %3081 = vrot.lane.b32.xlu2 %v2998_v31, %s9500_s13  ;;  %v10894_v31 = vrot.slane %v3278_v28, 5  ;;  %v3833_v28 = vrot.slane %v3831_v24, 4 }
 0x281   : > { %3095 = vrot.lane.b32.xlu0 %v3005_v20, %s9500_s13  ;;  %v3276_v20 = vrot.slane %v3275_v27, 4  ;;  %v3300_v3 = vrot.slane %v3299_v40, 4 }
 0x282   : > { %v2886_v17 = vpop.permute.xlu2 %2885  ;;  %v3285_v29 = vor.u32 %v3284_v1, %v10894_v31  ;;  %v3190_v1 = vld [vmem:[#allocation2 + $0x60] sm:$0xf] }
 0x283   : > { %v2882_v38 = vpop.permute.xlu0 %2881  ;;  %2964 = vst.msk [vmem:[#allocation3 + $0x48] sm:$0xf] %vm14223_vm9, %v2886_v17  ;;  %v3183_v17 = vld [vmem:[#allocation2 + $0x44] sm:$0x1]  ;;  %v3281_v47 = vsel %vm9761_vm14, %v3276_v20, %v10894_v31  ;;  %v3305_v13 = vsel %vm9761_vm14, %v3300_v3, %v3304_v46  ;;  %v3736_v3 = vld [vmem:[#allocation2 + $0x24] sm:$0xe] }
 0x284   : > { %2962 = vst.msk [vmem:[#allocation3 + $0x40] sm:$0xf] %vm14223_vm9, %v2882_v38  ;;  %3097 = vrot.lane.b32.xlu1 %v3006_v12, %s9500_s13  ;;  %v3245_v12 = vshrl.u32 %v3175_v30, 16  ;;  %v3286_v31 = vrot.slane %v3285_v29, 4 }
 0x286   : > { %v2884_v54 = vpop.permute.xlu1 %2883  ;;  %v3247_v49 = vrot.slane %v3245_v12, 4 }
 0x287   : > { %2963 = vst.msk [vmem:[#allocation3 + $0x44] sm:$0xf] %vm14223_vm9, %v2884_v54 }
 0x288   : > { %3087 = vrot.lane.b32.xlu2 %v3001_v33, %s9500_s13  ;;  %v3312_v33 = vshll.u32 %v3183_v17, 16  ;;  %v3251_v62 = vor.u32 %v3250_v42, %v3247_v49  ;;  %v3185_v17 = vld [vmem:[#allocation2 + $0x4c] sm:$0xf]  ;;  %v3737_v49 = vld [vmem:[#allocation2 + $0x28] sm:$0xf] }
 0x289   : > { %3101 = vrot.lane.b32.xlu0 %v3008_v18, %s9500_s13  ;;  %v3309_v18 = vor.u32 %v3308_v53, %v3304_v46  ;;  %v3196_v53 = vld [vmem:[#allocation2 + $0x78] sm:$0xf] }
 0x28a   : > { %v2892_v59 = vpop.permute.xlu2 %2891  ;;  %v3314_v52 = vrot.slane %v3312_v33, 5  ;;  %v3252_v7 = vrot.slane %v3251_v62, 4  ;;  %v3426_v62 = vshrl.u32 %v3197_v57, 16 }
 0x28b   : > { %v2888_v4 = vpop.permute.xlu0 %2887  ;;  %2967 = vst.msk [vmem:[#allocation3 + $0x54] sm:$0xf] %vm14223_vm9, %v2892_v59  ;;  %v3310_v60 = vrot.slane %v3309_v18, 4  ;;  %v9046_v59 = vrot.slane %v3733_v55, 9  ;;  %v3413_v18 = vshrl.u32 %v3196_v53, 16 }
 0x28c   : > { %2965 = vst.msk [vmem:[#allocation3 + $0x4c] sm:$0xf] %vm14223_vm9, %v2888_v4  ;;  %3103 = vrot.lane.b32.xlu1 %v3009_v43, %s9500_s13  ;;  %v3341_v43 = vshrl.u32 %v3187_v51, 16  ;;  %v3257_v9 = vsel %vm9761_vm14, %v3252_v7, %v10875_v63  ;;  %v3322_v63 = vrot.slane %v3320_v39, 5  ;;  %v3326_v51 = vshll.u32 %v3185_v17, 16 }
 0x28d   : > { %v3315_v21 = vsel %vm9761_vm14, %v3310_v60, %v3314_v52  ;;  %v3832_v27 = vsel %vm10152_vm4, %v9046_v59, %v3831_v24  ;;  %v3838_v60 = vrot.slane %v3737_v49, 5  ;;  %v3415_v52 = vrot.slane %v3413_v18, 4  ;;  %v3186_v7 = vld [vmem:[#allocation2 + $0x50] sm:$0x1] }
 0x28e   : > { %v2890_v26 = vpop.permute.xlu1 %2889  ;;  %v3343_v15 = vrot.slane %v3341_v43, 4  ;;  %v3330_v43 = vshrl.u32 %v3185_v17, 16  ;;  %v3422_v24 = vshll.u32 %v3197_v57, 16  ;;  %v3368_v39 = vshll.u32 %v3190_v1, 16  ;;  %v3739_v57 = vld [vmem:[#allocation2 + $0x30] sm:$0xe] }
 0x28f   : > { %2966 = vst.msk [vmem:[#allocation3 + $0x50] sm:$0xf] %vm14223_vm9, %v2890_v26  ;;  %v3180_v26 = vld [vmem:[#allocation2 + $0x38] sm:$0x1] }
 0x290   : > { %3093 = vrot.lane.b32.xlu2 %v3004_v48, %s9500_s13  ;;  %v3188_v48 = vld [vmem:[#allocation2 + $0x58] sm:$0xf]  ;;  %v3347_v16 = vor.u32 %v3346_v45, %v3343_v15  ;;  %v3332_v15 = vrot.slane %v3330_v43, 4  ;;  %v3200_v43 = vld [vmem:[#allocation2 + $0x88] sm:$0xf] }
 0x291   : > { %3604 = vrot.lane.b32.xlu0 %v3233_v8, %s9501_s19  ;;  %v3735_v8 = vld [vmem:[#allocation2 + $0x20] sm:$0x1]  ;;  %v3354_v23 = vshrl.u32 %v3188_v48, 16  ;;  %v3350_v10 = vshll.u32 %v3188_v48, 16  ;;  %v3738_v48 = vld [vmem:[#allocation2 + $0x2c] sm:$0x1] }
 0x292   : > { %v2898_v32 = vpop.permute.xlu2 %2897  ;;  %v3834_v2 = vrot.slane %v3735_v8, 5 }
 0x293   : > { %v2894_v36 = vpop.permute.xlu0 %2893  ;;  %2970 = vst.msk [vmem:[#allocation3 + $0x60] sm:$0xf] %vm14223_vm9, %v2898_v32  ;;  %v3356_v32 = vrot.slane %v3354_v23, 4  ;;  %v3352_v20 = vrot.slane %v3350_v10, 5  ;;  %v3198_v10 = vld [vmem:[#allocation2 + $0x80] sm:$0x1] }
 0x294   : > { %2968 = vst.msk [vmem:[#allocation3 + $0x58] sm:$0xf] %vm14223_vm9, %v2894_v36  ;;  %3606 = vrot.lane.b32.xlu1 %v3243_v5, %s9501_s19  ;;  %v3317_v5 = vshrl.u32 %v3184_v61, 16  ;;  %v3288_v36 = vshll.u32 %v3180_v26, 16  ;;  %v3835_v40 = vsel %vm10152_vm4, %v3833_v28, %v3834_v2  ;;  %v3840_v61 = vrot.slane %v3838_v60, 4 }
 0x295   : > { %v3357_v44 = vor.u32 %v3356_v32, %v3352_v20  ;;  %v3841_v26 = vrot.slane %v3738_v48, 5  ;;  %v3424_v28 = vrot.slane %v3422_v24, 5  ;;  %v3446_v48 = vshll.u32 %v3200_v43, 16 }
 0x296   : > { %v2896_v38 = vpop.permute.xlu1 %2895  ;;  %v3290_v12 = vrot.slane %v3288_v36, 5  ;;  %v3432_v36 = vshll.u32 %v3198_v10, 16 }
 0x297   : > { %2969 = vst.msk [vmem:[#allocation3 + $0x5c] sm:$0xf] %vm14223_vm9, %v2896_v38  ;;  %v3360_v38 = vshll.u32 %v3189_v37, 16  ;;  %v3358_v55 = vrot.slane %v3357_v44, 4  ;;  %v3842_v32 = vsel %vm10152_vm4, %v3840_v61, %v3841_v26  ;;  %v10953_v37 = vld [vmem:[#allocation2 + $0x7c] sm:$0xf] }
 0x298   : > { %3099 = vrot.lane.b32.xlu2 %v3007_v14, %s9500_s13  ;;  %v3319_v14 = vrot.slane %v3317_v5, 4  ;;  %v3365_v5 = vshrl.u32 %v3190_v1, 16  ;;  %v3887_v17 = vrot.slane %v10953_v37, 5 }
 0x299   : > { %3610 = vrot.lane.b32.xlu0 %v3267_v35, %s9501_s19  ;;  %v3348_v35 = vrot.slane %v3347_v16, 4  ;;  %v3336_v16 = vshll.u32 %v3186_v7, 16 }
 0x29a   : > { %v2904_v54 = vpop.permute.xlu2 %2903  ;;  %v3323_v42 = vor.u32 %v3322_v63, %v3319_v14  ;;  %v3370_v14 = vrot.slane %v3368_v39, 5  ;;  %v3199_v63 = vld [vmem:[#allocation2 + $0x84] sm:$0xf] }
 0x29b   : > { %v2900_v25 = vpop.permute.xlu0 %2899  ;;  %2973 = vst.msk [vmem:[#allocation3 + $0x6c] sm:$0xf] %vm14223_vm9, %v2904_v54  ;;  %v3353_v33 = vsel %vm9761_vm14, %v3348_v35, %v3352_v20  ;;  %v3291_v54 = vsel %vm9761_vm14, %v3286_v31, %v3290_v12  ;;  %v3367_v35 = vrot.slane %v3365_v5, 4  ;;  %v3191_v12 = vld [vmem:[#allocation2 + $0x64] sm:$0xf]  ;;  %v3440_v18 = vshll.u32 %v3199_v63, 16 }
 0x29c   : > { %2971 = vst.msk [vmem:[#allocation3 + $0x64] sm:$0xf] %vm14223_vm9, %v2900_v25  ;;  %3612 = vrot.lane.b32.xlu1 %v3281_v47, %s9501_s19  ;;  %v3416_v25 = vshll.u32 %v3196_v53, 16  ;;  %v3324_v22 = vrot.slane %v3323_v42, 4  ;;  %v3374_v42 = vshll.u32 %v3191_v12, 16 }
 0x29d   : > { %v3371_v49 = vor.u32 %v3370_v14, %v3367_v35 }
 0x29e   : > { %v2902_v4 = vpop.permute.xlu1 %2901  ;;  %v3418_v59 = vrot.slane %v3416_v25, 5 }
 0x29f   : > { %2972 = vst.msk [vmem:[#allocation3 + $0x68] sm:$0xf] %vm14223_vm9, %v2902_v4  ;;  %v3328_v4 = vrot.slane %v3326_v51, 5  ;;  %v3378_v51 = vshrl.u32 %v3191_v12, 16 }
 0x2a0   : > { %3105 = vrot.lane.b32.xlu2 %v3010_v34, %s9500_s13  ;;  %v9047_v34 = vrot.slane %v3736_v3, 9  ;;  %v3437_v3 = vshrl.u32 %v3199_v63, 16 }
 0x2a1   : > { %3616 = vrot.lane.b32.xlu0 %v3305_v13, %s9501_s19  ;;  %v3362_v13 = vrot.slane %v3360_v38, 5  ;;  %v3333_v2 = vor.u32 %v3332_v15, %v3328_v4  ;;  %v3434_v38 = vrot.slane %v3432_v36, 5 }
 0x2a2   : > { %v2910_v50 = vpop.permute.xlu2 %2909  ;;  %v3839_v23 = vsel %vm10152_vm4, %v9047_v34, %v3838_v60  ;;  %v3442_v34 = vrot.slane %v3440_v18, 5  ;;  %v3372_v60 = vrot.slane %v3371_v49, 4 }
 0x2a3   : > { %v2906_v41 = vpop.permute.xlu0 %2905  ;;  %2976 = vst.msk [vmem:[#allocation3 + $0x78] sm:$0xf] %vm14223_vm9, %v2910_v50  ;;  %v3363_v8 = vsel %vm9761_vm14, %v3358_v55, %v3362_v13  ;;  %v3329_v50 = vsel %vm9761_vm14, %v3324_v22, %v3328_v4  ;;  %v3334_v20 = vrot.slane %v3333_v2, 4  ;;  %v3380_v22 = vrot.slane %v3378_v51, 4 }
 0x2a4   : > { %2974 = vst.msk [vmem:[#allocation3 + $0x70] sm:$0xf] %vm14223_vm9, %v2906_v41  ;;  %3618 = vrot.lane.b32.xlu1 %v3315_v21, %s9501_s19  ;;  %v3428_v41 = vrot.slane %v3426_v62, 4  ;;  %v10970_v62 = vld [vmem:[#allocation2 + $0x34] sm:$0xf]  ;;  %v3450_v4 = vshrl.u32 %v3200_v43, 16 }
 0x2a6   : > { %v2908_v30 = vpop.permute.xlu1 %2907  ;;  %v3429_v29 = vor.u32 %v3428_v41, %v3424_v28  ;;  %v3201_v41 = vld [vmem:[#allocation2 + $0x8c] sm:$0x1] }
 0x2a7   : > { %2975 = vst.msk [vmem:[#allocation3 + $0x74] sm:$0xf] %vm14223_vm9, %v2908_v30  ;;  %v3456_v10 = vshll.u32 %v3201_v41, 16 }
 0x2a8   : > { %3608 = vrot.lane.b32.xlu2 %v3257_v9, %s9501_s19  ;;  %v3430_v44 = vrot.slane %v3429_v29, 4  ;;  %v3202_v29 = vld [vmem:[#allocation2 + $0x90] sm:$0xf] }
 0x2a9   : > { %3941 = vrot.lane.b32.xlu0 %v3832_v27, %s9502_s20  ;;  %v3419_v27 = vor.u32 %v3418_v59, %v3415_v52  ;;  %v3376_v52 = vrot.slane %v3374_v42, 5 }
 0x2aa   : > { %v3046_v47 = vpop.permute.xlu2 %3045  ;;  %v3435_v13 = vsel %vm9761_vm14, %v3430_v44, %v3434_v38  ;;  %v3757_v44 = vld [vmem:[#allocation2 + $0x78] sm:$0xe] }
 0x2ab   : > { %v2912_v46 = vpop.permute.xlu0 %2911  ;;  %3141 = vst.msk [vmem:[#allocation3 + $0x4] sm:$0xf] %vm14221_vm11, %v3046_v47  ;;  %v3420_v30 = vrot.slane %v3419_v27, 4  ;;  %v3759_v47 = vld [vmem:[#allocation2 + $0x80] sm:$0x1]  ;;  %v3377_v1 = vsel %vm9761_vm14, %v3372_v60, %v3376_v52  ;;  %v3448_v27 = vrot.slane %v3446_v48, 5 }
 0x2ac   : > { %2977 = vst.msk [vmem:[#allocation3 + $0x7c] sm:$0xf] %vm14223_vm9, %v2912_v46  ;;  %3943 = vrot.lane.b32.xlu1 %v3835_v40, %s9502_s20  ;;  %v3338_v40 = vrot.slane %v3336_v16, 5  ;;  %v3890_v55 = vrot.slane %v3759_v47, 5  ;;  %v3203_v47 = vld [vmem:[#allocation2 + $0x94] sm:$0xf] }
 0x2ad   : > { %v3425_v46 = vsel %vm9761_vm14, %v3420_v30, %v3424_v28  ;;  %v9054_v49 = vrot.slane %v3757_v44, 9  ;;  %v3474_v42 = vshrl.u32 %v3203_v47, 16 }
 0x2ae   : > { %v3044_v58 = vpop.permute.xlu1 %3043 }
 0x2af   : > { %3140 = vst.msk [vmem:[#allocation3] sm:$0xf] %vm14221_vm11, %v3044_v58  ;;  %v3439_v58 = vrot.slane %v3437_v3, 4 }
 0x2b0   : > { %3614 = vrot.lane.b32.xlu2 %v3291_v54, %s9501_s19  ;;  %v3889_v54 = vrot.slane %v3887_v17, 4 }
 0x2b1   : > { %3624 = vrot.lane.b32.xlu0 %v3353_v33, %s9501_s19  ;;  %v3339_v33 = vsel %vm9761_vm14, %v3334_v20, %v3338_v40  ;;  %v3443_v7 = vor.u32 %v3442_v34, %v3439_v58  ;;  %v3461_v20 = vshrl.u32 %v3202_v29, 16  ;;  %v3464_v40 = vshll.u32 %v3202_v29, 16  ;;  %v3206_v29 = vld [vmem:[#allocation2 + $0xa0] sm:$0xf] }
 0x2b2   : > { %v3052_v21 = vpop.permute.xlu2 %3051  ;;  %v3891_v15 = vsel %vm10152_vm4, %v3889_v54, %v3890_v55  ;;  %v3742_v54 = vld [vmem:[#allocation2 + $0x3c] sm:$0xe]  ;;  %v11004_v55 = vld [vmem:[#allocation2 + $0x40] sm:$0xf]  ;;  %v3888_v58 = vsel %vm10152_vm4, %v9054_v49, %v3887_v17 }
 0x2b3   : > { %v3048_v45 = vpop.permute.xlu0 %3047  ;;  %3144 = vst.msk [vmem:[#allocation3 + $0x10] sm:$0xf] %vm14221_vm11, %v3052_v21  ;;  %v3845_v21 = vrot.slane %v10970_v62, 5  ;;  %v3444_v28 = vrot.slane %v3443_v7, 4  ;;  %v3463_v3 = vrot.slane %v3461_v20, 4  ;;  %v3466_v18 = vrot.slane %v3464_v40, 5 }
 0x2b4   : > { %3142 = vst.msk [vmem:[#allocation3 + $0x8] sm:$0xf] %vm14221_vm11, %v3048_v45  ;;  %3626 = vrot.lane.b32.xlu1 %v3363_v8, %s9501_s19  ;;  %v3192_v8 = vld [vmem:[#allocation2 + $0x68] sm:$0x1]  ;;  %v9048_v45 = vrot.slane %v3739_v57, 9  ;;  %v9049_v34 = vrot.slane %v3742_v54, 9 }
 0x2b5   : > { %v3384_v61 = vshll.u32 %v3192_v8, 16  ;;  %v3449_v35 = vsel %vm9761_vm14, %v3444_v28, %v3448_v27  ;;  %v3467_v43 = vor.u32 %v3466_v18, %v3463_v3  ;;  %v3852_v60 = vrot.slane %v11004_v55, 5  ;;  %v11025_v7 = vld [vmem:[#allocation2 + $0x94] sm:$0xf]  ;;  %v3207_v18 = vld [vmem:[#allocation2 + $0xa4] sm:$0x1] }
 0x2b6   : > { %v3050_v9 = vpop.permute.xlu1 %3049  ;;  %v3846_v2 = vsel %vm10152_vm4, %v9048_v45, %v3845_v21  ;;  %v3847_v17 = vrot.slane %v3845_v21, 4  ;;  %v3901_v41 = vrot.slane %v11025_v7, 5  ;;  %v3504_v54 = vshll.u32 %v3207_v18, 16  ;;  %v11102_v18 = vld [vmem:[#allocation2 + $0xac] sm:$0xf] }
 0x2b7   : > { %3143 = vst.msk [vmem:[#allocation3 + $0xc] sm:$0xf] %vm14221_vm11, %v3050_v9  ;;  %v3386_v5 = vrot.slane %v3384_v61, 5  ;;  %v10987_v9 = vld [vmem:[#allocation2 + $0x88] sm:$0xf]  ;;  %v3468_v8 = vrot.slane %v3467_v43, 4  ;;  %v3853_v37 = vsel %vm10152_vm4, %v9049_v34, %v3852_v60 }
 0x2b8   : > { %3620 = vrot.lane.b32.xlu2 %v3329_v50, %s9501_s19  ;;  %v3452_v50 = vrot.slane %v3450_v4, 4  ;;  %v3894_v30 = vrot.slane %v10987_v9, 5  ;;  %v11063_v43 = vld [vmem:[#allocation2 + $0xa0] sm:$0xf] }
 0x2b9   : > { %3945 = vrot.lane.b32.xlu0 %v3839_v23, %s9502_s20  ;;  %v3381_v23 = vor.u32 %v3380_v22, %v3376_v52  ;;  %v3204_v52 = vld [vmem:[#allocation2 + $0x98] sm:$0x1]  ;;  %v3476_v22 = vrot.slane %v3474_v42, 4  ;;  %v3744_v42 = vld [vmem:[#allocation2 + $0x44] sm:$0x1] }
 0x2ba   : > { %v3058_v31 = vpop.permute.xlu2 %3057  ;;  %v3453_v39 = vor.u32 %v3452_v50, %v3448_v27  ;;  %v3896_v38 = vrot.slane %v3894_v30, 4  ;;  %v3480_v48 = vshll.u32 %v3204_v52, 16 }
 0x2bb   : > { %v3054_v53 = vpop.permute.xlu0 %3053  ;;  %3147 = vst.msk [vmem:[#allocation3 + $0x1c] sm:$0xf] %vm14221_vm11, %v3058_v31  ;;  %v3382_v16 = vrot.slane %v3381_v23, 4  ;;  %v3762_v31 = vld [vmem:[#allocation2 + $0x8c] sm:$0x1] }
 0x2bc   : > { %3145 = vst.msk [vmem:[#allocation3 + $0x14] sm:$0xf] %vm14221_vm11, %v3054_v53  ;;  %3947 = vrot.lane.b32.xlu1 %v3842_v32, %s9502_s20  ;;  %v3454_v63 = vrot.slane %v3453_v39, 4  ;;  %v3458_v53 = vrot.slane %v3456_v10, 5  ;;  %v3482_v28 = vrot.slane %v3480_v48, 5 }
 0x2bd   : > { %v3387_v14 = vsel %vm9761_vm14, %v3382_v16, %v3386_v5  ;;  %v3765_v10 = vld [vmem:[#allocation2 + $0x98] sm:$0x1]  ;;  %v3760_v16 = vld [vmem:[#allocation2 + $0x84] sm:$0xe]  ;;  %v3903_v5 = vrot.slane %v3901_v41, 4 }
 0x2be   : > { %v3056_v25 = vpop.permute.xlu1 %3055  ;;  %v3904_v39 = vrot.slane %v3765_v10, 5  ;;  %v9055_v40 = vrot.slane %v3760_v16, 9  ;;  %v11080_v10 = vld [vmem:[#allocation2 + $0x58] sm:$0xf] }
 0x2bf   : > { %3146 = vst.msk [vmem:[#allocation3 + $0x18] sm:$0xf] %vm14221_vm11, %v3056_v25 }
 0x2c0   : > { %3622 = vrot.lane.b32.xlu2 %v3339_v33, %s9501_s19  ;;  %v3459_v33 = vsel %vm9761_vm14, %v3454_v63, %v3458_v53  ;;  %v3745_v53 = vld [vmem:[#allocation2 + $0x48] sm:$0xe]  ;;  %v3905_v44 = vsel %vm10152_vm4, %v3903_v5, %v3904_v39 }
 0x2c1   : > { %3636 = vrot.lane.b32.xlu0 %v3425_v46, %s9501_s19  ;;  %v3897_v46 = vrot.slane %v3762_v31, 5  ;;  %v11042_v31 = vld [vmem:[#allocation2 + $0x4c] sm:$0xf] }
 0x2c2   : > { %v3064_v24 = vpop.permute.xlu2 %3063  ;;  %v3859_v3 = vrot.slane %v11042_v31, 5  ;;  %v3915_v31 = vrot.slane %v11102_v18, 5 }
 0x2c3   : > { %v3060_v59 = vpop.permute.xlu0 %3059  ;;  %3150 = vst.msk [vmem:[#allocation3 + $0x28] sm:$0xf] %vm14221_vm11, %v3064_v24  ;;  %v3898_v57 = vsel %vm10152_vm4, %v3896_v38, %v3897_v46  ;;  %v3895_v46 = vsel %vm10152_vm4, %v9055_v40, %v3894_v30  ;;  %v3854_v30 = vrot.slane %v3852_v60, 4  ;;  %v4110_v40 = vld [vmem:[%s9566_s4 + $0x20] sm:$0xf] }
 0x2c4   : > { %3148 = vst.msk [vmem:[#allocation3 + $0x20] sm:$0xf] %vm14221_vm11, %v3060_v59  ;;  %3638 = vrot.lane.b32.xlu1 %v3435_v13, %s9501_s19  ;;  %v3470_v13 = vshll.u32 %v3203_v47, 16  ;;  %v3741_v59 = vld [vmem:[#allocation2 + $0x38] sm:$0x1]  ;;  %v9050_v47 = vrot.slane %v3745_v53, 9 }
 0x2c6   : > { %v3062_v26 = vpop.permute.xlu1 %3061  ;;  %v3472_v24 = vrot.slane %v3470_v13, 5  ;;  %v3860_v9 = vsel %vm10152_vm4, %v9050_v47, %v3859_v3  ;;  %v3855_v13 = vrot.slane %v3744_v42, 5 }
 0x2c7   : > { %3149 = vst.msk [vmem:[#allocation3 + $0x24] sm:$0xf] %vm14221_vm11, %v3062_v26 }
 0x2c8   : > { %3628 = vrot.lane.b32.xlu2 %v3377_v1, %s9501_s19  ;;  %v3477_v45 = vor.u32 %v3476_v22, %v3472_v24  ;;  %v3205_v1 = vld [vmem:[#allocation2 + $0x9c] sm:$0xf]  ;;  %v3473_v62 = vsel %vm9761_vm14, %v3468_v8, %v3472_v24  ;;  %v3908_v22 = vrot.slane %v11063_v43, 5  ;;  %v3856_v60 = vsel %vm10152_vm4, %v3854_v30, %v3855_v13 }
 0x2c9   : > { %3975 = vrot.lane.b32.xlu0 %v3891_v15, %s9502_s20  ;;  %v3848_v15 = vrot.slane %v3741_v59, 5  ;;  %v3485_v50 = vshrl.u32 %v3205_v1, 16  ;;  %v3488_v26 = vshll.u32 %v3205_v1, 16  ;;  %v3506_v8 = vrot.slane %v3504_v54, 5 }
 0x2ca   : > { %v3070_v32 = vpop.permute.xlu2 %3069  ;;  %v3478_v27 = vrot.slane %v3477_v45, 4  ;;  %v3209_v45 = vld [vmem:[#allocation2 + $0xac] sm:$0xf] }
 0x2cb   : > { %v3066_v36 = vpop.permute.xlu0 %3065  ;;  %3153 = vst.msk [vmem:[#allocation3 + $0x34] sm:$0xf] %vm14221_vm11, %v3070_v32  ;;  %v3849_v21 = vsel %vm10152_vm4, %v3847_v17, %v3848_v15  ;;  %v3490_v32 = vrot.slane %v3488_v26, 5  ;;  %v3763_v17 = vld [vmem:[#allocation2 + $0x90] sm:$0xe]  ;;  %v3910_v15 = vrot.slane %v3908_v22, 4 }
 0x2cc   : > { %3151 = vst.msk [vmem:[#allocation3 + $0x2c] sm:$0xf] %vm14221_vm11, %v3066_v36  ;;  %3949 = vrot.lane.b32.xlu1 %v3846_v2, %s9502_s20  ;;  %v3487_v36 = vrot.slane %v3485_v50, 4  ;;  %v3483_v20 = vsel %vm9761_vm14, %v3478_v27, %v3482_v28  ;;  %v9056_v26 = vrot.slane %v3763_v17, 9  ;;  %v3751_v17 = vld [vmem:[#allocation2 + $0x60] sm:$0xe] }
 0x2ce   : > { %v3068_v12 = vpop.permute.xlu1 %3067  ;;  %v3491_v38 = vor.u32 %v3490_v32, %v3487_v36  ;;  %v3866_v36 = vrot.slane %v11080_v10, 5  ;;  %v3210_v32 = vld [vmem:[#allocation2 + $0xb0] sm:$0x1] }
 0x2cf   : > { %3152 = vst.msk [vmem:[#allocation3 + $0x30] sm:$0xf] %vm14221_vm11, %v3068_v12  ;;  %v3494_v12 = vshll.u32 %v3206_v29, 16 }
 0x2d0   : > { %3630 = vrot.lane.b32.xlu2 %v3387_v14, %s9501_s19 }
 0x2d1   : > { %3640 = vrot.lane.b32.xlu0 %v3449_v35, %s9501_s19  ;;  %v3498_v35 = vshrl.u32 %v3206_v29, 16  ;;  %v3902_v29 = vsel %vm10152_vm4, %v9056_v26, %v3901_v41  ;;  %v9052_v26 = vrot.slane %v3751_v17, 9  ;;  %v3754_v17 = vld [vmem:[#allocation2 + $0x6c] sm:$0xe] }
 0x2d2   : > { %v3076_v25 = vpop.permute.xlu2 %3075 }
 0x2d3   : > { %v3072_v51 = vpop.permute.xlu0 %3071  ;;  %3156 = vst.msk [vmem:[#allocation3 + $0x40] sm:$0xf] %vm14221_vm11, %v3076_v25  ;;  %v3492_v25 = vrot.slane %v3491_v38, 4  ;;  %v3861_v38 = vrot.slane %v3859_v3, 4 }
 0x2d4   : > { %3154 = vst.msk [vmem:[#allocation3 + $0x38] sm:$0xf] %vm14221_vm11, %v3072_v51  ;;  %3642 = vrot.lane.b32.xlu1 %v3459_v33, %s9501_s19  ;;  %v3500_v33 = vrot.slane %v3498_v35, 4  ;;  %v3496_v51 = vrot.slane %v3494_v12, 5  ;;  %v3528_v12 = vshll.u32 %v3210_v32, 16 }
 0x2d6   : > { %v3074_v4 = vpop.permute.xlu1 %3073  ;;  %v3497_v55 = vsel %vm9761_vm14, %v3492_v25, %v3496_v51  ;;  %v9335_v25 = vld [vmem:[%s9566_s4 + $0x18] sm:$0xff] }
 0x2d7   : > { %3155 = vst.msk [vmem:[#allocation3 + $0x3c] sm:$0xf] %vm14221_vm11, %v3074_v4 }
 0x2d8   : > { %3973 = vrot.lane.b32.xlu2 %v3888_v58, %s9502_s20  ;;  %v3208_v58 = vld [vmem:[#allocation2 + $0xa8] sm:$0xf] }
 0x2d9   : > { %3979 = vrot.lane.b32.xlu0 %v3898_v57, %s9502_s20  ;;  %v3501_v57 = vor.u32 %v3500_v33, %v3496_v51  ;;  %v3509_v4 = vshrl.u32 %v3208_v58, 16  ;;  %v3512_v59 = vshll.u32 %v3208_v58, 16  ;;  %v3211_v33 = vld [vmem:[#allocation2 + $0xb4] sm:$0xf]  ;;  %v3771_v58 = vld [vmem:[#allocation2 + $0xb0] sm:$0x1] }
 0x2da   : > { %v3082_v61 = vpop.permute.xlu2 %3081  ;;  %v3533_v3 = vshrl.u32 %v3211_v33, 16  ;;  %v3536_v54 = vshll.u32 %v3211_v33, 16 }
 0x2db   : > { %v3078_v23 = vpop.permute.xlu0 %3077  ;;  %3159 = vst.msk [vmem:[#allocation3 + $0x4c] sm:$0xf] %vm14221_vm11, %v3082_v61  ;;  %v3502_v24 = vrot.slane %v3501_v57, 4  ;;  %v3511_v1 = vrot.slane %v3509_v4, 4  ;;  %v3530_v57 = vrot.slane %v3528_v12, 5  ;;  %v9334_v4 = vld [vmem:[%s9566_s4 + $0x10] sm:$0xff] }
 0x2dc   : > { %3157 = vst.msk [vmem:[#allocation3 + $0x44] sm:$0xf] %vm14221_vm11, %v3078_v23  ;;  %3953 = vrot.lane.b32.xlu1 %v3853_v37, %s9502_s20  ;;  %v3768_v37 = vld [vmem:[#allocation2 + $0xa4] sm:$0x1]  ;;  %v3514_v23 = vrot.slane %v3512_v59, 5  ;;  %v3917_v59 = vrot.slane %v3915_v31, 4 }
 0x2dd   : > { %v3507_v61 = vsel %vm9761_vm14, %v3502_v24, %v3506_v8  ;;  %v3911_v50 = vrot.slane %v3768_v37, 5  ;;  %v3535_v24 = vrot.slane %v3533_v3, 4  ;;  %v3538_v8 = vrot.slane %v3536_v54, 5  ;;  %v3769_v3 = vld [vmem:[#allocation2 + $0xa8] sm:$0xe] }
 0x2de   : > { %v3080_v2 = vpop.permute.xlu1 %3079  ;;  %v3515_v5 = vor.u32 %v3514_v23, %v3511_v1 }
 0x2df   : > { %3158 = vst.msk [vmem:[#allocation3 + $0x48] sm:$0xf] %vm14221_vm11, %v3080_v2  ;;  %v3518_v2 = vshll.u32 %v3209_v45, 16  ;;  %v3912_v39 = vsel %vm10152_vm4, %v3910_v15, %v3911_v50  ;;  %v11122_v15 = vld [vmem:[#allocation2 + $0x64] sm:$0xf]  ;;  %v9333_v50 = vld [vmem:[%s9566_s4 + $0x8] sm:$0xff] }
 0x2e0   : > { %3951 = vrot.lane.b32.xlu2 %v3849_v21, %s9502_s20  ;;  %v3522_v21 = vshrl.u32 %v3209_v45, 16  ;;  %v3516_v7 = vrot.slane %v3515_v5, 4 }
 0x2e1   : > { %3644 = vrot.lane.b32.xlu0 %v3473_v62, %s9501_s19  ;;  %v3748_v62 = vld [vmem:[#allocation2 + $0x54] sm:$0xe]  ;;  %v3520_v53 = vrot.slane %v3518_v2, 5 }
 0x2e2   : > { %v3088_v63 = vpop.permute.xlu2 %3087  ;;  %v9051_v16 = vrot.slane %v3748_v62, 9  ;;  %v3873_v62 = vrot.slane %v11122_v15, 5 }
 0x2e3   : > { %v3084_v14 = vpop.permute.xlu0 %3083  ;;  %3162 = vst.msk [vmem:[#allocation3 + $0x58] sm:$0xf] %vm14221_vm11, %v3088_v63  ;;  %v4211_v63 = vunpack.c.l.b16 %v4110_v40 }
 0x2e4   : > { %3160 = vst.msk [vmem:[#allocation3 + $0x50] sm:$0xf] %vm14221_vm11, %v3084_v14  ;;  %3646 = vrot.lane.b32.xlu1 %v3483_v20, %s9501_s19  ;;  %v3524_v20 = vrot.slane %v3522_v21, 4  ;;  %v3747_v14 = vld [vmem:[#allocation2 + $0x50] sm:$0x1]  ;;  %v3539_v21 = vor.u32 %v3538_v8, %v3535_v24  ;;  %v3874_v43 = vsel %vm10152_vm4, %v9052_v26, %v3873_v62 }
 0x2e5   : > { %v4216_v41 = vpack.c.b16 %v4211_v63, %v4211_v63 }
 0x2e6   : > { %v3086_v49 = vpop.permute.xlu1 %3085  ;;  %v3525_v47 = vor.u32 %v3524_v20, %v3520_v53  ;;  %v9332_v20 = vld [vmem:[%s9566_s4] sm:$0xff] }
 0x2e7   : > { %3161 = vst.msk [vmem:[#allocation3 + $0x54] sm:$0xf] %vm14221_vm11, %v3086_v49  ;;  %v4272_v51 = vsel %vm14222_vm12, %v4216_v41, 0 }
 0x2e8   : > { %3977 = vrot.lane.b32.xlu2 %v3895_v46, %s9502_s20  ;;  %v3862_v46 = vrot.slane %v3747_v14, 5  ;;  %4277 = vmatpush.bf16.msra.mxu0 %v4272_v51  ;;  %v3526_v13 = vrot.slane %v3525_v47, 4  ;;  %v3868_v14 = vrot.slane %v3866_v36, 4 }
 0x2e9   : > { %3983 = vrot.lane.b32.xlu0 %v3905_v44, %s9502_s20  ;;  %v3867_v44 = vsel %vm10152_vm4, %v9051_v16, %v3866_v36  ;;  %9356 = vmatpush.bf16.msra.mxu2 %v4272_v51  ;;  %v3193_v16 = vld [vmem:[#allocation2 + $0x6c] sm:$0xf] }
 0x2ea   : > { %v3094_v52 = vpop.permute.xlu2 %3093  ;;  %v3863_v30 = vsel %vm10152_vm4, %v3861_v38, %v3862_v46  ;;  %v3389_v40 = vshrl.u32 %v3193_v16, 16 }
 0x2eb   : > { %v3090_v34 = vpop.permute.xlu0 %3089  ;;  %3165 = vst.msk [vmem:[#allocation3 + $0x64] sm:$0xf] %vm14221_vm11, %v3094_v52  ;;  %v3766_v52 = vld [vmem:[#allocation2 + $0x9c] sm:$0xe] }
 0x2ec   : > { %3163 = vst.msk [vmem:[#allocation3 + $0x5c] sm:$0xf] %vm14221_vm11, %v3090_v34  ;;  %3957 = vrot.lane.b32.xlu1 %v3860_v9, %s9502_s20  ;;  %v3521_v9 = vsel %vm9761_vm14, %v3516_v7, %v3520_v53  ;;  %4278 = vmatpush.bf16.msra.mxu0 %v9335_v25  ;;  %v9057_v37 = vrot.slane %v3766_v52, 9  ;;  %v3391_v10 = vrot.slane %v3389_v40, 4 }
 0x2ed   : > { %9357 = vmatpush.bf16.msra.mxu2 %v9335_v25  ;;  %v3774_v25 = vld [vmem:[#allocation2 + $0xbc] sm:$0x1] }
 0x2ee   : > { %v3092_v48 = vpop.permute.xlu1 %3091 }
 0x2ef   : > { %3164 = vst.msk [vmem:[#allocation3 + $0x60] sm:$0xf] %vm14221_vm11, %v3092_v48  ;;  %v3531_v48 = vsel %vm9761_vm14, %v3526_v13, %v3530_v57 }
 0x2f0   : > { %3955 = vrot.lane.b32.xlu2 %v3856_v60, %s9502_s20  ;;  %v3212_v60 = vld [vmem:[#allocation2 + $0xb8] sm:$0xf]  ;;  %4279 = vmatpush.bf16.msra.mxu0 %v9334_v4 }
 0x2f1   : > { %3648 = vrot.lane.b32.xlu0 %v3497_v55, %s9501_s19  ;;  %v3918_v55 = vrot.slane %v3771_v58, 5  ;;  %v3546_v45 = vshrl.u32 %v3212_v60, 16  ;;  %9358 = vmatpush.bf16.msra.mxu2 %v9334_v4  ;;  %v3925_v58 = vrot.slane %v3774_v25, 5 }
 0x2f2   : > { %v3100_v28 = vpop.permute.xlu2 %3099 }
 0x2f3   : > { %v3096_v27 = vpop.permute.xlu0 %3095  ;;  %3168 = vst.msk [vmem:[#allocation3 + $0x70] sm:$0xf] %vm14221_vm11, %v3100_v28  ;;  %v3909_v28 = vsel %vm10152_vm4, %v9057_v37, %v3908_v22  ;;  %v3548_v2 = vrot.slane %v3546_v45, 4  ;;  %v3540_v22 = vrot.slane %v3539_v21, 4  ;;  %v3755_v45 = vld [vmem:[#allocation2 + $0x70] sm:$0xf] }
 0x2f4   : > { %3166 = vst.msk [vmem:[#allocation3 + $0x68] sm:$0xf] %vm14221_vm11, %v3096_v27  ;;  %3650 = vrot.lane.b32.xlu1 %v3507_v61, %s9501_s19  ;;  %v3542_v61 = vshll.u32 %v3212_v60, 16  ;;  %v3919_v27 = vsel %vm10152_vm4, %v3917_v59, %v3918_v55  ;;  %4280 = vmatpush.bf16.msra.mxu0 %v9333_v50  ;;  %v3880_v26 = vrot.slane %v3755_v45, 5  ;;  %v3875_v21 = vrot.slane %v3873_v62, 4 }
 0x2f5   : > { %9359 = vmatpush.bf16.msra.mxu2 %v9333_v50  ;;  %v3216_v50 = vld [vmem:[#allocation2 + $0xc8] sm:$0x1]  ;;  %v3219_v45 = vld [vmem:[#allocation2 + $0xd4] sm:$0x1] }
 0x2f6   : > { %v3098_v35 = vpop.permute.xlu1 %3097  ;;  %v3544_v32 = vrot.slane %v3542_v61, 5 }
 0x2f7   : > { %3167 = vst.msk [vmem:[#allocation3 + $0x6c] sm:$0xf] %vm14221_vm11, %v3098_v35  ;;  %v3392_v35 = vshll.u32 %v3193_v16, 16 }
 0x2f8   : > { %3981 = vrot.lane.b32.xlu2 %v3902_v29, %s9502_s20  ;;  %v3213_v29 = vld [vmem:[#allocation2 + $0xbc] sm:$0x1]  ;;  %v3549_v53 = vor.u32 %v3548_v2, %v3544_v32  ;;  %4281 = vmatpush.bf16.msra.mxu0 %v9332_v20  ;;  %v3545_v38 = vsel %vm9761_vm14, %v3540_v22, %v3544_v32  ;;  %v3882_v22 = vrot.slane %v3880_v26, 4 }
 0x2f9   : > { %3987 = vrot.lane.b32.xlu0 %v3912_v39, %s9502_s20  ;;  %v3750_v39 = vld [vmem:[#allocation2 + $0x5c] sm:$0x1]  ;;  %v3552_v7 = vshll.u32 %v3213_v29, 16  ;;  %9360 = vmatpush.bf16.msra.mxu2 %v9332_v20  ;;  %v3394_v36 = vrot.slane %v3392_v35, 5  ;;  %v3576_v29 = vshll.u32 %v3216_v50, 16 }
 0x2fa   : > { %v3106_v42 = vpop.permute.xlu2 %3105  ;;  %v3869_v63 = vrot.slane %v3750_v39, 5  ;;  %v3550_v47 = vrot.slane %v3549_v53, 4  ;;  %v5173_v35 = vld [vmem:[#allocation2] sm:$0xf] }
 0x2fb   : > { %v3102_v49 = vpop.permute.xlu0 %3101  ;;  %3171 = vst.msk [vmem:[#allocation3 + $0x7c] sm:$0xf] %vm14221_vm11, %v3106_v42  ;;  %v3554_v33 = vrot.slane %v3552_v7, 5  ;;  %v11155_v42 = vld [vmem:[#allocation2 + $0x70] sm:$0xf]  ;;  %v3395_v54 = vor.u32 %v3394_v36, %v3391_v10  ;;  %v3578_v7 = vrot.slane %v3576_v29, 5 }
 0x2fc   : > { %3169 = vst.msk [vmem:[#allocation3 + $0x74] sm:$0xf] %vm14221_vm11, %v3102_v49  ;;  %3961 = vrot.lane.b32.xlu1 %v3867_v44, %s9502_s20  ;;  %v11145_v44 = vld [vmem:[#allocation2 + $0xb8] sm:$0xf]  ;;  %v3870_v46 = vsel %vm10152_vm4, %v3868_v14, %v3869_v63  ;;  %v3402_v32 = vshrl.u32 %v11155_v42, 16 }
 0x2fd   : > { %v3922_v49 = vrot.slane %v11145_v44, 5  ;;  %v3555_v13 = vsel %vm9761_vm14, %v3550_v47, %v3554_v33  ;;  %v3396_v60 = vrot.slane %v3395_v54, 4  ;;  %v3772_v63 = vld [vmem:[#allocation2 + $0xb4] sm:$0xe]  ;;  %v11200_v33 = vld [vmem:[#allocation2 + $0xc4] sm:$0xf] }
 0x2fe   : > { %v3104_v34 = vpop.permute.xlu1 %3103  ;;  %v9059_v47 = vrot.slane %v3772_v63, 9 }
 0x2ff   : > { %3170 = vst.msk [vmem:[#allocation3 + $0x78] sm:$0xf] %vm14221_vm11, %v3104_v34  ;;  %v3924_v57 = vrot.slane %v3922_v49, 4  ;;  %v9058_v34 = vrot.slane %v3769_v3, 9 }
 0x300   : > { %3959 = vrot.lane.b32.xlu2 %v3863_v30, %s9502_s20  ;;  %v3215_v30 = vld [vmem:[#allocation2 + $0xc4] sm:$0xf] }
 0x301   : > { %3652 = vrot.lane.b32.xlu0 %v3521_v9, %s9501_s19  ;;  %v3398_v9 = vshll.u32 %v11155_v42, 16  ;;  %v3566_v59 = vshll.u32 %v3215_v30, 16  ;;  %v3570_v55 = vshrl.u32 %v3215_v30, 16  ;;  %v3926_v8 = vsel %vm10152_vm4, %v3924_v57, %v3925_v58  ;;  %v3195_v42 = vld [vmem:[#allocation2 + $0x74] sm:$0x1] }
 0x302   : > { %v3609_v23 = vpop.permute.xlu2 %3608  ;;  %v5174_v58 = vld [vmem:[#allocation2 + $0x4] sm:$0xf] }
 0x303   : > { %v3605_v1 = vpop.permute.xlu0 %3604  ;;  %3703 = vst.msk [vmem:[#allocation3 + $0x8] sm:$0xf] %vm14220_vm13, %v3609_v23  ;;  %v11168_v24 = vrot.slane %v3398_v9, 5  ;;  %v11177_v23 = vrot.slane %v3566_v59, 5  ;;  %v3572_v61 = vrot.slane %v3570_v55, 4  ;;  %v3923_v55 = vsel %vm10152_vm4, %v9059_v47, %v3922_v49 }
 0x304   : > { %3701 = vst.msk [vmem:[#allocation3] sm:$0xf] %vm14220_vm13, %v3605_v1  ;;  %3654 = vrot.lane.b32.xlu1 %v3531_v48, %s9501_s19  ;;  %v3916_v48 = vsel %vm10152_vm4, %v9058_v34, %v3915_v31  ;;  %v3753_v1 = vld [vmem:[#allocation2 + $0x68] sm:$0x1]  ;;  %v9053_v31 = vrot.slane %v3754_v17, 9  ;;  %v3929_v34 = vrot.slane %v11200_v33, 5 }
 0x305   : > { %v3401_v18 = vsel %vm9761_vm14, %v3396_v60, %v11168_v24  ;;  %v3573_v39 = vor.u32 %v3572_v61, %v11177_v23  ;;  %v3214_v9 = vld [vmem:[#allocation2 + $0xc0] sm:$0xf] }
 0x306   : > { %v3607_v5 = vpop.permute.xlu1 %3606  ;;  %v3881_v15 = vsel %vm10152_vm4, %v9053_v31, %v3880_v26  ;;  %v3600_v31 = vshll.u32 %v3219_v45, 16 }
 0x307   : > { %3702 = vst.msk [vmem:[#allocation3 + $0x4] sm:$0xf] %vm14220_vm13, %v3607_v5  ;;  %v3756_v5 = vld [vmem:[#allocation2 + $0x74] sm:$0x1]  ;;  %v3574_v53 = vrot.slane %v3573_v39, 4 }
 0x308   : > { %3985 = vrot.lane.b32.xlu2 %v3909_v28, %s9502_s20  ;;  %v3217_v28 = vld [vmem:[#allocation2 + $0xcc] sm:$0xf]  ;;  %v3883_v40 = vrot.slane %v3756_v5, 5  ;;  %v3602_v29 = vrot.slane %v3600_v31, 5 }
 0x309   : > { %3991 = vrot.lane.b32.xlu0 %v3919_v27, %s9502_s20  ;;  %v3876_v27 = vrot.slane %v3753_v1, 5  ;;  %v3581_v20 = vshrl.u32 %v3217_v28, 16  ;;  %v3579_v30 = vsel %vm9761_vm14, %v3574_v53, %v3578_v7 }
 0x30a   : > { %v3615_v41 = vpop.permute.xlu2 %3614 }
 0x30b   : > { %v3611_v12 = vpop.permute.xlu0 %3610  ;;  %3706 = vst.msk [vmem:[#allocation3 + $0x14] sm:$0xf] %vm14220_vm13, %v3615_v41  ;;  %v3877_v62 = vsel %vm10152_vm4, %v3875_v21, %v3876_v27  ;;  %v3404_v41 = vrot.slane %v3402_v32, 4  ;;  %v3583_v10 = vrot.slane %v3581_v20, 4 }
 0x30c   : > { %3704 = vst.msk [vmem:[#allocation3 + $0xc] sm:$0xf] %vm14220_vm13, %v3611_v12  ;;  %3965 = vrot.lane.b32.xlu1 %v3874_v43, %s9502_s20  ;;  %v3584_v43 = vshll.u32 %v3217_v28, 16  ;;  %v3775_v12 = vld [vmem:[#allocation2 + $0xc0] sm:$0xe] }
 0x30e   : > { %v3613_v51 = vpop.permute.xlu1 %3612  ;;  %v3586_v36 = vrot.slane %v3584_v43, 5 }
 0x30f   : > { %3705 = vst.msk [vmem:[#allocation3 + $0x10] sm:$0xf] %vm14220_vm13, %v3613_v51 }
 0x310   : > { %3963 = vrot.lane.b32.xlu2 %v3870_v46, %s9502_s20  ;;  %v3884_v46 = vsel %vm10152_vm4, %v3882_v22, %v3883_v40  ;;  %v3587_v59 = vor.u32 %v3586_v36, %v3583_v10  ;;  %v3931_v10 = vrot.slane %v3929_v34, 4 }
 0x311   : > { %3656 = vrot.lane.b32.xlu0 %v3545_v38, %s9501_s19  ;;  %v3218_v38 = vld [vmem:[#allocation2 + $0xd0] sm:$0xf] }
 0x312   : > { %v3621_v4 = vpop.permute.xlu2 %3620  ;;  %v3594_v51 = vshrl.u32 %v3218_v38, 16  ;;  %v3590_v57 = vshll.u32 %v3218_v38, 16  ;;  %v3777_v38 = vld [vmem:[#allocation2 + $0xc8] sm:$0x1] }
 0x313   : > { %v3617_v52 = vpop.permute.xlu0 %3616  ;;  %3709 = vst.msk [vmem:[#allocation3 + $0x20] sm:$0xf] %vm14220_vm13, %v3621_v4  ;;  %v3408_v4 = vshll.u32 %v3195_v42, 16  ;;  %v3932_v36 = vrot.slane %v3777_v38, 5 }
 0x314   : > { %3707 = vst.msk [vmem:[#allocation3 + $0x18] sm:$0xf] %vm14220_vm13, %v3617_v52  ;;  %3658 = vrot.lane.b32.xlu1 %v3555_v13, %s9501_s19  ;;  %v9060_v13 = vrot.slane %v3775_v12, 9  ;;  %v3405_v52 = vor.u32 %v3404_v41, %v11168_v24  ;;  %v3596_v60 = vrot.slane %v3594_v51, 4  ;;  %v3592_v24 = vrot.slane %v3590_v57, 5 }
 0x315   : > { %v3410_v61 = vrot.slane %v3408_v4, 5  ;;  %v3933_v47 = vsel %vm10152_vm4, %v3931_v10, %v3932_v36  ;;  %v3778_v51 = vld [vmem:[#allocation2 + $0xcc] sm:$0xe] }
 0x316   : > { %v3619_v37 = vpop.permute.xlu1 %3618  ;;  %v3930_v44 = vsel %vm10152_vm4, %v9060_v13, %v3929_v34  ;;  %v3406_v49 = vrot.slane %v3405_v52, 4  ;;  %v3597_v50 = vor.u32 %v3596_v60, %v3592_v24 }
 0x317   : > { %3708 = vst.msk [vmem:[#allocation3 + $0x1c] sm:$0xf] %vm14220_vm13, %v3619_v37 }
 0x318   : > { %3989 = vrot.lane.b32.xlu2 %v3916_v48, %s9502_s20  ;;  %v3560_v48 = vshll.u32 %v3214_v9, 16  ;;  %v3598_v39 = vrot.slane %v3597_v50, 4 }
 0x319   : > { %3995 = vrot.lane.b32.xlu0 %v3926_v8, %s9502_s20  ;;  %v3557_v8 = vshrl.u32 %v3214_v9, 16 }
 0x31a   : > { %v3623_v16 = vpop.permute.xlu2 %3622  ;;  %v3562_v21 = vrot.slane %v3560_v48, 5 }
 0x31b   : > { %v3942_v2 = vpop.permute.xlu0 %3941  ;;  %3710 = vst.msk [vmem:[#allocation3 + $0x24] sm:$0xf] %vm14220_vm13, %v3623_v16  ;;  %v3559_v26 = vrot.slane %v3557_v8, 4  ;;  %v3411_v16 = vsel %vm9761_vm14, %v3406_v49, %v3410_v61 }
 0x31c   : > { %4038 = vst.msk [vmem:[#allocation3] sm:$0xf] %vm14219_vm2, %v3942_v2  ;;  %3632 = vrot.lane.b32.xlu1 %v3401_v18, %s9501_s19  ;;  %v3588_v18 = vrot.slane %v3587_v59, 4  ;;  %v3779_v2 = vld [vmem:[#allocation2 + $0xd0] sm:$0xf] }
 0x31d   : > { %v3563_v32 = vor.u32 %v3562_v21, %v3559_v26  ;;  %v3936_v20 = vrot.slane %v3779_v2, 5 }
 0x31e   : > { %v3944_v14 = vpop.permute.xlu1 %3943  ;;  %v3593_v5 = vsel %vm9761_vm14, %v3588_v18, %v3592_v24 }
 0x31f   : > { %4039 = vst.msk [vmem:[#allocation3 + $0x4] sm:$0xf] %vm14219_vm2, %v3944_v14  ;;  %v3564_v22 = vrot.slane %v3563_v32, 4  ;;  %v3938_v40 = vrot.slane %v3936_v20, 4 }
 0x320   : > { %3967 = vrot.lane.b32.xlu2 %v3877_v62, %s9502_s20  ;;  %v3603_v62 = vsel %vm9761_vm14, %v3598_v39, %v3602_v29 }
 0x321   : > { %3969 = vrot.lane.b32.xlu0 %v3881_v15, %s9502_s20  ;;  %v3780_v15 = vld [vmem:[#allocation2 + $0xd4] sm:$0x1]  ;;  %v3569_v53 = vsel %vm9761_vm14, %v3564_v22, %v11177_v23 }
 0x322   : > { %v3629_v54 = vpop.permute.xlu2 %3628 }
 0x323   : > { %v9064_v25 = vld [vmem:[#allocation3] sm:$0xf]  ;;  %v3625_v3 = vpop.permute.xlu0 %3624  ;;  %3713 = vst.msk [vmem:[#allocation3 + $0x30] sm:$0xf] %vm14220_vm13, %v3629_v54 }
 0x324   : > { %5205 = vst.msk [vmem:[#allocation3] sm:$0xf] %vm14228_vm10, %v5173_v35  ;;  %3971 = vrot.lane.b32.xlu1 %v3884_v46, %s9502_s20  ;;  %v3939_v35 = vrot.slane %v3780_v15, 5 }
 0x325   : > { %3711 = vst.msk [vmem:[#allocation3 + $0x28] sm:$0xf] %vm14220_vm13, %v3625_v3 }
 0x326   : > { %v9316_v37 = vld [vmem:[#allocation3] sm:$0xf0]  ;;  %v3627_v17 = vpop.permute.xlu1 %3626  ;;  %v3940_v7 = vsel %vm10152_vm4, %v3938_v40, %v3939_v35 }
 0x327   : > { %5206 = vst.msk [vmem:[#allocation3 + $0x4] sm:$0xf] %vm14228_vm10, %v5174_v58  ;;  %v9065_v1 = vor.u32 %v9316_v37, %v9064_v25  ;;  %v9061_v25 = vrot.slane %v3778_v51, 9 }
 0x328   : > { %3712 = vst.msk [vmem:[#allocation3 + $0x2c] sm:$0xf] %vm14220_vm13, %v3627_v17  ;;  %3993 = vrot.lane.b32.xlu2 %v3923_v55, %s9502_s20 }
 0x329   : > { %3662 = vrot.lane.b32.xlu0 %v3579_v30, %s9501_s19  ;;  %9142 = vmatmul.msk.bf16.vlgmr.msra.gmra.mxu0 %vm14217_vm3, %v9065_v1  ;;  %v3937_v9 = vsel %vm10152_vm4, %v9061_v25, %v3936_v20 }
 0x32a   : > { %v3631_v28 = vpop.permute.xlu2 %3630 }
 0x32b   : > { %v3946_v27 = vpop.permute.xlu0 %3945  ;;  %3714 = vst.msk [vmem:[#allocation3 + $0x34] sm:$0xf] %vm14220_vm13, %v3631_v28 }
 0x32c   : > { %4040 = vst.msk [vmem:[#allocation3 + $0x8] sm:$0xf] %vm14219_vm2, %v3946_v27  ;;  %3997 = vrot.lane.b32.xlu1 %v3930_v44, %s9502_s20 }
 0x32e   : > { %v3948_v43 = vpop.permute.xlu1 %3947 }
 0x32f   : > { %4041 = vst.msk [vmem:[#allocation3 + $0xc] sm:$0xf] %vm14219_vm2, %v3948_v43 }
 0x330   : > { %3634 = vrot.lane.b32.xlu2 %v3411_v16, %s9501_s19 }
 0x331   : > { %3664 = vrot.lane.b32.xlu0 %v3593_v5, %s9501_s19 }
 0x332   : > { %v3974_v63 = vpop.permute.xlu2 %3973 }
 0x333   : > { %v3637_v14 = vpop.permute.xlu0 %3636 }
 0x334   : > { %3717 = vst.msk [vmem:[#allocation3 + $0x40] sm:$0xf] %vm14220_vm13, %v3637_v14  ;;  %3666 = vrot.lane.b32.xlu1 %v3603_v62, %s9501_s19 }
 0x335   : > { %4054 = vst.msk [vmem:[#allocation3 + $0x40] sm:$0xf] %vm14219_vm2, %v3974_v63 }
 0x336   : > { %v3639_v12 = vpop.permute.xlu1 %3638  ;;  %v9317_v41 = vld [vmem:[#allocation3 + $0x8] sm:$0xff] }
 0x337   : > { %3718 = vst.msk [vmem:[#allocation3 + $0x44] sm:$0xf] %vm14220_vm13, %v3639_v12 }
 0x338   : > { %3660 = vrot.lane.b32.xlu2 %v3569_v53, %s9501_s19 }
 0x339   : > { %4003 = vrot.lane.b32.xlu0 %v3940_v7, %s9502_s20  ;;  %9143 = vmatmul.msk.bf16.gmra.mxu0 %vm14217_vm3, %v9317_v41 }
 0x33a   : > { %v3952_v23 = vpop.permute.xlu2 %3951 }
 0x33b   : > { %v3976_v46 = vpop.permute.xlu0 %3975  ;;  %4043 = vst.msk [vmem:[#allocation3 + $0x14] sm:$0xf] %vm14219_vm2, %v3952_v23 }
 0x33c   : > { %4055 = vst.msk [vmem:[#allocation3 + $0x44] sm:$0xf] %vm14219_vm2, %v3976_v46 }
 0x33e   : > { %v3950_v42 = vpop.permute.xlu1 %3949 }
 0x33f   : > { %4042 = vst.msk [vmem:[#allocation3 + $0x10] sm:$0xf] %vm14219_vm2, %v3950_v42 }
 0x340   : > { %3999 = vrot.lane.b32.xlu2 %v3933_v47, %s9502_s20 }
 0x342   : > { %v3978_v54 = vpop.permute.xlu2 %3977 }
 0x343   : > { %v3641_v3 = vpop.permute.xlu0 %3640  ;;  %v9324_v33 = vld [vmem:[#allocation3 + $0x40] sm:$0xff] }
 0x344   : > { %3719 = vst.msk [vmem:[#allocation3 + $0x48] sm:$0xf] %vm14220_vm13, %v3641_v3  ;;  %9150 = vmatmul.msk.bf16.vlgmr.msra.gmra.mxu2 %vm14217_vm3, %v9324_v33 }
 0x345   : > { %4056 = vst.msk [vmem:[#allocation3 + $0x48] sm:$0xf] %vm14219_vm2, %v3978_v54 }
 0x346   : > { %v3643_v30 = vpop.permute.xlu1 %3642  ;;  %v9318_v13 = vld [vmem:[#allocation3 + $0x10] sm:$0xff] }
 0x347   : > { %3720 = vst.msk [vmem:[#allocation3 + $0x4c] sm:$0xf] %vm14220_vm13, %v3643_v30 }
 0x348   : > { %4001 = vrot.lane.b32.xlu2 %v3937_v9, %s9502_s20 }
 0x349   : > { %9144 = vmatmul.msk.bf16.gmra.mxu0 %vm14217_vm3, %v9318_v13 }
 0x34a   : > { %v3956_v58 = vpop.permute.xlu2 %3955 }
 0x34b   : > { %v3980_v57 = vpop.permute.xlu0 %3979  ;;  %4045 = vst.msk [vmem:[#allocation3 + $0x1c] sm:$0xf] %vm14219_vm2, %v3956_v58 }
 0x34c   : > { %4057 = vst.msk [vmem:[#allocation3 + $0x4c] sm:$0xf] %vm14219_vm2, %v3980_v57 }
 0x34e   : > { %v3954_v34 = vpop.permute.xlu1 %3953 }
 0x34f   : > { %4044 = vst.msk [vmem:[#allocation3 + $0x18] sm:$0xf] %vm14219_vm2, %v3954_v34 }
 0x352   : > { %v3982_v59 = vpop.permute.xlu2 %3981 }
 0x353   : > { %v3645_v52 = vpop.permute.xlu0 %3644  ;;  %v9325_v4 = vld [vmem:[#allocation3 + $0x48] sm:$0xff] }
 0x354   : > { %3721 = vst.msk [vmem:[#allocation3 + $0x50] sm:$0xf] %vm14220_vm13, %v3645_v52  ;;  %9151 = vmatmul.msk.bf16.gmra.mxu2 %vm14217_vm3, %v9325_v4 }
 0x355   : > { %4058 = vst.msk [vmem:[#allocation3 + $0x50] sm:$0xf] %vm14219_vm2, %v3982_v59 }
 0x356   : > { %v3647_v55 = vpop.permute.xlu1 %3646  ;;  %v9319_v60 = vld [vmem:[#allocation3 + $0x18] sm:$0xff] }
 0x357   : > { %3722 = vst.msk [vmem:[#allocation3 + $0x54] sm:$0xf] %vm14220_vm13, %v3647_v55 }
 0x359   : > { %9145 = vmatmul.msk.bf16.gmra.mxu0 %vm14217_vm3, %v9319_v60 }
 0x35a   : > { %v3960_v48 = vpop.permute.xlu2 %3959 }
 0x35b   : > { %v3984_v8 = vpop.permute.xlu0 %3983  ;;  %4047 = vst.msk [vmem:[#allocation3 + $0x24] sm:$0xf] %vm14219_vm2, %v3960_v48 }
 0x35c   : > { %4059 = vst.msk [vmem:[#allocation3 + $0x54] sm:$0xf] %vm14219_vm2, %v3984_v8 }
 0x35e   : > { %v3958_v37 = vpop.permute.xlu1 %3957 }
 0x35f   : > { %4046 = vst.msk [vmem:[#allocation3 + $0x20] sm:$0xf] %vm14219_vm2, %v3958_v37  ;;  %v11329_v37 = vld [vmem:[%s9571_s7] ss:$0 sm:$0xff] }
 0x362   : > { %v3986_v1 = vpop.permute.xlu2 %3985 }
 0x363   : > { %v3649_v17 = vpop.permute.xlu0 %3648  ;;  %v9326_v45 = vld [vmem:[#allocation3 + $0x50] sm:$0xff] }
 0x364   : > { %3723 = vst.msk [vmem:[#allocation3 + $0x58] sm:$0xf] %vm14220_vm13, %v3649_v17  ;;  %9152 = vmatmul.msk.bf16.gmra.mxu2 %vm14217_vm3, %v9326_v45 }
 0x365   : > { %4060 = vst.msk [vmem:[#allocation3 + $0x58] sm:$0xf] %vm14219_vm2, %v3986_v1 }
 0x366   : > { %v3651_v24 = vpop.permute.xlu1 %3650  ;;  %v9320_v44 = vld [vmem:[#allocation3 + $0x20] sm:$0xff] }
 0x367   : > { %3724 = vst.msk [vmem:[#allocation3 + $0x5c] sm:$0xf] %vm14220_vm13, %v3651_v24 }
 0x369   : > { %9146 = vmatmul.msk.bf16.gmra.mxu0 %vm14217_vm3, %v9320_v44 }
 0x36a   : > { %v3964_v61 = vpop.permute.xlu2 %3963 }
 0x36b   : > { %v3988_v49 = vpop.permute.xlu0 %3987  ;;  %4049 = vst.msk [vmem:[#allocation3 + $0x2c] sm:$0xf] %vm14219_vm2, %v3964_v61 }
 0x36c   : > { %4061 = vst.msk [vmem:[#allocation3 + $0x5c] sm:$0xf] %vm14219_vm2, %v3988_v49 }
 0x36e   : > { %v3962_v18 = vpop.permute.xlu1 %3961 }
 0x36f   : > { %4048 = vst.msk [vmem:[#allocation3 + $0x28] sm:$0xf] %vm14219_vm2, %v3962_v18 }
 0x372   : > { %v3990_v26 = vpop.permute.xlu2 %3989 }
 0x373   : > { %v3653_v50 = vpop.permute.xlu0 %3652  ;;  %v9327_v31 = vld [vmem:[#allocation3 + $0x58] sm:$0xff] }
 0x374   : > { %3725 = vst.msk [vmem:[#allocation3 + $0x60] sm:$0xf] %vm14220_vm13, %v3653_v50  ;;  %9153 = vmatmul.msk.bf16.gmra.mxu2 %vm14217_vm3, %v9327_v31 }
 0x375   : > { %4062 = vst.msk [vmem:[#allocation3 + $0x60] sm:$0xf] %vm14219_vm2, %v3990_v26 }
 0x376   : > { %v3655_v21 = vpop.permute.xlu1 %3654  ;;  %v9321_v27 = vld [vmem:[#allocation3 + $0x28] sm:$0xff] }
 0x377   : > { %3726 = vst.msk [vmem:[#allocation3 + $0x64] sm:$0xf] %vm14220_vm13, %v3655_v21 }
 0x379   : > { %9147 = vmatmul.msk.bf16.gmra.mxu0 %vm14217_vm3, %v9321_v27 }
 0x37a   : > { %v3968_v2 = vpop.permute.xlu2 %3967 }
 0x37b   : > { %v3992_v28 = vpop.permute.xlu0 %3991  ;;  %4051 = vst.msk [vmem:[#allocation3 + $0x34] sm:$0xf] %vm14219_vm2, %v3968_v2 }
 0x37c   : > { %4063 = vst.msk [vmem:[#allocation3 + $0x64] sm:$0xf] %vm14219_vm2, %v3992_v28 }
 0x37e   : > { %v3966_v16 = vpop.permute.xlu1 %3965 }
 0x37f   : > { %4050 = vst.msk [vmem:[#allocation3 + $0x30] sm:$0xf] %vm14219_vm2, %v3966_v16 }
 0x382   : > { %v3994_v29 = vpop.permute.xlu2 %3993 }
 0x383   : > { %v3657_v5 = vpop.permute.xlu0 %3656  ;;  %v9328_v39 = vld [vmem:[#allocation3 + $0x60] sm:$0xff] }
 0x384   : > { %3727 = vst.msk [vmem:[#allocation3 + $0x68] sm:$0xf] %vm14220_vm13, %v3657_v5  ;;  %9154 = vmatmul.msk.bf16.gmra.mxu2 %vm14217_vm3, %v9328_v39 }
 0x385   : > { %4064 = vst.msk [vmem:[#allocation3 + $0x68] sm:$0xf] %vm14219_vm2, %v3994_v29 }
 0x386   : > { %v3659_v32 = vpop.permute.xlu1 %3658  ;;  %v9322_v20 = vld [vmem:[#allocation3 + $0x30] sm:$0xff] }
 0x387   : > { %3728 = vst.msk [vmem:[#allocation3 + $0x6c] sm:$0xf] %vm14220_vm13, %v3659_v32 }
 0x389   : > { %9148 = vmatmul.msk.bf16.gmra.mxu0 %vm14217_vm3, %v9322_v20 }
 0x38a   : > { %v3635_v15 = vpop.permute.xlu2 %3634 }
 0x38b   : > { %v3996_v43 = vpop.permute.xlu0 %3995  ;;  %3716 = vst.msk [vmem:[#allocation3 + $0x3c] sm:$0xf] %vm14220_vm13, %v3635_v15 }
 0x38c   : > { %4065 = vst.msk [vmem:[#allocation3 + $0x6c] sm:$0xf] %vm14219_vm2, %v3996_v43 }
 0x38e   : > { %v3633_v62 = vpop.permute.xlu1 %3632 }
 0x38f   : > { %3715 = vst.msk [vmem:[#allocation3 + $0x38] sm:$0xf] %vm14220_vm13, %v3633_v62 }
 0x392   : > { %v3661_v35 = vpop.permute.xlu2 %3660 }
 0x393   : > { %v9329_v22 = vld [vmem:[#allocation3 + $0x68] sm:$0xff]  ;;  %v3970_v40 = vpop.permute.xlu0 %3969  ;;  %3729 = vst.msk [vmem:[#allocation3 + $0x70] sm:$0xf] %vm14220_vm13, %v3661_v35 }
 0x394   : > { %4052 = vst.msk [vmem:[#allocation3 + $0x38] sm:$0xf] %vm14219_vm2, %v3970_v40  ;;  %9155 = vmatmul.msk.bf16.gmra.mxu2 %vm14217_vm3, %v9329_v22 }
 0x396   : > { %v3972_v14 = vpop.permute.xlu1 %3971 }
 0x397   : > { %4053 = vst.msk [vmem:[#allocation3 + $0x3c] sm:$0xf] %vm14219_vm2, %v3972_v14 }
 0x39a   : > { %v4000_v53 = vpop.permute.xlu2 %3999 }
 0x39b   : > { %v3663_v63 = vpop.permute.xlu0 %3662 }
 0x39c   : > { %3730 = vst.msk [vmem:[#allocation3 + $0x74] sm:$0xf] %vm14220_vm13, %v3663_v63 }
 0x39d   : > { %4067 = vst.msk [vmem:[#allocation3 + $0x74] sm:$0xf] %vm14219_vm2, %v4000_v53 }
 0x39e   : > { %v3998_v7 = vpop.permute.xlu1 %3997  ;;  %v9323_v12 = vld [vmem:[#allocation3 + $0x38] sm:$0xff] }
 0x39f   : > { %4066 = vst.msk [vmem:[#allocation3 + $0x70] sm:$0xf] %vm14219_vm2, %v3998_v7  ;;  %9149 = vmatmul.msk.bf16.gmra.mxu0 %vm14217_vm3, %v9323_v12 }
 0x3a2   : > { %v4002_v38 = vpop.permute.xlu2 %4001 }
 0x3a3   : > { %v3665_v41 = vpop.permute.xlu0 %3664 }
 0x3a4   : > { %3731 = vst.msk [vmem:[#allocation3 + $0x78] sm:$0xf] %vm14220_vm13, %v3665_v41 }
 0x3a5   : > { %4068 = vst.msk [vmem:[#allocation3 + $0x78] sm:$0xf] %vm14219_vm2, %v4002_v38 }
 0x3a6   : > { %v4283_v10 = vpop.f32.mrf.mxu0  ;;  %v9330_v36 = vld [vmem:[#allocation3 + $0x70] sm:$0xff]  ;;  %v3667_v46 = vpop.permute.xlu1 %3666 }
 0x3a7   : > { %3732 = vst.msk [vmem:[#allocation3 + $0x7c] sm:$0xf] %vm14220_vm13, %v3667_v46  ;;  %9156 = vmatmul.msk.bf16.gmra.mxu2 %vm14217_vm3, %v9330_v36  ;;  %v11337_v1 = vadd.f32 %v11329_v37, %v4283_v10 }
 0x3ab   : > { %v4004_v23 = vpop.permute.xlu0 %4003 }
 0x3ac   : > { %4069 = vst.msk [vmem:[#allocation3 + $0x7c] sm:$0xf] %vm14219_vm2, %v4004_v23 }
 0x3ae   : > { %v4285_v47 = vpop.f32.mrf.mxu0 }
 0x3af   : > { %v11332_v17 = vadd.f32 %v11329_v37, %v4285_v47 }
 0x3b3   : > { %v9331_v42 = vld [vmem:[#allocation3 + $0x78] sm:$0xff] }
 0x3b6   : > { %v4288_v51 = vpop.f32.mrf.mxu0 }
 0x3b7   : > { %9157 = vmatmul.msk.bf16.gmra.mxu2 %vm14217_vm3, %v9331_v42  ;;  %v11340_v24 = vadd.f32 %v11329_v37, %v4288_v51  ;;  %vm14218_vm3 = vcmask 64512  }
 0x3b8   : > { %v4365_v44 = vsel %vm14218_vm3, %v11332_v17, 0.0  ;;  %v4364_v18 = vsel %vm14218_vm3, %v11337_v1, 0.0 }
 0x3b9   : > { %v4367_v50 = vsel %vm14218_vm3, %v11340_v24, 0.0  ;;  %v4366_v26 = vadd.f32 %v4365_v44, %v4364_v18 }
 0x3bb   : > { %v4368_v28 = vadd.f32 %v4367_v50, %v4366_v26 }
 0x3be   : > { %v4290_v25 = vpop.f32.mrf.mxu0 }
 0x3bf   : > { %v11345_v49 = vadd.f32 %v11329_v37, %v4290_v25 }
 0x3c1   : > { %v4369_v21 = vsel %vm14218_vm3, %v11345_v49, 0.0 }
 0x3c2   : > { %v4370_v39 = vadd.f32 %v4369_v21, %v4368_v28 }
 0x3c6   : > { %v4293_v3 = vpop.f32.mrf.mxu0 }
 0x3c7   : > { %v11312_v33 = vpop.f32.mrf.mxu2  ;;  %v11352_v31 = vadd.f32 %v11329_v37, %v4293_v3 }
 0x3c9   : > { %v4371_v16 = vsel %vm14218_vm3, %v11352_v31, 0.0 }
 0x3ca   : > { %v4372_v20 = vadd.f32 %v4371_v16, %v4370_v39 }
 0x3ce   : > { %v4295_v54 = vpop.f32.mrf.mxu0 }
 0x3cf   : > { %v11314_v9 = vpop.f32.mrf.mxu2  ;;  %v11357_v27 = vadd.f32 %v11329_v37, %v4295_v54 }
 0x3d0   : > { %v11419_v26 = vadd.f32 %v11329_v37, %v11314_v9 }
 0x3d1   : > { %v4373_v29 = vsel %vm14218_vm3, %v11357_v27, 0.0 }
 0x3d2   : > { %v4374_v62 = vadd.f32 %v4373_v29, %v4372_v20  ;;  %v4397_v20 = vsel %vm14218_vm3, %v11419_v26, 0.0 }
 0x3d6   : > { %v4298_v30 = vpop.f32.mrf.mxu0 }
 0x3d7   : > { %v11316_v13 = vpop.f32.mrf.mxu2  ;;  %v11364_v5 = vadd.f32 %v11329_v37, %v4298_v30 }
 0x3d8   : > { %v11427_v39 = vadd.f32 %v11329_v37, %v11316_v13 }
 0x3d9   : > { %v4375_v43 = vsel %vm14218_vm3, %v11364_v5, 0.0 }
 0x3da   : > { %v4376_v14 = vadd.f32 %v4375_v43, %v4374_v62  ;;  %v4399_v62 = vsel %vm14218_vm3, %v11427_v39, 0.0 }
 0x3de   : > { %v4300_v57 = vpop.f32.mrf.mxu0 }
 0x3df   : > { %v11318_v58 = vpop.f32.mrf.mxu2  ;;  %v11369_v32 = vadd.f32 %v11329_v37, %v4300_v57 }
 0x3e0   : > { %v11433_v9 = vadd.f32 %v11329_v37, %v11318_v58 }
 0x3e1   : > { %v4377_v40 = vsel %vm14218_vm3, %v11369_v32, 0.0 }
 0x3e2   : > { %v4378_v7 = vadd.f32 %v4377_v40, %v4376_v14  ;;  %v4401_v13 = vsel %vm14218_vm3, %v11433_v9, 0.0 }
 0x3e6   : > { %v4303_v34 = vpop.f32.mrf.mxu0 }
 0x3e7   : > { %v11320_v52 = vpop.f32.mrf.mxu2  ;;  %v11374_v15 = vadd.f32 %v11329_v37, %v4303_v34 }
 0x3e9   : > { %v4379_v63 = vsel %vm14218_vm3, %v11374_v15, 0.0 }
 0x3ea   : > { %v4380_v10 = vadd.f32 %v4379_v63, %v4378_v7 }
 0x3ee   : > { %v4305_v4 = vpop.f32.mrf.mxu0 }
 0x3ef   : > { %v11322_v59 = vpop.f32.mrf.mxu2  ;;  %v11379_v35 = vadd.f32 %v11329_v37, %v4305_v4 }
 0x3f0   : > { %v11445_v14 = vadd.f32 %v11329_v37, %v11322_v59 }
 0x3f1   : > { %v4381_v41 = vsel %vm14218_vm3, %v11379_v35, 0.0 }
 0x3f2   : > { %v4382_v23 = vadd.f32 %v4381_v41, %v4380_v10 }
 0x3f6   : > { %v4308_v60 = vpop.f32.mrf.mxu0 }
 0x3f7   : > { %v11324_v55 = vpop.f32.mrf.mxu2  ;;  %v11384_v53 = vadd.f32 %v11329_v37, %v4308_v60 }
 0x3f8   : > { %v11451_v7 = vadd.f32 %v11329_v37, %v11324_v55 }
 0x3f9   : > { %v4383_v36 = vsel %vm14218_vm3, %v11384_v53, 0.0 }
 0x3fa   : > { %v4384_v25 = vadd.f32 %v4383_v36, %v4382_v23  ;;  %v4407_v59 = vsel %vm14218_vm3, %v11451_v7, 0.0 }
 0x3fe   : > { %v4310_v48 = vpop.f32.mrf.mxu0 }
 0x3ff   : > { %v11326_v8 = vpop.f32.mrf.mxu2  ;;  %v11389_v38 = vadd.f32 %v11329_v37, %v4310_v48 }
 0x400   : > { %v11457_v36 = vadd.f32 %v11329_v37, %v11326_v8 }
 0x401   : > { %v4385_v42 = vsel %vm14218_vm3, %v11389_v38, 0.0 }
 0x402   : > { %v4386_v30 = vadd.f32 %v4385_v42, %v4384_v25  ;;  %v4409_v55 = vsel %vm14218_vm3, %v11457_v36, 0.0 }
 0x406   : > { %v4313_v61 = vpop.f32.mrf.mxu0 }
 0x407   : > { %v11334_v45 = vpop.f32.mrf.mxu2  ;;  %v11394_v46 = vadd.f32 %v11329_v37, %v4313_v61  ;;  %v11412_v61 = vadd.f32 %v11329_v37, %v11312_v33 }
 0x409   : > { %v4387_v3 = vsel %vm14218_vm3, %v11394_v46, 0.0  ;;  %v4395_v16 = vsel %vm14218_vm3, %v11412_v61, 0.0 }
 0x40a   : > { %v4388_v34 = vadd.f32 %v4387_v3, %v4386_v30 }
 0x40e   : > { %v4315_v22 = vpop.f32.mrf.mxu0 }
 0x40f   : > { %v11359_v2 = vpop.f32.mrf.mxu2  ;;  %v11399_v51 = vadd.f32 %v11329_v37, %v4315_v22  ;;  %v11439_v22 = vadd.f32 %v11329_v37, %v11320_v52  ;;  %v4405_v52 = vsel %vm14218_vm3, %v11445_v14, 0.0 }
 0x410   : > { %v11469_v25 = vadd.f32 %v11329_v37, %v11359_v2 }
 0x411   : > { %v4389_v57 = vsel %vm14218_vm3, %v11399_v51, 0.0  ;;  %v4403_v58 = vsel %vm14218_vm3, %v11439_v22, 0.0 }
 0x412   : > { %v4390_v48 = vadd.f32 %v4389_v57, %v4388_v34 }
 0x417   : > { %v4348_v12 = vpop.f32.mrf.mxu2 }
 0x418   : > { %v11474_v30 = vadd.f32 %v11329_v37, %v4348_v12 }
 0x41a   : > { %v4415_v2 = vsel %vm14218_vm3, %v11474_v30, 0.0 }
 0x41c   : > { %v4318_v47 = vpop.f32.mrf.mxu0 }
 0x41d   : > { %v11404_v54 = vadd.f32 %v11329_v37, %v4318_v47  ;;  %v11463_v47 = vadd.f32 %v11329_v37, %v11334_v45  ;;  %v4413_v45 = vsel %vm14218_vm3, %v11469_v25, 0.0 }
 0x41f   : > { %v4350_v4 = vpop.f32.mrf.mxu2  ;;  %v4391_v60 = vsel %vm14218_vm3, %v11404_v54, 0.0  ;;  %v4411_v8 = vsel %vm14218_vm3, %v11463_v47, 0.0 }
 0x420   : > { %v4392_v50 = vadd.f32 %v4391_v60, %v4390_v48  ;;  %v11479_v60 = vadd.f32 %v11329_v37, %v4350_v4 }
 0x422   : > { %v4417_v12 = vsel %vm14218_vm3, %v11479_v60, 0.0 }
 0x424   : > { %v4320_v44 = vpop.f32.mrf.mxu0 }
 0x425   : > { %v11415_v18 = vadd.f32 %v11329_v37, %v4320_v44 }
 0x427   : > { %v4393_v21 = vsel %vm14218_vm3, %v11415_v18, 0.0 }
 0x428   : > { %v4394_v28 = vadd.f32 %v4393_v21, %v4392_v50 }
 0x42a   : > { %v4396_v33 = vadd.f32 %v4395_v16, %v4394_v28  ;;  %v4353_v29 = vpop.f32.mrf.mxu2 }
 0x42b   : > { %v11484_v44 = vadd.f32 %v11329_v37, %v4353_v29 }
 0x42c   : > { %v4398_v43 = vadd.f32 %v4397_v20, %v4396_v33 }
 0x42d   : > { %v4419_v16 = vsel %vm14218_vm3, %v11484_v44, 0.0 }
 0x42e   : > { %v4400_v40 = vadd.f32 %v4399_v62, %v4398_v43 }
 0x430   : > { %v4402_v63 = vadd.f32 %v4401_v13, %v4400_v40 }
 0x432   : > { %v4404_v41 = vadd.f32 %v4403_v58, %v4402_v63  ;;  %v4355_v10 = vpop.f32.mrf.mxu2 }
 0x433   : > { %v11489_v21 = vadd.f32 %v11329_v37, %v4355_v10 }
 0x434   : > { %v4406_v23 = vadd.f32 %v4405_v52, %v4404_v41 }
 0x435   : > { %v4421_v29 = vsel %vm14218_vm3, %v11489_v21, 0.0 }
 0x436   : > { %v4408_v42 = vadd.f32 %v4407_v59, %v4406_v23 }
 0x438   : > { %v4410_v3 = vadd.f32 %v4409_v55, %v4408_v42 }
 0x43a   : > { %v4412_v57 = vadd.f32 %v4411_v8, %v4410_v3  ;;  %v4358_v34 = vpop.f32.mrf.mxu2 }
 0x43b   : > { %v11494_v4 = vadd.f32 %v11329_v37, %v4358_v34 }
 0x43c   : > { %v4414_v48 = vadd.f32 %v4413_v45, %v4412_v57 }
 0x43d   : > { %v4423_v40 = vsel %vm14218_vm3, %v11494_v4, 0.0 }
 0x43e   : > { %v4416_v50 = vadd.f32 %v4415_v2, %v4414_v48 }
 0x440   : > { %v4418_v28 = vadd.f32 %v4417_v12, %v4416_v50 }
 0x442   : > { %v4420_v33 = vadd.f32 %v4419_v16, %v4418_v28  ;;  %v4360_v20 = vpop.f32.mrf.mxu2 }
 0x443   : > { %v11499_v43 = vadd.f32 %v11329_v37, %v4360_v20 }
 0x444   : > { %v4422_v62 = vadd.f32 %v4421_v29, %v4420_v33 }
 0x445   : > { %v4425_v63 = vsel %vm14218_vm3, %v11499_v43, 0.0 }
 0x446   : > { %v4424_v13 = vadd.f32 %v4423_v40, %v4422_v62 }
 0x448   : > { %v4426_v58 = vadd.f32 %v4425_v63, %v4424_v13 }
 0x44a   : > { %v4427_v41 = vrot.slane %v4426_v58, 4 }
 0x44c   : > { %v4428_v10 = vadd.f32 %v4427_v41, %v4426_v58 }
 0x44e   : > { %v4429_v52 = vrot.slane %v4428_v10, 2 }
 0x450   : > { %v4430_v23 = vadd.f32 %v4429_v52, %v4428_v10 }
 0x452   : > { %v4431_v59 = vrot.slane %v4430_v23, 1 }
 0x454   : > { %v4432_v42 = vadd.f32 %v4431_v59, %v4430_v23 }
 0x456   : > { %v11505_v55 = vmul.f32 0.00390625, %v4432_v42 }
 0x458   : > { %v11509_v37 = vsub.f32 %v11337_v1, %v11505_v55  ;;  %v11513_v3 = vsub.f32 %v11332_v17, %v11505_v55  ;;  %v11517_v8 = vsub.f32 %v11340_v24, %v11505_v55  ;;  %v11521_v57 = vsub.f32 %v11345_v49, %v11505_v55 }
 0x459   : > { %v11529_v1 = vsub.f32 %v11352_v31, %v11505_v55  ;;  %v11535_v24 = vsub.f32 %v11357_v27, %v11505_v55  ;;  %v11543_v12 = vsub.f32 %v11364_v5, %v11505_v55  ;;  %v11550_v27 = vsub.f32 %v11369_v32, %v11505_v55 }
 0x45a   : > { %v4466_v34 = vmul.f32 %v11509_v37, %v11509_v37  ;;  %v4467_v45 = vmul.f32 %v11513_v3, %v11513_v3  ;;  %v4468_v17 = vmul.f32 %v11517_v8, %v11517_v8  ;;  %v4469_v49 = vmul.f32 %v11521_v57, %v11521_v57 }
 0x45b   : > { %v4470_v31 = vmul.f32 %v11529_v1, %v11529_v1  ;;  %v4471_v33 = vmul.f32 %v11535_v24, %v11535_v24  ;;  %v11557_v5 = vsub.f32 %v11374_v15, %v11505_v55  ;;  %v4472_v62 = vmul.f32 %v11543_v12, %v11543_v12 }
 0x45c   : > { %v4498_v48 = vsel %vm14218_vm3, %v4466_v34, 0.0  ;;  %v4499_v2 = vsel %vm14218_vm3, %v4467_v45, 0.0  ;;  %v4501_v28 = vsel %vm14218_vm3, %v4468_v17, 0.0  ;;  %v4503_v20 = vsel %vm14218_vm3, %v4469_v49, 0.0 }
 0x45d   : > { %v4500_v50 = vadd.f32 %v4499_v2, %v4498_v48  ;;  %v4505_v40 = vsel %vm14218_vm3, %v4470_v31, 0.0  ;;  %v11564_v32 = vsub.f32 %v11379_v35, %v11505_v55  ;;  %v4473_v63 = vmul.f32 %v11550_v27, %v11550_v27 }
 0x45e   : > { %v4507_v58 = vsel %vm14218_vm3, %v4471_v33, 0.0  ;;  %v11571_v15 = vsub.f32 %v11384_v53, %v11505_v55  ;;  %v4474_v10 = vmul.f32 %v11557_v5, %v11557_v5  ;;  %v4509_v52 = vsel %vm14218_vm3, %v4472_v62, 0.0 }
 0x45f   : > { %v4502_v16 = vadd.f32 %v4501_v28, %v4500_v50  ;;  %v11578_v35 = vsub.f32 %v11389_v38, %v11505_v55  ;;  %v4475_v59 = vmul.f32 %v11564_v32, %v11564_v32  ;;  %v4511_v42 = vsel %vm14218_vm3, %v4473_v63, 0.0 }
 0x460   : > { %v11585_v53 = vsub.f32 %v11394_v46, %v11505_v55  ;;  %v4476_v45 = vmul.f32 %v11571_v15, %v11571_v15  ;;  %v4513_v17 = vsel %vm14218_vm3, %v4474_v10, 0.0  ;;  %v11592_v38 = vsub.f32 %v11399_v51, %v11505_v55 }
 0x461   : > { %v4504_v29 = vadd.f32 %v4503_v20, %v4502_v16  ;;  %v4477_v48 = vmul.f32 %v11578_v35, %v11578_v35  ;;  %v4515_v2 = vsel %vm14218_vm3, %v4475_v59, 0.0  ;;  %v11599_v46 = vsub.f32 %v11404_v54, %v11505_v55 }
 0x462   : > { %v4478_v31 = vmul.f32 %v11585_v53, %v11585_v53  ;;  %v4517_v28 = vsel %vm14218_vm3, %v4476_v45, 0.0  ;;  %v11606_v51 = vsub.f32 %v11415_v18, %v11505_v55  ;;  %v4479_v33 = vmul.f32 %v11592_v38, %v11592_v38 }
 0x463   : > { %v4506_v13 = vadd.f32 %v4505_v40, %v4504_v29  ;;  %v4519_v20 = vsel %vm14218_vm3, %v4477_v48, 0.0  ;;  %v11613_v54 = vsub.f32 %v11412_v61, %v11505_v55  ;;  %v4480_v62 = vmul.f32 %v11599_v46, %v11599_v46 }
 0x464   : > { %v4521_v40 = vsel %vm14218_vm3, %v4478_v31, 0.0  ;;  %v11620_v18 = vsub.f32 %v11419_v26, %v11505_v55  ;;  %v4481_v63 = vmul.f32 %v11606_v51, %v11606_v51  ;;  %v11627_v61 = vsub.f32 %v11427_v39, %v11505_v55 }
 0x465   : > { %v4508_v41 = vadd.f32 %v4507_v58, %v4506_v13  ;;  %v4523_v58 = vsel %vm14218_vm3, %v4479_v33, 0.0  ;;  %v4482_v10 = vmul.f32 %v11613_v54, %v11613_v54  ;;  %v11634_v26 = vsub.f32 %v11433_v9, %v11505_v55 }
 0x466   : > { %v4483_v59 = vmul.f32 %v11620_v18, %v11620_v18  ;;  %v11641_v39 = vsub.f32 %v11439_v22, %v11505_v55  ;;  %v4484_v45 = vmul.f32 %v11627_v61, %v11627_v61  ;;  %v11648_v9 = vsub.f32 %v11445_v14, %v11505_v55 }
 0x467   : > { %v4510_v23 = vadd.f32 %v4509_v52, %v4508_v41  ;;  %v4525_v52 = vsel %vm14218_vm3, %v4480_v62, 0.0  ;;  %v4485_v48 = vmul.f32 %v11634_v26, %v11634_v26  ;;  %v11655_v22 = vsub.f32 %v11451_v7, %v11505_v55 }
 0x468   : > { %v4486_v31 = vmul.f32 %v11641_v39, %v11641_v39  ;;  %v11662_v14 = vsub.f32 %v11457_v36, %v11505_v55  ;;  %v4487_v33 = vmul.f32 %v11648_v9, %v11648_v9  ;;  %v11669_v7 = vsub.f32 %v11463_v47, %v11505_v55 }
 0x469   : > { %v4512_v34 = vadd.f32 %v4511_v42, %v4510_v23  ;;  %v4527_v42 = vsel %vm14218_vm3, %v4481_v63, 0.0  ;;  %v4488_v62 = vmul.f32 %v11655_v22, %v11655_v22  ;;  %v11676_v36 = vsub.f32 %v11469_v25, %v11505_v55 }
 0x46a   : > { %v4489_v63 = vmul.f32 %v11662_v14, %v11662_v14  ;;  %v11683_v47 = vsub.f32 %v11474_v30, %v11505_v55  ;;  %v11690_v25 = vsub.f32 %v11479_v60, %v11505_v55  ;;  %v11697_v30 = vsub.f32 %v11484_v44, %v11505_v55 }
 0x46b   : > { %v4514_v49 = vadd.f32 %v4513_v17, %v4512_v34  ;;  %v4529_v17 = vsel %vm14218_vm3, %v4482_v10, 0.0  ;;  %v4490_v10 = vmul.f32 %v11669_v7, %v11669_v7  ;;  %v11704_v60 = vsub.f32 %v11489_v21, %v11505_v55 }
 0x46c   : > { %v4464_v44 = vsub.f32 %v11494_v4, %v11505_v55 }
 0x46d   : > { %v4516_v50 = vadd.f32 %v4515_v2, %v4514_v49  ;;  %v4531_v2 = vsel %vm14218_vm3, %v4483_v59, 0.0  ;;  %v4491_v59 = vmul.f32 %v11676_v36, %v11676_v36  ;;  %v4495_v21 = vmul.f32 %v11704_v60, %v11704_v60 }
 0x46f   : > { %v4518_v16 = vadd.f32 %v4517_v28, %v4516_v50  ;;  %v4533_v28 = vsel %vm14218_vm3, %v4484_v45, 0.0  ;;  %v4492_v45 = vmul.f32 %v11683_v47, %v11683_v47 }
 0x471   : > { %v4520_v29 = vadd.f32 %v4519_v20, %v4518_v16  ;;  %v4535_v20 = vsel %vm14218_vm3, %v4485_v48, 0.0  ;;  %v4493_v48 = vmul.f32 %v11690_v25, %v11690_v25 }
 0x473   : > { %v4522_v13 = vadd.f32 %v4521_v40, %v4520_v29  ;;  %v4537_v40 = vsel %vm14218_vm3, %v4486_v31, 0.0  ;;  %v4494_v31 = vmul.f32 %v11697_v30, %v11697_v30 }
 0x475   : > { %v4524_v41 = vadd.f32 %v4523_v58, %v4522_v13  ;;  %v4539_v58 = vsel %vm14218_vm3, %v4487_v33, 0.0  ;;  %v4465_v33 = vsub.f32 %v11499_v43, %v11505_v55 }
 0x477   : > { %v4526_v23 = vadd.f32 %v4525_v52, %v4524_v41  ;;  %v4541_v52 = vsel %vm14218_vm3, %v4488_v62, 0.0  ;;  %v4496_v62 = vmul.f32 %v4464_v44, %v4464_v44  ;;  %v4497_v4 = vmul.f32 %v4465_v33, %v4465_v33 }
 0x479   : > { %v4528_v34 = vadd.f32 %v4527_v42, %v4526_v23  ;;  %v4543_v42 = vsel %vm14218_vm3, %v4489_v63, 0.0  ;;  %v4555_v63 = vsel %vm14218_vm3, %v4495_v21, 0.0 }
 0x47b   : > { %v4530_v49 = vadd.f32 %v4529_v17, %v4528_v34  ;;  %v4545_v17 = vsel %vm14218_vm3, %v4490_v10, 0.0 }
 0x47d   : > { %v4532_v50 = vadd.f32 %v4531_v2, %v4530_v49  ;;  %v4547_v2 = vsel %vm14218_vm3, %v4491_v59, 0.0 }
 0x47f   : > { %v4534_v16 = vadd.f32 %v4533_v28, %v4532_v50  ;;  %v4549_v28 = vsel %vm14218_vm3, %v4492_v45, 0.0 }
 0x481   : > { %v4536_v29 = vadd.f32 %v4535_v20, %v4534_v16  ;;  %v4551_v20 = vsel %vm14218_vm3, %v4493_v48, 0.0  ;;  %v5238_v48 = vld [vmem:[#allocation2 + $0x4] sm:$0xf] }
 0x483   : > { %v4538_v13 = vadd.f32 %v4537_v40, %v4536_v29  ;;  %v4553_v40 = vsel %vm14218_vm3, %v4494_v31, 0.0  ;;  %v5299_v31 = vshrl.u32 %v5238_v48, 16 }
 0x485   : > { %v4540_v41 = vadd.f32 %v4539_v58, %v4538_v13  ;;  %v5301_v21 = vrot.slane %v5299_v31, 4 }
 0x487   : > { %v4542_v23 = vadd.f32 %v4541_v52, %v4540_v41  ;;  %v4557_v41 = vsel %vm14218_vm3, %v4496_v62, 0.0  ;;  %v4559_v52 = vsel %vm14218_vm3, %v4497_v4, 0.0 }
 0x489   : > { %v4544_v34 = vadd.f32 %v4543_v42, %v4542_v23 }
 0x48b   : > { %v4546_v49 = vadd.f32 %v4545_v17, %v4544_v34 }
 0x48d   : > { %v4548_v50 = vadd.f32 %v4547_v2, %v4546_v49  ;;  %v5239_v2 = vld [vmem:[#allocation2 + $0x8] sm:$0x1] }
 0x48f   : > { %v4550_v16 = vadd.f32 %v4549_v28, %v4548_v50  ;;  %v5295_v50 = vshll.u32 %v5238_v48, 16  ;;  %v5305_v28 = vshll.u32 %v5239_v2, 16 }
 0x491   : > { %v4552_v29 = vadd.f32 %v4551_v20, %v4550_v16  ;;  %v11723_v16 = vrot.slane %v5295_v50, 5  ;;  %v5307_v62 = vrot.slane %v5305_v28, 5  ;;  %v5168_v28 = vld [vmem:[#allocation2 + $0xc8] sm:$0x1] }
 0x493   : > { %v4554_v13 = vadd.f32 %v4553_v40, %v4552_v29  ;;  %v5302_v29 = vor.u32 %v5301_v21, %v11723_v16 }
 0x495   : > { %v4556_v58 = vadd.f32 %v4555_v63, %v4554_v13  ;;  %v5303_v13 = vrot.slane %v5302_v29, 4 }
 0x497   : > { %v4558_v10 = vadd.f32 %v4557_v41, %v4556_v58  ;;  %v5308_v63 = vsel %vm9761_vm14, %v5303_v13, %v5307_v62 }
 0x498   : > { %5671 = vrot.lane.b32.xlu2 %v5308_v63, %s9495_s8 }
 0x499   : > { %v4560_v43 = vadd.f32 %v4559_v52, %v4558_v10 }
 0x49b   : > { %v4561_v55 = vrot.slane %v4560_v43, 4 }
 0x49d   : > { %v4562_v23 = vadd.f32 %v4561_v55, %v4560_v43 }
 0x49f   : > { %v4563_v59 = vrot.slane %v4562_v23, 2 }
 0x4a1   : > { %v4564_v42 = vadd.f32 %v4563_v59, %v4562_v23 }
 0x4a3   : > { %v4565_v34 = vrot.slane %v4564_v42, 1 }
 0x4a5   : > { %v4566_v45 = vadd.f32 %v4565_v34, %v4564_v42 }
 0x4a7   : > { %v4567_v17 = vmul.f32 0.00390625, %v4566_v45 }
 0x4a9   : > { %v4568_v49 = vadd.f32 1e-05, %v4567_v17 }
 0x4ab   : > { %9418 = vrsqrt.f32 %v4568_v49  ;;  %vm4575_vm2 = vweird.f32 %v4568_v49 }
 0x4b1   : > { %v9419_v20 = vpop.eup %9418 }
 0x4b2   : > { %v4570_v40 = vmul.f32 %v9419_v20, %v4568_v49  ;;  %vm4576_vm3 = vweird.f32 %v9419_v20 }
 0x4b3   : > { %vm4577_vm13 = vmor %vm4575_vm2, %vm4576_vm3 }
 0x4b4   : > { %v4571_v4 = vmul.f32 %v9419_v20, %v4570_v40 }
 0x4b6   : > { %v4572_v58 = vmul.f32 0.5, %v4571_v4 }
 0x4b8   : > { %v4573_v41 = vsub.f32 1.5, %v4572_v58 }
 0x4ba   : > { %v4574_v10 = vmul.f32 %v9419_v20, %v4573_v41 }
 0x4bc   : > { %v11729_v52 = vsel %vm4577_vm13, %v9419_v20, %v4574_v10  ;;  %v11739_v20 = vld [vmem:[#allocation2] sm:$0xf] }
 0x4bd   : > { %v4609_v43 = vmul.f32 %v11729_v52, %v4464_v44  ;;  %v4610_v55 = vmul.f32 %v11729_v52, %v4465_v33  ;;  %v11747_v40 = vmul.f32 %v11729_v52, %v11509_v37  ;;  %v5286_v13 = vshrl.u32 %v11739_v20, 16 }
 0x4be   : > { %v5289_v4 = vshll.u32 %v11739_v20, 16  ;;  %v11754_v63 = vmul.f32 %v11729_v52, %v11513_v3  ;;  %v11758_v58 = vmul.f32 %v11729_v52, %v11517_v8  ;;  %v11762_v41 = vmul.f32 %v11729_v52, %v11521_v57 }
 0x4bf   : > { %vm4641_vm11 = vcmp.gt.f32.partialorder %v4609_v43, 0.0  ;;  %vm4642_vm12 = vcmp.gt.f32.partialorder %v4610_v55, 0.0  ;;  %v4673_v23 = vmul.f32 0.2, %v4609_v43  ;;  %v4674_v59 = vmul.f32 0.2, %v4610_v55 }
 0x4c0   : > { %v11766_v37 = vmul.f32 %v11729_v52, %v11529_v1  ;;  %v11770_v10 = vmul.f32 %v11729_v52, %v11535_v24  ;;  %v11774_v3 = vmul.f32 %v11729_v52, %v11543_v12  ;;  %v11778_v8 = vmul.f32 %v11729_v52, %v11550_v27 }
 0x4c1   : > { %v4705_v42 = vsel %vm4641_vm11, %v4609_v43, %v4673_v23  ;;  %v4706_v34 = vsel %vm4642_vm12, %v4610_v55, %v4674_v59  ;;  %v11782_v57 = vmul.f32 %v11729_v52, %v11557_v5  ;;  %v11786_v1 = vmul.f32 %v11729_v52, %v11564_v32 }
 0x4c2   : > { %v11733_v45 = vpack.c.bf16 %v4705_v42, %v4705_v42  ;;  %v4738_v17 = vpack.c.bf16 %v4706_v34, %v4706_v34  ;;  %v11790_v24 = vmul.f32 %v11729_v52, %v11571_v15  ;;  %v11794_v12 = vmul.f32 %v11729_v52, %v11578_v35 }
 0x4c3   : > { %v11798_v27 = vmul.f32 %v11729_v52, %v11585_v53  ;;  %v11802_v5 = vmul.f32 %v11729_v52, %v11592_v38  ;;  %v11806_v32 = vmul.f32 %v11729_v52, %v11599_v46  ;;  %v11810_v15 = vmul.f32 %v11729_v52, %v11606_v51 }
 0x4c4   : > { %v4995_v48 = vshrl.u32 %v11733_v45, 16  ;;  %v5003_v2 = vshrl.u32 %v4738_v17, 16  ;;  %v5006_v31 = vshll.u32 %v4738_v17, 16  ;;  %v11814_v35 = vmul.f32 %v11729_v52, %v11613_v54 }
 0x4c5   : > { %v11818_v53 = vmul.f32 %v11729_v52, %v11620_v18  ;;  %v11822_v38 = vmul.f32 %v11729_v52, %v11627_v61  ;;  %v11826_v46 = vmul.f32 %v11729_v52, %v11634_v26  ;;  %v11830_v51 = vmul.f32 %v11729_v52, %v11641_v39 }
 0x4c6   : > { %v11736_v49 = vrot.slane %v4995_v48, 7  ;;  %v5005_v50 = vrot.slane %v5003_v2, 7  ;;  %v11834_v54 = vmul.f32 %v11729_v52, %v11648_v9  ;;  %v11838_v18 = vmul.f32 %v11729_v52, %v11655_v22 }
 0x4c7   : > { %v11842_v61 = vmul.f32 %v11729_v52, %v11662_v14  ;;  %v11846_v26 = vmul.f32 %v11729_v52, %v11669_v7  ;;  %v11850_v39 = vmul.f32 %v11729_v52, %v11676_v36  ;;  %v11854_v9 = vmul.f32 %v11729_v52, %v11683_v47 }
 0x4c8   : > { %v5001_v44 = vrot.slane %v11736_v49, 4  ;;  %v5008_v33 = vor.u32 %v5006_v31, %v5005_v50  ;;  %v5010_v21 = vrot.slane %v5005_v50, 4  ;;  %v11858_v22 = vmul.f32 %v11729_v52, %v11690_v25 }
 0x4c9   : > { %v11862_v14 = vmul.f32 %v11729_v52, %v11697_v30  ;;  %v4998_v43 = vshll.u32 %v11733_v45, 16  ;;  %vm4611_vm11 = vcmp.gt.f32.partialorder %v11747_v40, 0.0  ;;  %vm4612_vm12 = vcmp.gt.f32.partialorder %v11754_v63, 0.0 }
 0x4ca   : > { %v5009_v29 = vsel %vm9767_vm15, %v5001_v44, %v5008_v33  ;;  %v5169_v62 = vsel %vm9783_vm1, %v5010_v21, %v5168_v28  ;;  %vm4613_vm13 = vcmp.gt.f32.partialorder %v11758_v58, 0.0  ;;  %vm4614_vm2 = vcmp.gt.f32.partialorder %v11762_v41, 0.0 }
 0x4cb   : > { %5170 = vst [vmem:[#allocation2 + $0xc8] sm:$0x1] %v5169_v62  ;;  %vm4615_vm3 = vcmp.gt.f32.partialorder %v11766_v37, 0.0  ;;  %v4643_v7 = vmul.f32 0.2, %v11747_v40  ;;  %v11878_v47 = vmul.f32 %v11729_v52, %v11704_v60  ;;  %v11892_v59 = vor.u32 %v4998_v43, %v11736_v49 }
 0x4cc   : > { %5167 = vst.msk [vmem:[#allocation2 + $0xc4] sm:$0xf] %vm14228_vm10, %v5009_v29  ;;  %v4644_v36 = vmul.f32 0.2, %v11754_v63  ;;  %v4645_v25 = vmul.f32 0.2, %v11758_v58 }
 0x4cd   : > { %v4646_v30 = vmul.f32 0.2, %v11762_v41  ;;  %v4647_v55 = vmul.f32 0.2, %v11766_v37  ;;  %vm4621_vm10 = vcmp.gt.f32.partialorder %v11790_v24, 0.0  ;;  %vm4626_vm9 = vcmp.gt.f32.partialorder %v11810_v15, 0.0 }
 0x4ce   : > { %v4648_v23 = vmul.f32 0.2, %v11770_v10  ;;  %v4649_v60 = vmul.f32 0.2, %v11774_v3  ;;  %v4650_v52 = vmul.f32 0.2, %v11778_v8  ;;  %v11902_v17 = vsel %vm4611_vm11, %v11747_v40, %v4643_v7 }
 0x4cf   : > { %v4651_v42 = vmul.f32 0.2, %v11782_v57  ;;  %v4652_v34 = vmul.f32 0.2, %v11786_v1  ;;  %v4653_v45 = vmul.f32 0.2, %v11790_v24  ;;  %v11914_v50 = vsel %vm4612_vm12, %v11754_v63, %v4644_v36 }
 0x4d0   : > { %vm4627_vm8 = vcmp.gt.f32.partialorder %v11814_v35, 0.0  ;;  %vm4628_vm6 = vcmp.gt.f32.partialorder %v11818_v53, 0.0  ;;  %v4654_v48 = vmul.f32 0.2, %v11794_v12  ;;  %v4655_v2 = vmul.f32 0.2, %v11798_v27 }
 0x4d1   : > { %v4656_v49 = vmul.f32 0.2, %v11802_v5  ;;  %v4657_v31 = vmul.f32 0.2, %v11806_v32  ;;  %v5288_v28 = vrot.slane %v5286_v13, 4  ;;  %v5291_v44 = vrot.slane %v5289_v4, 5 }
 0x4d2   : > { %v4677_v33 = vsel %vm4613_vm13, %v11758_v58, %v4645_v25  ;;  %vm4631_vm11 = vcmp.gt.f32.partialorder %v11830_v51, 0.0  ;;  %v4658_v21 = vmul.f32 0.2, %v11810_v15  ;;  %v4659_v29 = vmul.f32 0.2, %v11814_v35 }
 0x4d3   : > { %v4660_v62 = vmul.f32 0.2, %v11818_v53  ;;  %v4678_v20 = vsel %vm4614_vm2, %v11762_v41, %v4646_v30  ;;  %v5164_v40 = vld [vmem:[#allocation2 + $0xc0] sm:$0xf]  ;;  %v4661_v13 = vmul.f32 0.2, %v11822_v38  ;;  %v5292_v58 = vor.u32 %v5291_v44, %v5288_v28 }
 0x4d4   : > { %v4662_v4 = vmul.f32 0.2, %v11826_v46  ;;  %v4663_v63 = vmul.f32 0.2, %v11830_v51  ;;  %vm4635_vm13 = vcmp.gt.f32.partialorder %v11846_v26, 0.0  ;;  %v4679_v36 = vsel %vm4615_vm3, %v11766_v37, %v4647_v55 }
 0x4d5   : > { %v4664_v43 = vmul.f32 0.2, %v11834_v54  ;;  %v4665_v7 = vmul.f32 0.2, %v11838_v18  ;;  %v4666_v41 = vmul.f32 0.2, %v11842_v61  ;;  %v4709_v0 = vpack.c.bf16 %v4677_v33, %v4677_v33 }
 0x4d6   : > { %vm4638_vm2 = vcmp.gt.f32.partialorder %v11858_v22, 0.0  ;;  %v4667_v25 = vmul.f32 0.2, %v11846_v26  ;;  %v4668_v30 = vmul.f32 0.2, %v11850_v39  ;;  %v5293_v28 = vrot.slane %v5292_v58, 4 }
 0x4d7   : > { %vm14263_vm7 = vcmp.gt.f32.partialorder %v11770_v10, 0.0  ;;  %v4669_v56 = vmul.f32 0.2, %v11854_v9  ;;  %v4670_v19 = vmul.f32 0.2, %v11858_v22  ;;  %vm14264_vm3 = vcmp.gt.f32.partialorder %v11774_v3, 0.0 }
 0x4d8   : > { %v4680_v44 = vsel %vm14263_vm7, %v11770_v10, %v4648_v23  ;;  %v4671_v37 = vmul.f32 0.2, %v11862_v14  ;;  %v4681_v55 = vsel %vm14264_vm3, %v11774_v3, %v4649_v60  ;;  %v4672_v6 = vmul.f32 0.2, %v11878_v47 }
 0x4d9   : > { %v5298_v58 = vsel %vm9761_vm14, %v5293_v28, %v11723_v16  ;;  %vm14265_vm7 = vcmp.gt.f32.partialorder %v11778_v8, 0.0  ;;  %vm14266_vm12 = vcmp.gt.f32.partialorder %v11782_v57, 0.0  ;;  %vm14267_vm5 = vcmp.gt.f32.partialorder %v11786_v1, 0.0 }
 0x4da   : > { %v4682_v10 = vsel %vm14265_vm7, %v11778_v8, %v4650_v52  ;;  %v4683_v23 = vsel %vm14266_vm12, %v11782_v57, %v4651_v42  ;;  %5669 = vrot.lane.b32.xlu1 %v5298_v58, %s9495_s8  ;;  %v4684_v3 = vsel %vm14267_vm5, %v11786_v1, %v4652_v34  ;;  %v5165_v60 = vsel %vm9773_vm0, %v11892_v59, %v5164_v40 }
 0x4db   : > { %v4710_v16 = vpack.c.bf16 %v4678_v20, %v4678_v20  ;;  %v4685_v8 = vsel %vm4621_vm10, %v11790_v24, %v4653_v45  ;;  %vm14268_vm3 = vcmp.gt.f32.partialorder %v11794_v12, 0.0  ;;  %vm14269_vm12 = vcmp.gt.f32.partialorder %v11798_v27, 0.0  ;;  %5166 = vst [vmem:[#allocation2 + $0xc0] sm:$0xf] %v5165_v60 }
 0x4dc   : > { %v4686_v57 = vsel %vm14268_vm3, %v11794_v12, %v4654_v48  ;;  %v4687_v52 = vsel %vm14269_vm12, %v11798_v27, %v4655_v2  ;;  %vm14270_vm5 = vcmp.gt.f32.partialorder %v11802_v5, 0.0  ;;  %vm14271_vm7 = vcmp.gt.f32.partialorder %v11806_v32, 0.0 }
 0x4dd   : > { %v4688_v1 = vsel %vm14270_vm5, %v11802_v5, %v4656_v49  ;;  %v4689_v59 = vsel %vm14271_vm7, %v11806_v32, %v4657_v31  ;;  %v4690_v24 = vsel %vm4626_vm9, %v11810_v15, %v4658_v21  ;;  %v4757_v42 = vshrl.u32 %v4709_v0, 16  ;;  %v5066_v49 = vld [vmem:[#allocation2 + $0x18] sm:$0xf] }
 0x4de   : > { %v4765_v34 = vshrl.u32 %v4710_v16, 16  ;;  %v4691_v12 = vsel %vm4627_vm8, %v11814_v35, %v4659_v29  ;;  %v4692_v27 = vsel %vm4628_vm6, %v11818_v53, %v4660_v62  ;;  %vm14272_vm10 = vcmp.gt.f32.partialorder %v11822_v38, 0.0 }
 0x4df   : > { %v4693_v5 = vsel %vm14272_vm10, %v11822_v38, %v4661_v13  ;;  %vm14273_vm3 = vcmp.gt.f32.partialorder %v11826_v46, 0.0  ;;  %v4759_v45 = vrot.slane %v4757_v42, 7  ;;  %v4760_v15 = vshll.u32 %v4709_v0, 16 }
 0x4e0   : > { %v4694_v32 = vsel %vm14273_vm3, %v11826_v46, %v4662_v4  ;;  %v12007_v48 = vrot.slane %v4765_v34, 7  ;;  %v4768_v2 = vshll.u32 %v4710_v16, 16  ;;  %v4695_v35 = vsel %vm4631_vm11, %v11830_v51, %v4663_v63 }
 0x4e1   : > { %vm14274_vm6 = vcmp.gt.f32.partialorder %v11834_v54, 0.0  ;;  %vm14275_vm8 = vcmp.gt.f32.partialorder %v11838_v18, 0.0  ;;  %vm14276_vm9 = vcmp.gt.f32.partialorder %v11842_v61, 0.0  ;;  %v4762_v46 = vor.u32 %v4760_v15, %v4759_v45 }
 0x4e2   : > { %v4696_v53 = vsel %vm14274_vm6, %v11834_v54, %v4664_v43  ;;  %v4697_v38 = vsel %vm14275_vm8, %v11838_v18, %v4665_v7  ;;  %v4698_v0 = vsel %vm14276_vm9, %v11842_v61, %v4666_v41  ;;  %v4763_v31 = vrot.slane %v4759_v45, 4 }
 0x4e3   : > { %v4770_v33 = vor.u32 %v4768_v2, %v12007_v48  ;;  %v12024_v21 = vpack.c.bf16 %v11902_v17, %v11902_v17  ;;  %v4699_v51 = vsel %vm4635_vm13, %v11846_v26, %v4667_v25  ;;  %vm14277_vm11 = vcmp.gt.f32.partialorder %v11850_v39, 0.0 }
 0x4e4   : > { %v4700_v54 = vsel %vm14277_vm11, %v11850_v39, %v4668_v30  ;;  %vm14278_vm12 = vcmp.gt.f32.partialorder %v11854_v9, 0.0  ;;  %v4708_v61 = vpack.c.bf16 %v11914_v50, %v11914_v50  ;;  %v4702_v17 = vsel %vm4638_vm2, %v11858_v22, %v4670_v19 }
 0x4e5   : > { %v4701_v18 = vsel %vm14278_vm12, %v11854_v9, %v4669_v56  ;;  %vm14279_vm5 = vcmp.gt.f32.partialorder %v11862_v14, 0.0  ;;  %v4771_v62 = vsel %vm9767_vm15, %v4763_v31, %v4770_v33  ;;  %v5067_v39 = vsel %vm9773_vm0, %v4762_v46, %v5066_v49 }
 0x4e6   : > { %v4703_v29 = vsel %vm14279_vm5, %v11862_v14, %v4671_v37  ;;  %vm14281_vm13 = vcmp.gt.f32.partialorder %v11878_v47, 0.0  ;;  %5068 = vst [vmem:[#allocation2 + $0x18] sm:$0xf] %v5067_v39  ;;  %v12050_v9 = vpack.c.bf16 %v4679_v36, %v4679_v36  ;;  %v12052_v50 = vpack.c.bf16 %v4680_v44, %v4680_v44  ;;  %v5063_v44 = vld [vmem:[#allocation2 + $0x14] sm:$0x1] }
 0x4e7   : > { %v4704_v56 = vsel %vm14281_vm13, %v11878_v47, %v4672_v6  ;;  %v12054_v19 = vpack.c.bf16 %v4681_v55, %v4681_v55  ;;  %vm14282_vm2 = vcmask 60416   ;;  %v12057_v22 = vpack.c.bf16 %v4682_v10, %v4682_v10 }
 0x4e8   : > { %5069 = vst.msk [vmem:[#allocation2 + $0x1c] sm:$0xf] %vm14282_vm2, %v4771_v62  ;;  %v12059_v14 = vpack.c.bf16 %v4683_v23, %v4683_v23  ;;  %v12061_v20 = vpack.c.bf16 %v4684_v3, %v4684_v3  ;;  %v4740_v40 = vshrl.u32 %v12024_v21, 16  ;;  %v12064_v13 = vpack.c.bf16 %v4685_v8, %v4685_v8  ;;  %vm14291_vm7 = vmmov %vm14282_vm2 }
 0x4e9   : > { %v12066_v6 = vpack.c.bf16 %v4686_v57, %v4686_v57  ;;  %v12068_v47 = vpack.c.bf16 %v4687_v52, %v4687_v52  ;;  %v4748_v4 = vshrl.u32 %v4708_v61, 16  ;;  %v12070_v63 = vpack.c.bf16 %v4688_v1, %v4688_v1  ;;  %vm14298_vm10 = vmmov %vm14282_vm2 }
 0x4ea   : > { %v12072_v43 = vpack.c.bf16 %v4689_v59, %v4689_v59  ;;  %v12074_v7 = vpack.c.bf16 %v4690_v24, %v4690_v24  ;;  %v12076_v41 = vrot.slane %v4740_v40, 7  ;;  %v12078_v36 = vpack.c.bf16 %v4691_v12, %v4691_v12  ;;  %vm14316_vm3 = vmmov %vm14282_vm2 }
 0x4eb   : > { %v12080_v25 = vpack.c.bf16 %v4692_v27, %v4692_v27  ;;  %v4750_v30 = vrot.slane %v4748_v4, 7  ;;  %v4751_v28 = vshll.u32 %v4708_v61, 16  ;;  %v12082_v37 = vpack.c.bf16 %v4693_v5, %v4693_v5  ;;  %vm14319_vm6 = vmmov %vm14282_vm2 }
 0x4ec   : > { %v12084_v55 = vpack.c.bf16 %v4694_v32, %v4694_v32  ;;  %v12086_v58 = vpack.c.bf16 %v4695_v35, %v4695_v35  ;;  %v4746_v10 = vrot.slane %v12076_v41, 4  ;;  %v12089_v23 = vpack.c.bf16 %v4696_v53, %v4696_v53  ;;  %vm14340_vm8 = vmmov %vm14282_vm2 }
 0x4ed   : > { %v12091_v3 = vpack.c.bf16 %v4697_v38, %v4697_v38  ;;  %v4753_v60 = vor.u32 %v4751_v28, %v4750_v30  ;;  %v4755_v16 = vrot.slane %v4750_v30, 4  ;;  %v5243_v8 = vld [vmem:[#allocation2 + $0x18] sm:$0xf]  ;;  %v12093_v57 = vpack.c.bf16 %v4698_v0, %v4698_v0  ;;  %vm14342_vm9 = vmmov %vm14282_vm2 }
 0x4ee   : > { %v12095_v52 = vpack.c.bf16 %v4699_v51, %v4699_v51  ;;  %v12097_v1 = vpack.c.bf16 %v4700_v54, %v4700_v54  ;;  %v12099_v59 = vpack.c.bf16 %v4701_v18, %v4701_v18  ;;  %v5334_v42 = vshrl.u32 %v5243_v8, 16  ;;  %v5059_v54 = vld [vmem:[#allocation2 + $0xc] sm:$0xf]  ;;  %vm14345_vm11 = vmmov %vm14282_vm2 }
 0x4ef   : > { %v12101_v24 = vld [vmem:[#allocation2 + $0x1c] sm:$0xf]  ;;  %v5337_v34 = vshll.u32 %v5243_v8, 16  ;;  %v4754_v12 = vsel %vm9767_vm15, %v4746_v10, %v4753_v60  ;;  %v5064_v5 = vsel %vm9783_vm1, %v4755_v16, %v5063_v44  ;;  %v12107_v32 = vpack.c.bf16 %v4702_v17, %v4702_v17  ;;  %vm14346_vm12 = vmmov %vm14282_vm2 }
 0x4f0   : > { %14283 = vst [vmem:[#allocation5_spill] sm:$0xff] %v12095_v52  ;;  %v12109_v45 = vpack.c.bf16 %v4703_v29, %v4703_v29  ;;  %v12111_v15 = vpack.c.bf16 %v4704_v56, %v4704_v56  ;;  %v4772_v2 = vrot.slane %v12007_v48, 4  ;;  %v5336_v49 = vrot.slane %v5334_v42, 4  ;;  %vm14350_vm5 = vmmov %vm14282_vm2 }
 0x4f1   : > { %14284 = vst [vmem:[#allocation8_spill] sm:$0xff] %v12097_v1  ;;  %v5339_v35 = vrot.slane %v5337_v34, 5  ;;  %v5343_v53 = vshll.u32 %v12101_v24, 16  ;;  %v4743_v38 = vshll.u32 %v12024_v21, 16  ;;  %v4774_v0 = vshrl.u32 %v12050_v9, 16  ;;  %vm14351_vm13 = vmmov %vm14282_vm2 }
 0x4f2   : > { %14285 = vst [vmem:[#allocation9_spill] sm:$0xff] %v12099_v59  ;;  %v4782_v31 = vshrl.u32 %v12052_v50, 16  ;;  %v4785_v33 = vshll.u32 %v12052_v50, 16  ;;  %v4791_v48 = vshrl.u32 %v12054_v19, 16  ;;  %v4799_v18 = vshrl.u32 %v12057_v22, 16 }
 0x4f3   : > { %14286 = vst [vmem:[#allocation10_spill] sm:$0xff] %v12101_v24  ;;  %v5340_v51 = vor.u32 %v5339_v35, %v5336_v49  ;;  %v4808_v17 = vshrl.u32 %v12059_v14, 16  ;;  %v4816_v29 = vshrl.u32 %v12061_v20, 16  ;;  %v12128_v39 = vrot.slane %v5343_v53, 5 }
 0x4f4   : > { %14288 = vst [vmem:[#allocation6_spill] sm:$0xff] %v12107_v32  ;;  %v4859_v53 = vshrl.u32 %v12072_v43, 16  ;;  %v4876_v42 = vshrl.u32 %v12078_v36, 16  ;;  %v4893_v61 = vshrl.u32 %v12082_v37, 16  ;;  %v4901_v44 = vshrl.u32 %v12084_v55, 16 }
 0x4f5   : > { %14289 = vst [vmem:[#allocation11_spill] sm:$0xff] %v12109_v45  ;;  %v5341_v62 = vrot.slane %v5340_v51, 4  ;;  %v5070_v51 = vld [vmem:[#allocation2 + $0x20] sm:$0x1]  ;;  %v4918_v35 = vshrl.u32 %v12089_v23, 16  ;;  %v4745_v34 = vor.u32 %v4743_v38, %v12076_v41  ;;  %v4927_v28 = vshrl.u32 %v12091_v3, 16 }
 0x4f6   : > { %14290 = vst [vmem:[#allocation12_spill] sm:$0xff] %v12111_v15  ;;  %v4935_v40 = vshrl.u32 %v12093_v57, 16  ;;  %v4944_v41 = vshrl.u32 %v12095_v52, 16  ;;  %v4776_v38 = vrot.slane %v4774_v0, 7  ;;  %v4978_v0 = vshrl.u32 %v12109_v45, 16 }
 0x4f7   : > { %5062 = vst.msk [vmem:[#allocation2 + $0x10] sm:$0xf] %vm14291_vm7, %v4754_v12  ;;  %v5346_v60 = vsel %vm9761_vm14, %v5341_v62, %v12128_v39  ;;  %v4867_v62 = vshrl.u32 %v12074_v7, 16  ;;  %v14297_v50 = vshrl.u32 %v12070_v63, 16  ;;  %v12225_v45 = vrot.slane %v4859_v53, 7  ;;  %vm14357_vm7 = vmmov %vm14282_vm2 }
 0x4f8   : > { %5065 = vst [vmem:[#allocation2 + $0x14] sm:$0x1] %v5064_v5  ;;  %5677 = vrot.lane.b32.xlu2 %v5346_v60, %s9495_s8  ;;  %v12240_v53 = vrot.slane %v4901_v44, 7  ;;  %v12248_v52 = vrot.slane %v4935_v40, 7  ;;  %v12258_v44 = vrot.slane %v4978_v0, 7  ;;  %v14300_v40 = vshll.u32 %v12054_v19, 16 }
 0x4f9   : > { %14292 = vst [vmem:[#allocation13_spill] sm:$0xff] %v12128_v39  ;;  %v14295_v39 = vshrl.u32 %v12066_v6, 16  ;;  %v14302_v0 = vshll.u32 %v12059_v14, 16  ;;  %v14303_v19 = vshll.u32 %v12061_v20, 16  ;;  %v14305_v20 = vshll.u32 %v12066_v6, 16 }
 0x4fa   : > { %v14307_v6 = vshll.u32 %v12070_v63, 16  ;;  %v5084_v63 = vld [vmem:[#allocation2 + $0x38] sm:$0x1]  ;;  %v5087_v14 = vld [vmem:[#allocation2 + $0x3c] sm:$0xf] }
 0x4fe   : > { %v5241_v16 = vld [vmem:[#allocation2 + $0x10] sm:$0xf] }
 0x4ff   : > { %v5242_v12 = vld [vmem:[#allocation2 + $0x14] sm:$0x1]  ;;  %v5319_v5 = vshll.u32 %v5241_v16, 16  ;;  %v5323_v49 = vshrl.u32 %v5241_v16, 16  ;;  %v4884_v16 = vshrl.u32 %v12080_v25, 16 }
 0x500   : > { %v5329_v60 = vshll.u32 %v5242_v12, 16  ;;  %v5071_v12 = vsel %vm9783_vm1, %v4772_v2, %v5070_v51  ;;  %v5060_v51 = vsel %vm9773_vm0, %v4745_v34, %v5059_v54  ;;  %v4961_v34 = vshrl.u32 %v12099_v59, 16  ;;  %v5077_v54 = vld [vmem:[#allocation2 + $0x2c] sm:$0x1] }
 0x501   : > { %v12149_v30 = vrot.slane %v5319_v5, 5  ;;  %v5325_v56 = vrot.slane %v5323_v49, 4  ;;  %v4910_v49 = vshrl.u32 %v12086_v58, 16  ;;  %5072 = vst [vmem:[#allocation2 + $0x20] sm:$0x1] %v5071_v12  ;;  %v4952_v12 = vshrl.u32 %v12097_v1, 16 }
 0x502   : > { %v5331_v8 = vrot.slane %v5329_v60, 5  ;;  %5061 = vst [vmem:[#allocation2 + $0xc] sm:$0xf] %v5060_v51  ;;  %v12193_v2 = vrot.slane %v4791_v48, 7  ;;  %v12201_v51 = vrot.slane %v4808_v17, 7  ;;  %v4780_v5 = vrot.slane %v4776_v38, 4 }
 0x503   : > { %v5326_v46 = vor.u32 %v5325_v56, %v12149_v30  ;;  %v12207_v60 = vrot.slane %v4816_v29, 7  ;;  %v14294_v48 = vshrl.u32 %v12064_v13, 16  ;;  %v14296_v17 = vshrl.u32 %v12068_v47, 16 }
 0x504   : > { %v12231_v59 = vrot.slane %v4876_v42, 7  ;;  %v12236_v1 = vrot.slane %v4884_v16, 7  ;;  %v12246_v42 = vrot.slane %v4927_v28, 7  ;;  %v12254_v16 = vrot.slane %v4961_v34, 7 }
 0x505   : > { %v5327_v4 = vrot.slane %v5326_v46, 4  ;;  %v4784_v46 = vrot.slane %v4782_v31, 7  ;;  %v12211_v56 = vrot.slane %v14294_v48, 7  ;;  %v14299_v28 = vshll.u32 %v12050_v9, 16 }
 0x507   : > { %v5332_v21 = vsel %vm9761_vm14, %v5327_v4, %v5331_v8  ;;  %v4969_v8 = vshrl.u32 %v12107_v32, 16  ;;  %v12197_v4 = vrot.slane %v4799_v18, 7  ;;  %v4787_v31 = vor.u32 %v4785_v33, %v4784_v46 }
 0x508   : > { %5675 = vrot.lane.b32.xlu1 %v5332_v21, %s9495_s8  ;;  %v4986_v21 = vshrl.u32 %v12111_v15, 16  ;;  %v12215_v18 = vrot.slane %v14295_v39, 7  ;;  %v4789_v24 = vrot.slane %v4784_v46, 4  ;;  %v12219_v15 = vrot.slane %v14296_v17, 7 }
 0x509   : > { %v12223_v33 = vrot.slane %v14297_v50, 7  ;;  %v4788_v29 = vsel %vm9767_vm15, %v4780_v5, %v4787_v31  ;;  %v5240_v48 = vld [vmem:[#allocation2 + $0xc] sm:$0xf]  ;;  %v12229_v32 = vrot.slane %v4867_v62, 7  ;;  %v12238_v50 = vrot.slane %v4893_v61, 7 }
 0x50a   : > { %5076 = vst.msk [vmem:[#allocation2 + $0x28] sm:$0xf] %vm14298_vm10, %v4788_v29  ;;  %v5078_v39 = vsel %vm9783_vm1, %v4789_v24, %v5077_v54  ;;  %v5310_v46 = vshrl.u32 %v5240_v48, 16  ;;  %v5313_v17 = vshll.u32 %v5240_v48, 16  ;;  %v12242_v5 = vrot.slane %v4910_v49, 7 }
 0x50b   : > { %5079 = vst [vmem:[#allocation2 + $0x2c] sm:$0x1] %v5078_v39  ;;  %v12244_v62 = vrot.slane %v4918_v35, 7  ;;  %v12250_v24 = vrot.slane %v4944_v41, 7  ;;  %v12252_v54 = vrot.slane %v4952_v12, 7  ;;  %v12256_v61 = vrot.slane %v4969_v8, 7 }
 0x50c   : > { %v5312_v31 = vrot.slane %v5310_v46, 4  ;;  %v5315_v29 = vrot.slane %v5313_v17, 5  ;;  %v12260_v48 = vrot.slane %v4986_v21, 7  ;;  %v4779_v35 = vor.u32 %v14299_v28, %v4776_v38 }
 0x50d   : > { %v12267_v39 = vor.u32 %v14300_v40, %v12193_v2  ;;  %v4797_v41 = vrot.slane %v12193_v2, 4  ;;  %v14301_v12 = vshll.u32 %v12057_v22, 16  ;;  %v4806_v8 = vrot.slane %v12197_v4, 4 }
 0x50e   : > { %v5316_v49 = vor.u32 %v5315_v29, %v5312_v31  ;;  %v12277_v21 = vor.u32 %v14302_v0, %v12201_v51  ;;  %v4814_v46 = vrot.slane %v12201_v51, 4  ;;  %v4821_v17 = vor.u32 %v14303_v19, %v12207_v60 }
 0x50f   : > { %v4804_v34 = vor.u32 %v14301_v12, %v12197_v4  ;;  %v4823_v2 = vrot.slane %v12207_v60, 4  ;;  %v14304_v4 = vshll.u32 %v12064_v13, 16  ;;  %v14306_v12 = vshll.u32 %v12068_v47, 16  ;;  %v5108_v60 = vld [vmem:[#allocation2 + $0x60] sm:$0xf] }
 0x510   : > { %v5317_v9 = vrot.slane %v5316_v49, 4  ;;  %v12296_v49 = vor.u32 %v14305_v20, %v12215_v18  ;;  %v14308_v47 = vshll.u32 %v12072_v43, 16 }
 0x511   : > { %v5247_v38 = vld [vmem:[#allocation2 + $0x28] sm:$0xf]  ;;  %v12287_v28 = vor.u32 %v14304_v4, %v12211_v56  ;;  %v12302_v0 = vor.u32 %v14306_v12, %v12219_v15  ;;  %v12311_v4 = vor.u32 %v14307_v6, %v12223_v33  ;;  %v14310_v6 = vshll.u32 %v12078_v36, 16 }
 0x512   : > { %v5248_v31 = vld [vmem:[#allocation2 + $0x2c] sm:$0x1]  ;;  %v5367_v22 = vshll.u32 %v5247_v38, 16  ;;  %v5371_v29 = vshrl.u32 %v5247_v38, 16  ;;  %v5322_v51 = vsel %vm9761_vm14, %v5317_v9, %v12149_v30  ;;  %v5073_v9 = vld [vmem:[#allocation2 + $0x24] sm:$0xf]  ;;  %v12317_v12 = vor.u32 %v14308_v47, %v12225_v45 }
 0x513   : > { %5673 = vrot.lane.b32.xlu0 %v5322_v51, %s9495_s8  ;;  %v5377_v19 = vshll.u32 %v5248_v31, 16  ;;  %v14309_v31 = vshll.u32 %v12074_v7, 16  ;;  %v12330_v20 = vor.u32 %v14310_v6, %v12231_v59  ;;  %v5080_v30 = vld [vmem:[#allocation2 + $0x30] sm:$0xf]  ;;  %v14311_v47 = vshll.u32 %v12080_v25, 16 }
 0x514   : > { %v12305_v13 = vrot.slane %v5367_v22, 5  ;;  %v5373_v38 = vrot.slane %v5371_v29, 4  ;;  %v14312_v7 = vshll.u32 %v12082_v37, 16  ;;  %v4899_v6 = vrot.slane %v12238_v50, 4 }
 0x515   : > { %v12324_v51 = vor.u32 %v14309_v31, %v12229_v32  ;;  %v12336_v22 = vor.u32 %v14311_v47, %v12236_v1  ;;  %v5379_v36 = vrot.slane %v5377_v19, 5  ;;  %v5074_v43 = vsel %vm9773_vm0, %v4779_v35, %v5073_v9 }
 0x516   : > { %v5374_v29 = vor.u32 %v5373_v38, %v12305_v13  ;;  %v12342_v31 = vor.u32 %v14312_v7, %v12238_v50  ;;  %v14313_v25 = vshll.u32 %v12084_v55, 16  ;;  %5075 = vst [vmem:[#allocation2 + $0x24] sm:$0xf] %v5074_v43  ;;  %v4805_v37 = vsel %vm9767_vm15, %v4797_v41, %v4804_v34  ;;  %v5094_v41 = vld [vmem:[#allocation2 + $0x48] sm:$0xf]  ;;  %v14322_v34 = vld [vmem:[#allocation8_spill] sm:$0xff] }
 0x517   : > { %v4822_v19 = vsel %vm9767_vm15, %v4814_v46, %v4821_v17  ;;  %v14314_v35 = vshll.u32 %v12086_v58, 16  ;;  %v4916_v55 = vrot.slane %v12242_v5, 4  ;;  %v14315_v43 = vshll.u32 %v12089_v23, 16  ;;  %5083 = vst.msk [vmem:[#allocation2 + $0x34] sm:$0xf] %vm14316_vm3, %v4805_v37 }
 0x518   : > { %v5375_v40 = vrot.slane %v5374_v29, 4  ;;  %v12350_v47 = vor.u32 %v14313_v25, %v12240_v53  ;;  %v5091_v29 = vld [vmem:[#allocation2 + $0x44] sm:$0x1]  ;;  %v14317_v46 = vshll.u32 %v12091_v3, 16  ;;  %v4933_v17 = vrot.slane %v12246_v42, 4 }
 0x519   : > { %v12362_v9 = vor.u32 %v14314_v35, %v12242_v5  ;;  %v12368_v25 = vor.u32 %v14315_v43, %v12244_v62  ;;  %v5085_v35 = vsel %vm9783_vm1, %v4806_v8, %v5084_v63  ;;  %v5088_v3 = vsel %vm9773_vm0, %v12277_v21, %v5087_v14  ;;  %5090 = vst.msk [vmem:[#allocation2 + $0x40] sm:$0xf] %vm14319_vm6, %v4822_v19  ;;  %v5101_v43 = vld [vmem:[#allocation2 + $0x54] sm:$0xf]  ;;  %v5105_v21 = vld [vmem:[#allocation2 + $0x5c] sm:$0x1] }
 0x51a   : > { %v5380_v7 = vsel %vm9761_vm14, %v5375_v40, %v5379_v36  ;;  %v12376_v58 = vor.u32 %v14317_v46, %v12246_v42  ;;  %v14318_v40 = vshll.u32 %v12093_v57, 16  ;;  %v5098_v36 = vld [vmem:[#allocation2 + $0x50] sm:$0x1]  ;;  %v14320_v57 = vld [vmem:[#allocation5_spill] sm:$0xff]  ;;  %v5092_v8 = vsel %vm9783_vm1, %v4823_v2, %v5091_v29  ;;  %5086 = vst [vmem:[#allocation2 + $0x38] sm:$0x1] %v5085_v35 }
 0x51b   : > { %5683 = vrot.lane.b32.xlu2 %v5380_v7, %s9495_s8  ;;  %v5081_v7 = vsel %vm9773_vm0, %v12267_v39, %v5080_v30  ;;  %v14321_v46 = vshll.u32 %v14320_v57, 16  ;;  %v14323_v39 = vshll.u32 %v14322_v34, 16  ;;  %v14324_v63 = vld [vmem:[#allocation9_spill] sm:$0xff]  ;;  %v5095_v34 = vsel %vm9773_vm0, %v12287_v28, %v5094_v41  ;;  %v14328_v14 = vld [vmem:[#allocation11_spill] sm:$0xff]  ;;  %5089 = vst [vmem:[#allocation2 + $0x3c] sm:$0xf] %v5088_v3 }
 0x51c   : > { %v12382_v23 = vor.u32 %v14318_v40, %v12248_v52  ;;  %5082 = vst [vmem:[#allocation2 + $0x30] sm:$0xf] %v5081_v7  ;;  %v14325_v19 = vshll.u32 %v14324_v63, 16  ;;  %v14329_v63 = vshll.u32 %v14328_v14, 16  ;;  %v5245_v41 = vld [vmem:[#allocation2 + $0x20] sm:$0x1]  ;;  %v12487_v50 = vsel %vm9767_vm15, %v4916_v55, %v12368_v25 }
 0x51d   : > { %v12397_v40 = vor.u32 %v14321_v46, %v12250_v24  ;;  %v12403_v30 = vor.u32 %v14323_v39, %v12252_v54  ;;  %v14326_v39 = vld [vmem:[#allocation6_spill] sm:$0xff]  ;;  %v14330_v46 = vrot.slane %v12211_v56, 4  ;;  %v5246_v14 = vld [vmem:[#allocation2 + $0x24] sm:$0xf]  ;;  %5093 = vst [vmem:[#allocation2 + $0x44] sm:$0x1] %v5092_v8 }
 0x51e   : > { %v12413_v57 = vor.u32 %v14325_v19, %v12254_v16  ;;  %v14327_v2 = vshll.u32 %v14326_v39, 16  ;;  %v12428_v19 = vor.u32 %v14329_v63, %v12258_v44  ;;  %v14331_v39 = vld [vmem:[#allocation12_spill] sm:$0xff]  ;;  %v14333_v63 = vrot.slane %v12215_v18, 4  ;;  %v5115_v38 = vld [vmem:[#allocation2 + $0x6c] sm:$0xf] }
 0x51f   : > { %v4839_v28 = vsel %vm9767_vm15, %v14330_v46, %v12296_v49  ;;  %v5358_v49 = vshrl.u32 %v5246_v14, 16  ;;  %v5361_v46 = vshll.u32 %v5246_v14, 16  ;;  %v14334_v3 = vrot.slane %v12219_v15, 4  ;;  %5096 = vst [vmem:[#allocation2 + $0x48] sm:$0xf] %v5095_v34 }
 0x520   : > { %v12422_v29 = vor.u32 %v14327_v2, %v12256_v61  ;;  %v14332_v2 = vshll.u32 %v14331_v39, 16  ;;  %v5099_v56 = vsel %vm9783_vm1, %v14333_v63, %v5098_v36  ;;  %v5250_v7 = vld [vmem:[#allocation2 + $0x34] sm:$0xf]  ;;  %v5112_v18 = vld [vmem:[#allocation2 + $0x68] sm:$0x1]  ;;  %v14335_v36 = vrot.slane %v12225_v45, 4 }
 0x521   : > { %v4856_v39 = vsel %vm9767_vm15, %v14334_v3, %v12311_v4  ;;  %v14336_v14 = vrot.slane %v12231_v59, 4  ;;  %v14337_v4 = vrot.slane %v12223_v33, 4  ;;  %5097 = vst.msk [vmem:[#allocation2 + $0x4c] sm:$0xf] %vm14340_vm8, %v4839_v28  ;;  %v5119_v45 = vld [vmem:[#allocation2 + $0x74] sm:$0x1]  ;;  %v12476_v59 = vsel %vm9767_vm15, %v4899_v6, %v12350_v47 }
 0x522   : > { %v12439_v37 = vor.u32 %v14332_v2, %v12260_v48  ;;  %v5102_v2 = vsel %vm9773_vm0, %v12302_v0, %v5101_v43  ;;  %v4873_v8 = vsel %vm9767_vm15, %v14335_v36, %v12324_v51  ;;  %v14338_v43 = vld [vmem:[#allocation10_spill] sm:$0xff]  ;;  %v5360_v3 = vrot.slane %v5358_v49, 4  ;;  %5100 = vst [vmem:[#allocation2 + $0x50] sm:$0x1] %v5099_v56  ;;  %v5253_v28 = vld [vmem:[#allocation2 + $0x40] sm:$0xf] }
 0x523   : > { %v4890_v15 = vsel %vm9767_vm15, %v14336_v14, %v12336_v22  ;;  %v5106_v0 = vsel %vm9783_vm1, %v14337_v4, %v5105_v21  ;;  %v14339_v34 = vshrl.u32 %v14338_v43, 16  ;;  %v5363_v35 = vrot.slane %v5361_v46, 5  ;;  %v14341_v22 = vld [vmem:[#allocation13_spill] sm:$0xff]  ;;  %5103 = vst [vmem:[#allocation2 + $0x54] sm:$0xf] %v5102_v2 }
 0x524   : > { %v5353_v51 = vshll.u32 %v5245_v41, 16  ;;  %v5391_v36 = vshll.u32 %v5250_v7, 16  ;;  %v5109_v33 = vsel %vm9773_vm0, %v12317_v12, %v5108_v60  ;;  %v5395_v49 = vshrl.u32 %v5250_v7, 16  ;;  %v5122_v46 = vld [vmem:[#allocation2 + $0x78] sm:$0xf] }
 0x525   : > { %v5349_v63 = vrot.slane %v14339_v34, 4  ;;  %v5364_v41 = vor.u32 %v5363_v35, %v5360_v3  ;;  %5104 = vst.msk [vmem:[#allocation2 + $0x58] sm:$0xf] %vm14342_vm9, %v4856_v39  ;;  %v5415_v47 = vshll.u32 %v5253_v28, 16  ;;  %v14343_v12 = vrot.slane %v12229_v32, 4 }
 0x526   : > { %v5355_v6 = vrot.slane %v5353_v51, 5  ;;  %v5116_v7 = vsel %vm9773_vm0, %v12330_v20, %v5115_v38  ;;  %5107 = vst [vmem:[#allocation2 + $0x5c] sm:$0x1] %v5106_v0  ;;  %v5252_v5 = vld [vmem:[#allocation2 + $0x3c] sm:$0xf]  ;;  %v12497_v56 = vrot.slane %v5391_v36, 5  ;;  %v5123_v51 = vsel %vm9773_vm0, %v12342_v31, %v5122_v46 }
 0x527   : > { %v5350_v21 = vor.u32 %v5349_v63, %v14341_v22  ;;  %v5113_v60 = vsel %vm9783_vm1, %v14343_v12, %v5112_v18  ;;  %v5126_v55 = vld [vmem:[#allocation2 + $0x80] sm:$0x1]  ;;  %v5129_v25 = vld [vmem:[#allocation2 + $0x84] sm:$0xf]  ;;  %v5365_v2 = vrot.slane %v5364_v41, 4  ;;  %v5406_v39 = vshrl.u32 %v5252_v5, 16 }
 0x528   : > { %5110 = vst [vmem:[#allocation2 + $0x60] sm:$0xf] %v5109_v33  ;;  %v5409_v14 = vshll.u32 %v5252_v5, 16  ;;  %v5419_v4 = vshrl.u32 %v5253_v28, 16  ;;  %v14344_v32 = vrot.slane %v12236_v1, 4  ;;  %v12506_v38 = vrot.slane %v5415_v47, 5 }
 0x529   : > { %v5351_v35 = vrot.slane %v5350_v21, 4  ;;  %5111 = vst.msk [vmem:[#allocation2 + $0x64] sm:$0xf] %vm14345_vm11, %v4873_v8  ;;  %v5251_v0 = vld [vmem:[#allocation2 + $0x38] sm:$0x1]  ;;  %v5397_v43 = vrot.slane %v5395_v49, 4  ;;  %v5370_v63 = vsel %vm9761_vm14, %v5365_v2, %v12305_v13  ;;  %v12518_v8 = vsel %vm9767_vm15, %v4933_v17, %v12382_v23 }
 0x52a   : > { %v5120_v18 = vsel %vm9783_vm1, %v14344_v32, %v5119_v45  ;;  %v5133_v34 = vld [vmem:[#allocation2 + $0x8c] sm:$0x1]  ;;  %5114 = vst [vmem:[#allocation2 + $0x68] sm:$0x1] %v5113_v60  ;;  %v5408_v1 = vrot.slane %v5406_v39, 4  ;;  %v5411_v3 = vrot.slane %v5409_v14, 5  ;;  %5681 = vrot.lane.b32.xlu1 %v5370_v63, %s9495_s8  ;;  %v5130_v31 = vsel %vm9773_vm0, %v12362_v9, %v5129_v25 }
 0x52b   : > { %v5356_v20 = vsel %vm9761_vm14, %v5351_v35, %v5355_v6  ;;  %v5401_v45 = vshll.u32 %v5251_v0, 16  ;;  %5117 = vst [vmem:[#allocation2 + $0x6c] sm:$0xf] %v5116_v7  ;;  %v5398_v13 = vor.u32 %v5397_v43, %v12497_v56  ;;  %v5249_v36 = vld [vmem:[#allocation2 + $0x30] sm:$0xf]  ;;  %v5421_v42 = vrot.slane %v5419_v4, 4 }
 0x52c   : > { %5679 = vrot.lane.b32.xlu0 %v5356_v20, %s9495_s8  ;;  %v5256_v33 = vld [vmem:[#allocation2 + $0x4c] sm:$0xf]  ;;  %v5136_v22 = vld [vmem:[#allocation2 + $0x90] sm:$0xf]  ;;  %5118 = vst.msk [vmem:[#allocation2 + $0x70] sm:$0xf] %vm14346_vm12, %v4890_v15  ;;  %v5412_v21 = vor.u32 %v5411_v3, %v5408_v1 }
 0x52d   : > { %v5382_v28 = vshrl.u32 %v5249_v36, 16  ;;  %v5385_v49 = vshll.u32 %v5249_v36, 16  ;;  %v14347_v41 = vrot.slane %v12240_v53, 4  ;;  %5121 = vst [vmem:[#allocation2 + $0x74] sm:$0x1] %v5120_v18  ;;  %v5399_v23 = vrot.slane %v5398_v13, 4 }
 0x52e   : > { %v5257_v46 = vld [vmem:[#allocation2 + $0x50] sm:$0x1]  ;;  %v5439_v6 = vshll.u32 %v5256_v33, 16  ;;  %v5140_v47 = vld [vmem:[#allocation2 + $0x98] sm:$0x1]  ;;  %v5413_v15 = vrot.slane %v5412_v21, 4  ;;  %v5137_v20 = vsel %vm9773_vm0, %v12376_v58, %v5136_v22  ;;  %v5422_v43 = vor.u32 %v5421_v42, %v12506_v38 }
 0x52f   : > { %v5127_v17 = vsel %vm9783_vm1, %v14347_v41, %v5126_v55  ;;  %v5143_v12 = vld [vmem:[#allocation2 + $0x9c] sm:$0xf]  ;;  %5124 = vst [vmem:[#allocation2 + $0x78] sm:$0xf] %v5123_v51  ;;  %v5384_v60 = vrot.slane %v5382_v28, 4  ;;  %v5387_v7 = vrot.slane %v5385_v49, 5 }
 0x530   : > { %v5443_v35 = vshrl.u32 %v5256_v33, 16  ;;  %v14348_v53 = vrot.slane %v12250_v24, 4  ;;  %v14349_v55 = vrot.slane %v12244_v62, 4  ;;  %5125 = vst.msk [vmem:[#allocation2 + $0x7c] sm:$0xf] %vm14350_vm5, %v12476_v59  ;;  %v5403_v25 = vrot.slane %v5401_v45, 5 }
 0x531   : > { %v12543_v2 = vrot.slane %v5439_v6, 5  ;;  %v5255_v39 = vld [vmem:[#allocation2 + $0x48] sm:$0xf]  ;;  %5128 = vst [vmem:[#allocation2 + $0x80] sm:$0x1] %v5127_v17  ;;  %v5418_v24 = vsel %vm9761_vm14, %v5413_v15, %v12506_v38  ;;  %v5388_v14 = vor.u32 %v5387_v7, %v5384_v60  ;;  %v5449_v59 = vshll.u32 %v5257_v46, 16 }
 0x532   : > { %v4958_v5 = vsel %vm9767_vm15, %v14348_v53, %v12403_v30  ;;  %v5134_v9 = vsel %vm9783_vm1, %v14349_v55, %v5133_v34  ;;  %v5445_v4 = vrot.slane %v5443_v35, 4  ;;  %v5430_v30 = vshrl.u32 %v5255_v39, 16  ;;  %v5254_v32 = vld [vmem:[#allocation2 + $0x44] sm:$0x1]  ;;  %v5150_v18 = vld [vmem:[#allocation2 + $0xa8] sm:$0xf]  ;;  %5689 = vrot.lane.b32.xlu2 %v5418_v24, %s9495_s8 }
 0x533   : > { %v5147_v62 = vld [vmem:[#allocation2 + $0xa4] sm:$0x1]  ;;  %5131 = vst [vmem:[#allocation2 + $0x84] sm:$0xf] %v5130_v31  ;;  %v5433_v0 = vshll.u32 %v5255_v39, 16  ;;  %v5404_v34 = vsel %vm9761_vm14, %v5399_v23, %v5403_v25  ;;  %v5389_v63 = vrot.slane %v5388_v14, 4  ;;  %v5144_v38 = vsel %vm9773_vm0, %v12397_v40, %v5143_v12 }
 0x534   : > { %5132 = vst.msk [vmem:[#allocation2 + $0x88] sm:$0xf] %vm14351_vm13, %v12487_v50  ;;  %v5446_v1 = vor.u32 %v5445_v4, %v12543_v2  ;;  %v5432_v3 = vrot.slane %v5430_v30, 4  ;;  %v5261_v45 = vld [vmem:[#allocation2 + $0x60] sm:$0xf]  ;;  %v14352_v58 = vrot.slane %v12248_v52, 4  ;;  %5687 = vrot.lane.b32.xlu1 %v5404_v34, %s9495_s8 }
 0x535   : > { %v5154_v51 = vld [vmem:[#allocation2 + $0xb0] sm:$0x1]  ;;  %5135 = vst [vmem:[#allocation2 + $0x8c] sm:$0x1] %v5134_v9  ;;  %v5435_v50 = vrot.slane %v5433_v0, 5  ;;  %v5425_v36 = vshll.u32 %v5254_v32, 16  ;;  %v5394_v33 = vsel %vm9761_vm14, %v5389_v63, %v12497_v56 }
 0x536   : > { %v5141_v13 = vsel %vm9783_vm1, %v14352_v58, %v5140_v47  ;;  %5138 = vst [vmem:[#allocation2 + $0x90] sm:$0xf] %v5137_v20  ;;  %v5447_v22 = vrot.slane %v5446_v1, 4  ;;  %v5478_v21 = vshrl.u32 %v5261_v45, 16  ;;  %v5481_v52 = vshll.u32 %v5261_v45, 16  ;;  %5685 = vrot.lane.b32.xlu0 %v5394_v33, %s9495_s8 }
 0x537   : > { %v5157_v28 = vld [vmem:[#allocation2 + $0xb4] sm:$0xf]  ;;  %v5161_v49 = vld [vmem:[#allocation2 + $0xbc] sm:$0x1]  ;;  %v14353_v42 = vrot.slane %v12254_v16, 4  ;;  %v5451_v41 = vrot.slane %v5449_v59, 5  ;;  %v5436_v17 = vor.u32 %v5435_v50, %v5432_v3  ;;  %v5151_v16 = vsel %vm9773_vm0, %v12413_v57, %v5150_v18 }
 0x538   : > { %5139 = vst.msk [vmem:[#allocation2 + $0x94] sm:$0xf] %vm14282_vm2, %v12518_v8  ;;  %v5423_v31 = vrot.slane %v5422_v43, 4  ;;  %v5259_v56 = vld [vmem:[#allocation2 + $0x58] sm:$0xf]  ;;  %v14354_v23 = vrot.slane %v12252_v54, 4 }
 0x539   : > { %v4975_v40 = vsel %vm9767_vm15, %v14353_v42, %v12422_v29  ;;  %5142 = vst [vmem:[#allocation2 + $0x98] sm:$0x1] %v5141_v13  ;;  %v5262_v29 = vld [vmem:[#allocation2 + $0x64] sm:$0xf]  ;;  %v5480_v6 = vrot.slane %v5478_v21, 4  ;;  %v5483_v47 = vrot.slane %v5481_v52, 5  ;;  %v5452_v53 = vsel %vm9761_vm14, %v5447_v22, %v5451_v41 }
 0x53a   : > { %v5148_v46 = vsel %vm9783_vm1, %v14354_v23, %v5147_v62  ;;  %5145 = vst [vmem:[#allocation2 + $0x9c] sm:$0xf] %v5144_v38  ;;  %v5437_v8 = vrot.slane %v5436_v17, 4  ;;  %v5427_v12 = vrot.slane %v5425_v36, 5  ;;  %v5463_v15 = vshll.u32 %v5259_v56, 16  ;;  %5695 = vrot.lane.b32.xlu2 %v5452_v53, %s9495_s8 }
 0x53b   : > { %v5467_v60 = vshrl.u32 %v5259_v56, 16  ;;  %v14355_v7 = vrot.slane %v12258_v44, 4  ;;  %v14356_v35 = vrot.slane %v12256_v61, 4  ;;  %5146 = vst.msk [vmem:[#allocation2 + $0xa0] sm:$0xf] %vm14357_vm7, %v4958_v5  ;;  %v5484_v55 = vor.u32 %v5483_v47, %v5480_v6 }
 0x53c   : > { %v5260_v9 = vld [vmem:[#allocation2 + $0x5c] sm:$0x1]  ;;  %v5258_v25 = vld [vmem:[#allocation2 + $0x54] sm:$0xf]  ;;  %5149 = vst [vmem:[#allocation2 + $0xa4] sm:$0x1] %v5148_v46  ;;  %v5158_v61 = vsel %vm9773_vm0, %v12428_v19, %v5157_v28  ;;  %v5442_v14 = vsel %vm9761_vm14, %v5437_v8, %v12543_v2  ;;  %v5428_v30 = vsel %vm9761_vm14, %v5423_v31, %v5427_v12  ;;  %vm14360_vm0 = vmmov %vm14282_vm2 }
 0x53d   : > { %v4992_v54 = vsel %vm9767_vm15, %v14355_v7, %v12439_v37  ;;  %v5155_v57 = vsel %vm9783_vm1, %v14356_v35, %v5154_v51  ;;  %v5487_v44 = vshll.u32 %v5262_v29, 16  ;;  %v5465_v39 = vrot.slane %v5463_v15, 5  ;;  %5152 = vst [vmem:[#allocation2 + $0xa8] sm:$0xf] %v5151_v16  ;;  %vm14359_vm15 = vmmov %vm14282_vm2  ;;  %5693 = vrot.lane.b32.xlu1 %v5442_v14, %s9495_s8  ;;  %v5266_v59 = vld [vmem:[#allocation2 + $0x74] sm:$0x1] }
 0x53e   : > { %v5469_v26 = vrot.slane %v5467_v60, 4  ;;  %v5454_v37 = vshrl.u32 %v5258_v25, 16  ;;  %v14358_v24 = vrot.slane %v12260_v48, 4  ;;  %v5457_v4 = vshll.u32 %v5258_v25, 16  ;;  %5153 = vst.msk [vmem:[#allocation2 + $0xac] sm:$0xf] %vm14359_vm15, %v4975_v40  ;;  %5691 = vrot.lane.b32.xlu0 %v5428_v30, %s9495_s8  ;;  %vm14362_vm10 = vmmov %vm14360_vm0 }
 0x53f   : > { %v5491_v11 = vshrl.u32 %v5262_v29, 16  ;;  %v5265_v48 = vld [vmem:[#allocation2 + $0x70] sm:$0xf]  ;;  %5156 = vst [vmem:[#allocation2 + $0xb0] sm:$0x1] %v5155_v57  ;;  %v5485_v27 = vrot.slane %v5484_v55, 4  ;;  %vm14364_vm6 = vmmov %vm14360_vm0 }
 0x540   : > { %v5162_v5 = vsel %vm9783_vm1, %v14358_v24, %v5161_v49  ;;  %v5470_v19 = vor.u32 %v5469_v26, %v5465_v39  ;;  %v5456_v32 = vrot.slane %v5454_v37, 4  ;;  %v5473_v62 = vshll.u32 %v5260_v9, 16  ;;  %5159 = vst [vmem:[#allocation2 + $0xb4] sm:$0xf] %v5158_v61  ;;  %v5264_v1 = vld [vmem:[#allocation2 + $0x6c] sm:$0xf]  ;;  %vm14365_vm8 = vmmov %vm14360_vm0 }
 0x541   : > { %v5459_v18 = vrot.slane %v5457_v4, 5  ;;  %v5511_v20 = vshll.u32 %v5265_v48, 16  ;;  %v5489_v2 = vrot.slane %v5487_v44, 5  ;;  %v5515_v0 = vshrl.u32 %v5265_v48, 16  ;;  %5160 = vst.msk [vmem:[#allocation2 + $0xb8] sm:$0xf] %vm14360_vm0, %v4992_v54  ;;  %vm14366_vm9 = vmmov %vm14360_vm0 }
 0x542   : > { %v5471_v43 = vrot.slane %v5470_v19, 4  ;;  %5163 = vst [vmem:[#allocation2 + $0xbc] sm:$0x1] %v5162_v5  ;;  %v5502_v45 = vshrl.u32 %v5264_v1, 16  ;;  %v5493_v51 = vrot.slane %v5491_v11, 4  ;;  %v5475_v13 = vrot.slane %v5473_v62, 5  ;;  %vm14367_vm11 = vmmov %vm14360_vm0 }
 0x543   : > { %v5460_v34 = vor.u32 %v5459_v18, %v5456_v32  ;;  %v5513_v63 = vrot.slane %v5511_v20, 5  ;;  %v5517_v3 = vrot.slane %v5515_v0, 4  ;;  %v5490_v58 = vsel %vm9761_vm14, %v5485_v27, %v5489_v2  ;;  %v5270_v36 = vld [vmem:[#allocation2 + $0x84] sm:$0xf]  ;;  %v5263_v42 = vld [vmem:[#allocation2 + $0x68] sm:$0x1]  ;;  %vm14368_vm12 = vmmov %vm14360_vm0 }
 0x544   : > { %v5505_v50 = vshll.u32 %v5264_v1, 16  ;;  %5701 = vrot.lane.b32.xlu2 %v5490_v58, %s9495_s8  ;;  %v5521_v22 = vshll.u32 %v5266_v59, 16  ;;  %v5504_v21 = vrot.slane %v5502_v45, 4  ;;  %v5550_v52 = vshrl.u32 %v5270_v36, 16  ;;  %v5268_v41 = vld [vmem:[#allocation2 + $0x7c] sm:$0xf]  ;;  %vm14369_vm5 = vmmov %vm14360_vm0 }
 0x545   : > { %v5461_v38 = vrot.slane %v5460_v34, 4  ;;  %v5518_v33 = vor.u32 %v5517_v3, %v5513_v63  ;;  %v5476_v28 = vsel %vm9761_vm14, %v5471_v43, %v5475_v13  ;;  %v5553_v40 = vshll.u32 %v5270_v36, 16  ;;  %v5267_v6 = vld [vmem:[#allocation2 + $0x78] sm:$0xf]  ;;  %v5274_v12 = vld [vmem:[#allocation2 + $0x94] sm:$0xf]  ;;  %vm14370_vm13 = vmmov %vm14360_vm0 }
 0x546   : > { %v5507_v49 = vrot.slane %v5505_v50, 5  ;;  %5699 = vrot.lane.b32.xlu1 %v5476_v28, %s9495_s8  ;;  %v5494_v56 = vor.u32 %v5493_v51, %v5489_v2  ;;  %v5552_v46 = vrot.slane %v5550_v52, 4  ;;  %v5535_v29 = vshll.u32 %v5268_v41, 16  ;;  %v5271_v7 = vld [vmem:[#allocation2 + $0x88] sm:$0xf]  ;;  %vm14372_vm7 = vmmov %vm14360_vm0 }
 0x547   : > { %v5466_v17 = vsel %vm9761_vm14, %v5461_v38, %v5465_v39  ;;  %v5519_v31 = vrot.slane %v5518_v33, 4  ;;  %v5555_v16 = vrot.slane %v5553_v40, 5  ;;  %v5497_v47 = vshll.u32 %v5263_v42, 16  ;;  %v5273_v25 = vld [vmem:[#allocation2 + $0x90] sm:$0xf]  ;;  %vm14374_vm15 = vmmov %vm14360_vm0 }
 0x548   : > { %v5508_v23 = vor.u32 %v5507_v49, %v5504_v21  ;;  %5697 = vrot.lane.b32.xlu0 %v5466_v17, %s9495_s8  ;;  %v5539_v8 = vshrl.u32 %v5268_v41, 16  ;;  %v5523_v15 = vrot.slane %v5521_v22, 5  ;;  %v5537_v54 = vrot.slane %v5535_v29, 5  ;;  %v5269_v5 = vld [vmem:[#allocation2 + $0x80] sm:$0x1] }
 0x549   : > { %v5526_v35 = vshrl.u32 %v5267_v6, 16  ;;  %v5495_v57 = vrot.slane %v5494_v56, 4  ;;  %v5529_v55 = vshll.u32 %v5267_v6, 16  ;;  %v5583_v9 = vshll.u32 %v5274_v12, 16  ;;  %v5279_v59 = vld [vmem:[#allocation2 + $0xa8] sm:$0xf] }
 0x54a   : > { %v5509_v60 = vrot.slane %v5508_v23, 4  ;;  %v5541_v53 = vrot.slane %v5539_v8, 4  ;;  %v5524_v44 = vsel %vm9761_vm14, %v5519_v31, %v5523_v15  ;;  %v5556_v39 = vor.u32 %v5555_v16, %v5552_v46  ;;  %v5275_v0 = vld [vmem:[#allocation2 + $0x98] sm:$0x1]  ;;  %v5277_v3 = vld [vmem:[#allocation2 + $0xa0] sm:$0xf] }
 0x54b   : > { %v5528_v26 = vrot.slane %v5526_v35, 4  ;;  %v5587_v37 = vshrl.u32 %v5274_v12, 16  ;;  %v5499_v61 = vrot.slane %v5497_v47, 5  ;;  %v5559_v24 = vshll.u32 %v5271_v7, 16  ;;  %v5276_v52 = vld [vmem:[#allocation2 + $0x9c] sm:$0xf]  ;;  %v5672_v12 = vpop.permute.xlu2 %5671 }
 0x54c   : > { %5707 = vrot.lane.b32.xlu2 %v5524_v44, %s9495_s8  ;;  %v5531_v14 = vrot.slane %v5529_v55, 5  ;;  %v5514_v4 = vsel %vm9761_vm14, %v5509_v60, %v5513_v63  ;;  %v5542_v30 = vor.u32 %v5541_v53, %v5537_v54  ;;  %v5574_v11 = vshrl.u32 %v5273_v25, 16  ;;  %v5272_v42 = vld [vmem:[#allocation2 + $0x8c] sm:$0x1]  ;;  %v5283_v8 = vld [vmem:[#allocation2 + $0xb8] sm:$0xf] }
 0x54d   : > { %v5577_v19 = vshll.u32 %v5273_v25, 16  ;;  %v5563_v32 = vshrl.u32 %v5271_v7, 16  ;;  %v12628_v48 = vrot.slane %v5583_v9, 5  ;;  %v5589_v27 = vrot.slane %v5587_v37, 4  ;;  %v5280_v60 = vld [vmem:[#allocation2 + $0xac] sm:$0xf] }
 0x54e   : > { %5705 = vrot.lane.b32.xlu1 %v5514_v4, %s9495_s8  ;;  %v5500_v62 = vsel %vm9761_vm14, %v5495_v57, %v5499_v61  ;;  %v5557_v18 = vrot.slane %v5556_v39, 4  ;;  %v5545_v20 = vshll.u32 %v5269_v5, 16  ;;  %v5532_v2 = vor.u32 %v5531_v14, %v5528_v26  ;;  %v5278_v53 = vld [vmem:[#allocation2 + $0xa4] sm:$0x1]  ;;  %v5177_v61 = vld [vmem:[#allocation2 + $0x18] sm:$0xf] }
 0x54f   : > { %v5561_v43 = vrot.slane %v5559_v24, 5  ;;  %v5543_v34 = vrot.slane %v5542_v30, 4  ;;  %v5576_v63 = vrot.slane %v5574_v11, 4  ;;  %v5579_v1 = vrot.slane %v5577_v19, 5  ;;  %5209 = vst.msk [vmem:[#allocation3 + $0x10] sm:$0xf] %vm14362_vm10, %v5177_v61  ;;  %vm14376_vm10 = vmmov %vm14360_vm0 }
 0x550   : > { %5703 = vrot.lane.b32.xlu0 %v5500_v62, %s9495_s8  ;;  %v5590_v45 = vor.u32 %v5589_v27, %v12628_v48  ;;  %v5565_v51 = vrot.slane %v5563_v32, 4  ;;  %v5622_v58 = vshrl.u32 %v5279_v59, 16  ;;  %v5625_v13 = vshll.u32 %v5279_v59, 16  ;;  %v5182_v61 = vld [vmem:[#allocation2 + $0x34] sm:$0xf] }
 0x551   : > { %v5562_v38 = vsel %vm9761_vm14, %v5557_v18, %v5561_v43  ;;  %v5547_v50 = vrot.slane %v5545_v20, 5  ;;  %v5533_v36 = vrot.slane %v5532_v2, 4  ;;  %v5593_v33 = vshll.u32 %v5275_v0, 16  ;;  %v5180_v0 = vld [vmem:[#allocation2 + $0x28] sm:$0xf] }
 0x552   : > { %v5607_v22 = vshll.u32 %v5277_v3, 16  ;;  %v5611_v21 = vshrl.u32 %v5277_v3, 16  ;;  %v5580_v49 = vor.u32 %v5579_v1, %v5576_v63  ;;  %v5591_v40 = vrot.slane %v5590_v45, 4  ;;  %5212 = vst.msk [vmem:[#allocation3 + $0x1c] sm:$0xf] %vm14364_vm6, %v5180_v0 }
 0x553   : > { %v5548_v28 = vsel %vm9761_vm14, %v5543_v34, %v5547_v50  ;;  %v5566_v41 = vor.u32 %v5565_v51, %v5561_v43  ;;  %v5624_v17 = vrot.slane %v5622_v58, 4  ;;  %v5627_v31 = vrot.slane %v5625_v13, 5  ;;  %v5284_v34 = vld [vmem:[#allocation2 + $0xbc] sm:$0x1]  ;;  %5214 = vst.msk [vmem:[#allocation3 + $0x24] sm:$0xf] %vm14360_vm0, %v5182_v61 }
 0x554   : > { %5713 = vrot.lane.b32.xlu2 %v5562_v38, %s9495_s8  ;;  %v5538_v56 = vsel %vm9761_vm14, %v5533_v36, %v5537_v54  ;;  %v5598_v23 = vshrl.u32 %v5276_v52, 16  ;;  %v5601_v46 = vshll.u32 %v5276_v52, 16  ;;  %v5595_v16 = vrot.slane %v5593_v33, 5  ;;  %v5282_v54 = vld [vmem:[#allocation2 + $0xb4] sm:$0xf] }
 0x555   : > { %v5569_v29 = vshll.u32 %v5272_v42, 16  ;;  %v5609_v6 = vrot.slane %v5607_v22, 5  ;;  %v5613_v47 = vrot.slane %v5611_v21, 4  ;;  %v5581_v15 = vrot.slane %v5580_v49, 4  ;;  %v5281_v38 = vld [vmem:[#allocation2 + $0xb0] sm:$0x1] }
 0x556   : > { %5711 = vrot.lane.b32.xlu1 %v5548_v28, %s9495_s8  ;;  %vm14361_vm1 = vcmask 126016   ;;  %v5596_v7 = vsel %vm9761_vm14, %v5591_v40, %v5595_v16  ;;  %v5567_v35 = vrot.slane %v5566_v41, 4  ;;  %v5628_v57 = vor.u32 %v5627_v31, %v5624_v17  ;;  %v5183_v50 = vld [vmem:[#allocation2 + $0x3c] sm:$0xf]  ;;  %v5798_v21 = vld [vmem:[#allocation2 + $0x4] sm:$0xf] }
 0x557   : > { %5766 = vst.msk [vmem:[#allocation3 + $0x4] sm:$0xf] %vm14361_vm1, %v5672_v12  ;;  %v5600_v55 = vrot.slane %v5598_v23, 4  ;;  %v5603_v9 = vrot.slane %v5601_v46, 5  ;;  %v5655_v25 = vshll.u32 %v5283_v8, 16  ;;  %v5659_v44 = vshrl.u32 %v5283_v8, 16  ;;  %vm14363_vm3 = vmmov %vm14361_vm1 }
 0x558   : > { %5709 = vrot.lane.b32.xlu0 %v5538_v56, %s9495_s8  ;;  %v5571_v39 = vrot.slane %v5569_v29, 5  ;;  %v5631_v26 = vshll.u32 %v5280_v60, 16  ;;  %v5614_v37 = vor.u32 %v5613_v47, %v5609_v6  ;;  %v5586_v24 = vsel %vm9761_vm14, %v5581_v15, %v12628_v48  ;;  %v5678_v48 = vpop.permute.xlu2 %5677  ;;  %5215 = vst.msk [vmem:[#allocation3 + $0x28] sm:$0xf] %vm14365_vm8, %v5183_v50  ;;  %v5799_v42 = vld [vmem:[#allocation2 + $0x8] sm:$0x1]  ;;  %vm14371_vm2 = vmmov %vm14361_vm1 }
 0x559   : > { %v5646_v5 = vshrl.u32 %v5282_v54, 16  ;;  %v5649_v14 = vshll.u32 %v5282_v54, 16  ;;  %v5635_v30 = vshrl.u32 %v5280_v60, 16  ;;  %v5617_v11 = vshll.u32 %v5278_v53, 16  ;;  %5769 = vst.msk [vmem:[#allocation3 + $0x10] sm:$0xf] %vm14363_vm3, %v5678_v48  ;;  %v5670_v53 = vpop.permute.xlu1 %5669  ;;  %vm14375_vm1 = vmmov %vm14360_vm0 }
 0x55a   : > { %v5572_v4 = vsel %vm9761_vm14, %v5567_v35, %v5571_v39  ;;  %v5629_v19 = vrot.slane %v5628_v57, 4  ;;  %v5604_v32 = vor.u32 %v5603_v9, %v5600_v55  ;;  %v5657_v27 = vrot.slane %v5655_v25, 5  ;;  %v5186_v41 = vld [vmem:[#allocation2 + $0x4c] sm:$0xf]  ;;  %v5176_v17 = vld [vmem:[#allocation2 + $0x10] sm:$0xf]  ;;  %vm14377_vm3 = vmmov %vm14371_vm2 }
 0x55b   : > { %v5661_v62 = vrot.slane %v5659_v44, 4  ;;  %v5633_v18 = vrot.slane %v5631_v26, 5  ;;  %v5615_v20 = vrot.slane %v5614_v37, 4  ;;  %v5648_v2 = vrot.slane %v5646_v5, 4  ;;  %5218 = vst.msk [vmem:[#allocation3 + $0x34] sm:$0xf] %vm14366_vm9, %v5186_v41  ;;  %vm14378_vm6 = vmmov %vm14371_vm2 }
 0x55c   : > { %5719 = vrot.lane.b32.xlu2 %v5596_v7, %s9495_s8  ;;  %v5651_v59 = vrot.slane %v5649_v14, 5  ;;  %v5619_v43 = vrot.slane %v5617_v11, 5  ;;  %v5605_v1 = vrot.slane %v5604_v32, 4  ;;  %v5637_v45 = vrot.slane %v5635_v30, 4  ;;  %v5175_v23 = vld [vmem:[#allocation2 + $0xc] sm:$0xf]  ;;  %vm14379_vm8 = vmmov %vm14360_vm0 }
 0x55d   : > { %v5634_v63 = vsel %vm9761_vm14, %v5629_v19, %v5633_v18  ;;  %v5662_v3 = vor.u32 %v5661_v62, %v5657_v27  ;;  %v5665_v58 = vshll.u32 %v5284_v34, 16  ;;  %v5641_v49 = vshll.u32 %v5281_v38, 16  ;;  %v5800_v46 = vld [vmem:[#allocation2 + $0xc] sm:$0xe]  ;;  %v5801_v16 = vld [vmem:[#allocation2 + $0x10] sm:$0xf]  ;;  %vm14380_vm9 = vmmov %vm14360_vm0 }
 0x55e   : > { %5717 = vrot.lane.b32.xlu1 %v5586_v24, %s9495_s8  ;;  %v5620_v51 = vsel %vm9761_vm14, %v5615_v20, %v5619_v43  ;;  %v5652_v13 = vor.u32 %v5651_v59, %v5648_v2  ;;  %v5610_v36 = vsel %vm9761_vm14, %v5605_v1, %v5609_v6  ;;  %v5638_v22 = vor.u32 %v5637_v45, %v5633_v18  ;;  %v5797_v12 = vld [vmem:[#allocation2] sm:$0xe]  ;;  %v5179_v57 = vld [vmem:[#allocation2 + $0x24] sm:$0xf]  ;;  %v5804_v54 = vld [vmem:[#allocation2 + $0x1c] sm:$0xf] }
 0x55f   : > { %v5663_v33 = vrot.slane %v5662_v3, 4  ;;  %v5667_v52 = vrot.slane %v5665_v58, 5  ;;  %v5895_v40 = vrot.slane %v5798_v21, 5  ;;  %5208 = vst.msk [vmem:[#allocation3 + $0xc] sm:$0xf] %vm14367_vm11, %v5176_v17  ;;  %v5643_v6 = vrot.slane %v5641_v49, 5  ;;  %vm14381_vm11 = vmmov %vm14360_vm0 }
 0x560   : > { %5715 = vrot.lane.b32.xlu0 %v5572_v4, %s9495_s8  ;;  %v5653_v28 = vrot.slane %v5652_v13, 4  ;;  %v5639_v56 = vrot.slane %v5638_v22, 4  ;;  %5207 = vst.msk [vmem:[#allocation3 + $0x8] sm:$0xf] %vm14368_vm12, %v5175_v23  ;;  %v5898_v8 = vrot.slane %v5799_v42, 5  ;;  %v9160_v7 = vrot.slane %v5800_v46, 9  ;;  %vm14382_vm12 = vmmov %vm14360_vm0 }
 0x561   : > { %v5668_v31 = vsel %vm9761_vm14, %v5663_v33, %v5667_v52  ;;  %v5897_v47 = vrot.slane %v5895_v40, 4  ;;  %v5189_v15 = vld [vmem:[#allocation2 + $0x60] sm:$0xf]  ;;  %v5902_v35 = vrot.slane %v5801_v16, 5  ;;  %5211 = vst.msk [vmem:[#allocation3 + $0x18] sm:$0xf] %vm14370_vm13, %v5179_v57  ;;  %vm14384_vm13 = vmmov %vm14360_vm0 }
 0x562   : > { %v5658_v29 = vsel %vm9761_vm14, %v5653_v28, %v5657_v27  ;;  %v5644_v60 = vsel %vm9761_vm14, %v5639_v56, %v5643_v6  ;;  %5221 = vst.msk [vmem:[#allocation3 + $0x40] sm:$0xf] %vm14369_vm5, %v5189_v15  ;;  %v5178_v55 = vld [vmem:[#allocation2 + $0x1c] sm:$0xf]  ;;  %v9159_v9 = vrot.slane %v5797_v12, 9  ;;  %v5909_v26 = vrot.slane %v5804_v54, 5  ;;  %vm14383_vm5 = vmmov %vm14360_vm0 }
 0x563   : > { %5765 = vst.msk [vmem:[#allocation3] sm:$0xf] %vm14371_vm2, %v5670_v53  ;;  %v5899_v44 = vsel %vm10152_vm4, %v5897_v47, %v5898_v8  ;;  %v5903_v39 = vsel %vm10152_vm4, %v9160_v7, %v5902_v35  ;;  %v5192_v37 = vld [vmem:[#allocation2 + $0x70] sm:$0xf]  ;;  %v5803_v14 = vld [vmem:[#allocation2 + $0x18] sm:$0xe]  ;;  %vm14385_vm2 = vmmov %vm14360_vm0 }
 0x564   : > { %5725 = vrot.lane.b32.xlu2 %v5634_v63, %s9495_s8  ;;  %5210 = vst.msk [vmem:[#allocation3 + $0x14] sm:$0xf] %vm14372_vm7, %v5178_v55  ;;  %v5896_v24 = vsel %vm10152_vm4, %v9159_v9, %v5895_v40  ;;  %v5181_v5 = vld [vmem:[#allocation2 + $0x30] sm:$0xf]  ;;  %v5805_v4 = vld [vmem:[#allocation2 + $0x20] sm:$0x1]  ;;  %vm14386_vm7 = vmmov %vm14360_vm0 }
 0x565   : > { %5224 = vst.msk [vmem:[#allocation3 + $0x4c] sm:$0xf] %vm14374_vm15, %v5192_v37  ;;  %v5911_v30 = vrot.slane %v5909_v26, 4  ;;  %v5802_v11 = vld [vmem:[#allocation2 + $0x14] sm:$0x1]  ;;  %v9161_v32 = vrot.slane %v5803_v14, 9  ;;  %vm14387_vm15 = vmmov %vm14360_vm0 }
 0x566   : > { %5723 = vrot.lane.b32.xlu1 %v5620_v51, %s9495_s8  ;;  %5213 = vst.msk [vmem:[#allocation3 + $0x20] sm:$0xf] %vm14375_vm1, %v5181_v5  ;;  %v5195_v19 = vld [vmem:[#allocation2 + $0x84] sm:$0xf]  ;;  %v5912_v27 = vrot.slane %v5805_v4, 5  ;;  %v5904_v0 = vrot.slane %v5902_v35, 4  ;;  %vm14388_vm1 = vmmov %vm14360_vm0 }
 0x567   : > { %5227 = vst.msk [vmem:[#allocation3 + $0x58] sm:$0xf] %vm14376_vm10, %v5195_v19  ;;  %v5185_v18 = vld [vmem:[#allocation2 + $0x48] sm:$0xf]  ;;  %v5184_v2 = vld [vmem:[#allocation2 + $0x40] sm:$0xf]  ;;  %v5910_v63 = vsel %vm10152_vm4, %v9161_v32, %v5909_v26  ;;  %vm14389_vm10 = vmmov %vm14377_vm3 }
 0x568   : > { %5721 = vrot.lane.b32.xlu0 %v5610_v36, %s9495_s8  ;;  %v5807_v20 = vld [vmem:[#allocation2 + $0x28] sm:$0xf]  ;;  %v5913_v59 = vsel %vm10152_vm4, %v5911_v30, %v5912_v27  ;;  %v5809_v43 = vld [vmem:[#allocation2 + $0x30] sm:$0xe]  ;;  %v5810_v34 = vld [vmem:[#allocation2 + $0x34] sm:$0xf] }
 0x569   : > { %5217 = vst.msk [vmem:[#allocation3 + $0x30] sm:$0xf] %vm14379_vm8, %v5185_v18  ;;  %v5905_v1 = vrot.slane %v5802_v11, 5  ;;  %v5916_v3 = vrot.slane %v5807_v20, 5  ;;  %v5808_v45 = vld [vmem:[#allocation2 + $0x2c] sm:$0x1]  ;;  %vm14392_vm8 = vmmov %vm14360_vm0 }
 0x56a   : > { %5216 = vst.msk [vmem:[#allocation3 + $0x2c] sm:$0xf] %vm14380_vm9, %v5184_v2  ;;  %v5806_v51 = vld [vmem:[#allocation2 + $0x24] sm:$0xe]  ;;  %v5198_v58 = vld [vmem:[#allocation2 + $0x94] sm:$0xf]  ;;  %vm14393_vm9 = vmmov %vm14389_vm10 }
 0x56b   : > { %v5906_v13 = vsel %vm10152_vm4, %v5904_v0, %v5905_v1  ;;  %v9163_v38 = vrot.slane %v5809_v43, 9  ;;  %v5923_v50 = vrot.slane %v5810_v34, 5  ;;  %5230 = vst.msk [vmem:[#allocation3 + $0x64] sm:$0xf] %vm14381_vm11, %v5198_v58  ;;  %v5188_v36 = vld [vmem:[#allocation2 + $0x58] sm:$0xf]  ;;  %vm14394_vm11 = vmmov %vm14360_vm0 }
 0x56c   : > { %5731 = vrot.lane.b32.xlu2 %v5668_v31, %s9495_s8  ;;  %v5813_v33 = vld [vmem:[#allocation2 + $0x40] sm:$0xf]  ;;  %5220 = vst.msk [vmem:[#allocation3 + $0x3c] sm:$0xf] %vm14382_vm12, %v5188_v36  ;;  %v5187_v22 = vld [vmem:[#allocation2 + $0x54] sm:$0xf]  ;;  %vm14395_vm12 = vmmov %vm14360_vm0 }
 0x56d   : > { %v5918_v21 = vrot.slane %v5916_v3, 4  ;;  %5219 = vst.msk [vmem:[#allocation3 + $0x38] sm:$0xf] %vm14383_vm5, %v5187_v22  ;;  %v5919_v52 = vrot.slane %v5808_v45, 5  ;;  %v5924_v28 = vsel %vm10152_vm4, %v9163_v38, %v5923_v50  ;;  %v9162_v49 = vrot.slane %v5806_v51, 9  ;;  %vm14396_vm5 = vmmov %vm14360_vm0 }
 0x56e   : > { %5729 = vrot.lane.b32.xlu1 %v5658_v29, %s9495_s8  ;;  %v5930_v42 = vrot.slane %v5813_v33, 5  ;;  %v5201_v40 = vld [vmem:[#allocation2 + $0xa8] sm:$0xf]  ;;  %v5191_v41 = vld [vmem:[#allocation2 + $0x6c] sm:$0xf] }
 0x56f   : > { %v5812_v17 = vld [vmem:[#allocation2 + $0x3c] sm:$0xe]  ;;  %5233 = vst.msk [vmem:[#allocation3 + $0x70] sm:$0xf] %vm14384_vm13, %v5201_v40  ;;  %v5190_v31 = vld [vmem:[#allocation2 + $0x64] sm:$0xf]  ;;  %v5920_v56 = vsel %vm10152_vm4, %v5918_v21, %v5919_v52  ;;  %v5917_v46 = vsel %vm10152_vm4, %v9162_v49, %v5916_v3  ;;  %vm14397_vm13 = vmmov %vm14393_vm9 }
 0x570   : > { %5727 = vrot.lane.b32.xlu0 %v5644_v60, %s9495_s8  ;;  %5223 = vst.msk [vmem:[#allocation3 + $0x48] sm:$0xf] %vm14385_vm2, %v5191_v41  ;;  %v5814_v23 = vld [vmem:[#allocation2 + $0x44] sm:$0x1]  ;;  %v9164_v16 = vrot.slane %v5812_v17, 9  ;;  %v5932_v29 = vrot.slane %v5930_v42, 4  ;;  %vm14398_vm2 = vmmov %vm14393_vm9 }
 0x571   : > { %5222 = vst.msk [vmem:[#allocation3 + $0x44] sm:$0xf] %vm14386_vm7, %v5190_v31  ;;  %v5204_v6 = vld [vmem:[#allocation2 + $0xb8] sm:$0xf]  ;;  %v5194_v47 = vld [vmem:[#allocation2 + $0x7c] sm:$0xf]  ;;  %vm14399_vm7 = vmmov %vm14398_vm2 }
 0x572   : > { %v5811_v8 = vld [vmem:[#allocation2 + $0x38] sm:$0x1]  ;;  %5236 = vst.msk [vmem:[#allocation3 + $0x7c] sm:$0xf] %vm14387_vm15, %v5204_v6  ;;  %v5933_v15 = vrot.slane %v5814_v23, 5  ;;  %v5925_v60 = vrot.slane %v5923_v50, 4  ;;  %v5931_v26 = vsel %vm10152_vm4, %v9164_v16, %v5930_v42  ;;  %vm14400_vm15 = vmmov %vm14398_vm2 }
 0x573   : > { %v5193_v12 = vld [vmem:[#allocation2 + $0x78] sm:$0xf]  ;;  %v5816_v7 = vld [vmem:[#allocation2 + $0x4c] sm:$0xf]  ;;  %5226 = vst.msk [vmem:[#allocation3 + $0x54] sm:$0xf] %vm14360_vm0, %v5194_v47 }
 0x574   : > { %6009 = vrot.lane.b32.xlu2 %v5903_v39, %s9496_s9  ;;  %v5818_v35 = vld [vmem:[#allocation2 + $0x54] sm:$0xe]  ;;  %5225 = vst.msk [vmem:[#allocation3 + $0x50] sm:$0xf] %vm14388_vm1, %v5193_v12  ;;  %v5197_v54 = vld [vmem:[#allocation2 + $0x90] sm:$0xf]  ;;  %v5934_v53 = vsel %vm10152_vm4, %v5932_v29, %v5933_v15 }
 0x575   : > { %v5684_v62 = vpop.permute.xlu2 %5683  ;;  %v5819_v55 = vld [vmem:[#allocation2 + $0x58] sm:$0xf]  ;;  %v5196_v9 = vld [vmem:[#allocation2 + $0x88] sm:$0xf]  ;;  %v5937_v39 = vrot.slane %v5816_v7, 5  ;;  %v9166_v14 = vrot.slane %v5818_v35, 9 }
 0x576   : > { %6007 = vrot.lane.b32.xlu1 %v5899_v44, %s9496_s9  ;;  %5772 = vst.msk [vmem:[#allocation3 + $0x1c] sm:$0xf] %vm14377_vm3, %v5684_v62  ;;  %v5926_v44 = vrot.slane %v5811_v8, 5  ;;  %vm14390_vm3 = vmmov %vm14360_vm0  ;;  %v5200_v37 = vld [vmem:[#allocation2 + $0xa0] sm:$0xf]  ;;  %v5944_v4 = vrot.slane %v5819_v55, 5 }
 0x577   : > { %5229 = vst.msk [vmem:[#allocation3 + $0x60] sm:$0xf] %vm14390_vm3, %v5197_v54  ;;  %v5199_v61 = vld [vmem:[#allocation2 + $0x9c] sm:$0xf]  ;;  %v5817_v5 = vld [vmem:[#allocation2 + $0x50] sm:$0x1] }
 0x578   : > { %6005 = vrot.lane.b32.xlu0 %v5896_v24, %s9496_s9  ;;  %5232 = vst.msk [vmem:[#allocation3 + $0x6c] sm:$0xf] %vm14392_vm8, %v5200_v37  ;;  %v5927_v30 = vsel %vm10152_vm4, %v5925_v60, %v5926_v44  ;;  %v5815_v11 = vld [vmem:[#allocation2 + $0x48] sm:$0xe]  ;;  %v5203_v19 = vld [vmem:[#allocation2 + $0xb4] sm:$0xf]  ;;  %v5945_v20 = vsel %vm10152_vm4, %v9166_v14, %v5944_v4 }
 0x579   : > { %v5822_v32 = vld [vmem:[#allocation2 + $0x64] sm:$0xf]  ;;  %5231 = vst.msk [vmem:[#allocation3 + $0x68] sm:$0xf] %vm14394_vm11, %v5199_v61  ;;  %v5202_v27 = vld [vmem:[#allocation2 + $0xac] sm:$0xf] }
 0x57a   : > { %v5676_v48 = vpop.permute.xlu1 %5675  ;;  %v5939_v62 = vrot.slane %v5937_v39, 4  ;;  %5235 = vst.msk [vmem:[#allocation3 + $0x78] sm:$0xf] %vm14395_vm12, %v5203_v19  ;;  %v5940_v18 = vrot.slane %v5817_v5, 5  ;;  %v5951_v2 = vrot.slane %v5822_v32, 5  ;;  %v5946_v38 = vrot.slane %v5944_v4, 4 }
 0x57b   : > { %5768 = vst.msk [vmem:[#allocation3 + $0xc] sm:$0xf] %vm14378_vm6, %v5676_v48  ;;  %vm14391_vm6 = vmmov %vm14360_vm0  ;;  %v9165_v48 = vrot.slane %v5815_v11, 9  ;;  %v5821_v43 = vld [vmem:[#allocation2 + $0x60] sm:$0xe] }
 0x57c   : > { %6015 = vrot.lane.b32.xlu2 %v5913_v59, %s9496_s9  ;;  %5228 = vst.msk [vmem:[#allocation3 + $0x5c] sm:$0xf] %vm14391_vm6, %v5196_v9  ;;  %v5941_v59 = vsel %vm10152_vm4, %v5939_v62, %v5940_v18  ;;  %v5823_v34 = vld [vmem:[#allocation2 + $0x68] sm:$0x1]  ;;  %v5953_v1 = vrot.slane %v5951_v2, 4  ;;  %v9167_v3 = vrot.slane %v5821_v43, 9  ;;  %vm14401_vm0 = vmmov %vm14398_vm2 }
 0x57d   : > { %5234 = vst.msk [vmem:[#allocation3 + $0x74] sm:$0xf] %vm14396_vm5, %v5202_v27  ;;  %v5954_v45 = vrot.slane %v5823_v34, 5  ;;  %v5820_v51 = vld [vmem:[#allocation2 + $0x5c] sm:$0x1]  ;;  %vm14402_vm1 = vmmov %vm14401_vm0 }
 0x57e   : > { %6013 = vrot.lane.b32.xlu1 %v5910_v63, %s9496_s9  ;;  %v5938_v63 = vsel %vm10152_vm4, %v9165_v48, %v5937_v39  ;;  %v5825_v58 = vld [vmem:[#allocation2 + $0x70] sm:$0xf]  ;;  %v5827_v50 = vld [vmem:[#allocation2 + $0x78] sm:$0xe]  ;;  %v5828_v36 = vld [vmem:[#allocation2 + $0x7c] sm:$0xf]  ;;  %v5952_v33 = vsel %vm10152_vm4, %v9167_v3, %v5951_v2 }
 0x57f   : > { %v5947_v22 = vrot.slane %v5820_v51, 5  ;;  %v5958_v21 = vrot.slane %v5825_v58, 5  ;;  %v5826_v42 = vld [vmem:[#allocation2 + $0x74] sm:$0x1]  ;;  %v9169_v40 = vrot.slane %v5827_v50, 9  ;;  %v5965_v41 = vrot.slane %v5828_v36, 5  ;;  %vm14404_vm3 = vmmov %vm14401_vm0 }
 0x580   : > { %6011 = vrot.lane.b32.xlu0 %v5906_v13, %s9496_s9  ;;  %v5955_v13 = vsel %vm10152_vm4, %v5953_v1, %v5954_v45  ;;  %v5824_v31 = vld [vmem:[#allocation2 + $0x6c] sm:$0xe]  ;;  %v5830_v12 = vld [vmem:[#allocation2 + $0x84] sm:$0xe]  ;;  %v5832_v15 = vld [vmem:[#allocation2 + $0x8c] sm:$0x1] }
 0x581   : > { %v5960_v23 = vrot.slane %v5958_v21, 4  ;;  %v5966_v16 = vsel %vm10152_vm4, %v9169_v40, %v5965_v41  ;;  %v9168_v29 = vrot.slane %v5824_v31, 9  ;;  %v5975_v54 = vrot.slane %v5832_v15, 5  ;;  %v5829_v55 = vld [vmem:[#allocation2 + $0x80] sm:$0x1]  ;;  %vm14405_vm6 = vmmov %vm14401_vm0 }
 0x582   : > { %v5834_v9 = vld [vmem:[#allocation2 + $0x94] sm:$0xf]  ;;  %v5967_v39 = vrot.slane %v5965_v41, 4  ;;  %v5837_v37 = vld [vmem:[#allocation2 + $0xa0] sm:$0xf]  ;;  %vm14406_vm8 = vmmov %vm14401_vm0 }
 0x583   : > { %v5959_v60 = vsel %vm10152_vm4, %v9168_v29, %v5958_v21  ;;  %v5979_v5 = vrot.slane %v5834_v9, 5  ;;  %v5986_v11 = vrot.slane %v5837_v37, 5  ;;  %v5835_v32 = vld [vmem:[#allocation2 + $0x98] sm:$0x1]  ;;  %v5833_v27 = vld [vmem:[#allocation2 + $0x90] sm:$0xe]  ;;  %vm14408_vm11 = vmmov %vm14401_vm0 }
 0x584   : > { %6021 = vrot.lane.b32.xlu2 %v5924_v28, %s9496_s9  ;;  %v5948_v28 = vsel %vm10152_vm4, %v5946_v38, %v5947_v22  ;;  %v5840_v62 = vld [vmem:[#allocation2 + $0xac] sm:$0xf]  ;;  %v5982_v48 = vrot.slane %v5835_v32, 5  ;;  %v5841_v1 = vld [vmem:[#allocation2 + $0xb0] sm:$0x1]  ;;  %vm14409_vm12 = vmmov %vm14401_vm0 }
 0x585   : > { %v5674_v57 = vpop.permute.xlu0 %5673  ;;  %v5981_v18 = vrot.slane %v5979_v5, 4  ;;  %v5838_v50 = vld [vmem:[#allocation2 + $0xa4] sm:$0x1]  ;;  %v5843_v36 = vld [vmem:[#allocation2 + $0xb8] sm:$0xf]  ;;  %v5988_v22 = vrot.slane %v5986_v11, 4  ;;  %vm14410_vm5 = vmmov %vm14401_vm0 }
 0x586   : > { %6019 = vrot.lane.b32.xlu1 %v5920_v56, %s9496_s9  ;;  %5767 = vst.msk [vmem:[#allocation3 + $0x8] sm:$0xf] %vm14389_vm10, %v5674_v57  ;;  %v5831_v56 = vld [vmem:[#allocation2 + $0x88] sm:$0xf]  ;;  %v9170_v57 = vrot.slane %v5830_v12, 9  ;;  %vm14403_vm10 = vmmov %vm14401_vm0 }
 0x587   : > { %v5972_v6 = vrot.slane %v5831_v56, 5  ;;  %v5983_v43 = vsel %vm10152_vm4, %v5981_v18, %v5982_v48  ;;  %v5844_v41 = vld [vmem:[#allocation2 + $0xbc] sm:$0x1]  ;;  %v6138_v9 = vld [vmem:[#allocation2 + $0x28] sm:$0xf] }
 0x588   : > { %6017 = vrot.lane.b32.xlu0 %v5917_v46, %s9496_s9  ;;  %v5961_v46 = vrot.slane %v5826_v42, 5  ;;  %v6136_v15 = vld [vmem:[#allocation2 + $0x1c] sm:$0xf]  ;;  %v6145_v18 = vld [vmem:[#allocation2 + $0x54] sm:$0xf] }
 0x589   : > { %v5974_v7 = vrot.slane %v5972_v6, 4  ;;  %v5973_v61 = vsel %vm10152_vm4, %v9170_v57, %v5972_v6 }
 0x58a   : > { %v5962_v47 = vsel %vm10152_vm4, %v5960_v23, %v5961_v46  ;;  %v6003_v23 = vrot.slane %v5844_v41, 5  ;;  %v6133_v46 = vld [vmem:[#allocation2 + $0xc] sm:$0xf] }
 0x58b   : > { %v5976_v44 = vsel %vm10152_vm4, %v5974_v7, %v5975_v54 }
 0x58c   : > { %6027 = vrot.lane.b32.xlu2 %v5934_v53, %s9496_s9  ;;  %v5690_v24 = vpop.permute.xlu2 %5689 }
 0x58d   : > { %5775 = vst.msk [vmem:[#allocation3 + $0x28] sm:$0xf] %vm14393_vm9, %v5690_v24  ;;  %v5968_v24 = vrot.slane %v5829_v55, 5  ;;  %vm14407_vm9 = vmmov %vm14401_vm0  ;;  %v6338_v55 = vld [vmem:[#allocation2 + $0x40] sm:$0xf] }
 0x58e   : > { %6025 = vrot.lane.b32.xlu1 %v5931_v26, %s9496_s9  ;;  %v5836_v26 = vld [vmem:[#allocation2 + $0x9c] sm:$0xe] }
 0x58f   : > { %v5969_v4 = vsel %vm10152_vm4, %v5967_v39, %v5968_v24  ;;  %v6137_v39 = vld [vmem:[#allocation2 + $0x24] sm:$0xf] }
 0x590   : > { %6023 = vrot.lane.b32.xlu0 %v5927_v30, %s9496_s9  ;;  %v9172_v30 = vrot.slane %v5836_v26, 9  ;;  %v6479_v26 = vshll.u32 %v6338_v55, 16 }
 0x592   : > { %v5987_v2 = vsel %vm10152_vm4, %v9172_v30, %v5986_v11 }
 0x594   : > { %6033 = vrot.lane.b32.xlu2 %v5945_v20, %s9496_s9  ;;  %v5696_v0 = vpop.permute.xlu2 %5695 }
 0x595   : > { %5778 = vst.msk [vmem:[#allocation3 + $0x34] sm:$0xf] %vm14397_vm13, %v5696_v0  ;;  %v5993_v0 = vrot.slane %v5840_v62, 5  ;;  %vm14411_vm13 = vmmov %vm14401_vm0 }
 0x596   : > { %6031 = vrot.lane.b32.xlu1 %v5941_v59, %s9496_s9  ;;  %v9171_v59 = vrot.slane %v5833_v27, 9 }
 0x597   : > { %v5995_v45 = vrot.slane %v5993_v0, 4 }
 0x598   : > { %6029 = vrot.lane.b32.xlu0 %v5938_v63, %s9496_s9  ;;  %v5839_v63 = vld [vmem:[#allocation2 + $0xa8] sm:$0xe]  ;;  %v5980_v3 = vsel %vm10152_vm4, %v9171_v59, %v5979_v5  ;;  %v6142_v5 = vld [vmem:[#allocation2 + $0x40] sm:$0xf] }
 0x599   : > { %v9173_v58 = vrot.slane %v5839_v63, 9 }
 0x59b   : > { %v5994_v21 = vsel %vm10152_vm4, %v9173_v58, %v5993_v0  ;;  %v6150_v58 = vld [vmem:[#allocation2 + $0x70] sm:$0xf] }
 0x59c   : > { %6039 = vrot.lane.b32.xlu2 %v5955_v13, %s9496_s9  ;;  %v5682_v17 = vpop.permute.xlu1 %5681  ;;  %v5996_v13 = vrot.slane %v5841_v1, 5  ;;  %v6146_v1 = vld [vmem:[#allocation2 + $0x58] sm:$0xf] }
 0x59d   : > { %5771 = vst.msk [vmem:[#allocation3 + $0x18] sm:$0xf] %vm14400_vm15, %v5682_v17  ;;  %v5842_v17 = vld [vmem:[#allocation2 + $0xb4] sm:$0xe]  ;;  %vm14414_vm15 = vmmov %vm14401_vm0 }
 0x59e   : > { %6037 = vrot.lane.b32.xlu1 %v5952_v33, %s9496_s9  ;;  %v5702_v52 = vpop.permute.xlu2 %5701  ;;  %v5680_v49 = vpop.permute.xlu0 %5679  ;;  %v5997_v33 = vsel %vm10152_vm4, %v5995_v45, %v5996_v13 }
 0x59f   : > { %5781 = vst.msk [vmem:[#allocation3 + $0x40] sm:$0xf] %vm14398_vm2, %v5702_v52  ;;  %v5989_v52 = vrot.slane %v5838_v50, 5  ;;  %vm14412_vm2 = vmmov %vm14401_vm0 }
 0x5a0   : > { %6035 = vrot.lane.b32.xlu0 %v5948_v28, %s9496_s9  ;;  %5770 = vst.msk [vmem:[#allocation3 + $0x14] sm:$0xf] %vm14399_vm7, %v5680_v49  ;;  %v6000_v28 = vrot.slane %v5843_v36, 5  ;;  %vm14413_vm7 = vmmov %vm14401_vm0 }
 0x5a1   : > { %v5990_v42 = vsel %vm10152_vm4, %v5988_v22, %v5989_v52  ;;  %v6153_v22 = vld [vmem:[#allocation2 + $0x84] sm:$0xf]  ;;  %v6152_v52 = vld [vmem:[#allocation2 + $0x7c] sm:$0xf] }
 0x5a2   : > { %v6002_v31 = vrot.slane %v6000_v28, 4 }
 0x5a4   : > { %6045 = vrot.lane.b32.xlu2 %v5966_v16, %s9496_s9  ;;  %v9174_v16 = vrot.slane %v5842_v17, 9  ;;  %v6004_v29 = vsel %vm10152_vm4, %v6002_v31, %v6003_v23  ;;  %v6155_v17 = vld [vmem:[#allocation2 + $0x90] sm:$0xf] }
 0x5a5   : > { %v6326_v31 = vld [vmem:[#allocation2 + $0x10] sm:$0xf] }
 0x5a6   : > { %6043 = vrot.lane.b32.xlu1 %v5962_v47, %s9496_s9  ;;  %v5708_v8 = vpop.permute.xlu2 %5707  ;;  %v5688_v35 = vpop.permute.xlu1 %5687  ;;  %v6001_v47 = vsel %vm10152_vm4, %v9174_v16, %v6000_v28  ;;  %v6383_v16 = vshll.u32 %v6326_v31, 16 }
 0x5a7   : > { %5784 = vst.msk [vmem:[#allocation3 + $0x4c] sm:$0xf] %vm14401_vm0, %v5708_v8 }
 0x5a8   : > { %6041 = vrot.lane.b32.xlu0 %v5959_v60, %s9496_s9  ;;  %5774 = vst.msk [vmem:[#allocation3 + $0x24] sm:$0xf] %vm14402_vm1, %v5688_v35  ;;  %v5686_v53 = vpop.permute.xlu0 %5685  ;;  %v6135_v60 = vld [vmem:[#allocation2 + $0x18] sm:$0xf]  ;;  %v6134_v35 = vld [vmem:[#allocation2 + $0x10] sm:$0xf] }
 0x5a9   : > { %5773 = vst.msk [vmem:[#allocation3 + $0x20] sm:$0xf] %vm14403_vm10, %v5686_v53  ;;  %vm14415_vm1 = vcmask 191616   ;;  %vm14416_vm10 = vmmov %vm14401_vm0  ;;  %v6139_v53 = vld [vmem:[#allocation2 + $0x30] sm:$0xf] }
 0x5ac   : > { %6051 = vrot.lane.b32.xlu2 %v5976_v44, %s9496_s9 }
 0x5ae   : > { %6049 = vrot.lane.b32.xlu1 %v5973_v61, %s9496_s9  ;;  %v5714_v14 = vpop.permute.xlu2 %5713  ;;  %v6483_v61 = vshrl.u32 %v6338_v55, 16 }
 0x5af   : > { %5787 = vst.msk [vmem:[#allocation3 + $0x58] sm:$0xf] %vm14404_vm3, %v5714_v14  ;;  %v5694_v19 = vpop.permute.xlu1 %5693  ;;  %vm14417_vm3 = vmmov %vm14401_vm0  ;;  %v12836_v14 = vrot.slane %v6479_v26, 5  ;;  %v6329_v26 = vld [vmem:[#allocation2 + $0x1c] sm:$0xf] }
 0x5b0   : > { %6047 = vrot.lane.b32.xlu0 %v5969_v4, %s9496_s9  ;;  %5777 = vst.msk [vmem:[#allocation3 + $0x30] sm:$0xf] %vm14405_vm6, %v5694_v19  ;;  %v5692_v20 = vpop.permute.xlu0 %5691  ;;  %vm14418_vm6 = vmmov %vm14415_vm1  ;;  %v6141_v4 = vld [vmem:[#allocation2 + $0x3c] sm:$0xf]  ;;  %v12839_v30 = vrot.slane %v6483_v61, 4 }
 0x5b1   : > { %5776 = vst.msk [vmem:[#allocation3 + $0x2c] sm:$0xf] %vm14406_vm8, %v5692_v20  ;;  %vm14419_vm8 = vmmov %vm14401_vm0  ;;  %v6140_v19 = vld [vmem:[#allocation2 + $0x34] sm:$0xf]  ;;  %v6144_v20 = vld [vmem:[#allocation2 + $0x4c] sm:$0xf] }
 0x5b2   : > { %v6486_v32 = vor.u32 %v12839_v30, %v12836_v14 }
 0x5b4   : > { %6057 = vrot.lane.b32.xlu2 %v5987_v2, %s9496_s9  ;;  %v6143_v2 = vld [vmem:[#allocation2 + $0x48] sm:$0xf] }
 0x5b6   : > { %6055 = vrot.lane.b32.xlu1 %v5983_v43, %s9496_s9  ;;  %v5720_v34 = vpop.permute.xlu2 %5719  ;;  %v6148_v43 = vld [vmem:[#allocation2 + $0x64] sm:$0xf] }
 0x5b7   : > { %5790 = vst.msk [vmem:[#allocation3 + $0x64] sm:$0xf] %vm14407_vm9, %v5720_v34  ;;  %vm14420_vm9 = vmmov %vm14401_vm0  ;;  %v6147_v34 = vld [vmem:[#allocation2 + $0x60] sm:$0xf] }
 0x5b8   : > { %6053 = vrot.lane.b32.xlu0 %v5980_v3, %s9496_s9  ;;  %v5700_v51 = vpop.permute.xlu1 %5699 }
 0x5b9   : > { %5780 = vst.msk [vmem:[#allocation3 + $0x3c] sm:$0xf] %vm14408_vm11, %v5700_v51  ;;  %vm14421_vm11 = vmmov %vm14415_vm1  ;;  %v6151_v51 = vld [vmem:[#allocation2 + $0x78] sm:$0xf] }
 0x5ba   : > { %v5698_v38 = vpop.permute.xlu0 %5697 }
 0x5bb   : > { %5779 = vst.msk [vmem:[#allocation3 + $0x38] sm:$0xf] %vm14409_vm12, %v5698_v38  ;;  %vm14422_vm12 = vmmov %vm14401_vm0  ;;  %v6149_v38 = vld [vmem:[#allocation2 + $0x6c] sm:$0xf] }
 0x5bc   : > { %6063 = vrot.lane.b32.xlu2 %v5997_v33, %s9496_s9  ;;  %v6154_v33 = vld [vmem:[#allocation2 + $0x88] sm:$0xf] }
 0x5be   : > { %6061 = vrot.lane.b32.xlu1 %v5994_v21, %s9496_s9  ;;  %v5726_v49 = vpop.permute.xlu2 %5725 }
 0x5bf   : > { %5793 = vst.msk [vmem:[#allocation3 + $0x70] sm:$0xf] %vm14410_vm5, %v5726_v49  ;;  %vm14423_vm5 = vmmov %vm14401_vm0 }
 0x5c0   : > { %6059 = vrot.lane.b32.xlu0 %v5990_v42, %s9496_s9  ;;  %v5706_v40 = vpop.permute.xlu1 %5705  ;;  %v6157_v42 = vld [vmem:[#allocation2 + $0x9c] sm:$0xf] }
 0x5c1   : > { %5783 = vst.msk [vmem:[#allocation3 + $0x48] sm:$0xf] %vm14411_vm13, %v5706_v40  ;;  %vm14424_vm13 = vmmov %vm14415_vm1  ;;  %v6156_v40 = vld [vmem:[#allocation2 + $0x94] sm:$0xf] }
 0x5c2   : > { %v5704_v56 = vpop.permute.xlu0 %5703 }
 0x5c3   : > { %5782 = vst.msk [vmem:[#allocation3 + $0x44] sm:$0xf] %vm14412_vm2, %v5704_v56  ;;  %vm14425_vm2 = vmmov %vm14415_vm1 }
 0x5c4   : > { %6197 = vrot.lane.b32.xlu2 %v6133_v46, %s9497_s10  ;;  %v6325_v46 = vld [vmem:[#allocation2 + $0xc] sm:$0xf] }
 0x5c6   : > { %6067 = vrot.lane.b32.xlu1 %v6004_v29, %s9496_s9  ;;  %v5732_v6 = vpop.permute.xlu2 %5731  ;;  %v6387_v29 = vshrl.u32 %v6326_v31, 16  ;;  %v6164_v31 = vld [vmem:[#allocation2 + $0xc4] sm:$0xf] }
 0x5c7   : > { %5796 = vst.msk [vmem:[#allocation3 + $0x7c] sm:$0xf] %vm14413_vm7, %v5732_v6  ;;  %vm14426_vm7 = vmmov %vm14415_vm1  ;;  %v6160_v6 = vld [vmem:[#allocation2 + $0xac] sm:$0xf] }
 0x5c8   : > { %6065 = vrot.lane.b32.xlu0 %v6001_v47, %s9496_s9  ;;  %v5712_v8 = vpop.permute.xlu1 %5711  ;;  %v6159_v47 = vld [vmem:[#allocation2 + $0xa8] sm:$0xf] }
 0x5c9   : > { %5786 = vst.msk [vmem:[#allocation3 + $0x54] sm:$0xf] %vm14414_vm15, %v5712_v8  ;;  %vm14427_vm15 = vmmov %vm14415_vm1  ;;  %v6374_v8 = vshrl.u32 %v6325_v46, 16 }
 0x5ca   : > { %v5710_v12 = vpop.permute.xlu0 %5709 }
 0x5cb   : > { %5785 = vst.msk [vmem:[#allocation3 + $0x50] sm:$0xf] %vm14401_vm0, %v5710_v12  ;;  %vm14428_vm0 = vmmov %vm14415_vm1  ;;  %v6377_v12 = vshll.u32 %v6325_v46, 16 }
 0x5cc   : > { %6203 = vrot.lane.b32.xlu2 %v6136_v15, %s9497_s10 }
 0x5cd   : > { %v6379_v55 = vrot.slane %v6377_v12, 5 }
 0x5ce   : > { %6201 = vrot.lane.b32.xlu1 %v6135_v60, %s9497_s10  ;;  %v6010_v7 = vpop.permute.xlu2 %6009  ;;  %v6385_v60 = vrot.slane %v6383_v16, 5 }
 0x5cf   : > { %6103 = vst.msk [vmem:[#allocation3 + $0x8] sm:$0xf] %vm14415_vm1, %v6010_v7  ;;  %vm14429_vm1 = vmmov %vm14428_vm0  ;;  %v6389_v7 = vrot.slane %v6387_v29, 4 }
 0x5d0   : > { %6199 = vrot.lane.b32.xlu0 %v6134_v35, %s9497_s10  ;;  %v5718_v57 = vpop.permute.xlu1 %5717  ;;  %v6158_v35 = vld [vmem:[#allocation2 + $0xa0] sm:$0xf] }
 0x5d1   : > { %5789 = vst.msk [vmem:[#allocation3 + $0x60] sm:$0xf] %vm14416_vm10, %v5718_v57  ;;  %vm14430_vm10 = vmmov %vm14428_vm0  ;;  %v6331_v57 = vld [vmem:[#allocation2 + $0x24] sm:$0xf] }
 0x5d2   : > { %v5716_v54 = vpop.permute.xlu0 %5715  ;;  %v6425_v61 = vshll.u32 %v6331_v57, 16 }
 0x5d3   : > { %5788 = vst.msk [vmem:[#allocation3 + $0x5c] sm:$0xf] %vm14417_vm3, %v5716_v54  ;;  %vm14431_vm3 = vmmov %vm14428_vm0 }
 0x5d4   : > { %6209 = vrot.lane.b32.xlu2 %v6139_v53, %s9497_s10  ;;  %v6376_v53 = vrot.slane %v6374_v8, 4 }
 0x5d6   : > { %6207 = vrot.lane.b32.xlu1 %v6138_v9, %s9497_s10  ;;  %v6016_v44 = vpop.permute.xlu2 %6015  ;;  %v6327_v9 = vld [vmem:[#allocation2 + $0x14] sm:$0x1] }
 0x5d7   : > { %6106 = vst.msk [vmem:[#allocation3 + $0x14] sm:$0xf] %vm14418_vm6, %v6016_v44  ;;  %vm14432_vm6 = vmmov %vm14428_vm0 }
 0x5d8   : > { %6205 = vrot.lane.b32.xlu0 %v6137_v39, %s9497_s10  ;;  %v5724_v37 = vpop.permute.xlu1 %5723  ;;  %v6390_v39 = vor.u32 %v6389_v7, %v6385_v60 }
 0x5d9   : > { %5792 = vst.msk [vmem:[#allocation3 + $0x6c] sm:$0xf] %vm14419_vm8, %v5724_v37  ;;  %vm14433_vm8 = vmmov %vm14428_vm0  ;;  %v6422_v37 = vshrl.u32 %v6331_v57, 16  ;;  %v6336_v57 = vld [vmem:[#allocation2 + $0x38] sm:$0x1] }
 0x5da   : > { %v5722_v24 = vpop.permute.xlu0 %5721 }
 0x5db   : > { %5791 = vst.msk [vmem:[#allocation3 + $0x68] sm:$0xf] %vm14420_vm9, %v5722_v24  ;;  %vm14434_vm9 = vmmov %vm14428_vm0  ;;  %v6163_v24 = vld [vmem:[#allocation2 + $0xc0] sm:$0xf] }
 0x5dc   : > { %6215 = vrot.lane.b32.xlu2 %v6142_v5, %s9497_s10  ;;  %v6393_v5 = vshll.u32 %v6327_v9, 16 }
 0x5de   : > { %6213 = vrot.lane.b32.xlu1 %v6141_v4, %s9497_s10  ;;  %v6022_v11 = vpop.permute.xlu2 %6021  ;;  %v6328_v4 = vld [vmem:[#allocation2 + $0x18] sm:$0xf] }
 0x5df   : > { %6109 = vst.msk [vmem:[#allocation3 + $0x20] sm:$0xf] %vm14421_vm11, %v6022_v11  ;;  %vm14435_vm11 = vmmov %vm14428_vm0  ;;  %v6162_v11 = vld [vmem:[#allocation2 + $0xb8] sm:$0xf] }
 0x5e0   : > { %6211 = vrot.lane.b32.xlu0 %v6140_v19, %s9497_s10  ;;  %v5730_v27 = vpop.permute.xlu1 %5729  ;;  %v6380_v19 = vor.u32 %v6379_v55, %v6376_v53 }
 0x5e1   : > { %5795 = vst.msk [vmem:[#allocation3 + $0x78] sm:$0xf] %vm14422_vm12, %v5730_v27  ;;  %vm14436_vm12 = vmmov %vm14428_vm0  ;;  %v6407_v27 = vshll.u32 %v6329_v26, 16 }
 0x5e2   : > { %v5728_v62 = vpop.permute.xlu0 %5727 }
 0x5e3   : > { %5794 = vst.msk [vmem:[#allocation3 + $0x74] sm:$0xf] %vm14423_vm5, %v5728_v62  ;;  %vm14437_vm5 = vmmov %vm14428_vm0  ;;  %v6411_v62 = vshrl.u32 %v6329_v26, 16 }
 0x5e4   : > { %6221 = vrot.lane.b32.xlu2 %v6145_v18, %s9497_s10 }
 0x5e6   : > { %6219 = vrot.lane.b32.xlu1 %v6144_v20, %s9497_s10  ;;  %v6028_v48 = vpop.permute.xlu2 %6027  ;;  %v6391_v20 = vrot.slane %v6390_v39, 4  ;;  %v6337_v39 = vld [vmem:[#allocation2 + $0x3c] sm:$0xf] }
 0x5e7   : > { %6112 = vst.msk [vmem:[#allocation3 + $0x2c] sm:$0xf] %vm14424_vm13, %v6028_v48  ;;  %vm14438_vm13 = vmmov %vm14428_vm0  ;;  %v6424_v48 = vrot.slane %v6422_v37, 4 }
 0x5e8   : > { %6217 = vrot.lane.b32.xlu0 %v6143_v2, %s9497_s10  ;;  %v6008_v59 = vpop.permute.xlu1 %6007  ;;  %v6427_v2 = vrot.slane %v6425_v61, 5  ;;  %v6465_v61 = vshll.u32 %v6336_v57, 16 }
 0x5e9   : > { %6102 = vst.msk [vmem:[#allocation3 + $0x4] sm:$0xf] %vm14425_vm2, %v6008_v59  ;;  %vm14439_vm2 = vmmov %vm14428_vm0  ;;  %v6161_v59 = vld [vmem:[#allocation2 + $0xb4] sm:$0xf] }
 0x5ea   : > { %v6006_v0 = vpop.permute.xlu0 %6005 }
 0x5eb   : > { %6101 = vst.msk [vmem:[#allocation3] sm:$0xf] %vm14426_vm7, %v6006_v0  ;;  %vm14440_vm7 = vmmov %vm14428_vm0  ;;  %v6398_v0 = vshrl.u32 %v6328_v4, 16 }
 0x5ec   : > { %6227 = vrot.lane.b32.xlu2 %v6148_v43, %s9497_s10  ;;  %v6401_v43 = vshll.u32 %v6328_v4, 16 }
 0x5ee   : > { %6225 = vrot.lane.b32.xlu1 %v6147_v34, %s9497_s10  ;;  %v6034_v63 = vpop.permute.xlu2 %6033 }
 0x5ef   : > { %6115 = vst.msk [vmem:[#allocation3 + $0x38] sm:$0xf] %vm14427_vm15, %v6034_v63  ;;  %vm14441_vm15 = vmmov %vm14428_vm0  ;;  %v6395_v63 = vrot.slane %v6393_v5, 5  ;;  %v6333_v5 = vld [vmem:[#allocation2 + $0x2c] sm:$0x1] }
 0x5f0   : > { %6223 = vrot.lane.b32.xlu0 %v6146_v1, %s9497_s10  ;;  %v6014_v3 = vpop.permute.xlu1 %6013  ;;  %v6332_v1 = vld [vmem:[#allocation2 + $0x28] sm:$0xf] }
 0x5f1   : > { %6105 = vst.msk [vmem:[#allocation3 + $0x10] sm:$0xf] %vm14428_vm0, %v6014_v3  ;;  %v6335_v3 = vld [vmem:[#allocation2 + $0x34] sm:$0xf]  ;;  %v6435_v46 = vshrl.u32 %v6332_v1, 16 }
 0x5f2   : > { %v6012_v45 = vpop.permute.xlu0 %6011 }
 0x5f3   : > { %6104 = vst.msk [vmem:[#allocation3 + $0xc] sm:$0xf] %vm14429_vm1, %v6012_v45  ;;  %vm14442_vm1 = vmmov %vm14428_vm0  ;;  %v6381_v45 = vrot.slane %v6380_v19, 4 }
 0x5f4   : > { %6233 = vrot.lane.b32.xlu2 %v6151_v51, %s9497_s10  ;;  %v6409_v51 = vrot.slane %v6407_v27, 5 }
 0x5f6   : > { %6231 = vrot.lane.b32.xlu1 %v6150_v58, %s9497_s10  ;;  %v6040_v13 = vpop.permute.xlu2 %6039  ;;  %v6413_v58 = vrot.slane %v6411_v62, 4  ;;  %v6886_v62 = vld [vmem:[#allocation2 + $0x10] sm:$0xf] }
 0x5f7   : > { %6118 = vst.msk [vmem:[#allocation3 + $0x44] sm:$0xf] %vm14430_vm10, %v6040_v13  ;;  %vm14443_vm10 = vmmov %vm14428_vm0 }
 0x5f8   : > { %6229 = vrot.lane.b32.xlu0 %v6149_v38, %s9497_s10  ;;  %v6020_v50 = vpop.permute.xlu1 %6019  ;;  %v6396_v38 = vsel %vm9761_vm14, %v6391_v20, %v6395_v63  ;;  %v6983_v63 = vrot.slane %v6886_v62, 5 }
 0x5f9   : > { %6108 = vst.msk [vmem:[#allocation3 + $0x1c] sm:$0xf] %vm14431_vm3, %v6020_v50  ;;  %v6330_v50 = vld [vmem:[#allocation2 + $0x20] sm:$0x1]  ;;  %vm14444_vm3 = vcmask 257216  }
 0x5fa   : > { %v6018_v36 = vpop.permute.xlu0 %6017 }
 0x5fb   : > { %6107 = vst.msk [vmem:[#allocation3 + $0x18] sm:$0xf] %vm14432_vm6, %v6018_v36  ;;  %v6428_v36 = vor.u32 %v6427_v2, %v6424_v48  ;;  %vm14445_vm6 = vmmov %vm14428_vm0  ;;  %v7413_v48 = vld [vmem:[#allocation2 + $0x18] sm:$0xf] }
 0x5fc   : > { %6239 = vrot.lane.b32.xlu2 %v6154_v33, %s9497_s10  ;;  %v6334_v33 = vld [vmem:[#allocation2 + $0x30] sm:$0xf] }
 0x5fd   : > { %v6429_v16 = vrot.slane %v6428_v36, 4  ;;  %v6885_v36 = vld [vmem:[#allocation2 + $0xc] sm:$0xe] }
 0x5fe   : > { %6237 = vrot.lane.b32.xlu1 %v6153_v22, %s9497_s10  ;;  %v6046_v21 = vpop.permute.xlu2 %6045  ;;  %v6400_v22 = vrot.slane %v6398_v0, 4  ;;  %v6441_v0 = vshll.u32 %v6333_v5, 16 }
 0x5ff   : > { %6121 = vst.msk [vmem:[#allocation3 + $0x50] sm:$0xf] %vm14433_vm8, %v6046_v21  ;;  %v6403_v21 = vrot.slane %v6401_v43, 5  ;;  %vm14446_vm8 = vmmov %vm14428_vm0 }
 0x600   : > { %6235 = vrot.lane.b32.xlu0 %v6152_v52, %s9497_s10  ;;  %v6026_v28 = vpop.permute.xlu1 %6025  ;;  %v6455_v52 = vshll.u32 %v6335_v3, 16 }
 0x601   : > { %6111 = vst.msk [vmem:[#allocation3 + $0x28] sm:$0xf] %vm14434_vm9, %v6026_v28  ;;  %v6459_v28 = vshrl.u32 %v6335_v3, 16  ;;  %v6404_v29 = vor.u32 %v6403_v21, %v6400_v22  ;;  %vm14447_vm9 = vmmov %vm14444_vm3  ;;  %v6985_v22 = vrot.slane %v6983_v63, 4 }
 0x602   : > { %v6024_v49 = vpop.permute.xlu0 %6023 }
 0x603   : > { %6110 = vst.msk [vmem:[#allocation3 + $0x24] sm:$0xf] %vm14435_vm11, %v6024_v49  ;;  %v6431_v49 = vshll.u32 %v6332_v1, 16  ;;  %v6405_v9 = vrot.slane %v6404_v29, 4  ;;  %vm14448_vm11 = vmmov %vm14428_vm0 }
 0x604   : > { %6245 = vrot.lane.b32.xlu2 %v6157_v42, %s9497_s10  ;;  %v6386_v42 = vsel %vm9761_vm14, %v6381_v45, %v6385_v60 }
 0x605   : > { %v6410_v19 = vsel %vm9761_vm14, %v6405_v9, %v6409_v51  ;;  %v7973_v9 = vld [vmem:[#allocation2 + $0x18] sm:$0xe] }
 0x606   : > { %6243 = vrot.lane.b32.xlu1 %v6156_v40, %s9497_s10  ;;  %v6052_v41 = vpop.permute.xlu2 %6051  ;;  %v6414_v40 = vor.u32 %v6413_v58, %v6409_v51  ;;  %v7462_v51 = vshrl.u32 %v7413_v48, 16  ;;  %v7465_v58 = vshll.u32 %v7413_v48, 16 }
 0x607   : > { %6124 = vst.msk [vmem:[#allocation3 + $0x5c] sm:$0xf] %vm14436_vm12, %v6052_v41  ;;  %v6446_v41 = vshrl.u32 %v6334_v33, 16  ;;  %vm14449_vm12 = vmmov %vm14428_vm0 }
 0x608   : > { %6241 = vrot.lane.b32.xlu0 %v6155_v17, %s9497_s10  ;;  %v6032_v56 = vpop.permute.xlu1 %6031  ;;  %v6449_v17 = vshll.u32 %v6334_v33, 16  ;;  %v6415_v12 = vrot.slane %v6414_v40, 4  ;;  %v6887_v33 = vld [vmem:[#allocation2 + $0x14] sm:$0x1]  ;;  %v9175_v40 = vrot.slane %v6885_v36, 9 }
 0x609   : > { %6114 = vst.msk [vmem:[#allocation3 + $0x34] sm:$0xf] %vm14437_vm5, %v6032_v56  ;;  %v6448_v60 = vrot.slane %v6446_v41, 4  ;;  %vm14450_vm5 = vmmov %vm14444_vm3  ;;  %v6986_v41 = vrot.slane %v6887_v33, 5  ;;  %v6888_v36 = vld [vmem:[#allocation2 + $0x18] sm:$0xe] }
 0x60a   : > { %v6030_v23 = vpop.permute.xlu0 %6029  ;;  %v6451_v7 = vrot.slane %v6449_v17, 5  ;;  %v6349_v33 = vld [vmem:[#allocation2 + $0x6c] sm:$0xf] }
 0x60b   : > { %6113 = vst.msk [vmem:[#allocation3 + $0x30] sm:$0xf] %vm14438_vm13, %v6030_v23  ;;  %v6417_v23 = vshll.u32 %v6330_v50, 16  ;;  %vm14451_vm13 = vmmov %vm14428_vm0 }
 0x60c   : > { %6251 = vrot.lane.b32.xlu2 %v6160_v6, %s9497_s10  ;;  %v6457_v6 = vrot.slane %v6455_v52, 5  ;;  %v6452_v37 = vor.u32 %v6451_v7, %v6448_v60  ;;  %v7974_v60 = vld [vmem:[#allocation2 + $0x1c] sm:$0xf] }
 0x60d   : > { %v6419_v53 = vrot.slane %v6417_v23, 5 }
 0x60e   : > { %6249 = vrot.lane.b32.xlu1 %v6159_v47, %s9497_s10  ;;  %v6058_v15 = vpop.permute.xlu2 %6057  ;;  %v6461_v47 = vrot.slane %v6459_v28, 4  ;;  %v6453_v2 = vrot.slane %v6452_v37, 4  ;;  %v7464_v28 = vrot.slane %v7462_v51, 4  ;;  %v7221_v37 = vld [vmem:[#allocation2 + $0x18] sm:$0xf] }
 0x60f   : > { %6127 = vst.msk [vmem:[#allocation3 + $0x68] sm:$0xf] %vm14439_vm2, %v6058_v15  ;;  %v6433_v15 = vrot.slane %v6431_v49, 5  ;;  %v6420_v26 = vsel %vm9761_vm14, %v6415_v12, %v6419_v53  ;;  %v7467_v49 = vrot.slane %v7465_v58, 5  ;;  %vm14452_vm2 = vmmov %vm14428_vm0  ;;  %v6890_v58 = vld [vmem:[#allocation2 + $0x20] sm:$0x1] }
 0x610   : > { %6247 = vrot.lane.b32.xlu0 %v6158_v35, %s9497_s10  ;;  %v6038_v54 = vpop.permute.xlu1 %6037 }
 0x611   : > { %6117 = vst.msk [vmem:[#allocation3 + $0x40] sm:$0xf] %vm14440_vm7, %v6038_v54  ;;  %v6437_v54 = vrot.slane %v6435_v46, 4  ;;  %v6434_v55 = vsel %vm9761_vm14, %v6429_v16, %v6433_v15  ;;  %v7468_v46 = vor.u32 %v7467_v49, %v7464_v28  ;;  %v6984_v16 = vsel %vm10152_vm4, %v9175_v40, %v6983_v63  ;;  %vm14453_vm7 = vmmov %vm14444_vm3  ;;  %v7418_v40 = vld [vmem:[#allocation2 + $0x2c] sm:$0x1] }
 0x612   : > { %v6036_v44 = vpop.permute.xlu0 %6035  ;;  %v6993_v49 = vrot.slane %v6890_v58, 5  ;;  %v6911_v58 = vld [vmem:[#allocation2 + $0x74] sm:$0x1] }
 0x613   : > { %6116 = vst.msk [vmem:[#allocation3 + $0x3c] sm:$0xf] %vm14441_vm15, %v6036_v44  ;;  %v6462_v44 = vor.u32 %v6461_v47, %v6457_v6  ;;  %v6438_v4 = vor.u32 %v6437_v54, %v6433_v15  ;;  %vm14454_vm15 = vmmov %vm14428_vm0  ;;  %v8071_v54 = vrot.slane %v7974_v60, 5 }
 0x614   : > { %6257 = vrot.lane.b32.xlu2 %v6163_v24, %s9497_s10 }
 0x615   : > { %v6463_v27 = vrot.slane %v6462_v44, 4 }
 0x616   : > { %6255 = vrot.lane.b32.xlu1 %v6162_v11, %s9497_s10  ;;  %v6064_v18 = vpop.permute.xlu2 %6063  ;;  %v6470_v11 = vshrl.u32 %v6337_v39, 16 }
 0x617   : > { %6130 = vst.msk [vmem:[#allocation3 + $0x74] sm:$0xf] %vm14428_vm0, %v6064_v18  ;;  %v6473_v18 = vshll.u32 %v6337_v39, 16  ;;  %v7975_v39 = vld [vmem:[#allocation2 + $0x20] sm:$0x1] }
 0x618   : > { %6253 = vrot.lane.b32.xlu0 %v6161_v59, %s9497_s10  ;;  %v6044_v34 = vpop.permute.xlu1 %6043  ;;  %v6467_v59 = vrot.slane %v6465_v61, 5  ;;  %v6472_v1 = vrot.slane %v6470_v11, 4  ;;  %v8073_v61 = vrot.slane %v8071_v54, 4  ;;  %v7417_v11 = vld [vmem:[#allocation2 + $0x28] sm:$0xf] }
 0x619   : > { %6120 = vst.msk [vmem:[#allocation3 + $0x4c] sm:$0xf] %vm14442_vm1, %v6044_v34  ;;  %v6439_v34 = vrot.slane %v6438_v4, 4  ;;  %v6475_v45 = vrot.slane %v6473_v18, 5  ;;  %vm14455_vm1 = vmmov %vm14444_vm3  ;;  %v9191_v4 = vrot.slane %v7973_v9, 9 }
 0x61a   : > { %v6042_v13 = vpop.permute.xlu0 %6041  ;;  %v6468_v3 = vsel %vm9761_vm14, %v6463_v27, %v6467_v59  ;;  %v6889_v18 = vld [vmem:[#allocation2 + $0x1c] sm:$0xf]  ;;  %v7495_v59 = vshll.u32 %v7417_v11, 16 }
 0x61b   : > { %6119 = vst.msk [vmem:[#allocation3 + $0x48] sm:$0xf] %vm14443_vm10, %v6042_v13  ;;  %v6458_v13 = vsel %vm9761_vm14, %v6453_v2, %v6457_v6  ;;  %v6476_v52 = vor.u32 %v6475_v45, %v6472_v1  ;;  %vm14456_vm10 = vmmov %vm14455_vm1  ;;  %v6990_v63 = vrot.slane %v6889_v18, 5 }
 0x61c   : > { %6759 = vrot.lane.b32.xlu2 %v6396_v38, %s9498_s11  ;;  %v6443_v38 = vrot.slane %v6441_v0, 5  ;;  %v7499_v0 = vshrl.u32 %v7417_v11, 16  ;;  %v6910_v11 = vld [vmem:[#allocation2 + $0x70] sm:$0xf] }
 0x61d   : > { %v6477_v23 = vrot.slane %v6476_v52, 4 }
 0x61e   : > { %6757 = vrot.lane.b32.xlu1 %v6386_v42, %s9498_s11  ;;  %v6198_v56 = vpop.permute.xlu2 %6197  ;;  %v6444_v21 = vsel %vm9761_vm14, %v6439_v34, %v6443_v38  ;;  %v7501_v38 = vrot.slane %v7499_v0, 4 }
 0x61f   : > { %6293 = vst.msk [vmem:[#allocation3] sm:$0xf] %vm14444_vm3, %v6198_v56  ;;  %v6987_v56 = vsel %vm10152_vm4, %v6985_v22, %v6986_v41  ;;  %v6482_v47 = vsel %vm9761_vm14, %v6477_v23, %v12836_v14  ;;  %vm14457_vm3 = vmmov %vm14455_vm1  ;;  %v6992_v22 = vrot.slane %v6990_v63, 4  ;;  %v9176_v41 = vrot.slane %v6888_v36, 9 }
 0x620   : > { %6259 = vrot.lane.b32.xlu0 %v6164_v31, %s9497_s10  ;;  %v6050_v8 = vpop.permute.xlu1 %6049  ;;  %v7414_v31 = vld [vmem:[#allocation2 + $0x1c] sm:$0xf] }
 0x621   : > { %6123 = vst.msk [vmem:[#allocation3 + $0x58] sm:$0xf] %vm14445_vm6, %v6050_v8  ;;  %v7471_v29 = vshll.u32 %v7414_v31, 16  ;;  %v7469_v8 = vrot.slane %v7468_v46, 4  ;;  %v7475_v12 = vshrl.u32 %v7414_v31, 16  ;;  %vm14458_vm6 = vmmov %vm14455_vm1  ;;  %v6566_v31 = vshrl.u32 %v6349_v33, 16 }
 0x622   : > { %v6048_v35 = vpop.permute.xlu0 %6047  ;;  %v6994_v23 = vsel %vm10152_vm4, %v6992_v22, %v6993_v49 }
 0x623   : > { %6122 = vst.msk [vmem:[#allocation3 + $0x54] sm:$0xf] %vm14446_vm8, %v6048_v35  ;;  %v7473_v7 = vrot.slane %v7471_v29, 5  ;;  %v7477_v53 = vrot.slane %v7475_v12, 4  ;;  %vm14459_vm8 = vmmov %vm14455_vm1 }
 0x624   : > { %6765 = vrot.lane.b32.xlu2 %v6434_v55, %s9498_s11  ;;  %v7222_v55 = vld [vmem:[#allocation2 + $0x1c] sm:$0xf] }
 0x625   : > { %v7474_v57 = vsel %vm9761_vm14, %v7469_v8, %v7473_v7  ;;  %v6568_v8 = vrot.slane %v6566_v31, 4 }
 0x626   : > { %6763 = vrot.lane.b32.xlu1 %v6420_v26, %s9498_s11  ;;  %v6204_v24 = vpop.permute.xlu2 %6203  ;;  %v7415_v26 = vld [vmem:[#allocation2 + $0x20] sm:$0x1] }
 0x627   : > { %6296 = vst.msk [vmem:[#allocation3 + $0xc] sm:$0xf] %vm14447_vm9, %v6204_v24  ;;  %v7478_v24 = vor.u32 %v7477_v53, %v7473_v7  ;;  %v7481_v27 = vshll.u32 %v7415_v26, 16  ;;  %vm14460_vm9 = vmmov %vm14455_vm1  ;;  %v7224_v26 = vld [vmem:[#allocation2 + $0x28] sm:$0xf] }
 0x628   : > { %6761 = vrot.lane.b32.xlu0 %v6410_v19, %s9498_s11  ;;  %v6056_v20 = vpop.permute.xlu1 %6055  ;;  %v8074_v19 = vrot.slane %v7975_v39, 5 }
 0x629   : > { %6126 = vst.msk [vmem:[#allocation3 + $0x64] sm:$0xf] %vm14448_vm11, %v6056_v20  ;;  %v7416_v20 = vld [vmem:[#allocation2 + $0x24] sm:$0xf]  ;;  %v7479_v2 = vrot.slane %v7478_v24, 4  ;;  %v7483_v34 = vrot.slane %v7481_v27, 5  ;;  %vm14461_vm11 = vmmov %vm14455_vm1 }
 0x62a   : > { %v6054_v43 = vpop.permute.xlu0 %6053  ;;  %v8075_v48 = vsel %vm10152_vm4, %v8073_v61, %v8074_v19  ;;  %v7486_v1 = vshrl.u32 %v7416_v20, 16  ;;  %v7978_v61 = vld [vmem:[#allocation2 + $0x2c] sm:$0x1]  ;;  %v7976_v24 = vld [vmem:[#allocation2 + $0x24] sm:$0xe] }
 0x62b   : > { %6125 = vst.msk [vmem:[#allocation3 + $0x60] sm:$0xf] %vm14449_vm12, %v6054_v43  ;;  %v8072_v43 = vsel %vm10152_vm4, %v9191_v4, %v8071_v54  ;;  %v7484_v51 = vsel %vm9761_vm14, %v7479_v2, %v7483_v34  ;;  %vm14462_vm12 = vmmov %vm14455_vm1  ;;  %v6350_v54 = vld [vmem:[#allocation2 + $0x70] sm:$0xf]  ;;  %v7437_v27 = vld [vmem:[#allocation2 + $0x78] sm:$0xf] }
 0x62c   : > { %6771 = vrot.lane.b32.xlu2 %v6468_v3, %s9498_s11  ;;  %v7489_v3 = vshll.u32 %v7416_v20, 16  ;;  %v6575_v39 = vshll.u32 %v6350_v54, 16  ;;  %v6579_v4 = vshrl.u32 %v6350_v54, 16  ;;  %v9192_v2 = vrot.slane %v7976_v24, 9  ;;  %v7997_v54 = vld [vmem:[#allocation2 + $0x78] sm:$0xe] }
 0x62d   : > { %v7654_v34 = vshrl.u32 %v7437_v27, 16  ;;  %v7420_v24 = vld [vmem:[#allocation2 + $0x34] sm:$0xf] }
 0x62e   : > { %6769 = vrot.lane.b32.xlu1 %v6458_v13, %s9498_s11  ;;  %v6210_v50 = vpop.permute.xlu2 %6209  ;;  %v7497_v13 = vrot.slane %v7495_v59, 5  ;;  %v7491_v52 = vrot.slane %v7489_v3, 5  ;;  %v6577_v18 = vrot.slane %v6575_v39, 5  ;;  %v7039_v59 = vrot.slane %v6910_v11, 5  ;;  %v6892_v11 = vld [vmem:[#allocation2 + $0x28] sm:$0xf] }
 0x62f   : > { %6299 = vst.msk [vmem:[#allocation3 + $0x18] sm:$0xf] %vm14450_vm5, %v6210_v50  ;;  %vm14463_vm5 = vmmov %vm14455_vm1  ;;  %v7656_v36 = vrot.slane %v7654_v34, 4 }
 0x630   : > { %6767 = vrot.lane.b32.xlu0 %v6444_v21, %s9498_s11  ;;  %v6062_v42 = vpop.permute.xlu1 %6061  ;;  %v7488_v21 = vrot.slane %v7486_v1, 4 }
 0x631   : > { %6129 = vst.msk [vmem:[#allocation3 + $0x70] sm:$0xf] %vm14451_vm13, %v6062_v42  ;;  %v7223_v42 = vld [vmem:[#allocation2 + $0x24] sm:$0xf]  ;;  %vm14464_vm13 = vmmov %vm14455_vm1 }
 0x632   : > { %v6060_v17 = vpop.permute.xlu0 %6059  ;;  %v7492_v46 = vor.u32 %v7491_v52, %v7488_v21  ;;  %v7042_v52 = vrot.slane %v6911_v58, 5 }
 0x633   : > { %6128 = vst.msk [vmem:[#allocation3 + $0x6c] sm:$0xf] %vm14452_vm2, %v6060_v17  ;;  %v7502_v17 = vor.u32 %v7501_v38, %v7497_v13  ;;  %vm14465_vm2 = vmmov %vm14455_vm1  ;;  %v7041_v38 = vrot.slane %v7039_v59, 4 }
 0x634   : > { %7095 = vrot.lane.b32.xlu2 %v6987_v56, %s9499_s12  ;;  %v6569_v56 = vshll.u32 %v6349_v33, 16  ;;  %v7493_v60 = vrot.slane %v7492_v46, 4 }
 0x636   : > { %7093 = vrot.lane.b32.xlu1 %v6984_v16, %s9499_s12  ;;  %v6216_v6 = vpop.permute.xlu2 %6215  ;;  %v7505_v16 = vshll.u32 %v7418_v40, 16  ;;  %v6571_v12 = vrot.slane %v6569_v56, 5  ;;  %v7498_v9 = vsel %vm9761_vm14, %v7493_v60, %v7497_v13  ;;  %v6351_v13 = vld [vmem:[#allocation2 + $0x74] sm:$0x1]  ;;  %v7043_v40 = vsel %vm10152_vm4, %v7041_v38, %v7042_v52  ;;  %v6352_v38 = vld [vmem:[#allocation2 + $0x78] sm:$0xf] }
 0x637   : > { %6302 = vst.msk [vmem:[#allocation3 + $0x24] sm:$0xf] %vm14453_vm7, %v6216_v6  ;;  %v6991_v6 = vsel %vm10152_vm4, %v9176_v41, %v6990_v63  ;;  %vm14466_vm7 = vmmov %vm14455_vm1  ;;  %v7657_v63 = vshll.u32 %v7437_v27, 16  ;;  %v7419_v27 = vld [vmem:[#allocation2 + $0x30] sm:$0xf] }
 0x638   : > { %6773 = vrot.lane.b32.xlu0 %v6482_v47, %s9498_s11  ;;  %v6068_v15 = vpop.permute.xlu1 %6067  ;;  %v7503_v47 = vrot.slane %v7502_v17, 4  ;;  %v7507_v7 = vrot.slane %v7505_v16, 5  ;;  %v7513_v34 = vshll.u32 %v7419_v27, 16  ;;  %v7225_v52 = vld [vmem:[#allocation2 + $0x30] sm:$0xf] }
 0x639   : > { %6132 = vst.msk [vmem:[#allocation3 + $0x7c] sm:$0xf] %vm14454_vm15, %v6068_v15  ;;  %vm14467_vm15 = vmmov %vm14455_vm1  ;;  %v7659_v33 = vrot.slane %v7657_v63, 5 }
 0x63a   : > { %v6066_v35 = vpop.permute.xlu0 %6065  ;;  %v7508_v53 = vsel %vm9761_vm14, %v7503_v47, %v7507_v7 }
 0x63b   : > { %6131 = vst.msk [vmem:[#allocation3 + $0x78] sm:$0xf] %vm14428_vm0, %v6066_v35  ;;  %vm14468_vm0 = vmmov %vm14455_vm1  ;;  %v7660_v17 = vor.u32 %v7659_v33, %v7656_v36  ;;  %v7515_v33 = vrot.slane %v7513_v34, 5 }
 0x63c   : > { %7845 = vrot.lane.b32.xlu2 %v7474_v57, %s9501_s19  ;;  %v7977_v57 = vld [vmem:[#allocation2 + $0x28] sm:$0xf] }
 0x63e   : > { %7287 = vrot.lane.b32.xlu1 %v7222_v55, %s9500_s13  ;;  %v6222_v44 = vpop.permute.xlu2 %6221  ;;  %v6572_v55 = vor.u32 %v6571_v12, %v6568_v8  ;;  %v7998_v8 = vld [vmem:[#allocation2 + $0x7c] sm:$0xf] }
 0x63f   : > { %6305 = vst.msk [vmem:[#allocation3 + $0x30] sm:$0xf] %vm14455_vm1, %v6222_v44  ;;  %v8078_v44 = vrot.slane %v7977_v57, 5  ;;  %vm14469_vm1 = vmmov %vm14468_vm0  ;;  %v8127_v7 = vrot.slane %v7998_v8, 5  ;;  %v7238_v57 = vld [vmem:[#allocation2 + $0x7c] sm:$0xf] }
 0x640   : > { %7285 = vrot.lane.b32.xlu0 %v7221_v37, %s9500_s13  ;;  %v6202_v5 = vpop.permute.xlu1 %6201 }
 0x641   : > { %6295 = vst.msk [vmem:[#allocation3 + $0x8] sm:$0xf] %vm14456_vm10, %v6202_v5  ;;  %v6573_v5 = vrot.slane %v6572_v55, 4  ;;  %v8079_v3 = vsel %vm10152_vm4, %v9192_v2, %v8078_v44  ;;  %vm14470_vm10 = vmmov %vm14468_vm0  ;;  %v7999_v55 = vld [vmem:[#allocation2 + $0x80] sm:$0x1]  ;;  %v8129_v39 = vrot.slane %v8127_v7, 4 }
 0x642   : > { %v6200_v62 = vpop.permute.xlu0 %6199  ;;  %v6997_v2 = vrot.slane %v6892_v11, 5 }
 0x643   : > { %6294 = vst.msk [vmem:[#allocation3 + $0x4] sm:$0xf] %vm14457_vm3, %v6200_v62  ;;  %v8080_v62 = vrot.slane %v8078_v44, 4  ;;  %v6578_v0 = vsel %vm9761_vm14, %v6573_v5, %v6577_v18  ;;  %vm14471_vm3 = vmmov %vm14468_vm0  ;;  %v7237_v44 = vld [vmem:[#allocation2 + $0x78] sm:$0xf]  ;;  %v8130_v5 = vrot.slane %v7999_v55, 5 }
 0x644   : > { %8183 = vrot.lane.b32.xlu2 %v8075_v48, %s9502_s20  ;;  %v8081_v48 = vrot.slane %v7978_v61, 5  ;;  %v9199_v61 = vrot.slane %v7997_v54, 9 }
 0x646   : > { %8181 = vrot.lane.b32.xlu1 %v8072_v43, %s9502_s20  ;;  %v6228_v45 = vpop.permute.xlu2 %6227  ;;  %v6581_v43 = vrot.slane %v6579_v4, 4  ;;  %v8082_v1 = vsel %vm10152_vm4, %v8080_v62, %v8081_v48  ;;  %v8131_v62 = vsel %vm10152_vm4, %v8129_v39, %v8130_v5  ;;  %v7523_v48 = vshrl.u32 %v7420_v24, 16  ;;  %v7981_v39 = vld [vmem:[#allocation2 + $0x38] sm:$0x1]  ;;  %v6913_v5 = vld [vmem:[#allocation2 + $0x7c] sm:$0xf] }
 0x647   : > { %6308 = vst.msk [vmem:[#allocation3 + $0x3c] sm:$0xf] %vm14458_vm6, %v6228_v45  ;;  %vm14472_vm6 = vmmov %vm14468_vm0 }
 0x648   : > { %7847 = vrot.lane.b32.xlu0 %v7484_v51, %s9501_s19  ;;  %v6208_v50 = vpop.permute.xlu1 %6207  ;;  %v6909_v51 = vld [vmem:[#allocation2 + $0x6c] sm:$0xe] }
 0x649   : > { %6298 = vst.msk [vmem:[#allocation3 + $0x14] sm:$0xf] %vm14459_vm8, %v6208_v50  ;;  %v6582_v50 = vor.u32 %v6581_v43, %v6577_v18  ;;  %v9183_v21 = vrot.slane %v6909_v51, 9  ;;  %vm14473_vm8 = vmmov %vm14468_vm0  ;;  %v7510_v43 = vshrl.u32 %v7419_v27, 16  ;;  %v7525_v51 = vrot.slane %v7523_v48, 4 }
 0x64a   : > { %v6206_v28 = vpop.permute.xlu0 %6205 }
 0x64b   : > { %6297 = vst.msk [vmem:[#allocation3 + $0x10] sm:$0xf] %vm14460_vm9, %v6206_v28  ;;  %v6585_v28 = vshll.u32 %v6351_v13, 16  ;;  %v6583_v41 = vrot.slane %v6582_v50, 4  ;;  %v7040_v31 = vsel %vm10152_vm4, %v9183_v21, %v7039_v59  ;;  %vm14474_vm9 = vmmov %vm14468_vm0  ;;  %v8128_v59 = vsel %vm10152_vm4, %v9199_v61, %v8127_v7  ;;  %v6891_v13 = vld [vmem:[#allocation2 + $0x24] sm:$0xe] }
 0x64c   : > { %7289 = vrot.lane.b32.xlu2 %v7223_v42, %s9500_s13  ;;  %v7438_v42 = vld [vmem:[#allocation2 + $0x7c] sm:$0xf]  ;;  %v6999_v50 = vrot.slane %v6997_v2, 4  ;;  %v7512_v36 = vrot.slane %v7510_v43, 4  ;;  %v7979_v61 = vld [vmem:[#allocation2 + $0x30] sm:$0xe] }
 0x64d   : > { %v6587_v56 = vrot.slane %v6585_v28, 5  ;;  %v7421_v28 = vld [vmem:[#allocation2 + $0x38] sm:$0x1]  ;;  %v6353_v7 = vld [vmem:[#allocation2 + $0x7c] sm:$0xf] }
 0x64e   : > { %7099 = vrot.lane.b32.xlu1 %v6994_v23, %s9499_s12  ;;  %v6234_v29 = vpop.permute.xlu2 %6233  ;;  %v7663_v23 = vshll.u32 %v7438_v42, 16  ;;  %v6599_v55 = vshll.u32 %v6353_v7, 16 }
 0x64f   : > { %6311 = vst.msk [vmem:[#allocation3 + $0x48] sm:$0xf] %vm14461_vm11, %v6234_v29  ;;  %v6588_v16 = vsel %vm9761_vm14, %v6583_v41, %v6587_v56  ;;  %v7661_v29 = vrot.slane %v7660_v17, 4  ;;  %vm14475_vm11 = vmmov %vm14468_vm0  ;;  %v6593_v41 = vshll.u32 %v6352_v38, 16  ;;  %v7529_v56 = vshll.u32 %v7421_v28, 16 }
 0x650   : > { %7097 = vrot.lane.b32.xlu0 %v6991_v6, %s9499_s12  ;;  %v6214_v15 = vpop.permute.xlu1 %6213  ;;  %v7667_v6 = vshrl.u32 %v7438_v42, 16  ;;  %v7665_v12 = vrot.slane %v7663_v23, 5 }
 0x651   : > { %6301 = vst.msk [vmem:[#allocation3 + $0x20] sm:$0xf] %vm14462_vm12, %v6214_v15  ;;  %vm14476_vm12 = vcmask 322816  }
 0x652   : > { %v6212_v35 = vpop.permute.xlu0 %6211  ;;  %v7666_v60 = vsel %vm9761_vm14, %v7661_v29, %v7665_v12 }
 0x653   : > { %6300 = vst.msk [vmem:[#allocation3 + $0x1c] sm:$0xf] %vm14463_vm5, %v6212_v35  ;;  %v7669_v35 = vrot.slane %v7667_v6, 4  ;;  %vm14477_vm5 = vmmov %vm14468_vm0  ;;  %v6595_v6 = vrot.slane %v6593_v41, 5 }
 0x654   : > { %7851 = vrot.lane.b32.xlu2 %v7508_v53, %s9501_s19 }
 0x656   : > { %7849 = vrot.lane.b32.xlu1 %v7498_v9, %s9501_s19  ;;  %v6240_v37 = vpop.permute.xlu2 %6239  ;;  %v7439_v9 = vld [vmem:[#allocation2 + $0x80] sm:$0x1] }
 0x657   : > { %6314 = vst.msk [vmem:[#allocation3 + $0x54] sm:$0xf] %vm14464_vm13, %v6240_v37  ;;  %v7673_v4 = vshll.u32 %v7439_v9, 16  ;;  %vm14478_vm13 = vmmov %vm14468_vm0  ;;  %v7226_v9 = vld [vmem:[#allocation2 + $0x34] sm:$0xf] }
 0x658   : > { %7291 = vrot.lane.b32.xlu0 %v7224_v26, %s9500_s13  ;;  %v6220_v19 = vpop.permute.xlu1 %6219  ;;  %v7670_v26 = vor.u32 %v7669_v35, %v7665_v12  ;;  %v7531_v12 = vrot.slane %v7529_v56, 5 }
 0x659   : > { %6304 = vst.msk [vmem:[#allocation3 + $0x2c] sm:$0xf] %vm14465_vm2, %v6220_v19  ;;  %vm14479_vm2 = vmmov %vm14476_vm12 }
 0x65a   : > { %v6218_v20 = vpop.permute.xlu0 %6217  ;;  %v7671_v18 = vrot.slane %v7670_v26, 4  ;;  %v6603_v26 = vshrl.u32 %v6353_v7, 16  ;;  %v9355_v7 = vld [vmem:[%s9566_s4 + $0x3c] sm:$0xff] }
 0x65b   : > { %6303 = vst.msk [vmem:[#allocation3 + $0x28] sm:$0xf] %vm14466_vm7, %v6218_v20  ;;  %v7519_v20 = vshll.u32 %v7420_v24, 16  ;;  %vm14480_vm7 = vmmov %vm14468_vm0 }
 0x65c   : > { %6789 = vrot.lane.b32.xlu2 %v6578_v0, %s9498_s11  ;;  %v7675_v0 = vrot.slane %v7673_v4, 5  ;;  %v7440_v4 = vld [vmem:[#allocation2 + $0x84] sm:$0xf] }
 0x65e   : > { %8187 = vrot.lane.b32.xlu1 %v8082_v1, %s9502_s20  ;;  %v6246_v45 = vpop.permute.xlu2 %6245  ;;  %v7676_v1 = vsel %vm9761_vm14, %v7671_v18, %v7675_v0  ;;  %v9193_v18 = vrot.slane %v7979_v61, 9  ;;  %v7681_v0 = vshll.u32 %v7440_v4, 16 }
 0x65f   : > { %6317 = vst.msk [vmem:[#allocation3 + $0x60] sm:$0xf] %vm14467_vm15, %v6246_v45  ;;  %v7521_v45 = vrot.slane %v7519_v20, 5  ;;  %vm14481_vm15 = vmmov %vm14468_vm0  ;;  %v6605_v20 = vrot.slane %v6603_v26, 4  ;;  %v9354_v26 = vld [vmem:[%s9566_s4 + $0x34] sm:$0xff] }
 0x660   : > { %8185 = vrot.lane.b32.xlu0 %v8079_v3, %s9502_s20  ;;  %v6226_v22 = vpop.permute.xlu1 %6225  ;;  %v6893_v3 = vld [vmem:[#allocation2 + $0x2c] sm:$0x1] }
 0x661   : > { %6307 = vst.msk [vmem:[#allocation3 + $0x38] sm:$0xf] %vm14468_vm0, %v6226_v22  ;;  %v7000_v21 = vrot.slane %v6893_v3, 5  ;;  %v7526_v42 = vor.u32 %v7525_v51, %v7521_v45  ;;  %vm14482_vm0 = vmmov %vm14479_vm2  ;;  %v6914_v3 = vld [vmem:[#allocation2 + $0x80] sm:$0x1] }
 0x662   : > { %v6224_v49 = vpop.permute.xlu0 %6223 }
 0x663   : > { %6306 = vst.msk [vmem:[#allocation3 + $0x34] sm:$0xf] %vm14469_vm1, %v6224_v49  ;;  %v9177_v49 = vrot.slane %v6891_v13, 9  ;;  %v7001_v17 = vsel %vm10152_vm4, %v6999_v50, %v7000_v21 }
 0x664   : > { %7127 = vrot.lane.b32.xlu2 %v7043_v40, %s9499_s12  ;;  %v6590_v40 = vshrl.u32 %v6352_v38, 16  ;;  %v7683_v38 = vrot.slane %v7681_v0, 5 }
 0x666   : > { %7125 = vrot.lane.b32.xlu1 %v7040_v31, %s9499_s12  ;;  %v6252_v46 = vpop.permute.xlu2 %6251  ;;  %v7516_v31 = vor.u32 %v7515_v33, %v7512_v36  ;;  %v6592_v29 = vrot.slane %v6590_v40, 4  ;;  %v7049_v33 = vrot.slane %v6914_v3, 5  ;;  %v9215_v40 = vld [vmem:[%s9566_s4 + $0x44] sm:$0xf] }
 0x667   : > { %6320 = vst.msk [vmem:[#allocation3 + $0x6c] sm:$0xf] %vm14470_vm10, %v6252_v46  ;;  %v6998_v46 = vsel %vm10152_vm4, %v9177_v49, %v6997_v2  ;;  %vm14483_vm10 = vmmov %vm14469_vm1  ;;  %v7046_v2 = vrot.slane %v6913_v5, 5  ;;  %v8451_v56 = vunpack.c.l.b16 %v9215_v40 }
 0x668   : > { %6791 = vrot.lane.b32.xlu0 %v6588_v16, %s9498_s11  ;;  %v6232_v47 = vpop.permute.xlu1 %6231  ;;  %v7527_v16 = vrot.slane %v7526_v42, 4  ;;  %v7517_v8 = vrot.slane %v7516_v31, 4 }
 0x669   : > { %6310 = vst.msk [vmem:[#allocation3 + $0x44] sm:$0xf] %vm14471_vm3, %v6232_v47  ;;  %vm14484_vm3 = vcmask 388416   ;;  %v7048_v51 = vrot.slane %v7046_v2, 4 }
 0x66a   : > { %v6230_v15 = vpop.permute.xlu0 %6229  ;;  %v7532_v35 = vsel %vm9761_vm14, %v7527_v16, %v7531_v12  ;;  %v7522_v54 = vsel %vm9761_vm14, %v7517_v8, %v7521_v45  ;;  %v6354_v45 = vld [vmem:[#allocation2 + $0x80] sm:$0x1]  ;;  %v8001_v8 = vld [vmem:[#allocation2 + $0x88] sm:$0xf] }
 0x66b   : > { %6309 = vst.msk [vmem:[#allocation3 + $0x40] sm:$0xf] %vm14472_vm6, %v6230_v15  ;;  %vm14485_vm6 = vmmov %vm14482_vm0  ;;  %v7050_v28 = vsel %vm10152_vm4, %v7048_v51, %v7049_v33 }
 0x66c   : > { %7877 = vrot.lane.b32.xlu2 %v7666_v60, %s9501_s19  ;;  %v7980_v60 = vld [vmem:[#allocation2 + $0x34] sm:$0xf] }
 0x66e   : > { %7319 = vrot.lane.b32.xlu1 %v7238_v57, %s9500_s13  ;;  %v6258_v53 = vpop.permute.xlu2 %6257  ;;  %v6596_v57 = vor.u32 %v6595_v6, %v6592_v29  ;;  %v8456_v6 = vpack.c.b16 %v8451_v56, %v8451_v56 }
 0x66f   : > { %6323 = vst.msk [vmem:[#allocation3 + $0x78] sm:$0xf] %vm14473_vm8, %v6258_v53  ;;  %v8085_v53 = vrot.slane %v7980_v60, 5  ;;  %vm14486_vm8 = vmmov %vm14469_vm1 }
 0x670   : > { %7317 = vrot.lane.b32.xlu0 %v7237_v44, %s9500_s13  ;;  %v6238_v37 = vpop.permute.xlu1 %6237 }
 0x671   : > { %6313 = vst.msk [vmem:[#allocation3 + $0x50] sm:$0xf] %vm14474_vm9, %v6238_v37  ;;  %v6597_v37 = vrot.slane %v6596_v57, 4  ;;  %v8087_v11 = vrot.slane %v8085_v53, 4  ;;  %v8086_v34 = vsel %vm10152_vm4, %v9193_v18, %v8085_v53  ;;  %vm14487_vm9 = vmmov %vm14482_vm0  ;;  %v8134_v57 = vrot.slane %v8001_v8, 5 }
 0x672   : > { %v6236_v19 = vpop.permute.xlu0 %6235  ;;  %v7240_v53 = vld [vmem:[#allocation2 + $0x88] sm:$0xf]  ;;  %v6895_v18 = vld [vmem:[#allocation2 + $0x34] sm:$0xf] }
 0x673   : > { %6312 = vst.msk [vmem:[#allocation3 + $0x4c] sm:$0xf] %vm14475_vm11, %v6236_v19  ;;  %v6601_v19 = vrot.slane %v6599_v55, 5  ;;  %vm14488_vm11 = vcmask 1043456   ;;  %v8000_v55 = vld [vmem:[#allocation2 + $0x84] sm:$0xe] }
 0x674   : > { %8215 = vrot.lane.b32.xlu2 %v8131_v62, %s9502_s20  ;;  %v8088_v62 = vrot.slane %v7981_v39, 5  ;;  %v7442_v39 = vld [vmem:[#allocation2 + $0x8c] sm:$0x1]  ;;  %v8136_v61 = vrot.slane %v8134_v57, 4 }
 0x675   : > { %v6602_v48 = vsel %vm9761_vm14, %v6597_v37, %v6601_v19  ;;  %v7239_v37 = vld [vmem:[#allocation2 + $0x84] sm:$0xf] }
 0x676   : > { %8213 = vrot.lane.b32.xlu1 %v8128_v59, %s9502_s20  ;;  %v6760_v63 = vpop.permute.xlu2 %6759  ;;  %v7678_v59 = vshrl.u32 %v7440_v4, 16  ;;  %v8089_v43 = vsel %vm10152_vm4, %v8087_v11, %v8088_v62  ;;  %v9200_v4 = vrot.slane %v8000_v55, 9  ;;  %v7423_v11 = vld [vmem:[#allocation2 + $0x40] sm:$0xf] }
 0x677   : > { %6854 = vst.msk [vmem:[#allocation3 + $0x4] sm:$0xf] %vm14476_vm12, %v6760_v63  ;;  %vm14489_vm12 = vmmov %vm14482_vm0  ;;  %v7543_v0 = vshll.u32 %v7423_v11, 16  ;;  %v7983_v55 = vld [vmem:[#allocation2 + $0x40] sm:$0xf] }
 0x678   : > { %7879 = vrot.lane.b32.xlu0 %v7676_v1, %s9501_s19  ;;  %v6244_v58 = vpop.permute.xlu1 %6243  ;;  %v6912_v1 = vld [vmem:[#allocation2 + $0x78] sm:$0xe]  ;;  %v7680_v13 = vrot.slane %v7678_v59, 4 }
 0x679   : > { %6316 = vst.msk [vmem:[#allocation3 + $0x5c] sm:$0xf] %vm14477_vm5, %v6244_v58  ;;  %v6606_v58 = vor.u32 %v6605_v20, %v6601_v19  ;;  %v9184_v36 = vrot.slane %v6912_v1, 9  ;;  %vm14490_vm5 = vmmov %vm14482_vm0  ;;  %v7422_v20 = vld [vmem:[#allocation2 + $0x3c] sm:$0xf]  ;;  %v7004_v1 = vrot.slane %v6895_v18, 5 }
 0x67a   : > { %v6242_v22 = vpop.permute.xlu0 %6241  ;;  %v7684_v42 = vor.u32 %v7683_v38, %v7680_v13  ;;  %v7534_v3 = vshrl.u32 %v7422_v20, 16  ;;  %v6896_v38 = vld [vmem:[#allocation2 + $0x38] sm:$0x1]  ;;  %v6916_v18 = vld [vmem:[#allocation2 + $0x88] sm:$0xf] }
 0x67b   : > { %6315 = vst.msk [vmem:[#allocation3 + $0x58] sm:$0xf] %vm14478_vm13, %v6242_v22  ;;  %v6609_v22 = vshll.u32 %v6354_v45, 16  ;;  %v6607_v49 = vrot.slane %v6606_v58, 4  ;;  %v7047_v41 = vsel %vm10152_vm4, %v9184_v36, %v7046_v2  ;;  %vm14491_vm13 = vmmov %vm14482_vm0  ;;  %v7537_v45 = vshll.u32 %v7422_v20, 16  ;;  %v9352_v58 = vld [vmem:[%s9566_s4 + $0x24] sm:$0xff] }
 0x67c   : > { %7293 = vrot.lane.b32.xlu2 %v7225_v52, %s9500_s13  ;;  %v7441_v52 = vld [vmem:[#allocation2 + $0x88] sm:$0xf]  ;;  %v7685_v16 = vrot.slane %v7684_v42, 4  ;;  %v7007_v40 = vrot.slane %v6896_v38, 5  ;;  %v7443_v20 = vld [vmem:[#allocation2 + $0x90] sm:$0xf] }
 0x67d   : > { %v7687_v31 = vshll.u32 %v7441_v52, 16  ;;  %v7691_v29 = vshrl.u32 %v7441_v52, 16  ;;  %v7006_v52 = vrot.slane %v7004_v1, 4 }
 0x67e   : > { %7103 = vrot.lane.b32.xlu1 %v7001_v17, %s9499_s12  ;;  %v6766_v23 = vpop.permute.xlu2 %6765  ;;  %v6611_v17 = vrot.slane %v6609_v22, 5  ;;  %v6894_v22 = vld [vmem:[#allocation2 + $0x30] sm:$0xe] }
 0x67f   : > { %6857 = vst.msk [vmem:[#allocation3 + $0x10] sm:$0xf] %vm14479_vm2, %v6766_v23  ;;  %v7689_v12 = vrot.slane %v7687_v31, 5  ;;  %vm14492_vm2 = vmmov %vm14484_vm3  ;;  %v9178_v31 = vrot.slane %v6894_v22, 9 }
 0x680   : > { %7101 = vrot.lane.b32.xlu0 %v6998_v46, %s9499_s12  ;;  %v6250_v47 = vpop.permute.xlu1 %6249  ;;  %v6612_v46 = vsel %vm9761_vm14, %v6607_v49, %v6611_v17  ;;  %v7539_v49 = vrot.slane %v7537_v45, 5  ;;  %v7424_v17 = vld [vmem:[#allocation2 + $0x44] sm:$0x1]  ;;  %v7705_v45 = vshll.u32 %v7443_v20, 16 }
 0x681   : > { %6319 = vst.msk [vmem:[#allocation3 + $0x68] sm:$0xf] %vm14480_vm7, %v6250_v47  ;;  %vm14493_vm7 = vmmov %vm14482_vm0 }
 0x682   : > { %v6248_v15 = vpop.permute.xlu0 %6247 }
 0x683   : > { %6318 = vst.msk [vmem:[#allocation3 + $0x64] sm:$0xf] %vm14481_vm15, %v6248_v15  ;;  %v8510_v15 = vsel %vm14488_vm11, %v8456_v6, 0  ;;  %vm14494_vm15 = vcmask 454016   ;;  %vm14502_vm11 = vmmov %vm14492_vm2 }
 0x684   : > { %7855 = vrot.lane.b32.xlu2 %v7532_v35, %s9501_s19  ;;  %8515 = vmatpush.bf16.msra.mxu1 %v8510_v15  ;;  %v7690_v35 = vsel %vm9761_vm14, %v7685_v16, %v7689_v12 }
 0x685   : > { %9361 = vmatpush.bf16.msra.mxu3 %v8510_v15 }
 0x686   : > { %7853 = vrot.lane.b32.xlu1 %v7522_v54, %s9501_s19  ;;  %v6772_v44 = vpop.permute.xlu2 %6771  ;;  %v7693_v54 = vrot.slane %v7691_v29, 4  ;;  %v7008_v29 = vsel %vm10152_vm4, %v7006_v52, %v7007_v40 }
 0x687   : > { %6860 = vst.msk [vmem:[#allocation3 + $0x1c] sm:$0xf] %vm14482_vm0, %v6772_v44  ;;  %v8002_v44 = vld [vmem:[#allocation2 + $0x8c] sm:$0x1]  ;;  %vm14495_vm0 = vmmov %vm14494_vm15 }
 0x688   : > { %7295 = vrot.lane.b32.xlu0 %v7226_v9, %s9500_s13  ;;  %v6256_v24 = vpop.permute.xlu1 %6255  ;;  %8516 = vmatpush.bf16.msra.mxu1 %v9355_v7  ;;  %v8137_v19 = vrot.slane %v8002_v44, 5  ;;  %v6356_v44 = vld [vmem:[#allocation2 + $0x88] sm:$0xf] }
 0x689   : > { %6322 = vst.msk [vmem:[#allocation3 + $0x74] sm:$0xf] %vm14469_vm1, %v6256_v24  ;;  %v7694_v24 = vor.u32 %v7693_v54, %v7689_v12  ;;  %9362 = vmatpush.bf16.msra.mxu3 %v9355_v7  ;;  %v7005_v12 = vsel %vm10152_vm4, %v9178_v31, %v7004_v1  ;;  %vm14496_vm1 = vcmask 519616  }
 0x68a   : > { %v6254_v27 = vpop.permute.xlu0 %6253  ;;  %v8138_v2 = vsel %vm10152_vm4, %v8136_v61, %v8137_v19  ;;  %v8092_v61 = vrot.slane %v7983_v55, 5  ;;  %v7982_v19 = vld [vmem:[#allocation2 + $0x3c] sm:$0xe] }
 0x68b   : > { %6321 = vst.msk [vmem:[#allocation3 + $0x70] sm:$0xf] %vm14483_vm10, %v6254_v27  ;;  %v7697_v27 = vshll.u32 %v7442_v39, 16  ;;  %v7695_v59 = vrot.slane %v7694_v24, 4  ;;  %v6623_v24 = vshll.u32 %v6356_v44, 16  ;;  %vm14497_vm10 = vmmov %vm14490_vm5 }
 0x68c   : > { %6793 = vrot.lane.b32.xlu2 %v6602_v48, %s9498_s11  ;;  %8517 = vmatpush.bf16.msra.mxu1 %v9354_v26  ;;  %v9353_v48 = vld [vmem:[%s9566_s4 + $0x2c] sm:$0xff] }
 0x68d   : > { %9363 = vmatpush.bf16.msra.mxu3 %v9354_v26 }
 0x68e   : > { %8191 = vrot.lane.b32.xlu1 %v8089_v43, %s9502_s20  ;;  %v7096_v63 = vpop.permute.xlu2 %7095  ;;  %v7547_v43 = vshrl.u32 %v7423_v11, 16  ;;  %v7984_v11 = vld [vmem:[#allocation2 + $0x44] sm:$0x1] }
 0x68f   : > { %7190 = vst.msk [vmem:[#allocation3 + $0x4] sm:$0xf] %vm14484_vm3, %v7096_v63  ;;  %v7699_v63 = vrot.slane %v7697_v27, 5  ;;  %vm14498_vm3 = vcmask 585216  }
 0x690   : > { %8189 = vrot.lane.b32.xlu0 %v8086_v34, %s9502_s20  ;;  %v6758_v50 = vpop.permute.xlu1 %6757  ;;  %v8135_v34 = vsel %vm10152_vm4, %v9200_v4, %v8134_v57  ;;  %8518 = vmatpush.bf16.msra.mxu1 %v9353_v48  ;;  %v7549_v36 = vrot.slane %v7547_v43, 4  ;;  %v9194_v43 = vrot.slane %v7982_v19, 9  ;;  %v6898_v19 = vld [vmem:[#allocation2 + $0x40] sm:$0xf] }
 0x691   : > { %6853 = vst.msk [vmem:[#allocation3] sm:$0xf] %vm14485_vm6, %v6758_v50  ;;  %v7700_v13 = vsel %vm9761_vm14, %v7695_v59, %v7699_v63  ;;  %v7545_v50 = vrot.slane %v7543_v0, 5  ;;  %9364 = vmatpush.bf16.msra.mxu3 %v9353_v48  ;;  %v8094_v48 = vrot.slane %v8092_v61, 4  ;;  %v8095_v0 = vrot.slane %v7984_v11, 5  ;;  %vm14499_vm6 = vmmov %vm14496_vm1 }
 0x692   : > { %v6260_v21 = vpop.permute.xlu0 %6259 }
 0x693   : > { %6324 = vst.msk [vmem:[#allocation3 + $0x7c] sm:$0xf] %vm14486_vm8, %v6260_v21  ;;  %v6355_v21 = vld [vmem:[#allocation2 + $0x84] sm:$0xf]  ;;  %v7550_v56 = vor.u32 %v7549_v36, %v7545_v50  ;;  %vm14500_vm8 = vmmov %vm14498_vm3  ;;  %v6917_v36 = vld [vmem:[#allocation2 + $0x8c] sm:$0x1] }
 0x694   : > { %7131 = vrot.lane.b32.xlu2 %v7050_v28, %s9499_s12  ;;  %v7536_v28 = vrot.slane %v7534_v3, 4  ;;  %8519 = vmatpush.bf16.msra.mxu1 %v9352_v58  ;;  %v6617_v16 = vshll.u32 %v6355_v21, 16  ;;  %v7702_v3 = vshrl.u32 %v7443_v20, 16 }
 0x695   : > { %9365 = vmatpush.bf16.msra.mxu3 %v9352_v58  ;;  %v7551_v15 = vrot.slane %v7550_v56, 4  ;;  %v8096_v58 = vsel %vm10152_vm4, %v8094_v48, %v8095_v0  ;;  %v7011_v48 = vrot.slane %v6898_v19, 5 }
 0x696   : > { %7129 = vrot.lane.b32.xlu1 %v7047_v41, %s9499_s12  ;;  %v13060_v23 = vpop.permute.xlu2 %7845  ;;  %v7227_v41 = vld [vmem:[#allocation2 + $0x3c] sm:$0xf]  ;;  %v7540_v6 = vor.u32 %v7539_v49, %v7536_v28  ;;  %v6619_v7 = vrot.slane %v6617_v16, 5  ;;  %v7704_v52 = vrot.slane %v7702_v3, 4  ;;  %v7707_v28 = vrot.slane %v7705_v45, 5 }
 0x697   : > { %v6897_v3 = vld [vmem:[#allocation2 + $0x3c] sm:$0xe]  ;;  %v6899_v45 = vld [vmem:[#allocation2 + $0x44] sm:$0x1] }
 0x698   : > { %6795 = vrot.lane.b32.xlu0 %v6612_v46, %s9498_s11  ;;  %v6764_v47 = vpop.permute.xlu1 %6763  ;;  %v6614_v46 = vshrl.u32 %v6355_v21, 16  ;;  %v7541_v57 = vrot.slane %v7540_v6, 4  ;;  %v7708_v16 = vor.u32 %v7707_v28, %v7704_v52  ;;  %v7014_v52 = vrot.slane %v6899_v45, 5 }
 0x699   : > { %6856 = vst.msk [vmem:[#allocation3 + $0xc] sm:$0xf] %vm14487_vm9, %v6764_v47  ;;  %v7553_v47 = vshll.u32 %v7424_v17, 16  ;;  %vm14501_vm9 = vmmov %vm14492_vm2  ;;  %v7444_v17 = vld [vmem:[#allocation2 + $0x94] sm:$0xf] }
 0x69a   : > { %v6762_v60 = vpop.permute.xlu0 %6761 }
 0x69b   : > { %6855 = vst.msk [vmem:[#allocation3 + $0x8] sm:$0xf] %vm14489_vm12, %v6762_v60  ;;  %v6616_v60 = vrot.slane %v6614_v46, 4  ;;  %v7555_v54 = vrot.slane %v7553_v47, 5  ;;  %vm14503_vm12 = vmmov %vm14495_vm0  ;;  %v7711_v47 = vshll.u32 %v7444_v17, 16 }
 0x69c   : > { %7881 = vrot.lane.b32.xlu2 %v7690_v35, %s9501_s19 }
 0x69d   : > { %v7556_v39 = vsel %vm9761_vm14, %v7551_v15, %v7555_v54  ;;  %v6620_v26 = vor.u32 %v6619_v7, %v6616_v60  ;;  %v7709_v60 = vrot.slane %v7708_v16, 4  ;;  %v7715_v7 = vshrl.u32 %v7444_v17, 16 }
 0x69e   : > { %7323 = vrot.lane.b32.xlu1 %v7240_v53, %s9500_s13  ;;  %v13073_v9 = vpop.permute.xlu2 %8183 }
 0x69f   : > { %v6621_v27 = vrot.slane %v6620_v26, 4 }
 0x6a0   : > { %7321 = vrot.lane.b32.xlu0 %v7239_v37, %s9500_s13  ;;  %v6770_v5 = vpop.permute.xlu1 %6769  ;;  %v7546_v37 = vsel %vm9761_vm14, %v7541_v57, %v7545_v50  ;;  %v6915_v50 = vld [vmem:[#allocation2 + $0x84] sm:$0xe]  ;;  %v7713_v57 = vrot.slane %v7711_v47, 5 }
 0x6a1   : > { %6859 = vst.msk [vmem:[#allocation3 + $0x18] sm:$0xf] %vm14490_vm5, %v6770_v5  ;;  %v7228_v5 = vld [vmem:[#allocation2 + $0x40] sm:$0xf]  ;;  %v9185_v49 = vrot.slane %v6915_v50, 9  ;;  %vm14504_vm5 = vcmask 588800  }
 0x6a2   : > { %v6768_v62 = vpop.permute.xlu0 %6767  ;;  %v7013_v50 = vrot.slane %v7011_v48, 4 }
 0x6a3   : > { %6858 = vst.msk [vmem:[#allocation3 + $0x14] sm:$0xf] %vm14491_vm13, %v6768_v62  ;;  %v6627_v62 = vshrl.u32 %v6356_v44, 16  ;;  %vm14505_vm13 = vmmov %vm14496_vm1  ;;  %v7717_v44 = vrot.slane %v7715_v7, 4 }
 0x6a4   : > { %8219 = vrot.lane.b32.xlu2 %v8138_v2, %s9502_s20  ;;  %v6625_v2 = vrot.slane %v6623_v24, 5  ;;  %v7445_v24 = vld [vmem:[#allocation2 + $0x98] sm:$0x1] }
 0x6a5   : > { %v6629_v1 = vrot.slane %v6627_v62, 4  ;;  %v7718_v11 = vor.u32 %v7717_v44, %v7713_v57  ;;  %v7425_v62 = vld [vmem:[#allocation2 + $0x48] sm:$0xf] }
 0x6a6   : > { %8217 = vrot.lane.b32.xlu1 %v8135_v34, %s9502_s20  ;;  %v13086_v51 = vpop.permute.xlu2 %7289  ;;  %v7053_v34 = vrot.slane %v6916_v18, 5  ;;  %v6626_v63 = vsel %vm9761_vm14, %v6621_v27, %v6625_v2  ;;  %v7558_v0 = vshrl.u32 %v7425_v62, 16  ;;  %v7229_v44 = vld [vmem:[#allocation2 + $0x48] sm:$0xf] }
 0x6a7   : > { %v6630_v21 = vor.u32 %v6629_v1, %v6625_v2 }
 0x6a8   : > { %7883 = vrot.lane.b32.xlu0 %v7700_v13, %s9501_s19  ;;  %v7094_v33 = vpop.permute.xlu1 %7093  ;;  %v8093_v13 = vsel %vm10152_vm4, %v9194_v43, %v8092_v61  ;;  %v7055_v22 = vrot.slane %v7053_v34, 4  ;;  %v8005_v61 = vld [vmem:[#allocation2 + $0x98] sm:$0x1]  ;;  %v7561_v43 = vshll.u32 %v7425_v62, 16 }
 0x6a9   : > { %7189 = vst.msk [vmem:[#allocation3] sm:$0xf] %vm14492_vm2, %v7094_v33  ;;  %v6357_v33 = vld [vmem:[#allocation2 + $0x8c] sm:$0x1]  ;;  %v6631_v46 = vrot.slane %v6630_v21, 4  ;;  %vm14506_vm2 = vmmov %vm14495_vm0  ;;  %v8144_v18 = vrot.slane %v8005_v61, 5 }
 0x6aa   : > { %v6774_v42 = vpop.permute.xlu0 %6773  ;;  %v6633_v40 = vshll.u32 %v6357_v33, 16  ;;  %v7563_v33 = vrot.slane %v7561_v43, 5  ;;  %v9179_v21 = vrot.slane %v6897_v3, 9  ;;  %v7427_v61 = vld [vmem:[#allocation2 + $0x50] sm:$0x1] }
 0x6ab   : > { %6861 = vst.msk [vmem:[#allocation3 + $0x20] sm:$0xf] %vm14493_vm7, %v6774_v42  ;;  %v7056_v42 = vrot.slane %v6917_v36, 5  ;;  %vm14507_vm7 = vmmov %vm14496_vm1  ;;  %v7560_v36 = vrot.slane %v7558_v0, 4  ;;  %v7577_v62 = vshll.u32 %v7427_v61, 16 }
 0x6ac   : > { %7297 = vrot.lane.b32.xlu2 %v7227_v41, %s9500_s13  ;;  %v6635_v6 = vrot.slane %v6633_v40, 5  ;;  %v7015_v40 = vsel %vm10152_vm4, %v7013_v50, %v7014_v52  ;;  %v6918_v43 = vld [vmem:[#allocation2 + $0x90] sm:$0xe]  ;;  %v7243_v61 = vld [vmem:[#allocation2 + $0x9c] sm:$0xf] }
 0x6ad   : > { %v7057_v56 = vsel %vm10152_vm4, %v7055_v22, %v7056_v42  ;;  %v7426_v42 = vld [vmem:[#allocation2 + $0x4c] sm:$0xf]  ;;  %v7564_v17 = vor.u32 %v7563_v33, %v7560_v36  ;;  %v7579_v3 = vrot.slane %v7577_v62, 5  ;;  %v9186_v36 = vrot.slane %v6918_v43, 9 }
 0x6ae   : > { %7107 = vrot.lane.b32.xlu1 %v7008_v29, %s9499_s12  ;;  %v13098_v8 = vpop.permute.xlu2 %7851  ;;  %v7054_v29 = vsel %vm10152_vm4, %v9185_v49, %v7053_v34  ;;  %v6636_v15 = vsel %vm9761_vm14, %v6631_v46, %v6635_v6  ;;  %v7567_v46 = vshll.u32 %v7426_v42, 16 }
 0x6af   : > { %v7565_v30 = vrot.slane %v7564_v17, 4 }
 0x6b0   : > { %7105 = vrot.lane.b32.xlu0 %v7005_v12, %s9499_s12  ;;  %v7288_v35 = vpop.permute.xlu1 %7287  ;;  %v7569_v6 = vrot.slane %v7567_v46, 5 }
 0x6b1   : > { %7382 = vst.msk [vmem:[#allocation3 + $0x4] sm:$0xf] %vm14494_vm15, %v7288_v35  ;;  %v8004_v35 = vld [vmem:[#allocation2 + $0x94] sm:$0xf]  ;;  %vm14508_vm15 = vmmov %vm14498_vm3 }
 0x6b2   : > { %v7286_v53 = vpop.permute.xlu0 %7285  ;;  %v8141_v55 = vrot.slane %v8004_v35, 5  ;;  %v6358_v35 = vld [vmem:[#allocation2 + $0x90] sm:$0xf] }
 0x6b3   : > { %7381 = vst.msk [vmem:[#allocation3] sm:$0xf] %vm14495_vm0, %v7286_v53  ;;  %v7714_v53 = vsel %vm9761_vm14, %v7709_v60, %v7713_v57  ;;  %vm14509_vm0 = vmmov %vm14498_vm3  ;;  %v7570_v60 = vsel %vm9761_vm14, %v7565_v30, %v7569_v6  ;;  %v7230_v57 = vld [vmem:[#allocation2 + $0x4c] sm:$0xf] }
 0x6b4   : > { %7941 = vst.msk [vmem:[#allocation3] sm:$0xf] %vm14496_vm1, %v13060_v23  ;;  %7859 = vrot.lane.b32.xlu2 %v7556_v39, %s9501_s19  ;;  %v7242_v39 = vld [vmem:[#allocation2 + $0x94] sm:$0xf]  ;;  %vm14510_vm1 = vmmov %vm14501_vm9 }
 0x6b6   : > { %7857 = vrot.lane.b32.xlu1 %v7546_v37, %s9501_s19  ;;  %v6790_v4 = vpop.permute.xlu2 %6789  ;;  %v8003_v37 = vld [vmem:[#allocation2 + $0x90] sm:$0xe] }
 0x6b7   : > { %6869 = vst.msk [vmem:[#allocation3 + $0x40] sm:$0xf] %vm14497_vm10, %v6790_v4  ;;  %v8143_v4 = vrot.slane %v8141_v55, 4 }
 0x6b8   : > { %7299 = vrot.lane.b32.xlu0 %v7228_v5, %s9500_s13  ;;  %v8182_v23 = vpop.permute.xlu1 %8181  ;;  %v7241_v5 = vld [vmem:[#allocation2 + $0x90] sm:$0xf] }
 0x6b9   : > { %8277 = vst.msk [vmem:[#allocation3] sm:$0xf] %vm14498_vm3, %v8182_v23  ;;  %v7721_v23 = vshll.u32 %v7445_v24, 16  ;;  %v8145_v2 = vsel %vm10152_vm4, %v8143_v4, %v8144_v18  ;;  %vm14511_vm3 = vmmov %vm14510_vm1  ;;  %v6638_v4 = vshrl.u32 %v6358_v35, 16 }
 0x6ba   : > { %v7848_v59 = vpop.permute.xlu0 %7847 }
 0x6bb   : > { %7942 = vst.msk [vmem:[#allocation3 + $0x4] sm:$0xf] %vm14499_vm6, %v7848_v59  ;;  %v7719_v59 = vrot.slane %v7718_v11, 4  ;;  %vm14512_vm6 = vmmov %vm14504_vm5  ;;  %v6641_v11 = vshll.u32 %v6358_v35, 16  ;;  %v8006_v35 = vld [vmem:[#allocation2 + $0x9c] sm:$0xe] }
 0x6bc   : > { %8278 = vst.msk [vmem:[#allocation3 + $0x4] sm:$0xf] %vm14500_vm8, %v13073_v9  ;;  %6797 = vrot.lane.b32.xlu2 %v6626_v63, %s9498_s11  ;;  %v7723_v63 = vrot.slane %v7721_v23, 5  ;;  %vm14513_vm8 = vmmov %vm14506_vm2 }
 0x6bd   : > { %v6643_v0 = vrot.slane %v6641_v11, 5 }
 0x6be   : > { %8195 = vrot.lane.b32.xlu1 %v8096_v58, %s9502_s20  ;;  %v13127_v38 = vpop.permute.xlu2 %7127  ;;  %v6339_v58 = vld [vmem:[#allocation2 + $0x44] sm:$0x1] }
 0x6bf   : > { %v6489_v28 = vshll.u32 %v6339_v58, 16 }
 0x6c0   : > { %8193 = vrot.lane.b32.xlu0 %v8093_v13, %s9502_s20  ;;  %v7100_v9 = vpop.permute.xlu1 %7099  ;;  %v7724_v13 = vsel %vm9761_vm14, %v7719_v59, %v7723_v63  ;;  %v6640_v59 = vrot.slane %v6638_v4, 4 }
 0x6c1   : > { %7192 = vst.msk [vmem:[#allocation3 + $0xc] sm:$0xf] %vm14501_vm9, %v7100_v9  ;;  %vm14514_vm9 = vmmov %vm14506_vm2 }
 0x6c2   : > { %v7098_v41 = vpop.permute.xlu0 %7097 }
 0x6c3   : > { %7191 = vst.msk [vmem:[#allocation3 + $0x8] sm:$0xf] %vm14502_vm11, %v7098_v41  ;;  %v9336_v31 = vld [vmem:[#allocation3] sm:$0xff]  ;;  %v6487_v41 = vrot.slane %v6486_v32, 4  ;;  %v7571_v32 = vshrl.u32 %v7426_v42, 16  ;;  %vm14515_vm11 = vmmov %vm14507_vm7 }
 0x6c4   : > { %7383 = vst.msk [vmem:[#allocation3 + $0x8] sm:$0xf] %vm14503_vm12, %v13086_v51  ;;  %7135 = vrot.lane.b32.xlu2 %v7057_v56, %s9499_s12  ;;  %9296 = vmatmul.msk.bf16.vlgmr.msra.gmra.mxu1 %vm14504_vm5, %v9336_v31  ;;  %v7012_v31 = vsel %vm10152_vm4, %v9179_v21, %v7011_v48  ;;  %v6491_v56 = vrot.slane %v6489_v28, 5  ;;  %vm14516_vm12 = vmmov %vm14497_vm10  ;;  %v7447_v28 = vld [vmem:[#allocation2 + $0xa0] sm:$0xf] }
 0x6c5   : > { %vm14517_vm5 = vmmov %vm14509_vm0 }
 0x6c6   : > { %7133 = vrot.lane.b32.xlu1 %v7054_v29, %s9499_s12  ;;  %v13141_v12 = vpop.permute.xlu2 %7877  ;;  %v6492_v14 = vsel %vm9761_vm14, %v6487_v41, %v6491_v56  ;;  %v7986_v29 = vld [vmem:[#allocation2 + $0x4c] sm:$0xf]  ;;  %v7446_v41 = vld [vmem:[#allocation2 + $0x9c] sm:$0xf]  ;;  %v7739_v56 = vshrl.u32 %v7447_v28, 16 }
 0x6c7   : > { %v8099_v7 = vrot.slane %v7986_v29, 5  ;;  %v7726_v30 = vshrl.u32 %v7446_v41, 16  ;;  %v6341_v29 = vld [vmem:[#allocation2 + $0x4c] sm:$0xf] }
 0x6c8   : > { %6799 = vrot.lane.b32.xlu0 %v6636_v15, %s9498_s11  ;;  %v7850_v51 = vpop.permute.xlu1 %7849  ;;  %v6359_v15 = vld [vmem:[#allocation2 + $0x94] sm:$0xf] }
 0x6c9   : > { %7943 = vst.msk [vmem:[#allocation3 + $0x8] sm:$0xf] %vm14505_vm13, %v7850_v51  ;;  %v7573_v51 = vrot.slane %v7571_v32, 4  ;;  %v8101_v24 = vrot.slane %v8099_v7, 4  ;;  %vm14518_vm13 = vmmov %vm14507_vm7  ;;  %v7729_v32 = vshll.u32 %v7446_v41, 16 }
 0x6ca   : > { %v7292_v54 = vpop.permute.xlu0 %7291  ;;  %v7428_v41 = vld [vmem:[#allocation2 + $0x54] sm:$0xf] }
 0x6cb   : > { %7384 = vst.msk [vmem:[#allocation3 + $0xc] sm:$0xf] %vm14506_vm2, %v7292_v54  ;;  %v7985_v54 = vld [vmem:[#allocation2 + $0x48] sm:$0xe]  ;;  %vm14519_vm2 = vmmov %vm14509_vm0 }
 0x6cc   : > { %7944 = vst.msk [vmem:[#allocation3 + $0xc] sm:$0xf] %vm14507_vm7, %v13098_v8  ;;  %7885 = vrot.lane.b32.xlu2 %v7714_v53, %s9501_s19  ;;  %v9201_v8 = vrot.slane %v8003_v37, 9  ;;  %v6647_v53 = vshll.u32 %v6359_v15, 16  ;;  %v7987_v37 = vld [vmem:[#allocation2 + $0x50] sm:$0x1]  ;;  %vm14520_vm7 = vmmov %vm14510_vm1 }
 0x6cd   : > { %v9195_v19 = vrot.slane %v7985_v54, 9  ;;  %v7728_v54 = vrot.slane %v7726_v30, 4 }
 0x6ce   : > { %7327 = vrot.lane.b32.xlu1 %v7242_v39, %s9500_s13  ;;  %v13154_v26 = vpop.permute.xlu2 %8215  ;;  %v8142_v34 = vsel %vm10152_vm4, %v9201_v8, %v8141_v55  ;;  %v6651_v55 = vshrl.u32 %v6359_v15, 16  ;;  %v6649_v8 = vrot.slane %v6647_v53, 5  ;;  %v7731_v53 = vrot.slane %v7729_v32, 5 }
 0x6cf   : > { %v8100_v63 = vsel %vm10152_vm4, %v9195_v19, %v8099_v7 }
 0x6d0   : > { %7325 = vrot.lane.b32.xlu0 %v7241_v5, %s9500_s13  ;;  %v8188_v27 = vpop.permute.xlu1 %8187  ;;  %v7574_v5 = vor.u32 %v7573_v51, %v7569_v6  ;;  %v6653_v18 = vrot.slane %v6651_v55, 4  ;;  %v7244_v6 = vld [vmem:[#allocation2 + $0xa0] sm:$0xf]  ;;  %v7448_v51 = vld [vmem:[#allocation2 + $0xa4] sm:$0x1]  ;;  %v6503_v55 = vshll.u32 %v6341_v29, 16 }
 0x6d1   : > { %8280 = vst.msk [vmem:[#allocation3 + $0xc] sm:$0xf] %vm14508_vm15, %v8188_v27  ;;  %v8102_v27 = vrot.slane %v7987_v37, 5  ;;  %vm14521_vm15 = vmmov %vm14510_vm1  ;;  %v8007_v37 = vld [vmem:[#allocation2 + $0xa0] sm:$0xf]  ;;  %v7745_v19 = vshll.u32 %v7448_v51, 16 }
 0x6d2   : > { %v8186_v20 = vpop.permute.xlu0 %8185  ;;  %v6654_v45 = vor.u32 %v6653_v18, %v6649_v8  ;;  %v8148_v62 = vrot.slane %v8007_v37, 5  ;;  %v6900_v51 = vld [vmem:[#allocation2 + $0x48] sm:$0xe]  ;;  %v7430_v37 = vld [vmem:[#allocation2 + $0x5c] sm:$0x1] }
 0x6d3   : > { %8279 = vst.msk [vmem:[#allocation3 + $0x8] sm:$0xf] %vm14509_vm0, %v8186_v20  ;;  %v6360_v20 = vld [vmem:[#allocation2 + $0x98] sm:$0x1]  ;;  %v8103_v48 = vsel %vm10152_vm4, %v8101_v24, %v8102_v27  ;;  %vm14522_vm0 = vmmov %vm14513_vm8  ;;  %v9202_v27 = vrot.slane %v8006_v35, 9  ;;  %v7747_v43 = vrot.slane %v7745_v19, 5 }
 0x6d4   : > { %8223 = vrot.lane.b32.xlu2 %v8145_v2, %s9502_s20  ;;  %v7575_v2 = vrot.slane %v7574_v5, 4  ;;  %v6655_v21 = vrot.slane %v6654_v45, 4  ;;  %v6361_v35 = vld [vmem:[#allocation2 + $0x9c] sm:$0xf] }
 0x6d6   : > { %8221 = vrot.lane.b32.xlu1 %v8142_v34, %s9502_s20  ;;  %v13165_v1 = vpop.permute.xlu2 %7293  ;;  %v6919_v34 = vld [vmem:[#allocation2 + $0x94] sm:$0xf]  ;;  %v7580_v50 = vsel %vm9761_vm14, %v7575_v2, %v7579_v3 }
 0x6d7   : > { %v7060_v33 = vrot.slane %v6919_v34, 5  ;;  %v8149_v34 = vsel %vm10152_vm4, %v9202_v27, %v8148_v62  ;;  %v7601_v27 = vshll.u32 %v7430_v37, 16 }
 0x6d8   : > { %7887 = vrot.lane.b32.xlu0 %v7724_v13, %s9501_s19  ;;  %v7126_v22 = vpop.permute.xlu1 %7125  ;;  %v6657_v13 = vshll.u32 %v6360_v20, 16 }
 0x6d9   : > { %7205 = vst.msk [vmem:[#allocation3 + $0x40] sm:$0xf] %vm14510_vm1, %v7126_v22  ;;  %v7061_v42 = vsel %vm10152_vm4, %v9186_v36, %v7060_v33  ;;  %vm14523_vm1 = vmmov %vm14512_vm6 }
 0x6da   : > { %v6792_v9 = vpop.permute.xlu0 %6791  ;;  %v9337_v49 = vld [vmem:[#allocation3 + $0x8] sm:$0xff] }
 0x6db   : > { %6870 = vst.msk [vmem:[#allocation3 + $0x44] sm:$0xf] %vm14497_vm10, %v6792_v9  ;;  %9297 = vmatmul.msk.bf16.gmra.mxu1 %vm14512_vm6, %v9337_v49  ;;  %v6659_v49 = vrot.slane %v6657_v13, 5  ;;  %vm14524_vm10 = vmmov %vm14515_vm11 }
 0x6dc   : > { %7206 = vst.msk [vmem:[#allocation3 + $0x44] sm:$0xf] %vm14511_vm3, %v13127_v38  ;;  %7111 = vrot.lane.b32.xlu2 %v7015_v40, %s9499_s12  ;;  %vm14525_vm3 = vmmov %vm14522_vm0 }
 0x6dd   : > { %v6660_v17 = vsel %vm9761_vm14, %v6655_v21, %v6659_v49  ;;  %vm14526_vm6 = vmmov %vm14524_vm10  ;;  %v7429_v21 = vld [vmem:[#allocation2 + $0x58] sm:$0xf] }
 0x6de   : > { %7109 = vrot.lane.b32.xlu1 %v7012_v31, %s9499_s12  ;;  %v13184_v16 = vpop.permute.xlu2 %7855  ;;  %v7735_v31 = vshll.u32 %v7447_v28, 16 }
 0x6e0   : > { %6775 = vrot.lane.b32.xlu0 %v6492_v14, %s9498_s11  ;;  %v7320_v38 = vpop.permute.xlu1 %7319  ;;  %v7737_v15 = vrot.slane %v7735_v31, 5  ;;  %v8150_v31 = vrot.slane %v8148_v62, 4 }
 0x6e1   : > { %7398 = vst.msk [vmem:[#allocation3 + $0x44] sm:$0xf] %vm14513_vm8, %v7320_v38  ;;  %v6920_v38 = vld [vmem:[#allocation2 + $0x98] sm:$0x1]  ;;  %vm14527_vm8 = vmmov %vm14519_vm2 }
 0x6e2   : > { %v7318_v47 = vpop.permute.xlu0 %7317 }
 0x6e3   : > { %7397 = vst.msk [vmem:[#allocation3 + $0x40] sm:$0xf] %vm14514_vm9, %v7318_v47  ;;  %v7062_v47 = vrot.slane %v7060_v33, 4  ;;  %vm14528_vm9 = vmmov %vm14519_vm2 }
 0x6e4   : > { %7957 = vst.msk [vmem:[#allocation3 + $0x40] sm:$0xf] %vm14515_vm11, %v13141_v12  ;;  %7861 = vrot.lane.b32.xlu2 %v7570_v60, %s9501_s19  ;;  %v7741_v60 = vrot.slane %v7739_v56, 4  ;;  %vm14529_vm11 = vmmov %vm14520_vm7  ;;  %v7591_v56 = vshll.u32 %v7429_v21, 16 }
 0x6e6   : > { %7303 = vrot.lane.b32.xlu1 %v7230_v57, %s9500_s13  ;;  %v6794_v39 = vpop.permute.xlu2 %6793  ;;  %v6340_v57 = vld [vmem:[#allocation2 + $0x48] sm:$0xf]  ;;  %v7742_v24 = vor.u32 %v7741_v60, %v7737_v15 }
 0x6e7   : > { %6871 = vst.msk [vmem:[#allocation3 + $0x48] sm:$0xf] %vm14516_vm12, %v6794_v39  ;;  %v7063_v39 = vrot.slane %v6920_v38, 5  ;;  %v6494_v5 = vshrl.u32 %v6340_v57, 16  ;;  %v6497_v4 = vshll.u32 %v6340_v57, 16  ;;  %v7582_v38 = vshrl.u32 %v7428_v41, 16 }
 0x6e8   : > { %7301 = vrot.lane.b32.xlu0 %v7229_v44, %s9500_s13  ;;  %v8214_v12 = vpop.permute.xlu1 %8213  ;;  %v6507_v44 = vshrl.u32 %v6341_v29, 16  ;;  %v7743_v20 = vrot.slane %v7742_v24, 4  ;;  %v7585_v29 = vshll.u32 %v7428_v41, 16 }
 0x6e9   : > { %8293 = vst.msk [vmem:[#allocation3 + $0x40] sm:$0xf] %vm14517_vm5, %v8214_v12  ;;  %v7064_v11 = vsel %vm10152_vm4, %v7062_v47, %v7063_v39  ;;  %v6499_v2 = vrot.slane %v6497_v4, 5  ;;  %vm14530_vm5 = vmmov %vm14520_vm7  ;;  %v7231_v39 = vld [vmem:[#allocation2 + $0x54] sm:$0xf]  ;;  %v6665_v4 = vshll.u32 %v6361_v35, 16 }
 0x6ea   : > { %v7880_v23 = vpop.permute.xlu0 %7879  ;;  %v6509_v18 = vrot.slane %v6507_v44, 4  ;;  %v7748_v45 = vsel %vm9761_vm14, %v7743_v20, %v7747_v43 }
 0x6eb   : > { %7958 = vst.msk [vmem:[#allocation3 + $0x44] sm:$0xf] %vm14518_vm13, %v7880_v23  ;;  %vm14531_vm13 = vmmov %vm14523_vm1 }
 0x6ec   : > { %8294 = vst.msk [vmem:[#allocation3 + $0x44] sm:$0xf] %vm14519_vm2, %v13154_v26  ;;  %8199 = vrot.lane.b32.xlu2 %v8103_v48, %s9502_s20  ;;  %v6644_v26 = vor.u32 %v6643_v0, %v6640_v59  ;;  %v6496_v48 = vrot.slane %v6494_v5, 4  ;;  %v6342_v0 = vld [vmem:[#allocation2 + $0x50] sm:$0x1]  ;;  %vm14532_vm2 = vmmov %vm14522_vm0  ;;  %v6662_v5 = vshrl.u32 %v6361_v35, 16 }
 0x6ee   : > { %8197 = vrot.lane.b32.xlu1 %v8100_v63, %s9502_s20  ;;  %v13209_v58 = vpop.permute.xlu2 %7131  ;;  %v6645_v40 = vrot.slane %v6644_v26, 4  ;;  %v6500_v13 = vor.u32 %v6499_v2, %v6496_v48  ;;  %v7603_v48 = vrot.slane %v7601_v27, 5 }
 0x6f0   : > { %7863 = vrot.lane.b32.xlu0 %v7580_v50, %s9501_s19  ;;  %v7104_v22 = vpop.permute.xlu1 %7103  ;;  %v6650_v14 = vsel %vm9761_vm14, %v6645_v40, %v6649_v8  ;;  %v7732_v8 = vor.u32 %v7731_v53, %v7728_v54  ;;  %v6513_v50 = vshll.u32 %v6342_v0, 16  ;;  %v6901_v40 = vld [vmem:[#allocation2 + $0x4c] sm:$0xf]  ;;  %v7584_v54 = vrot.slane %v7582_v38, 4  ;;  %v6362_v0 = vld [vmem:[#allocation2 + $0xa0] sm:$0xf] }
 0x6f1   : > { %7194 = vst.msk [vmem:[#allocation3 + $0x14] sm:$0xf] %vm14520_vm7, %v7104_v22  ;;  %v7587_v53 = vrot.slane %v7585_v29, 5  ;;  %vm14533_vm7 = vmmov %vm14522_vm0 }
 0x6f2   : > { %v7102_v52 = vpop.permute.xlu0 %7101  ;;  %v7733_v63 = vrot.slane %v7732_v8, 4  ;;  %v6515_v28 = vrot.slane %v6513_v50, 5 }
 0x6f3   : > { %7193 = vst.msk [vmem:[#allocation3 + $0x10] sm:$0xf] %vm14521_vm15, %v7102_v52  ;;  %v9344_v9 = vld [vmem:[#allocation3 + $0x40] sm:$0xff]  ;;  %v6501_v52 = vrot.slane %v6500_v13, 4  ;;  %vm14534_vm15 = vmmov %vm14526_vm6  ;;  %v7588_v19 = vor.u32 %v7587_v53, %v7584_v54 }
 0x6f4   : > { %7385 = vst.msk [vmem:[#allocation3 + $0x10] sm:$0xf] %vm14522_vm0, %v13165_v1  ;;  %7137 = vrot.lane.b32.xlu2 %v7061_v42, %s9499_s12  ;;  %9304 = vmatmul.msk.bf16.vlgmr.msra.gmra.mxu3 %vm14523_vm1, %v9344_v9  ;;  %v7738_v33 = vsel %vm9761_vm14, %v7733_v63, %v7737_v15  ;;  %v8008_v9 = vld [vmem:[#allocation2 + $0xa4] sm:$0x1]  ;;  %v6902_v15 = vld [vmem:[#allocation2 + $0x50] sm:$0x1]  ;;  %vm14535_vm0 = vmmov %vm14516_vm12 }
 0x6f5   : > { %v8151_v30 = vrot.slane %v8008_v9, 5  ;;  %v7021_v44 = vrot.slane %v6902_v15, 5  ;;  %vm14536_vm1 = vmmov %vm14527_vm8  ;;  %v7589_v20 = vrot.slane %v7588_v19, 4  ;;  %v7232_v13 = vld [vmem:[#allocation2 + $0x58] sm:$0xf] }
 0x6f6   : > { %6803 = vrot.lane.b32.xlu1 %v6660_v17, %s9498_s11  ;;  %v13225_v46 = vpop.permute.xlu2 %7881  ;;  %v6923_v15 = vld [vmem:[#allocation2 + $0xa4] sm:$0x1] }
 0x6f7   : > { %v8152_v47 = vsel %vm10152_vm4, %v8150_v31, %v8151_v30  ;;  %v7070_v54 = vrot.slane %v6923_v15, 5 }
 0x6f8   : > { %6801 = vrot.lane.b32.xlu0 %v6650_v14, %s9498_s11  ;;  %v7854_v1 = vpop.permute.xlu1 %7853  ;;  %v7595_v14 = vshrl.u32 %v7429_v21, 16  ;;  %v7988_v21 = vld [vmem:[#allocation2 + $0x54] sm:$0xe] }
 0x6f9   : > { %7945 = vst.msk [vmem:[#allocation3 + $0x10] sm:$0xf] %vm14524_vm10, %v7854_v1  ;;  %v7018_v1 = vrot.slane %v6901_v40, 5  ;;  %vm14537_vm10 = vmmov %vm14526_vm6  ;;  %v9196_v41 = vrot.slane %v7988_v21, 9 }
 0x6fa   : > { %v7296_v7 = vpop.permute.xlu0 %7295  ;;  %v7597_v60 = vrot.slane %v7595_v14, 4 }
 0x6fb   : > { %7386 = vst.msk [vmem:[#allocation3 + $0x14] sm:$0xf] %vm14525_vm3, %v7296_v7  ;;  %v7020_v57 = vrot.slane %v7018_v1, 4  ;;  %vm14538_vm3 = vmmov %vm14536_vm1 }
 0x6fc   : > { %7946 = vst.msk [vmem:[#allocation3 + $0x14] sm:$0xf] %vm14526_vm6, %v13184_v16  ;;  %7331 = vrot.lane.b32.xlu2 %v7244_v6, %s9500_s13  ;;  %v6505_v16 = vrot.slane %v6503_v55, 5  ;;  %vm14539_vm6 = vmmov %vm14530_vm5 }
 0x6fe   : > { %7329 = vrot.lane.b32.xlu1 %v7243_v61, %s9500_s13  ;;  %v13238_v12 = vpop.permute.xlu2 %8219  ;;  %v6510_v3 = vor.u32 %v6509_v18, %v6505_v16  ;;  %v6506_v32 = vsel %vm9761_vm14, %v6501_v52, %v6505_v16  ;;  %v9180_v61 = vrot.slane %v6900_v51, 9  ;;  %v6664_v18 = vrot.slane %v6662_v5, 4  ;;  %v6922_v52 = vld [vmem:[#allocation2 + $0xa0] sm:$0xf] }
 0x700   : > { %7139 = vrot.lane.b32.xlu0 %v7064_v11, %s9499_s12  ;;  %v8192_v23 = vpop.permute.xlu1 %8191  ;;  %v6511_v26 = vrot.slane %v6510_v3, 4  ;;  %v7022_v11 = vsel %vm10152_vm4, %v7020_v57, %v7021_v44  ;;  %v7019_v8 = vsel %vm10152_vm4, %v9180_v61, %v7018_v1  ;;  %v7450_v44 = vld [vmem:[#allocation2 + $0xac] sm:$0xf] }
 0x701   : > { %8282 = vst.msk [vmem:[#allocation3 + $0x14] sm:$0xf] %vm14527_vm8, %v8192_v23  ;;  %v6667_v23 = vrot.slane %v6665_v4, 5  ;;  %vm14540_vm8 = vmmov %vm14530_vm5  ;;  %v7759_v4 = vshll.u32 %v7450_v44, 16 }
 0x702   : > { %v8190_v59 = vpop.permute.xlu0 %8189  ;;  %v6516_v17 = vsel %vm9761_vm14, %v6511_v26, %v6515_v28  ;;  %v7449_v28 = vld [vmem:[#allocation2 + $0xa8] sm:$0xf] }
 0x703   : > { %8281 = vst.msk [vmem:[#allocation3 + $0x10] sm:$0xf] %vm14528_vm9, %v8190_v59  ;;  %v7989_v59 = vld [vmem:[#allocation2 + $0x58] sm:$0xf]  ;;  %v7750_v30 = vshrl.u32 %v7449_v28, 16  ;;  %vm14541_vm9 = vmmov %vm14532_vm2 }
 0x704   : > { %8225 = vrot.lane.b32.xlu2 %v8149_v34, %s9502_s20  ;;  %v6668_v34 = vor.u32 %v6667_v23, %v6664_v18  ;;  %v8106_v3 = vrot.slane %v7989_v59, 5  ;;  %v6344_v23 = vld [vmem:[#allocation2 + $0x58] sm:$0xf]  ;;  %v7246_v59 = vld [vmem:[#allocation2 + $0xac] sm:$0xf] }
 0x706   : > { %7891 = vrot.lane.b32.xlu1 %v7748_v45, %s9501_s19  ;;  %v13249_v36 = vpop.permute.xlu2 %7297  ;;  %v6671_v45 = vshll.u32 %v6362_v0, 16  ;;  %v6669_v26 = vrot.slane %v6668_v34, 4  ;;  %v8108_v9 = vrot.slane %v8106_v3, 4  ;;  %v8107_v38 = vsel %vm10152_vm4, %v9196_v41, %v8106_v3  ;;  %v8011_v3 = vld [vmem:[#allocation2 + $0xb0] sm:$0x1] }
 0x707   : > { %v6531_v34 = vshrl.u32 %v6344_v23, 16 }
 0x708   : > { %7889 = vrot.lane.b32.xlu0 %v7738_v33, %s9501_s19  ;;  %v7130_v22 = vpop.permute.xlu1 %7129  ;;  %v7990_v33 = vld [vmem:[#allocation2 + $0x5c] sm:$0x1] }
 0x709   : > { %7207 = vst.msk [vmem:[#allocation3 + $0x48] sm:$0xf] %vm14529_vm11, %v7130_v22  ;;  %v6675_v22 = vshrl.u32 %v6362_v0, 16  ;;  %v8109_v40 = vrot.slane %v7990_v33, 5  ;;  %vm14542_vm11 = vmmov %vm14531_vm13  ;;  %v8009_v0 = vld [vmem:[#allocation2 + $0xa8] sm:$0xe] }
 0x70a   : > { %v6796_v49 = vpop.permute.xlu0 %6795  ;;  %v9338_v42 = vld [vmem:[#allocation3 + $0x10] sm:$0xff] }
 0x70b   : > { %6872 = vst.msk [vmem:[#allocation3 + $0x4c] sm:$0xf] %vm14516_vm12, %v6796_v49  ;;  %9298 = vmatmul.msk.bf16.gmra.mxu1 %vm14531_vm13, %v9338_v42  ;;  %v6673_v49 = vrot.slane %v6671_v45, 5  ;;  %v6677_v14 = vrot.slane %v6675_v22, 4  ;;  %v8110_v1 = vsel %vm10152_vm4, %v8108_v9, %v8109_v40  ;;  %vm14543_vm12 = vmmov %vm14537_vm10  ;;  %v7451_v45 = vld [vmem:[#allocation2 + $0xb0] sm:$0x1] }
 0x70c   : > { %7208 = vst.msk [vmem:[#allocation3 + $0x4c] sm:$0xf] %vm14530_vm5, %v13209_v58  ;;  %6779 = vrot.lane.b32.xlu2 %v6516_v17, %s9498_s11  ;;  %v7593_v58 = vrot.slane %v7591_v56, 5  ;;  %v7067_v17 = vrot.slane %v6922_v52, 5  ;;  %vm14544_vm5 = vmmov %vm14532_vm2  ;;  %v7769_v9 = vshll.u32 %v7451_v45, 16 }
 0x70d   : > { %v6674_v56 = vsel %vm9761_vm14, %v6669_v26, %v6673_v49  ;;  %vm14545_vm13 = vmmov %vm14537_vm10 }
 0x70e   : > { %6777 = vrot.lane.b32.xlu1 %v6506_v32, %s9498_s11  ;;  %v13265_v6 = vpop.permute.xlu2 %7859  ;;  %v7598_v24 = vor.u32 %v7597_v60, %v7593_v58  ;;  %v7594_v63 = vsel %vm9761_vm14, %v7589_v20, %v7593_v58  ;;  %v7753_v32 = vshll.u32 %v7449_v28, 16  ;;  %v6363_v58 = vld [vmem:[#allocation2 + $0xa4] sm:$0x1]  ;;  %v7069_v60 = vrot.slane %v7067_v17, 4 }
 0x70f   : > { %v6681_v53 = vshll.u32 %v6363_v58, 16  ;;  %v8158_v28 = vrot.slane %v8011_v3, 5 }
 0x710   : > { %8227 = vrot.lane.b32.xlu0 %v8152_v47, %s9502_s20  ;;  %v7324_v7 = vpop.permute.xlu1 %7323  ;;  %v7599_v16 = vrot.slane %v7598_v24, 4  ;;  %v6921_v47 = vld [vmem:[#allocation2 + $0x9c] sm:$0xe]  ;;  %v7755_v51 = vrot.slane %v7753_v32, 5  ;;  %v6903_v32 = vld [vmem:[#allocation2 + $0x54] sm:$0xe] }
 0x711   : > { %7400 = vst.msk [vmem:[#allocation3 + $0x4c] sm:$0xf] %vm14532_vm2, %v7324_v7  ;;  %v6678_v7 = vor.u32 %v6677_v14, %v6673_v49  ;;  %v9187_v57 = vrot.slane %v6921_v47, 9  ;;  %v6683_v5 = vrot.slane %v6681_v53, 5  ;;  %vm14546_vm2 = vmmov %vm14536_vm1  ;;  %v7771_v47 = vrot.slane %v7769_v9, 5 }
 0x712   : > { %v7322_v55 = vpop.permute.xlu0 %7321  ;;  %v7604_v43 = vsel %vm9761_vm14, %v7599_v16, %v7603_v48  ;;  %v7761_v16 = vrot.slane %v7759_v4, 5  ;;  %v7432_v53 = vld [vmem:[#allocation2 + $0x64] sm:$0xf] }
 0x713   : > { %7399 = vst.msk [vmem:[#allocation3 + $0x48] sm:$0xf] %vm14533_vm7, %v7322_v55  ;;  %v6679_v37 = vrot.slane %v6678_v7, 4  ;;  %v7068_v24 = vsel %vm10152_vm4, %v9187_v57, %v7067_v17  ;;  %vm14547_vm7 = vmmov %vm14536_vm1  ;;  %v6345_v17 = vld [vmem:[#allocation2 + $0x5c] sm:$0x1] }
 0x714   : > { %7959 = vst.msk [vmem:[#allocation3 + $0x48] sm:$0xf] %vm14534_vm15, %v13225_v46  ;;  %7305 = vrot.lane.b32.xlu2 %v7231_v39, %s9500_s13  ;;  %v7071_v39 = vsel %vm10152_vm4, %v7069_v60, %v7070_v54  ;;  %vm14548_vm15 = vmmov %vm14539_vm6  ;;  %v6537_v60 = vshll.u32 %v6345_v17, 16 }
 0x715   : > { %v6684_v19 = vsel %vm9761_vm14, %v6679_v37, %v6683_v5  ;;  %v7431_v37 = vld [vmem:[#allocation2 + $0x60] sm:$0xf]  ;;  %v7619_v5 = vshrl.u32 %v7432_v53, 16 }
 0x716   : > { %7115 = vrot.lane.b32.xlu1 %v7022_v11, %s9499_s12  ;;  %v6798_v62 = vpop.permute.xlu2 %6797 }
 0x717   : > { %6873 = vst.msk [vmem:[#allocation3 + $0x50] sm:$0xf] %vm14535_vm0, %v6798_v62  ;;  %v7763_v62 = vshrl.u32 %v7450_v44, 16 }
 0x718   : > { %7113 = vrot.lane.b32.xlu0 %v7019_v8, %s9499_s12  ;;  %v8218_v46 = vpop.permute.xlu1 %8217 }
 0x719   : > { %8295 = vst.msk [vmem:[#allocation3 + $0x48] sm:$0xf] %vm14536_vm1, %v8218_v46  ;;  %v7765_v48 = vrot.slane %v7763_v62, 4  ;;  %vm14549_vm1 = vmmov %vm14539_vm6  ;;  %v7609_v62 = vshll.u32 %v7431_v37, 16 }
 0x71a   : > { %v7884_v2 = vpop.permute.xlu0 %7883 }
 0x71b   : > { %7960 = vst.msk [vmem:[#allocation3 + $0x4c] sm:$0xf] %vm14537_vm10, %v7884_v2  ;;  %v6343_v2 = vld [vmem:[#allocation2 + $0x54] sm:$0xf]  ;;  %v7766_v26 = vor.u32 %v7765_v48, %v7761_v16  ;;  %vm14550_vm10 = vmmov %vm14542_vm11  ;;  %v7433_v48 = vld [vmem:[#allocation2 + $0x68] sm:$0x1] }
 0x71c   : > { %8296 = vst.msk [vmem:[#allocation3 + $0x4c] sm:$0xf] %vm14538_vm3, %v13238_v12  ;;  %7867 = vrot.lane.b32.xlu2 %v7604_v43, %s9501_s19  ;;  %v6527_v43 = vshll.u32 %v6344_v23, 16  ;;  %v6518_v22 = vshrl.u32 %v6343_v2, 16  ;;  %v6521_v21 = vshll.u32 %v6343_v2, 16  ;;  %vm14551_vm3 = vmmov %vm14544_vm5 }
 0x71d   : > { %v7991_v2 = vld [vmem:[#allocation2 + $0x60] sm:$0xe] }
 0x71e   : > { %7865 = vrot.lane.b32.xlu1 %v7594_v63, %s9501_s19  ;;  %v13292_v50 = vpop.permute.xlu2 %7135  ;;  %v6529_v49 = vrot.slane %v6527_v43, 5  ;;  %v6520_v14 = vrot.slane %v6518_v22, 4  ;;  %v7611_v43 = vrot.slane %v7609_v62, 5  ;;  %v9197_v9 = vrot.slane %v7991_v2, 9  ;;  %v6346_v2 = vld [vmem:[#allocation2 + $0x60] sm:$0xf] }
 0x720   : > { %7307 = vrot.lane.b32.xlu0 %v7232_v13, %s9500_s13  ;;  %v7108_v12 = vpop.permute.xlu1 %7107  ;;  %v7245_v13 = vld [vmem:[#allocation2 + $0xa8] sm:$0xf] }
 0x721   : > { %7196 = vst.msk [vmem:[#allocation3 + $0x1c] sm:$0xf] %vm14539_vm6, %v7108_v12  ;;  %v9203_v12 = vrot.slane %v8009_v0, 9  ;;  %vm14552_vm6 = vmmov %vm14551_vm3 }
 0x722   : > { %v7106_v42 = vpop.permute.xlu0 %7105 }
 0x723   : > { %7195 = vst.msk [vmem:[#allocation3 + $0x18] sm:$0xf] %vm14540_vm8, %v7106_v42  ;;  %v9345_v31 = vld [vmem:[#allocation3 + $0x48] sm:$0xff]  ;;  %v6533_v42 = vrot.slane %v6531_v34, 4  ;;  %vm14553_vm8 = vmmov %vm14543_vm12 }
 0x724   : > { %7387 = vst.msk [vmem:[#allocation3 + $0x18] sm:$0xf] %vm14541_vm9, %v13249_v36  ;;  %6805 = vrot.lane.b32.xlu2 %v6674_v56, %s9498_s11  ;;  %9305 = vmatmul.msk.bf16.gmra.mxu3 %vm14542_vm11, %v9345_v31  ;;  %v7752_v36 = vrot.slane %v7750_v30, 4  ;;  %v7767_v56 = vrot.slane %v7766_v26, 4  ;;  %v6523_v30 = vrot.slane %v6521_v21, 5  ;;  %vm14554_vm9 = vmmov %vm14546_vm2 }
 0x725   : > { %v6534_v15 = vor.u32 %v6533_v42, %v6529_v49  ;;  %vm14555_vm11 = vmmov %vm14553_vm8 }
 0x726   : > { %8203 = vrot.lane.b32.xlu1 %v8110_v1, %s9502_s20  ;;  %v13308_v29 = vpop.permute.xlu2 %7885  ;;  %v7756_v61 = vor.u32 %v7755_v51, %v7752_v36  ;;  %v6904_v1 = vld [vmem:[#allocation2 + $0x58] sm:$0xf]  ;;  %v7772_v7 = vsel %vm9761_vm14, %v7767_v56, %v7771_v47  ;;  %v6524_v51 = vor.u32 %v6523_v30, %v6520_v14  ;;  %v6366_v30 = vld [vmem:[#allocation2 + $0xb0] sm:$0x1] }
 0x727   : > { %v7025_v36 = vrot.slane %v6904_v1, 5  ;;  %v6535_v57 = vrot.slane %v6534_v15, 4 }
 0x728   : > { %8201 = vrot.lane.b32.xlu0 %v8107_v38, %s9502_s20  ;;  %v7858_v35 = vpop.permute.xlu1 %7857  ;;  %v7757_v27 = vrot.slane %v7756_v61, 4 }
 0x729   : > { %7947 = vst.msk [vmem:[#allocation3 + $0x18] sm:$0xf] %vm14543_vm12, %v7858_v35  ;;  %vm14556_vm12 = vmmov %vm14546_vm2 }
 0x72a   : > { %v7300_v55 = vpop.permute.xlu0 %7299  ;;  %v7762_v46 = vsel %vm9761_vm14, %v7757_v27, %v7761_v16  ;;  %v7606_v27 = vshrl.u32 %v7431_v37, 16  ;;  %v7234_v16 = vld [vmem:[#allocation2 + $0x64] sm:$0xf]  ;;  %v7452_v37 = vld [vmem:[#allocation2 + $0xb4] sm:$0xf] }
 0x72b   : > { %7388 = vst.msk [vmem:[#allocation3 + $0x1c] sm:$0xf] %vm14544_vm5, %v7300_v55  ;;  %v6539_v55 = vrot.slane %v6537_v60, 5  ;;  %vm14557_vm5 = vmmov %vm14549_vm1 }
 0x72c   : > { %7948 = vst.msk [vmem:[#allocation3 + $0x1c] sm:$0xf] %vm14545_vm13, %v13265_v6  ;;  %7143 = vrot.lane.b32.xlu2 %v7071_v39, %s9499_s12  ;;  %v8010_v6 = vld [vmem:[#allocation2 + $0xac] sm:$0xf]  ;;  %v6525_v39 = vrot.slane %v6524_v51, 4  ;;  %v7608_v0 = vrot.slane %v7606_v27, 4  ;;  %vm14558_vm13 = vmmov %vm14535_vm0 }
 0x72d   : > { %v8155_v20 = vrot.slane %v8010_v6, 5  ;;  %v6540_v61 = vsel %vm9761_vm14, %v6535_v57, %v6539_v55  ;;  %v6365_v6 = vld [vmem:[#allocation2 + $0xac] sm:$0xf]  ;;  %v7453_v57 = vld [vmem:[#allocation2 + $0xb8] sm:$0xf] }
 0x72e   : > { %7141 = vrot.lane.b32.xlu1 %v7068_v24, %s9499_s12  ;;  %v13321_v11 = vpop.permute.xlu2 %8223  ;;  %v7615_v24 = vshll.u32 %v7432_v53, 16  ;;  %v6695_v34 = vshll.u32 %v6365_v6, 16  ;;  %v6699_v3 = vshrl.u32 %v6365_v6, 16  ;;  %v7612_v42 = vor.u32 %v7611_v43, %v7608_v0  ;;  %v7993_v55 = vld [vmem:[#allocation2 + $0x68] sm:$0x1] }
 0x72f   : > { %v8157_v33 = vrot.slane %v8155_v20, 4  ;;  %v8156_v38 = vsel %vm10152_vm4, %v9203_v12, %v8155_v20  ;;  %v8116_v27 = vrot.slane %v7993_v55, 5  ;;  %v7777_v6 = vshll.u32 %v7452_v37, 16 }
 0x730   : > { %6807 = vrot.lane.b32.xlu0 %v6684_v19, %s9498_s11  ;;  %v8196_v8 = vpop.permute.xlu1 %8195  ;;  %v6530_v19 = vsel %vm9761_vm14, %v6525_v39, %v6529_v49  ;;  %v7617_v23 = vrot.slane %v7615_v24, 5  ;;  %v7613_v47 = vrot.slane %v7612_v42, 4  ;;  %v6925_v39 = vld [vmem:[#allocation2 + $0xac] sm:$0xf] }
 0x731   : > { %8284 = vst.msk [vmem:[#allocation3 + $0x1c] sm:$0xf] %vm14546_vm2, %v8196_v8  ;;  %v8159_v31 = vsel %vm10152_vm4, %v8157_v33, %v8158_v28  ;;  %v6905_v8 = vld [vmem:[#allocation2 + $0x5c] sm:$0x1]  ;;  %v7233_v33 = vld [vmem:[#allocation2 + $0x60] sm:$0xf]  ;;  %vm14559_vm2 = vmmov %vm14549_vm1 }
 0x732   : > { %v8194_v18 = vpop.permute.xlu0 %8193  ;;  %v7028_v45 = vrot.slane %v6905_v8, 5  ;;  %v7625_v28 = vshll.u32 %v7433_v48, 16  ;;  %v7618_v51 = vsel %vm9761_vm14, %v7613_v47, %v7617_v23  ;;  %v7774_v8 = vshrl.u32 %v7452_v37, 16  ;;  %v6924_v48 = vld [vmem:[#allocation2 + $0xa8] sm:$0xe] }
 0x733   : > { %8283 = vst.msk [vmem:[#allocation3 + $0x18] sm:$0xf] %vm14547_vm7, %v8194_v18  ;;  %v7027_v18 = vrot.slane %v7025_v36, 4  ;;  %vm14560_vm7 = vmmov %vm14550_vm10  ;;  %v7779_v43 = vrot.slane %v7777_v6, 5 }
 0x734   : > { %7893 = vrot.lane.b32.xlu2 %v7762_v46, %s9501_s19  ;;  %v7621_v46 = vrot.slane %v7619_v5, 4  ;;  %v7627_v1 = vrot.slane %v7625_v28, 5  ;;  %v7783_v5 = vshll.u32 %v7453_v57, 16  ;;  %v7776_v0 = vrot.slane %v7774_v8, 4 }
 0x736   : > { %7335 = vrot.lane.b32.xlu1 %v7246_v59, %s9500_s13  ;;  %v13332_v63 = vpop.permute.xlu2 %7111  ;;  %v6364_v59 = vld [vmem:[#allocation2 + $0xa8] sm:$0xf]  ;;  %v7622_v26 = vor.u32 %v7621_v46, %v7617_v23  ;;  %v6926_v23 = vld [vmem:[#allocation2 + $0xb0] sm:$0x1]  ;;  %v7785_v46 = vrot.slane %v7783_v5, 5  ;;  %v7780_v28 = vor.u32 %v7779_v43, %v7776_v0 }
 0x737   : > { %v6686_v22 = vshrl.u32 %v6364_v59, 16  ;;  %v6689_v21 = vshll.u32 %v6364_v59, 16 }
 0x738   : > { %7333 = vrot.lane.b32.xlu0 %v7245_v13, %s9500_s13  ;;  %v7134_v52 = vpop.permute.xlu1 %7133  ;;  %v7992_v13 = vld [vmem:[#allocation2 + $0x64] sm:$0xf]  ;;  %v7623_v17 = vrot.slane %v7622_v26, 4 }
 0x739   : > { %7209 = vst.msk [vmem:[#allocation3 + $0x50] sm:$0xf] %vm14548_vm15, %v7134_v52  ;;  %v7029_v52 = vsel %vm10152_vm4, %v7027_v18, %v7028_v45  ;;  %v8113_v49 = vrot.slane %v7992_v13, 5  ;;  %v6691_v56 = vrot.slane %v6689_v21, 5  ;;  %vm14561_vm15 = vmmov %vm14551_vm3  ;;  %v7247_v45 = vld [vmem:[#allocation2 + $0xb4] sm:$0xf] }
 0x73a   : > { %v6800_v40 = vpop.permute.xlu0 %6799  ;;  %v9339_v41 = vld [vmem:[#allocation3 + $0x18] sm:$0xff]  ;;  %v7628_v60 = vsel %vm9761_vm14, %v7623_v17, %v7627_v1  ;;  %v7454_v13 = vld [vmem:[#allocation2 + $0xbc] sm:$0x1]  ;;  %v6545_v21 = vshll.u32 %v6346_v2, 16  ;;  %v7781_v17 = vrot.slane %v7780_v28, 4 }
 0x73b   : > { %6874 = vst.msk [vmem:[#allocation3 + $0x54] sm:$0xf] %vm14535_vm0, %v6800_v40  ;;  %9299 = vmatmul.msk.bf16.gmra.mxu1 %vm14550_vm10, %v9339_v41  ;;  %v6701_v40 = vrot.slane %v6699_v3, 4  ;;  %vm14562_vm0 = vmmov %vm14551_vm3  ;;  %v8115_v24 = vrot.slane %v8113_v49, 4  ;;  %v7077_v3 = vrot.slane %v6926_v23, 5 }
 0x73c   : > { %7210 = vst.msk [vmem:[#allocation3 + $0x54] sm:$0xf] %vm14549_vm1, %v13292_v50  ;;  %8231 = vrot.lane.b32.xlu2 %v8159_v31, %s9502_s20  ;;  %v9181_v50 = vrot.slane %v6903_v32, 9  ;;  %v6688_v31 = vrot.slane %v6686_v22, 4  ;;  %vm14563_vm1 = vmmov %vm14553_vm8  ;;  %v6542_v22 = vshrl.u32 %v6346_v2, 16  ;;  %v7786_v47 = vsel %vm9761_vm14, %v7781_v17, %v7785_v46 }
 0x73d   : > { %v8117_v18 = vsel %vm10152_vm4, %v8115_v24, %v8116_v27  ;;  %vm14564_vm10 = vmmov %vm14554_vm9  ;;  %v6908_v23 = vld [vmem:[#allocation2 + $0x68] sm:$0x1] }
 0x73e   : > { %8229 = vrot.lane.b32.xlu1 %v8156_v38, %s9502_s20  ;;  %v13346_v58 = vpop.permute.xlu2 %7861  ;;  %v7026_v44 = vsel %vm10152_vm4, %v9181_v50, %v7025_v36  ;;  %v8114_v38 = vsel %vm10152_vm4, %v9197_v9, %v8113_v49  ;;  %v6705_v50 = vshll.u32 %v6366_v30, 16  ;;  %v7793_v9 = vshll.u32 %v7454_v13, 16  ;;  %v6347_v30 = vld [vmem:[#allocation2 + $0x64] sm:$0xf] }
 0x73f   : > { %v7035_v0 = vrot.slane %v6908_v23, 5 }
 0x740   : > { %7895 = vrot.lane.b32.xlu0 %v7772_v7, %s9501_s19  ;;  %v7328_v35 = vpop.permute.xlu1 %7327  ;;  %v6692_v7 = vor.u32 %v6691_v56, %v6688_v31  ;;  %v6707_v53 = vrot.slane %v6705_v50, 5  ;;  %v7795_v31 = vrot.slane %v7793_v9, 5 }
 0x741   : > { %7402 = vst.msk [vmem:[#allocation3 + $0x54] sm:$0xf] %vm14551_vm3, %v7328_v35  ;;  %vm14565_vm3 = vmmov %vm14563_vm1 }
 0x742   : > { %v7326_v54 = vpop.permute.xlu0 %7325 }
 0x743   : > { %7401 = vst.msk [vmem:[#allocation3 + $0x50] sm:$0xf] %vm14552_vm6, %v7326_v54  ;;  %v6693_v54 = vrot.slane %v6692_v7, 4  ;;  %vm14566_vm6 = vmmov %vm14554_vm9  ;;  %v7248_v7 = vld [vmem:[#allocation2 + $0xb8] sm:$0xf] }
 0x744   : > { %7961 = vst.msk [vmem:[#allocation3 + $0x50] sm:$0xf] %vm14553_vm8, %v13308_v29  ;;  %7117 = vrot.lane.b32.xlu2 %v7026_v44, %s9499_s12  ;;  %vm14567_vm8 = vmmov %vm14558_vm13 }
 0x746   : > { %6783 = vrot.lane.b32.xlu1 %v6540_v61, %s9498_s11  ;;  %v13361_v4 = vpop.permute.xlu2 %8199 }
 0x748   : > { %6781 = vrot.lane.b32.xlu0 %v6530_v19, %s9498_s11  ;;  %v8222_v29 = vpop.permute.xlu1 %8221  ;;  %v7787_v19 = vshrl.u32 %v7453_v57, 16  ;;  %v8012_v57 = vld [vmem:[#allocation2 + $0xb4] sm:$0xe] }
 0x749   : > { %8297 = vst.msk [vmem:[#allocation3 + $0x50] sm:$0xf] %vm14554_vm9, %v8222_v29  ;;  %v7074_v29 = vrot.slane %v6925_v39, 5  ;;  %vm14568_vm9 = vmmov %vm14567_vm8 }
 0x74a   : > { %v7888_v20 = vpop.permute.xlu0 %7887 }
 0x74b   : > { %7962 = vst.msk [vmem:[#allocation3 + $0x54] sm:$0xf] %vm14555_vm11, %v7888_v20  ;;  %v7789_v20 = vrot.slane %v7787_v19, 4  ;;  %v7076_v59 = vrot.slane %v7074_v29, 4  ;;  %vm14569_vm11 = vmmov %vm14567_vm8 }
 0x74c   : > { %8298 = vst.msk [vmem:[#allocation3 + $0x54] sm:$0xf] %vm14556_vm12, %v13321_v11  ;;  %7311 = vrot.lane.b32.xlu2 %v7234_v16, %s9500_s13  ;;  %v6697_v11 = vrot.slane %v6695_v34, 5  ;;  %vm14570_vm12 = vmmov %vm14559_vm2 }
 0x74d   : > { %v7790_v26 = vor.u32 %v7789_v20, %v7785_v46  ;;  %v6348_v46 = vld [vmem:[#allocation2 + $0x68] sm:$0x1] }
 0x74e   : > { %7309 = vrot.lane.b32.xlu1 %v7233_v33, %s9500_s13  ;;  %v13374_v12 = vpop.permute.xlu2 %7137  ;;  %v6702_v15 = vor.u32 %v6701_v40, %v6697_v11  ;;  %v6698_v62 = vsel %vm9761_vm14, %v6693_v54, %v6697_v11  ;;  %v9188_v33 = vrot.slane %v6924_v48, 9  ;;  %v6544_v40 = vrot.slane %v6542_v22, 4  ;;  %v6907_v54 = vld [vmem:[#allocation2 + $0x64] sm:$0xf] }
 0x74f   : > { %v7791_v11 = vrot.slane %v7790_v26, 4  ;;  %v7032_v24 = vrot.slane %v6907_v54, 5  ;;  %v6561_v43 = vshll.u32 %v6348_v46, 16 }
 0x750   : > { %7119 = vrot.lane.b32.xlu0 %v7029_v52, %s9499_s12  ;;  %v7110_v41 = vpop.permute.xlu1 %7109  ;;  %v6703_v35 = vrot.slane %v6702_v15, 4  ;;  %v7078_v52 = vsel %vm10152_vm4, %v7076_v59, %v7077_v3  ;;  %v7075_v42 = vsel %vm10152_vm4, %v9188_v33, %v7074_v29  ;;  %v7435_v3 = vld [vmem:[#allocation2 + $0x70] sm:$0xf] }
 0x751   : > { %7197 = vst.msk [vmem:[#allocation3 + $0x20] sm:$0xf] %vm14557_vm5, %v7110_v41  ;;  %v6547_v41 = vrot.slane %v6545_v21, 5  ;;  %v7796_v1 = vsel %vm9761_vm14, %v7791_v11, %v7795_v31  ;;  %vm14571_vm5 = vmmov %vm14560_vm7  ;;  %v7034_v20 = vrot.slane %v7032_v24, 4  ;;  %v6563_v22 = vrot.slane %v6561_v43, 5 }
 0x752   : > { %v6776_v14 = vpop.permute.xlu0 %6775  ;;  %v6708_v61 = vsel %vm9761_vm14, %v6703_v35, %v6707_v53  ;;  %v7434_v53 = vld [vmem:[#allocation2 + $0x6c] sm:$0xf]  ;;  %v7639_v21 = vshll.u32 %v7435_v3, 16  ;;  %v7456_v43 = vld [vmem:[#allocation2 + $0xc4] sm:$0xf] }
 0x753   : > { %6862 = vst.msk [vmem:[#allocation3 + $0x24] sm:$0xf] %vm14558_vm13, %v6776_v14  ;;  %v9346_v32 = vld [vmem:[#allocation3 + $0x50] sm:$0xff]  ;;  %v8013_v14 = vld [vmem:[#allocation2 + $0xb8] sm:$0xf]  ;;  %vm14572_vm13 = vmmov %vm14562_vm0  ;;  %v7630_v27 = vshrl.u32 %v7434_v53, 16 }
 0x754   : > { %7198 = vst.msk [vmem:[#allocation3 + $0x24] sm:$0xf] %vm14559_vm2, %v13332_v63  ;;  %8205 = vrot.lane.b32.xlu2 %v8114_v38, %s9502_s20  ;;  %9306 = vmatmul.msk.bf16.gmra.mxu3 %vm14560_vm7, %v9346_v32  ;;  %v6548_v38 = vor.u32 %v6547_v41, %v6544_v40  ;;  %v8162_v15 = vrot.slane %v8013_v14, 5  ;;  %vm14573_vm7 = vmmov %vm14562_vm0  ;;  %v7641_v11 = vrot.slane %v7639_v21, 5  ;;  %v6368_v41 = vld [vmem:[#allocation2 + $0xb8] sm:$0xf] }
 0x755   : > { %v7632_v48 = vrot.slane %v7630_v27, 4  ;;  %v7236_v14 = vld [vmem:[#allocation2 + $0x70] sm:$0xf] }
 0x756   : > { %7871 = vrot.lane.b32.xlu1 %v7628_v60, %s9501_s19  ;;  %v13388_v36 = vpop.permute.xlu2 %7331  ;;  %v6551_v60 = vshll.u32 %v6347_v30, 16  ;;  %v6549_v35 = vrot.slane %v6548_v38, 4  ;;  %v8164_v55 = vrot.slane %v8162_v15, 4 }
 0x758   : > { %7869 = vrot.lane.b32.xlu0 %v7618_v51, %s9501_s19  ;;  %v7304_v63 = vpop.permute.xlu1 %7303  ;;  %v8014_v51 = vld [vmem:[#allocation2 + $0xbc] sm:$0x1] }
 0x759   : > { %7390 = vst.msk [vmem:[#allocation3 + $0x24] sm:$0xf] %vm14561_vm15, %v7304_v63  ;;  %v6555_v63 = vshrl.u32 %v6347_v30, 16  ;;  %v8165_v37 = vrot.slane %v8014_v51, 5  ;;  %vm14574_vm15 = vmmov %vm14563_vm1  ;;  %v7994_v30 = vld [vmem:[#allocation2 + $0x6c] sm:$0xe] }
 0x75a   : > { %v7302_v44 = vpop.permute.xlu0 %7301  ;;  %v9198_v54 = vrot.slane %v7994_v30, 9 }
 0x75b   : > { %7389 = vst.msk [vmem:[#allocation3 + $0x20] sm:$0xf] %vm14562_vm0, %v7302_v44  ;;  %v6553_v44 = vrot.slane %v6551_v60, 5  ;;  %v6557_v19 = vrot.slane %v6555_v63, 4  ;;  %v8166_v29 = vsel %vm10152_vm4, %v8164_v55, %v8165_v37  ;;  %vm14575_vm0 = vmmov %vm14563_vm1  ;;  %v7235_v60 = vld [vmem:[#allocation2 + $0x6c] sm:$0xf] }
 0x75c   : > { %7949 = vst.msk [vmem:[#allocation3 + $0x20] sm:$0xf] %vm14563_vm1, %v13346_v58  ;;  %6811 = vrot.lane.b32.xlu2 %v6708_v61, %s9498_s11  ;;  %v9204_v61 = vrot.slane %v8012_v57, 9  ;;  %vm14576_vm1 = vmmov %vm14566_vm6 }
 0x75d   : > { %v6554_v5 = vsel %vm9761_vm14, %v6549_v35, %v6553_v44 }
 0x75e   : > { %6809 = vrot.lane.b32.xlu1 %v6698_v62, %s9498_s11  ;;  %v13403_v16 = vpop.permute.xlu2 %8225  ;;  %v7633_v62 = vshll.u32 %v7434_v53, 16  ;;  %v8163_v8 = vsel %vm10152_vm4, %v9204_v61, %v8162_v15  ;;  %v7436_v15 = vld [vmem:[#allocation2 + $0x74] sm:$0x1]  ;;  %v6369_v61 = vld [vmem:[#allocation2 + $0xbc] sm:$0x1] }
 0x75f   : > { %v7649_v53 = vshll.u32 %v7436_v15, 16  ;;  %v8016_v15 = vld [vmem:[#allocation2 + $0xc4] sm:$0xf] }
 0x760   : > { %8207 = vrot.lane.b32.xlu0 %v8117_v18, %s9502_s20  ;;  %v8198_v58 = vpop.permute.xlu1 %8197  ;;  %v6906_v18 = vld [vmem:[#allocation2 + $0x60] sm:$0xe]  ;;  %v7635_v2 = vrot.slane %v7633_v62, 5  ;;  %v6927_v62 = vld [vmem:[#allocation2 + $0xb4] sm:$0xe] }
 0x761   : > { %8285 = vst.msk [vmem:[#allocation3 + $0x20] sm:$0xf] %vm14564_vm10, %v8198_v58  ;;  %v6558_v58 = vor.u32 %v6557_v19, %v6553_v44  ;;  %v9182_v59 = vrot.slane %v6906_v18, 9  ;;  %vm14577_vm10 = vmmov %vm14567_vm8  ;;  %v7651_v18 = vrot.slane %v7649_v53, 5  ;;  %v8169_v53 = vrot.slane %v8016_v15, 5 }
 0x762   : > { %v7864_v34 = vpop.permute.xlu0 %7863  ;;  %v7636_v33 = vor.u32 %v7635_v2, %v7632_v48 }
 0x763   : > { %7950 = vst.msk [vmem:[#allocation3 + $0x24] sm:$0xf] %vm14565_vm3, %v7864_v34  ;;  %v6559_v13 = vrot.slane %v6558_v58, 4  ;;  %v7033_v26 = vsel %vm10152_vm4, %v9182_v59, %v7032_v24  ;;  %vm14578_vm3 = vmmov %vm14567_vm8 }
 0x764   : > { %8286 = vst.msk [vmem:[#allocation3 + $0x24] sm:$0xf] %vm14566_vm6, %v13361_v4  ;;  %7337 = vrot.lane.b32.xlu2 %v7247_v45, %s9500_s13  ;;  %v7036_v45 = vsel %vm10152_vm4, %v7034_v20, %v7035_v0  ;;  %v7637_v9 = vrot.slane %v7636_v33, 4  ;;  %vm14579_vm6 = vmmov %vm14576_vm1  ;;  %v6729_v20 = vshll.u32 %v6369_v61, 16 }
 0x765   : > { %v6564_v28 = vsel %vm9761_vm14, %v6559_v13, %v6563_v22  ;;  %v7455_v13 = vld [vmem:[#allocation2 + $0xc0] sm:$0xf]  ;;  %v7811_v22 = vshrl.u32 %v7456_v43, 16 }
 0x766   : > { %7147 = vrot.lane.b32.xlu1 %v7078_v52, %s9499_s12  ;;  %v6780_v49 = vpop.permute.xlu2 %6779 }
 0x767   : > { %6864 = vst.msk [vmem:[#allocation3 + $0x2c] sm:$0xf] %vm14567_vm8, %v6780_v49  ;;  %v7643_v49 = vshrl.u32 %v7435_v3, 16  ;;  %vm14580_vm8 = vmmov %vm14559_vm2 }
 0x768   : > { %7145 = vrot.lane.b32.xlu0 %v7075_v42, %s9499_s12  ;;  %v6804_v4 = vpop.permute.xlu1 %6803  ;;  %v7995_v42 = vld [vmem:[#allocation2 + $0x70] sm:$0xf] }
 0x769   : > { %6876 = vst.msk [vmem:[#allocation3 + $0x5c] sm:$0xf] %vm14568_vm9, %v6804_v4  ;;  %v7642_v4 = vsel %vm9761_vm14, %v7637_v9, %v7641_v11  ;;  %v8120_v17 = vrot.slane %v7995_v42, 5  ;;  %v7645_v31 = vrot.slane %v7643_v49, 4  ;;  %vm14581_vm9 = vmmov %vm14559_vm2  ;;  %v7801_v9 = vshll.u32 %v7455_v13, 16 }
 0x76a   : > { %v6802_v56 = vpop.permute.xlu0 %6801  ;;  %v6929_v49 = vld [vmem:[#allocation2 + $0xbc] sm:$0x1]  ;;  %v7250_v42 = vld [vmem:[#allocation2 + $0xc4] sm:$0xf] }
 0x76b   : > { %6875 = vst.msk [vmem:[#allocation3 + $0x58] sm:$0xf] %vm14569_vm11, %v6802_v56  ;;  %v9340_v32 = vld [vmem:[#allocation3 + $0x20] sm:$0xff]  ;;  %v6367_v56 = vld [vmem:[#allocation2 + $0xb4] sm:$0xf]  ;;  %v7646_v51 = vor.u32 %v7645_v31, %v7641_v11  ;;  %vm14582_vm11 = vmmov %vm14573_vm7  ;;  %v7803_v30 = vrot.slane %v7801_v9, 5 }
 0x76c   : > { %7211 = vst.msk [vmem:[#allocation3 + $0x58] sm:$0xf] %vm14570_vm12, %v13374_v12  ;;  %7899 = vrot.lane.b32.xlu2 %v7796_v1, %s9501_s19  ;;  %9300 = vmatmul.msk.bf16.gmra.mxu1 %vm14571_vm5, %v9340_v32  ;;  %v6719_v32 = vshll.u32 %v6368_v41, 16  ;;  %v6723_v1 = vshrl.u32 %v6368_v41, 16  ;;  %v6710_v35 = vshrl.u32 %v6367_v56, 16  ;;  %v6713_v63 = vshll.u32 %v6367_v56, 16  ;;  %vm14583_vm12 = vmmov %vm14571_vm5 }
 0x76d   : > { %vm14584_vm5 = vmmov %vm14575_vm0  ;;  %v7813_v41 = vrot.slane %v7811_v22, 4  ;;  %v8015_v31 = vld [vmem:[#allocation2 + $0xc0] sm:$0xe] }
 0x76e   : > { %7897 = vrot.lane.b32.xlu1 %v7786_v47, %s9501_s19  ;;  %v13431_v50 = vpop.permute.xlu2 %7305  ;;  %v7996_v47 = vld [vmem:[#allocation2 + $0x74] sm:$0x1]  ;;  %v6721_v55 = vrot.slane %v6719_v32, 5  ;;  %v6725_v44 = vrot.slane %v6723_v1, 4  ;;  %v6712_v19 = vrot.slane %v6710_v35, 4  ;;  %v6715_v27 = vrot.slane %v6713_v63, 5 }
 0x76f   : > { %v6370_v56 = vld [vmem:[#allocation2 + $0xc0] sm:$0xf] }
 0x770   : > { %7339 = vrot.lane.b32.xlu0 %v7248_v7, %s9500_s13  ;;  %v7330_v12 = vpop.permute.xlu1 %7329  ;;  %v8122_v7 = vrot.slane %v8120_v17, 4  ;;  %v6726_v23 = vor.u32 %v6725_v44, %v6721_v55  ;;  %v6716_v2 = vor.u32 %v6715_v27, %v6712_v19  ;;  %v6737_v35 = vshll.u32 %v6370_v56, 16 }
 0x771   : > { %7403 = vst.msk [vmem:[#allocation3 + $0x58] sm:$0xf] %vm14572_vm13, %v7330_v12  ;;  %v8123_v12 = vrot.slane %v7996_v47, 5  ;;  %vm14585_vm13 = vmmov %vm14573_vm7  ;;  %v7084_v47 = vrot.slane %v6929_v49, 5 }
 0x772   : > { %v7140_v39 = vpop.permute.xlu0 %7139  ;;  %v6727_v59 = vrot.slane %v6726_v23, 4 }
 0x773   : > { %7212 = vst.msk [vmem:[#allocation3 + $0x5c] sm:$0xf] %vm14559_vm2, %v7140_v39  ;;  %v8124_v24 = vsel %vm10152_vm4, %v8122_v7, %v8123_v12  ;;  %vm14586_vm2 = vmmov %vm14575_vm0  ;;  %v9205_v12 = vrot.slane %v8015_v31, 9 }
 0x774   : > { %7404 = vst.msk [vmem:[#allocation3 + $0x5c] sm:$0xf] %vm14573_vm7, %v13388_v36  ;;  %6785 = vrot.lane.b32.xlu2 %v6554_v5, %s9498_s11  ;;  %v7647_v5 = vrot.slane %v7646_v51, 4  ;;  %vm14587_vm7 = vmmov %vm14576_vm1  ;;  %v6734_v51 = vshrl.u32 %v6370_v56, 16 }
 0x776   : > { %8235 = vrot.lane.b32.xlu1 %v8166_v29, %s9502_s20  ;;  %v13446_v6 = vpop.permute.xlu2 %7867  ;;  %v6928_v29 = vld [vmem:[#allocation2 + $0xb8] sm:$0xf]  ;;  %v7652_v58 = vsel %vm9761_vm14, %v7647_v5, %v7651_v18  ;;  %v6739_v5 = vrot.slane %v6737_v35, 5 }
 0x777   : > { %v7081_v48 = vrot.slane %v6928_v29, 5 }
 0x778   : > { %8233 = vrot.lane.b32.xlu0 %v8163_v8, %s9502_s20  ;;  %v7892_v36 = vpop.permute.xlu1 %7891  ;;  %v8121_v8 = vsel %vm10152_vm4, %v9198_v54, %v8120_v17  ;;  %v7457_v17 = vld [vmem:[#allocation2 + $0xc8] sm:$0x1] }
 0x779   : > { %7964 = vst.msk [vmem:[#allocation3 + $0x5c] sm:$0xf] %vm14574_vm15, %v7892_v36  ;;  %v7083_v11 = vrot.slane %v7081_v48, 4  ;;  %vm14588_vm15 = vmmov %vm14576_vm1  ;;  %v7817_v54 = vshll.u32 %v7457_v17, 16 }
 0x77a   : > { %v7890_v34 = vpop.permute.xlu0 %7889 }
 0x77b   : > { %7963 = vst.msk [vmem:[#allocation3 + $0x58] sm:$0xf] %vm14575_vm0, %v7890_v34  ;;  %v6731_v34 = vrot.slane %v6729_v20, 5  ;;  %v7085_v63 = vsel %vm10152_vm4, %v7083_v11, %v7084_v47  ;;  %vm14589_vm0 = vmmov %vm14580_vm8  ;;  %v7819_v29 = vrot.slane %v7817_v54, 5 }
 0x77c   : > { %8299 = vst.msk [vmem:[#allocation3 + $0x58] sm:$0xf] %vm14576_vm1, %v13403_v16  ;;  %7123 = vrot.lane.b32.xlu2 %v7036_v45, %s9499_s12  ;;  %v6717_v45 = vrot.slane %v6716_v2, 4  ;;  %vm14590_vm1 = vmmov %vm14578_vm3 }
 0x77d   : > { %v6732_v33 = vsel %vm9761_vm14, %v6727_v59, %v6731_v34  ;;  %v7458_v59 = vld [vmem:[#allocation2 + $0xcc] sm:$0xf] }
 0x77e   : > { %7121 = vrot.lane.b32.xlu1 %v7033_v26, %s9499_s12  ;;  %v6806_v52 = vpop.permute.xlu2 %6805  ;;  %v7807_v26 = vshll.u32 %v7456_v43, 16  ;;  %v7825_v22 = vshll.u32 %v7458_v59, 16 }
 0x77f   : > { %6877 = vst.msk [vmem:[#allocation3 + $0x60] sm:$0xf] %vm14577_vm10, %v6806_v52  ;;  %v6722_v52 = vsel %vm9761_vm14, %v6717_v45, %v6721_v55  ;;  %vm14591_vm10 = vmmov %vm14589_vm0  ;;  %v6931_v45 = vld [vmem:[#allocation2 + $0xc4] sm:$0xf] }
 0x780   : > { %6787 = vrot.lane.b32.xlu0 %v6564_v28, %s9498_s11  ;;  %v6778_v16 = vpop.permute.xlu1 %6777  ;;  %v7798_v28 = vshrl.u32 %v7455_v13, 16  ;;  %v7088_v9 = vrot.slane %v6931_v45, 5  ;;  %v7827_v11 = vrot.slane %v7825_v22, 5 }
 0x781   : > { %6863 = vst.msk [vmem:[#allocation3 + $0x28] sm:$0xf] %vm14578_vm3, %v6778_v16  ;;  %v6371_v16 = vld [vmem:[#allocation2 + $0xc4] sm:$0xf]  ;;  %vm14592_vm3 = vmmov %vm14583_vm12 }
 0x782   : > { %v8228_v40 = vpop.permute.xlu0 %8227  ;;  %v6743_v32 = vshll.u32 %v6371_v16, 16  ;;  %v6747_v1 = vshrl.u32 %v6371_v16, 16  ;;  %v6932_v16 = vld [vmem:[#allocation2 + $0xc8] sm:$0x1] }
 0x783   : > { %8300 = vst.msk [vmem:[#allocation3 + $0x5c] sm:$0xf] %vm14579_vm6, %v8228_v40  ;;  %v7809_v40 = vrot.slane %v7807_v26, 5  ;;  %vm14593_vm6 = vmmov %vm14582_vm11  ;;  %v7822_v26 = vshrl.u32 %v7458_v59, 16  ;;  %v7091_v31 = vrot.slane %v6932_v16, 5 }
 0x784   : > { %7873 = vrot.lane.b32.xlu2 %v7642_v4, %s9501_s19  ;;  %v6745_v44 = vrot.slane %v6743_v32, 5  ;;  %v7251_v32 = vld [vmem:[#allocation2 + $0xcc] sm:$0xf] }
 0x785   : > { %v7814_v7 = vor.u32 %v7813_v41, %v7809_v40  ;;  %v7459_v41 = vld [vmem:[#allocation2 + $0xd0] sm:$0xf] }
 0x786   : > { %7315 = vrot.lane.b32.xlu1 %v7236_v14, %s9500_s13  ;;  %v13469_v38 = vpop.permute.xlu2 %7143  ;;  %v7800_v14 = vrot.slane %v7798_v28, 4  ;;  %v7835_v35 = vshrl.u32 %v7459_v41, 16 }
 0x787   : > { %v7815_v61 = vrot.slane %v7814_v7, 4 }
 0x788   : > { %7313 = vrot.lane.b32.xlu0 %v7235_v60, %s9500_s13  ;;  %v7116_v57 = vpop.permute.xlu1 %7115  ;;  %v7249_v60 = vld [vmem:[#allocation2 + $0xc0] sm:$0xf]  ;;  %v7804_v55 = vor.u32 %v7803_v30, %v7800_v14  ;;  %v7831_v30 = vshll.u32 %v7459_v41, 16 }
 0x789   : > { %7200 = vst.msk [vmem:[#allocation3 + $0x2c] sm:$0xf] %vm14580_vm8, %v7116_v57  ;;  %v7820_v20 = vsel %vm9761_vm14, %v7815_v61, %v7819_v29  ;;  %vm14594_vm8 = vmmov %vm14593_vm6 }
 0x78a   : > { %v7114_v39 = vpop.permute.xlu0 %7113  ;;  %v9347_v37 = vld [vmem:[#allocation3 + $0x58] sm:$0xff]  ;;  %v7805_v18 = vrot.slane %v7804_v55, 4  ;;  %v7833_v7 = vrot.slane %v7831_v30, 5 }
 0x78b   : > { %7199 = vst.msk [vmem:[#allocation3 + $0x28] sm:$0xf] %vm14581_vm9, %v7114_v39  ;;  %9307 = vmatmul.msk.bf16.gmra.mxu3 %vm14583_vm12, %v9347_v37  ;;  %v6749_v39 = vrot.slane %v6747_v1, 4  ;;  %vm14595_vm9 = vmmov %vm14586_vm2 }
 0x78c   : > { %7391 = vst.msk [vmem:[#allocation3 + $0x28] sm:$0xf] %vm14582_vm11, %v13431_v50  ;;  %8211 = vrot.lane.b32.xlu2 %v8124_v24, %s9502_s20  ;;  %v9189_v50 = vrot.slane %v6927_v62, 9  ;;  %v6736_v24 = vrot.slane %v6734_v51, 4  ;;  %v6372_v62 = vld [vmem:[#allocation2 + $0xc8] sm:$0x1]  ;;  %v7810_v2 = vsel %vm9761_vm14, %v7805_v18, %v7809_v40  ;;  %vm14596_vm11 = vmmov %vm14587_vm7 }
 0x78d   : > { %v6750_v23 = vor.u32 %v6749_v39, %v6745_v44  ;;  %v6930_v40 = vld [vmem:[#allocation2 + $0xc0] sm:$0xe]  ;;  %vm14597_vm12 = vmmov %vm14586_vm2  ;;  %v7837_v39 = vrot.slane %v7835_v35, 4 }
 0x78e   : > { %8209 = vrot.lane.b32.xlu1 %v8121_v8, %s9502_s20  ;;  %v13483_v46 = vpop.permute.xlu2 %7893  ;;  %v7082_v3 = vsel %vm10152_vm4, %v9189_v50, %v7081_v48  ;;  %v8170_v8 = vsel %vm10152_vm4, %v9205_v12, %v8169_v53  ;;  %v6753_v50 = vshll.u32 %v6372_v62, 16  ;;  %v9190_v56 = vrot.slane %v6930_v40, 9 }
 0x790   : > { %7875 = vrot.lane.b32.xlu0 %v7652_v58, %s9501_s19  ;;  %v7866_v36 = vpop.permute.xlu1 %7865  ;;  %v6740_v58 = vor.u32 %v6739_v5, %v6736_v24  ;;  %v6755_v43 = vrot.slane %v6753_v50, 5  ;;  %v7089_v15 = vsel %vm10152_vm4, %v9190_v56, %v7088_v9  ;;  %v8018_v5 = vld [vmem:[#allocation2 + $0xcc] sm:$0xe]  ;;  %v8521_v56 = vpop.f32.mrf.mxu1 }
 0x791   : > { %7951 = vst.msk [vmem:[#allocation3 + $0x28] sm:$0xf] %vm14584_vm5, %v7866_v36  ;;  %v6751_v36 = vrot.slane %v6750_v23, 4  ;;  %vm14598_vm5 = vmmov %vm14587_vm7 }
 0x792   : > { %v7308_v0 = vpop.permute.xlu0 %7307 }
 0x793   : > { %7392 = vst.msk [vmem:[#allocation3 + $0x2c] sm:$0xf] %vm14585_vm13, %v7308_v0  ;;  %v6741_v0 = vrot.slane %v6740_v58, 4  ;;  %v6756_v13 = vsel %vm9761_vm14, %v6751_v36, %v6755_v43  ;;  %vm14599_vm13 = vmmov %vm14590_vm1 }
 0x794   : > { %7952 = vst.msk [vmem:[#allocation3 + $0x2c] sm:$0xf] %vm14586_vm2, %v13446_v6  ;;  %7149 = vrot.lane.b32.xlu2 %v7082_v3, %s9499_s12  ;;  %v8017_v3 = vld [vmem:[#allocation2 + $0xc8] sm:$0x1]  ;;  %vm14600_vm2 = vmmov %vm14590_vm1 }
 0x795   : > { %v8172_v28 = vrot.slane %v8017_v3, 5 }
 0x796   : > { %6815 = vrot.lane.b32.xlu1 %v6732_v33, %s9498_s11  ;;  %v13498_v21 = vpop.permute.xlu2 %8231  ;;  %v8171_v33 = vrot.slane %v8169_v53, 4  ;;  %v8020_v53 = vld [vmem:[#allocation2 + $0xd4] sm:$0x1] }
 0x797   : > { %v8179_v62 = vrot.slane %v8020_v53, 5 }
 0x798   : > { %6813 = vrot.lane.b32.xlu0 %v6722_v52, %s9498_s11  ;;  %v8204_v6 = vpop.permute.xlu1 %8203  ;;  %v6746_v52 = vsel %vm9761_vm14, %v6741_v0, %v6745_v44  ;;  %v8173_v49 = vsel %vm10152_vm4, %v8171_v33, %v8172_v28  ;;  %v7460_v44 = vld [vmem:[#allocation2 + $0xd4] sm:$0x1] }
 0x799   : > { %8288 = vst.msk [vmem:[#allocation3 + $0x2c] sm:$0xf] %vm14587_vm7, %v8204_v6  ;;  %vm14601_vm7 = vmmov %vm14590_vm1  ;;  %v7841_v61 = vshll.u32 %v7460_v44, 16 }
 0x79a   : > { %v8202_v4 = vpop.permute.xlu0 %8201 }
 0x79b   : > { %8287 = vst.msk [vmem:[#allocation3 + $0x28] sm:$0xf] %vm14588_vm15, %v8202_v4  ;;  %v7090_v4 = vrot.slane %v7088_v9, 4  ;;  %vm14602_vm15 = vmmov %vm14589_vm0  ;;  %v7843_v29 = vrot.slane %v7841_v61, 5 }
 0x79c   : > { %7343 = vrot.lane.b32.xlu2 %v7250_v42, %s9500_s13  ;;  %v7824_v42 = vrot.slane %v7822_v26, 4 }
 0x79d   : > { %v7092_v1 = vsel %vm10152_vm4, %v7090_v4, %v7091_v31 }
 0x79e   : > { %7341 = vrot.lane.b32.xlu1 %v7249_v60, %s9500_s13  ;;  %v13509_v57 = vpop.permute.xlu2 %7117  ;;  %v7828_v14 = vor.u32 %v7827_v11, %v7824_v42 }
 0x7a0   : > { %7151 = vrot.lane.b32.xlu0 %v7085_v63, %s9499_s12  ;;  %v7142_v37 = vpop.permute.xlu1 %7141  ;;  %v7829_v60 = vrot.slane %v7828_v14, 4 }
 0x7a1   : > { %7213 = vst.msk [vmem:[#allocation3 + $0x60] sm:$0xf] %vm14589_vm0, %v7142_v37  ;;  %vm14603_vm0 = vmmov %vm14592_vm3  ;;  %v7252_v37 = vld [vmem:[#allocation2 + $0xd0] sm:$0xf] }
 0x7a2   : > { %v6808_v19 = vpop.permute.xlu0 %6807  ;;  %v9341_v27 = vld [vmem:[#allocation3 + $0x28] sm:$0xff]  ;;  %v7834_v12 = vsel %vm9761_vm14, %v7829_v60, %v7833_v7 }
 0x7a3   : > { %6878 = vst.msk [vmem:[#allocation3 + $0x64] sm:$0xf] %vm14590_vm1, %v6808_v19  ;;  %9301 = vmatmul.msk.bf16.gmra.mxu1 %vm14592_vm3, %v9341_v27  ;;  %v7838_v19 = vor.u32 %v7837_v39, %v7833_v7  ;;  %vm14604_vm1 = vmmov %vm14593_vm6 }
 0x7a4   : > { %7214 = vst.msk [vmem:[#allocation3 + $0x64] sm:$0xf] %vm14591_vm10, %v13469_v38  ;;  %8237 = vrot.lane.b32.xlu2 %v8170_v8, %s9502_s20  ;;  %vm14605_vm3 = vmmov %vm14604_vm1 }
 0x7a5   : > { %v7839_v18 = vrot.slane %v7838_v19, 4  ;;  %v13626_v19 = vpop.f32.mrf.mxu3 }
 0x7a6   : > { %7903 = vrot.lane.b32.xlu1 %v7820_v20, %s9501_s19  ;;  %v13523_v48 = vpop.permute.xlu2 %7311 }
 0x7a7   : > { %v7844_v20 = vsel %vm9761_vm14, %v7839_v18, %v7843_v29  ;;  %vm14606_vm14 = vmmov %vm14595_vm9 }
 0x7a8   : > { %7901 = vrot.lane.b32.xlu0 %v7810_v2, %s9501_s19  ;;  %v7336_v38 = vpop.permute.xlu1 %7335 }
 0x7a9   : > { %7406 = vst.msk [vmem:[#allocation3 + $0x64] sm:$0xf] %vm14593_vm6, %v7336_v38  ;;  %vm14607_vm6 = vmmov %vm14595_vm9 }
 0x7aa   : > { %v7334_v34 = vpop.permute.xlu0 %7333 }
 0x7ab   : > { %7405 = vst.msk [vmem:[#allocation3 + $0x60] sm:$0xf] %vm14594_vm8, %v7334_v34  ;;  %vm14608_vm8 = vmmov %vm14598_vm5 }
 0x7ac   : > { %7965 = vst.msk [vmem:[#allocation3 + $0x60] sm:$0xf] %vm14595_vm9, %v13483_v46  ;;  %6819 = vrot.lane.b32.xlu2 %v6756_v13, %s9498_s11  ;;  %vm14609_vm9 = vmmov %vm14600_vm2 }
 0x7ae   : > { %6817 = vrot.lane.b32.xlu1 %v6746_v52, %s9498_s11  ;;  %v13538_v6 = vpop.permute.xlu2 %8205 }
 0x7b0   : > { %8239 = vrot.lane.b32.xlu0 %v8173_v49, %s9502_s20  ;;  %v8230_v46 = vpop.permute.xlu1 %8229 }
 0x7b1   : > { %8301 = vst.msk [vmem:[#allocation3 + $0x60] sm:$0xf] %vm14596_vm11, %v8230_v46  ;;  %vm14610_vm11 = vmmov %vm14600_vm2 }
 0x7b2   : > { %v7896_v17 = vpop.permute.xlu0 %7895 }
 0x7b3   : > { %7966 = vst.msk [vmem:[#allocation3 + $0x64] sm:$0xf] %vm14597_vm12, %v7896_v17  ;;  %vm14612_vm12 = vmmov %vm14591_vm10 }
 0x7b4   : > { %8302 = vst.msk [vmem:[#allocation3 + $0x64] sm:$0xf] %vm14598_vm5, %v13498_v21  ;;  %7345 = vrot.lane.b32.xlu2 %v7251_v32, %s9500_s13  ;;  %v8019_v21 = vld [vmem:[#allocation2 + $0xd0] sm:$0xf]  ;;  %v8523_v32 = vpop.f32.mrf.mxu1 }
 0x7b5   : > { %v8176_v55 = vrot.slane %v8019_v21, 5 }
 0x7b6   : > { %7155 = vrot.lane.b32.xlu1 %v7092_v1, %s9499_s12  ;;  %v6812_v47 = vpop.permute.xlu2 %6811 }
 0x7b7   : > { %6880 = vst.msk [vmem:[#allocation3 + $0x6c] sm:$0xf] %vm14599_vm13, %v6812_v47  ;;  %v8178_v27 = vrot.slane %v8176_v55, 4  ;;  %vm14614_vm13 = vmmov %vm14604_vm1 }
 0x7b8   : > { %7153 = vrot.lane.b32.xlu0 %v7089_v15, %s9499_s12  ;;  %v6784_v51 = vpop.permute.xlu1 %6783 }
 0x7b9   : > { %6866 = vst.msk [vmem:[#allocation3 + $0x34] sm:$0xf] %vm14600_vm2, %v6784_v51  ;;  %v8180_v58 = vsel %vm10152_vm4, %v8178_v27, %v8179_v62  ;;  %vm14615_vm2 = vmmov %vm14603_vm0  ;;  %v13628_v62 = vpop.f32.mrf.mxu3 }
 0x7ba   : > { %v6782_v63 = vpop.permute.xlu0 %6781 }
 0x7bb   : > { %6865 = vst.msk [vmem:[#allocation3 + $0x30] sm:$0xf] %vm14601_vm7, %v6782_v63  ;;  %v9348_v54 = vld [vmem:[#allocation3 + $0x60] sm:$0xff]  ;;  %vm14616_vm7 = vmmov %vm14607_vm6 }
 0x7bc   : > { %7201 = vst.msk [vmem:[#allocation3 + $0x30] sm:$0xf] %vm14602_vm15, %v13509_v57  ;;  %9308 = vmatmul.msk.bf16.gmra.mxu3 %vm14603_vm0, %v9348_v54  ;;  %v9206_v57 = vrot.slane %v8018_v5, 9  ;;  %7907 = vrot.lane.b32.xlu2 %v7844_v20, %s9501_s19  ;;  %vm14617_vm15 = vmmov %vm14604_vm1  ;;  %v8526_v15 = vpop.f32.mrf.mxu1 }
 0x7bd   : > { %vm14618_vm0 = vmmov %vm14607_vm6 }
 0x7be   : > { %7905 = vrot.lane.b32.xlu1 %v7834_v12, %s9501_s19  ;;  %v7338_v24 = vpop.permute.xlu2 %7337  ;;  %v8177_v50 = vsel %vm10152_vm4, %v9206_v57, %v8176_v55  ;;  %vm14611_vm4 = vmmov %vm14598_vm5 }
 0x7bf   : > { %vm14613_vm5 = vmmov %vm14591_vm10 }
 0x7c0   : > { %7347 = vrot.lane.b32.xlu0 %v7252_v37, %s9500_s13  ;;  %v7310_v8 = vpop.permute.xlu1 %7309 }
 0x7c1   : > { %7393 = vst.msk [vmem:[#allocation3 + $0x30] sm:$0xf] %vm14604_vm1, %v7310_v8  ;;  %vm14619_vm1 = vmmov %vm14611_vm4  ;;  %v13630_v8 = vpop.f32.mrf.mxu3 }
 0x7c2   : > { %v7120_v23 = vpop.permute.xlu0 %7119 }
 0x7c3   : > { %7202 = vst.msk [vmem:[#allocation3 + $0x34] sm:$0xf] %vm14591_vm10, %v7120_v23  ;;  %vm14620_vm10 = vmmov %vm14619_vm1 }
 0x7c4   : > { %7394 = vst.msk [vmem:[#allocation3 + $0x34] sm:$0xf] %vm14605_vm3, %v13523_v48  ;;  %vm14621_vm3 = vmmov %vm14613_vm5  ;;  %v8528_v35 = vpop.f32.mrf.mxu1 }
 0x7c6   : > { %8243 = vrot.lane.b32.xlu1 %v8180_v58, %s9502_s20  ;;  %v7900_v2 = vpop.permute.xlu2 %7899 }
 0x7c8   : > { %8241 = vrot.lane.b32.xlu0 %v8177_v50, %s9502_s20  ;;  %v7872_v10 = vpop.permute.xlu1 %7871  ;;  %v13637_v50 = vld [vmem:[%s9571_s7 + $0x1] ss:$0 sm:$0xff] }
 0x7c9   : > { %7954 = vst.msk [vmem:[#allocation3 + $0x34] sm:$0xf] %vm14606_vm14, %v7872_v10  ;;  %vm14622_vm14 = vmmov %vm14609_vm9  ;;  %v13632_v57 = vpop.f32.mrf.mxu3  ;;  %v13642_v10 = vadd.f32 %v13637_v50, %v8523_v32 }
 0x7ca   : > { %v7870_v36 = vpop.permute.xlu0 %7869 }
 0x7cb   : > { %7953 = vst.msk [vmem:[#allocation3 + $0x30] sm:$0xf] %vm14607_vm6, %v7870_v36  ;;  %vm14623_vm6 = vmmov %vm14621_vm3 }
 0x7cc   : > { %8289 = vst.msk [vmem:[#allocation3 + $0x30] sm:$0xf] %vm14608_vm8, %v13538_v6  ;;  %vm14624_vm8 = vmmov %vm14615_vm2  ;;  %v8531_v12 = vpop.f32.mrf.mxu1 }
 0x7ce   : > { %v6786_v38 = vpop.permute.xlu2 %6785 }
 0x7cf   : > { %6867 = vst.msk [vmem:[#allocation3 + $0x38] sm:$0xf] %vm14609_vm9, %v6786_v38  ;;  %vm14625_vm9 = vmmov %vm14614_vm13  ;;  %v13645_v38 = vadd.f32 %v13637_v50, %v8521_v56 }
 0x7d0   : > { %v6810_v48 = vpop.permute.xlu1 %6809 }
 0x7d1   : > { %6879 = vst.msk [vmem:[#allocation3 + $0x68] sm:$0xf] %vm14610_vm11, %v6810_v48  ;;  %vm14626_vm11 = vmmov %vm14625_vm9  ;;  %v13648_v48 = vadd.f32 %v13637_v50, %v8526_v15 }
 0x7d2   : > { %v8208_v25 = vpop.permute.xlu0 %8207 }
 0x7d3   : > { %8290 = vst.msk [vmem:[#allocation3 + $0x34] sm:$0xf] %vm14611_vm4, %v8208_v25  ;;  %vm14627_vm4 = vmmov %vm14618_vm0 }
 0x7d4   : > { %v8533_v37 = vpop.f32.mrf.mxu1 }
 0x7d6   : > { %v7124_v59 = vpop.permute.xlu2 %7123 }
 0x7d7   : > { %v13634_v20 = vpop.f32.mrf.mxu3 }
 0x7d8   : > { %v7148_v0 = vpop.permute.xlu1 %7147 }
 0x7d9   : > { %7216 = vst.msk [vmem:[#allocation3 + $0x6c] sm:$0xf] %vm14612_vm12, %v7148_v0  ;;  %vm14628_vm12 = vmmov %vm14619_vm1 }
 0x7da   : > { %v7146_v43 = vpop.permute.xlu0 %7145  ;;  %v9342_v34 = vld [vmem:[#allocation3 + $0x30] sm:$0xff] }
 0x7db   : > { %7215 = vst.msk [vmem:[#allocation3 + $0x68] sm:$0xf] %vm14613_vm5, %v7146_v43  ;;  %9302 = vmatmul.msk.bf16.gmra.mxu1 %vm14615_vm2, %v9342_v34  ;;  %vm14629_vm5 = vmmov %vm14618_vm0  ;;  %v13660_v34 = vadd.f32 %v13637_v50, %v8531_v12 }
 0x7dc   : > { %7407 = vst.msk [vmem:[#allocation3 + $0x68] sm:$0xf] %vm14614_vm13, %v7338_v24  ;;  %vm14630_vm13 = vmmov %vm14619_vm1  ;;  %v8536_v24 = vpop.f32.mrf.mxu1 }
 0x7dd   : > { %vm14631_vm2 = vmmov %vm14622_vm14 }
 0x7de   : > { %v7874_v3 = vpop.permute.xlu2 %7873 }
 0x7e0   : > { %v7898_v45 = vpop.permute.xlu1 %7897 }
 0x7e1   : > { %7967 = vst.msk [vmem:[#allocation3 + $0x68] sm:$0xf] %vm14616_vm7, %v7898_v45  ;;  %vm14632_vm7 = vmmov %vm14631_vm2 }
 0x7e2   : > { %v7340_v13 = vpop.permute.xlu0 %7339 }
 0x7e3   : > { %7408 = vst.msk [vmem:[#allocation3 + $0x6c] sm:$0xf] %vm14617_vm15, %v7340_v13  ;;  %vm14633_vm15 = vmmov %vm14631_vm2 }
 0x7e4   : > { %7968 = vst.msk [vmem:[#allocation3 + $0x6c] sm:$0xf] %vm14618_vm0, %v7900_v2  ;;  %vm14634_vm0 = vmmov %vm14621_vm3  ;;  %v8538_v27 = vpop.f32.mrf.mxu1  ;;  %v13639_v2 = vpop.f32.mrf.mxu3 }
 0x7e6   : > { %v8212_v33 = vpop.permute.xlu2 %8211 }
 0x7e8   : > { %v8236_v26 = vpop.permute.xlu1 %8235 }
 0x7e9   : > { %8304 = vst.msk [vmem:[#allocation3 + $0x6c] sm:$0xf] %vm14619_vm1, %v8236_v26  ;;  %vm14635_vm1 = vmmov %vm14624_vm8 }
 0x7ea   : > { %v8234_v22 = vpop.permute.xlu0 %8233 }
 0x7eb   : > { %8303 = vst.msk [vmem:[#allocation3 + $0x68] sm:$0xf] %vm14620_vm10, %v8234_v22  ;;  %vm14636_vm10 = vmmov %vm14625_vm9 }
 0x7ec   : > { %v8541_v29 = vpop.f32.mrf.mxu1 }
 0x7ee   : > { %v7150_v52 = vpop.permute.xlu2 %7149 }
 0x7f0   : > { %v7122_v28 = vpop.permute.xlu1 %7121 }
 0x7f1   : > { %7203 = vst.msk [vmem:[#allocation3 + $0x38] sm:$0xf] %vm14621_vm3, %v7122_v28  ;;  %vm14637_vm3 = vmmov %vm14634_vm0 }
 0x7f2   : > { %v6788_v9 = vpop.permute.xlu0 %6787  ;;  %v9349_v6 = vld [vmem:[#allocation3 + $0x68] sm:$0xff] }
 0x7f3   : > { %6868 = vst.msk [vmem:[#allocation3 + $0x3c] sm:$0xf] %vm14622_vm14, %v6788_v9  ;;  %9309 = vmatmul.msk.bf16.gmra.mxu3 %vm14624_vm8, %v9349_v6  ;;  %vm14638_vm14 = vmmov %vm14625_vm9 }
 0x7f4   : > { %7204 = vst.msk [vmem:[#allocation3 + $0x3c] sm:$0xf] %vm14623_vm6, %v7124_v59  ;;  %vm14639_vm6 = vmmov %vm14627_vm4  ;;  %v8543_v18 = vpop.f32.mrf.mxu1  ;;  %v13653_v59 = vadd.f32 %v13637_v50, %v8528_v35 }
 0x7f5   : > { %vm14640_vm8 = vmmov %vm14627_vm4 }
 0x7f6   : > { %v7344_v49 = vpop.permute.xlu2 %7343 }
 0x7f8   : > { %v7316_v16 = vpop.permute.xlu1 %7315 }
 0x7f9   : > { %7396 = vst.msk [vmem:[#allocation3 + $0x3c] sm:$0xf] %vm14625_vm9, %v7316_v16  ;;  %vm14641_vm9 = vmmov %vm14628_vm12 }
 0x7fa   : > { %v7314_v42 = vpop.permute.xlu0 %7313 }
 0x7fb   : > { %7395 = vst.msk [vmem:[#allocation3 + $0x38] sm:$0xf] %vm14626_vm11, %v7314_v42  ;;  %vm14642_vm11 = vmmov %vm14631_vm2 }
 0x7fc   : > { %7955 = vst.msk [vmem:[#allocation3 + $0x38] sm:$0xf] %vm14627_vm4, %v7874_v3  ;;  %vm14643_vm4 = vmmov %vm14641_vm9 }
 0x7fe   : > { %v8238_v11 = vpop.permute.xlu2 %8237 }
 0x800   : > { %v8210_v46 = vpop.permute.xlu1 %8209 }
 0x801   : > { %8291 = vst.msk [vmem:[#allocation3 + $0x38] sm:$0xf] %vm14628_vm12, %v8210_v46  ;;  %vm14644_vm12 = vmmov %vm14634_vm0 }
 0x802   : > { %v7876_v40 = vpop.permute.xlu0 %7875 }
 0x803   : > { %7956 = vst.msk [vmem:[#allocation3 + $0x3c] sm:$0xf] %vm14629_vm5, %v7876_v40  ;;  %vm14645_vm5 = vmmov %vm14634_vm0 }
 0x804   : > { %8292 = vst.msk [vmem:[#allocation3 + $0x3c] sm:$0xf] %vm14630_vm13, %v8212_v33  ;;  %vm14646_vm13 = vmmov %vm14635_vm1  ;;  %v13667_v33 = vadd.f32 %v13637_v50, %v8533_v37 }
 0x806   : > { %v6820_v41 = vpop.permute.xlu2 %6819 }
 0x807   : > { %6884 = vst.msk [vmem:[#allocation3 + $0x7c] sm:$0xf] %vm14631_vm2, %v6820_v41  ;;  %vm14647_vm2 = vmmov %vm14636_vm10  ;;  %v13687_v41 = vadd.f32 %v13637_v50, %v8543_v18 }
 0x808   : > { %v6816_v4 = vpop.permute.xlu1 %6815 }
 0x809   : > { %6882 = vst.msk [vmem:[#allocation3 + $0x74] sm:$0xf] %vm14632_vm7, %v6816_v4  ;;  %vm14648_vm7 = vmmov %vm14639_vm6 }
 0x80a   : > { %v6814_v17 = vpop.permute.xlu0 %6813 }
 0x80b   : > { %6881 = vst.msk [vmem:[#allocation3 + $0x70] sm:$0xf] %vm14633_vm15, %v6814_v17  ;;  %v9343_v31 = vld [vmem:[#allocation3 + $0x38] sm:$0xff]  ;;  %vm14649_vm15 = vmmov %vm14647_vm2 }
 0x80c   : > { %7217 = vst.msk [vmem:[#allocation3 + $0x70] sm:$0xf] %vm14634_vm0, %v7150_v52  ;;  %9303 = vmatmul.msk.bf16.gmra.mxu1 %vm14635_vm1, %v9343_v31  ;;  %vm14650_vm0 = vmmov %vm14639_vm6  ;;  %v13672_v52 = vadd.f32 %v13637_v50, %v8536_v24 }
 0x80d   : > { %vm14651_vm1 = vmmov %vm14643_vm4 }
 0x80e   : > { %v7346_v51 = vpop.permute.xlu2 %7345  ;;  %v13662_v45 = vpop.f32.mrf.mxu3 }
 0x810   : > { %v7342_v14 = vpop.permute.xlu1 %7341 }
 0x811   : > { %7409 = vst.msk [vmem:[#allocation3 + $0x70] sm:$0xf] %vm14636_vm10, %v7342_v14  ;;  %vm14652_vm10 = vmmov %vm14651_vm1 }
 0x812   : > { %v7152_v30 = vpop.permute.xlu0 %7151 }
 0x813   : > { %7218 = vst.msk [vmem:[#allocation3 + $0x74] sm:$0xf] %vm14637_vm3, %v7152_v30  ;;  %vm14653_vm3 = vmmov %vm14646_vm13 }
 0x814   : > { %7410 = vst.msk [vmem:[#allocation3 + $0x74] sm:$0xf] %vm14638_vm14, %v7344_v49  ;;  %vm14654_vm14 = vcmask 64512   ;;  %v13677_v49 = vadd.f32 %v13637_v50, %v8538_v27 }
 0x815   : > { %v8602_v25 = vsel %vm14654_vm14, %v13642_v10, 0.0 }
 0x816   : > { %v7908_v55 = vpop.permute.xlu2 %7907  ;;  %v8578_v17 = vpop.f32.mrf.mxu3 }
 0x818   : > { %v7904_v1 = vpop.permute.xlu1 %7903 }
 0x819   : > { %7970 = vst.msk [vmem:[#allocation3 + $0x74] sm:$0xf] %vm14639_vm6, %v7904_v1  ;;  %vm14655_vm6 = vmmov %vm14654_vm14 }
 0x81a   : > { %v7902_v47 = vpop.permute.xlu0 %7901  ;;  %v8601_v0 = vsel %vm14655_vm6, %v13645_v38, 0.0 }
 0x81b   : > { %7969 = vst.msk [vmem:[#allocation3 + $0x70] sm:$0xf] %vm14640_vm8, %v7902_v47  ;;  %vm14656_vm8 = vmmov %vm14655_vm6  ;;  %v8603_v3 = vadd.f32 %v8602_v25, %v8601_v0 }
 0x81c   : > { %8305 = vst.msk [vmem:[#allocation3 + $0x70] sm:$0xf] %vm14641_vm9, %v8238_v11  ;;  %v8604_v43 = vsel %vm14656_vm8, %v13648_v48, 0.0  ;;  %vm14657_vm9 = vmmov %vm14655_vm6  ;;  %v13682_v11 = vadd.f32 %v13637_v50, %v8541_v29  ;;  %v13725_v29 = vadd.f32 %v13637_v50, %v13626_v19 }
 0x81d   : > { %v8606_v13 = vsel %vm14657_vm9, %v13653_v59, 0.0  ;;  %v8605_v26 = vadd.f32 %v8604_v43, %v8603_v3  ;;  %v13737_v43 = vadd.f32 %v13637_v50, %v13630_v8 }
 0x81f   : > { %v8607_v9 = vadd.f32 %v8606_v13, %v8605_v26  ;;  %v13743_v26 = vadd.f32 %v13637_v50, %v13632_v57 }
 0x820   : > { %v6818_v60 = vpop.permute.xlu1 %6817  ;;  %v8546_v23 = vpop.f32.mrf.mxu1 }
 0x821   : > { %6883 = vst.msk [vmem:[#allocation3 + $0x78] sm:$0xf] %vm14642_vm11, %v6818_v60  ;;  %vm14658_vm11 = vmmov %vm14655_vm6  ;;  %v13692_v56 = vadd.f32 %v13637_v50, %v8546_v23 }
 0x822   : > { %v8240_v7 = vpop.permute.xlu0 %8239  ;;  %v8608_v22 = vsel %vm14658_vm11, %v13660_v34, 0.0 }
 0x823   : > { %8306 = vst.msk [vmem:[#allocation3 + $0x74] sm:$0xf] %vm14643_vm4, %v8240_v7  ;;  %vm14659_vm4 = vmmov %vm14655_vm6  ;;  %v8609_v16 = vadd.f32 %v8608_v22, %v8607_v9 }
 0x824   : > { %v8610_v6 = vsel %vm14659_vm4, %v13667_v33, 0.0 }
 0x825   : > { %v8611_v46 = vadd.f32 %v8610_v6, %v8609_v16  ;;  %v13755_v16 = vadd.f32 %v13637_v50, %v13639_v2 }
 0x828   : > { %v7156_v21 = vpop.permute.xlu1 %7155  ;;  %v8548_v58 = vpop.f32.mrf.mxu1 }
 0x829   : > { %7220 = vst.msk [vmem:[#allocation3 + $0x7c] sm:$0xf] %vm14644_vm12, %v7156_v21  ;;  %vm14660_vm12 = vmmov %vm14659_vm4  ;;  %v13697_v1 = vadd.f32 %v13637_v50, %v8548_v58 }
 0x82a   : > { %v7154_v63 = vpop.permute.xlu0 %7153  ;;  %v9350_v54 = vld [vmem:[#allocation3 + $0x70] sm:$0xff]  ;;  %v8612_v42 = vsel %vm14660_vm12, %v13672_v52, 0.0 }
 0x82b   : > { %7219 = vst.msk [vmem:[#allocation3 + $0x78] sm:$0xf] %vm14645_vm5, %v7154_v63  ;;  %9310 = vmatmul.msk.bf16.gmra.mxu3 %vm14646_vm13, %v9350_v54  ;;  %vm14661_vm5 = vmmov %vm14659_vm4  ;;  %v8613_v4 = vadd.f32 %v8612_v42, %v8611_v46  ;;  %v13761_v46 = vadd.f32 %v13637_v50, %v13662_v45 }
 0x82c   : > { %7411 = vst.msk [vmem:[#allocation3 + $0x78] sm:$0xf] %vm14647_vm2, %v7346_v51  ;;  %v8614_v40 = vsel %vm14661_vm5, %v13677_v49, 0.0  ;;  %vm14662_vm13 = vmmov %vm14659_vm4 }
 0x82d   : > { %v8616_v31 = vsel %vm14662_vm13, %v13682_v11, 0.0  ;;  %v8615_v30 = vadd.f32 %v8614_v40, %v8613_v4  ;;  %vm14663_vm2 = vmmov %vm14659_vm4 }
 0x82e   : > { %v8618_v32 = vsel %vm14663_vm2, %v13687_v41, 0.0 }
 0x82f   : > { %v8617_v47 = vadd.f32 %v8616_v31, %v8615_v30  ;;  %v13766_v31 = vadd.f32 %v13637_v50, %v8578_v17 }
 0x830   : > { %v7906_v53 = vpop.permute.xlu1 %7905 }
 0x831   : > { %7971 = vst.msk [vmem:[#allocation3 + $0x78] sm:$0xf] %vm14648_vm7, %v7906_v53  ;;  %vm14664_vm7 = vmmov %vm14663_vm2  ;;  %v8619_v7 = vadd.f32 %v8618_v32, %v8617_v47 }
 0x832   : > { %v7348_v44 = vpop.permute.xlu0 %7347  ;;  %v8620_v15 = vsel %vm14664_vm7, %v13692_v56, 0.0 }
 0x833   : > { %7412 = vst.msk [vmem:[#allocation3 + $0x7c] sm:$0xf] %vm14649_vm15, %v7348_v44  ;;  %vm14665_vm15 = vmmov %vm14663_vm2  ;;  %v8621_v21 = vadd.f32 %v8620_v15, %v8619_v7 }
 0x834   : > { %7972 = vst.msk [vmem:[#allocation3 + $0x7c] sm:$0xf] %vm14650_vm0, %v7908_v55  ;;  %v8622_v51 = vsel %vm14665_vm15, %v13697_v1, 0.0  ;;  %vm14666_vm0 = vmmov %vm14663_vm2 }
 0x835   : > { %v8623_v55 = vadd.f32 %v8622_v51, %v8621_v21  ;;  %vm14670_vm14 = vmmov %vm14666_vm0 }
 0x836   : > { %v8632_v58 = vsel %vm14670_vm14, %v13725_v29, 0.0  ;;  %vm14671_vm6 = vmmov %vm14666_vm0 }
 0x837   : > { %vm14672_vm8 = vmmov %vm14666_vm0 }
 0x838   : > { %v8244_v39 = vpop.permute.xlu1 %8243  ;;  %v8636_v13 = vsel %vm14672_vm8, %v13737_v43, 0.0  ;;  %vm14673_vm9 = vmmov %vm14666_vm0 }
 0x839   : > { %8308 = vst.msk [vmem:[#allocation3 + $0x7c] sm:$0xf] %vm14651_vm1, %v8244_v39  ;;  %vm14667_vm1 = vmmov %vm14666_vm0 }
 0x83a   : > { %v8242_v61 = vpop.permute.xlu0 %8241  ;;  %vm14674_vm11 = vmmov %vm14666_vm0 }
 0x83b   : > { %8307 = vst.msk [vmem:[#allocation3 + $0x78] sm:$0xf] %vm14652_vm10, %v8242_v61  ;;  %vm14668_vm10 = vmmov %vm14666_vm0 }
 0x83c   : > { %vm14675_vm4 = vmmov %vm14666_vm0 }
 0x83d   : > { %v8642_v57 = vsel %vm14675_vm4, %v13755_v16, 0.0  ;;  %vm14676_vm12 = vmmov %vm14666_vm0 }
 0x83e   : > { %v8644_v4 = vsel %vm14676_vm12, %v13761_v46, 0.0  ;;  %vm14677_vm5 = vmmov %vm14666_vm0 }
 0x83f   : > { %v8581_v63 = vpop.f32.mrf.mxu3  ;;  %v8646_v2 = vsel %vm14677_vm5, %v13766_v31, 0.0  ;;  %vm14678_vm13 = vmmov %vm14666_vm0 }
 0x840   : > { %v13771_v30 = vadd.f32 %v13637_v50, %v8581_v63  ;;  %vm14679_vm2 = vmmov %vm14666_vm0 }
 0x841   : > { %vm14680_vm7 = vmmov %vm14666_vm0 }
 0x842   : > { %v9351_v5 = vld [vmem:[#allocation3 + $0x78] sm:$0xff]  ;;  %v8648_v45 = vsel %vm14678_vm13, %v13771_v30, 0.0  ;;  %vm14681_vm15 = vmmov %vm14666_vm0 }
 0x843   : > { %9311 = vmatmul.msk.bf16.gmra.mxu3 %vm14653_vm3, %v9351_v5  ;;  %vm14669_vm3 = vmmov %vm14666_vm0 }
 0x844   : > { %vm14685_vm14 = vmmov %vm14666_vm0 }
 0x845   : > { %vm14687_vm8 = vmmov %vm14666_vm0 }
 0x846   : > { %vm14690_vm4 = vmmov %vm14666_vm0 }
 0x847   : > { %v8583_v18 = vpop.f32.mrf.mxu3  ;;  %vm14691_vm12 = vmmov %vm14666_vm0 }
 0x848   : > { %v13776_v47 = vadd.f32 %v13637_v50, %v8583_v18  ;;  %vm14692_vm5 = vmmov %vm14666_vm0 }
 0x849   : > { %vm14693_vm13 = vmmov %vm14666_vm0 }
 0x84a   : > { %v8650_v17 = vsel %vm14679_vm2, %v13776_v47, 0.0  ;;  %vm14694_vm2 = vmmov %vm14666_vm0 }
 0x858   : > { %v8551_v36 = vpop.f32.mrf.mxu1 }
 0x859   : > { %v13702_v60 = vadd.f32 %v13637_v50, %v8551_v36  ;;  %v13731_v36 = vadd.f32 %v13637_v50, %v13628_v62  ;;  %v8638_v62 = vsel %vm14673_vm9, %v13743_v26, 0.0  ;;  %vm14688_vm9 = vmmov %vm14666_vm0 }
 0x85b   : > { %v8624_v54 = vsel %vm14666_vm0, %v13702_v60, 0.0  ;;  %v8634_v0 = vsel %vm14671_vm6, %v13731_v36, 0.0  ;;  %vm14686_vm6 = vmmov %vm14666_vm0 }
 0x85c   : > { %v8625_v37 = vadd.f32 %v8624_v54, %v8623_v55 }
 0x860   : > { %v8553_v28 = vpop.f32.mrf.mxu1 }
 0x861   : > { %v13707_v35 = vadd.f32 %v13637_v50, %v8553_v28  ;;  %v13749_v28 = vadd.f32 %v13637_v50, %v13634_v20 }
 0x863   : > { %v8626_v44 = vsel %vm14667_vm1, %v13707_v35, 0.0  ;;  %v8640_v6 = vsel %vm14674_vm11, %v13749_v28, 0.0  ;;  %vm14682_vm1 = vmmov %vm14666_vm0 }
 0x864   : > { %v8627_v24 = vadd.f32 %v8626_v44, %v8625_v37  ;;  %vm14689_vm11 = vmmov %vm14666_vm0 }
 0x876   : > { %v8586_v3 = vpop.f32.mrf.mxu3 }
 0x877   : > { %v13781_v51 = vadd.f32 %v13637_v50, %v8586_v3 }
 0x879   : > { %v8652_v63 = vsel %vm14680_vm7, %v13781_v51, 0.0  ;;  %vm14695_vm7 = vmmov %vm14666_vm0 }
 0x87e   : > { %v8588_v8 = vpop.f32.mrf.mxu3 }
 0x87f   : > { %v13786_v54 = vadd.f32 %v13637_v50, %v8588_v8 }
 0x889   : > { %v8556_v14 = vpop.f32.mrf.mxu1 }
 0x88a   : > { %v13712_v12 = vadd.f32 %v13637_v50, %v8556_v14 }
 0x88c   : > { %v8628_v61 = vsel %vm14668_vm10, %v13712_v12, 0.0  ;;  %vm14683_vm10 = vmmov %vm14666_vm0 }
 0x88d   : > { %v8629_v27 = vadd.f32 %v8628_v61, %v8627_v24  ;;  %v8654_v61 = vsel %vm14681_vm15, %v13786_v54, 0.0  ;;  %vm14696_vm15 = vmmov %vm14666_vm0 }
 0x891   : > { %v8558_v53 = vpop.f32.mrf.mxu1 }
 0x892   : > { %v13717_v39 = vadd.f32 %v13637_v50, %v8558_v53 }
 0x894   : > { %v8630_v5 = vsel %vm14669_vm3, %v13717_v39, 0.0  ;;  %vm14684_vm3 = vmmov %vm14666_vm0 }
 0x895   : > { %v8631_v23 = vadd.f32 %v8630_v5, %v8629_v27 }
 0x897   : > { %v8633_v25 = vadd.f32 %v8632_v58, %v8631_v23 }
 0x899   : > { %v8635_v19 = vadd.f32 %v8634_v0, %v8633_v25 }
 0x89b   : > { %v8637_v22 = vadd.f32 %v8636_v13, %v8635_v19 }
 0x89d   : > { %v8639_v9 = vadd.f32 %v8638_v62, %v8637_v22 }
 0x89f   : > { %v8641_v42 = vadd.f32 %v8640_v6, %v8639_v9 }
 0x8a1   : > { %v8643_v40 = vadd.f32 %v8642_v57, %v8641_v42 }
 0x8a3   : > { %v8645_v14 = vadd.f32 %v8644_v4, %v8643_v40 }
 0x8a5   : > { %v8647_v32 = vadd.f32 %v8646_v2, %v8645_v14 }
 0x8a7   : > { %v8649_v15 = vadd.f32 %v8648_v45, %v8647_v32 }
 0x8a9   : > { %v8651_v21 = vadd.f32 %v8650_v17, %v8649_v15 }
 0x8ab   : > { %v8653_v55 = vadd.f32 %v8652_v63, %v8651_v21 }
 0x8ad   : > { %v8655_v27 = vadd.f32 %v8654_v61, %v8653_v55 }
 0x8ae   : > { %v8591_v20 = vpop.f32.mrf.mxu3 }
 0x8af   : > { %v13789_v53 = vadd.f32 %v13637_v50, %v8591_v20 }
 0x8b1   : > { %v8656_v24 = vsel %vm14666_vm0, %v13789_v53, 0.0 }
 0x8b2   : > { %v8657_v23 = vadd.f32 %v8656_v24, %v8655_v27 }
 0x8b6   : > { %v8593_v7 = vpop.f32.mrf.mxu3 }
 0x8b7   : > { %v13792_v37 = vadd.f32 %v13637_v50, %v8593_v7 }
 0x8b9   : > { %v8658_v18 = vsel %vm14682_vm1, %v13792_v37, 0.0  ;;  %vm14697_vm1 = vmmov %vm14666_vm0 }
 0x8ba   : > { %v8659_v25 = vadd.f32 %v8658_v18, %v8657_v23 }
 0x8c6   : > { %v8596_v44 = vpop.f32.mrf.mxu3 }
 0x8c7   : > { %v13799_v5 = vadd.f32 %v13637_v50, %v8596_v44 }
 0x8c9   : > { %v8660_v58 = vsel %vm14683_vm10, %v13799_v5, 0.0  ;;  %vm14698_vm10 = vmmov %vm14666_vm0 }
 0x8ca   : > { %v8661_v19 = vadd.f32 %v8660_v58, %v8659_v25 }
 0x8ce   : > { %v8598_v0 = vpop.f32.mrf.mxu3 }
 0x8cf   : > { %v13806_v3 = vadd.f32 %v13637_v50, %v8598_v0 }
 0x8d1   : > { %v8662_v13 = vsel %vm14684_vm3, %v13806_v3, 0.0  ;;  %vm14699_vm3 = vmmov %vm14666_vm0 }
 0x8d2   : > { %v8663_v22 = vadd.f32 %v8662_v13, %v8661_v19 }
 0x8d4   : > { %v8664_v62 = vrot.slane %v8663_v22, 4 }
 0x8d6   : > { %v8665_v9 = vadd.f32 %v8664_v62, %v8663_v22 }
 0x8d8   : > { %v8666_v8 = vrot.slane %v8665_v9, 2 }
 0x8da   : > { %v8667_v6 = vadd.f32 %v8666_v8, %v8665_v9 }
 0x8dc   : > { %v8668_v42 = vrot.slane %v8667_v6, 1 }
 0x8de   : > { %v8669_v57 = vadd.f32 %v8668_v42, %v8667_v6 }
 0x8e0   : > { %v13810_v40 = vmul.f32 0.00390625, %v8669_v57 }
 0x8e2   : > { %v13814_v20 = vsub.f32 %v13645_v38, %v13810_v40  ;;  %v13818_v50 = vsub.f32 %v13642_v10, %v13810_v40  ;;  %v13822_v4 = vsub.f32 %v13648_v48, %v13810_v40  ;;  %v13826_v14 = vsub.f32 %v13653_v59, %v13810_v40 }
 0x8e3   : > { %v13834_v38 = vsub.f32 %v13660_v34, %v13810_v40  ;;  %v13840_v48 = vsub.f32 %v13667_v33, %v13810_v40  ;;  %v13848_v17 = vsub.f32 %v13672_v52, %v13810_v40  ;;  %v13855_v33 = vsub.f32 %v13677_v49, %v13810_v40 }
 0x8e4   : > { %v8703_v2 = vmul.f32 %v13814_v20, %v13814_v20  ;;  %v8704_v32 = vmul.f32 %v13818_v50, %v13818_v50  ;;  %v8705_v10 = vmul.f32 %v13822_v4, %v13822_v4  ;;  %v8706_v59 = vmul.f32 %v13826_v14, %v13826_v14 }
 0x8e5   : > { %v8707_v34 = vmul.f32 %v13834_v38, %v13834_v38  ;;  %v8708_v55 = vmul.f32 %v13840_v48, %v13840_v48  ;;  %v13862_v52 = vsub.f32 %v13682_v11, %v13810_v40  ;;  %v8709_v24 = vmul.f32 %v13848_v17, %v13848_v17 }
 0x8e6   : > { %v8735_v45 = vsel %vm14685_vm14, %v8703_v2, 0.0  ;;  %v8736_v15 = vsel %vm14686_vm6, %v8704_v32, 0.0  ;;  %v8738_v21 = vsel %vm14687_vm8, %v8705_v10, 0.0  ;;  %v8740_v44 = vsel %vm14688_vm9, %v8706_v59, 0.0  ;;  %vm14700_vm14 = vmmov %vm14666_vm0 }
 0x8e7   : > { %v8737_v7 = vadd.f32 %v8736_v15, %v8735_v45  ;;  %v8742_v27 = vsel %vm14689_vm11, %v8707_v34, 0.0  ;;  %v13869_v49 = vsub.f32 %v13687_v41, %v13810_v40  ;;  %v8710_v23 = vmul.f32 %v13855_v33, %v13855_v33  ;;  %vm14701_vm6 = vmmov %vm14666_vm0 }
 0x8e8   : > { %v8744_v58 = vsel %vm14690_vm4, %v8708_v55, 0.0  ;;  %v13876_v11 = vsub.f32 %v13692_v56, %v13810_v40  ;;  %v8711_v0 = vmul.f32 %v13862_v52, %v13862_v52  ;;  %v8746_v19 = vsel %vm14691_vm12, %v8709_v24, 0.0  ;;  %vm14702_vm8 = vmmov %vm14666_vm0 }
 0x8e9   : > { %v8739_v63 = vadd.f32 %v8738_v21, %v8737_v7  ;;  %v13883_v41 = vsub.f32 %v13697_v1, %v13810_v40  ;;  %v8712_v22 = vmul.f32 %v13869_v49, %v13869_v49  ;;  %v8748_v62 = vsel %vm14692_vm5, %v8710_v23, 0.0  ;;  %vm14703_vm9 = vmmov %vm14666_vm0 }
 0x8ea   : > { %v13890_v56 = vsub.f32 %v13702_v60, %v13810_v40  ;;  %v8713_v8 = vmul.f32 %v13876_v11, %v13876_v11  ;;  %v8750_v6 = vsel %vm14693_vm13, %v8711_v0, 0.0  ;;  %v13897_v1 = vsub.f32 %v13707_v35, %v13810_v40  ;;  %vm14704_vm11 = vmmov %vm14666_vm0 }
 0x8eb   : > { %v8741_v61 = vadd.f32 %v8740_v44, %v8739_v63  ;;  %v8714_v57 = vmul.f32 %v13883_v41, %v13883_v41  ;;  %v8752_v2 = vsel %vm14694_vm2, %v8712_v22, 0.0  ;;  %v13904_v60 = vsub.f32 %v13712_v12, %v13810_v40  ;;  %vm14705_vm4 = vmmov %vm14666_vm0 }
 0x8ec   : > { %v8715_v10 = vmul.f32 %v13890_v56, %v13890_v56  ;;  %v8754_v59 = vsel %vm14695_vm7, %v8713_v8, 0.0  ;;  %v13911_v35 = vsub.f32 %v13717_v39, %v13810_v40  ;;  %v8716_v15 = vmul.f32 %v13897_v1, %v13897_v1  ;;  %vm14706_vm12 = vmmov %vm14666_vm0 }
 0x8ed   : > { %v8743_v18 = vadd.f32 %v8742_v27, %v8741_v61  ;;  %v8756_v7 = vsel %vm14696_vm15, %v8714_v57, 0.0  ;;  %v13918_v12 = vsub.f32 %v13725_v29, %v13810_v40  ;;  %v8717_v21 = vmul.f32 %v13904_v60, %v13904_v60  ;;  %vm14707_vm5 = vmmov %vm14666_vm0 }
 0x8ee   : > { %v8758_v63 = vsel %vm14666_vm0, %v8715_v10, 0.0  ;;  %v13925_v39 = vsub.f32 %v13731_v36, %v13810_v40  ;;  %v8718_v44 = vmul.f32 %v13911_v35, %v13911_v35  ;;  %v8760_v61 = vsel %vm14697_vm1, %v8716_v15, 0.0  ;;  %vm14708_vm13 = vmmov %vm14666_vm0 }
 0x8ef   : > { %v8745_v25 = vadd.f32 %v8744_v58, %v8743_v18  ;;  %v13932_v29 = vsub.f32 %v13737_v43, %v13810_v40  ;;  %v8719_v27 = vmul.f32 %v13918_v12, %v13918_v12  ;;  %v8762_v18 = vsel %vm14698_vm10, %v8717_v21, 0.0  ;;  %vm14709_vm2 = vmmov %vm14666_vm0 }
 0x8f0   : > { %v13939_v36 = vsub.f32 %v13743_v26, %v13810_v40  ;;  %v8720_v58 = vmul.f32 %v13925_v39, %v13925_v39  ;;  %v13946_v43 = vsub.f32 %v13749_v28, %v13810_v40  ;;  %v13953_v26 = vsub.f32 %v13755_v16, %v13810_v40  ;;  %vm14710_vm7 = vmmov %vm14666_vm0 }
 0x8f1   : > { %v8747_v13 = vadd.f32 %v8746_v19, %v8745_v25  ;;  %v8764_v25 = vsel %vm14699_vm3, %v8718_v44, 0.0  ;;  %v8721_v19 = vmul.f32 %v13932_v29, %v13932_v29  ;;  %v13960_v28 = vsub.f32 %v13761_v46, %v13810_v40  ;;  %vm14711_vm15 = vmmov %vm14666_vm0 }
 0x8f2   : > { %v13967_v16 = vsub.f32 %v13766_v31, %v13810_v40  ;;  %v13974_v46 = vsub.f32 %v13771_v30, %v13810_v40  ;;  %v13981_v31 = vsub.f32 %v13776_v47, %v13810_v40  ;;  %v13988_v30 = vsub.f32 %v13781_v51, %v13810_v40  ;;  %vm14712_vm1 = vmmov %vm14666_vm0 }
 0x8f3   : > { %v8749_v9 = vadd.f32 %v8748_v62, %v8747_v13  ;;  %v8766_v13 = vsel %vm14700_vm14, %v8719_v27, 0.0  ;;  %v8722_v62 = vmul.f32 %v13939_v36, %v13939_v36  ;;  %v13995_v47 = vsub.f32 %v13786_v54, %v13810_v40  ;;  %vm14713_vm10 = vmmov %vm14666_vm0 }
 0x8f4   : > { %v14002_v51 = vsub.f32 %v13789_v53, %v13810_v40  ;;  %v14009_v54 = vsub.f32 %v13792_v37, %v13810_v40  ;;  %v14016_v53 = vsub.f32 %v13799_v5, %v13810_v40  ;;  %v14023_v37 = vsub.f32 %v13806_v3, %v13810_v40  ;;  %vm14714_vm3 = vmmov %vm14666_vm0 }
 0x8f5   : > { %v8751_v42 = vadd.f32 %v8750_v6, %v8749_v9  ;;  %v8768_v9 = vsel %vm14701_vm6, %v8720_v58, 0.0  ;;  %v8723_v6 = vmul.f32 %v13946_v43, %v13946_v43 }
 0x8f6   : > { %v8733_v5 = vmul.f32 %v14016_v53, %v14016_v53 }
 0x8f7   : > { %v8753_v32 = vadd.f32 %v8752_v2, %v8751_v42  ;;  %v8770_v42 = vsel %vm14702_vm8, %v8721_v19, 0.0  ;;  %v8724_v2 = vmul.f32 %v13953_v26, %v13953_v26 }
 0x8f8   : > { %v8794_v3 = vsel %vm14713_vm10, %v8733_v5, 0.0  ;;  %v9423_v5 = vld [vmem:[%s9561_s28 + $0x8] sm:$0xff]  ;;  %vm14725_vm10 = vmmov %vm14666_vm0 }
 0x8f9   : > { %v8755_v45 = vadd.f32 %v8754_v59, %v8753_v32  ;;  %v8772_v32 = vsel %vm14703_vm9, %v8722_v62, 0.0  ;;  %v8725_v59 = vmul.f32 %v13960_v28, %v13960_v28  ;;  %vm14715_vm9 = vmmov %vm14666_vm0 }
 0x8fb   : > { %v8757_v34 = vadd.f32 %v8756_v7, %v8755_v45  ;;  %v8774_v45 = vsel %vm14704_vm11, %v8723_v6, 0.0  ;;  %v8726_v7 = vmul.f32 %v13967_v16, %v13967_v16  ;;  %vm14716_vm11 = vmmov %vm14666_vm0 }
 0x8fd   : > { %v8759_v55 = vadd.f32 %v8758_v63, %v8757_v34  ;;  %v8776_v34 = vsel %vm14705_vm4, %v8724_v2, 0.0  ;;  %v8727_v63 = vmul.f32 %v13974_v46, %v13974_v46  ;;  %v8734_v2 = vmul.f32 %v14023_v37, %v14023_v37  ;;  %vm14717_vm4 = vmmov %vm14666_vm0 }
 0x8ff   : > { %v8761_v24 = vadd.f32 %v8760_v61, %v8759_v55  ;;  %v8778_v55 = vsel %vm14706_vm12, %v8725_v59, 0.0  ;;  %v8728_v61 = vmul.f32 %v13981_v31, %v13981_v31  ;;  %v8796_v59 = vsel %vm14714_vm3, %v8734_v2, 0.0  ;;  %vm14718_vm12 = vmmov %vm14666_vm0 }
 0x900   : > { %vm14726_vm3 = vmmov %vm14666_vm0 }
 0x901   : > { %v8763_v23 = vadd.f32 %v8762_v18, %v8761_v24  ;;  %v8780_v24 = vsel %vm14707_vm5, %v8726_v7, 0.0  ;;  %v8729_v18 = vmul.f32 %v13988_v30, %v13988_v30  ;;  %vm14719_vm5 = vmmov %vm14666_vm0 }
 0x903   : > { %v8765_v0 = vadd.f32 %v8764_v25, %v8763_v23  ;;  %v8782_v23 = vsel %vm14708_vm13, %v8727_v63, 0.0  ;;  %v8730_v25 = vmul.f32 %v13995_v47, %v13995_v47  ;;  %vm14720_vm13 = vmmov %vm14666_vm0 }
 0x905   : > { %v8767_v22 = vadd.f32 %v8766_v13, %v8765_v0  ;;  %v8784_v0 = vsel %vm14709_vm2, %v8728_v61, 0.0  ;;  %v8731_v13 = vmul.f32 %v14002_v51, %v14002_v51  ;;  %vm14721_vm2 = vmmov %vm14666_vm0 }
 0x907   : > { %v8769_v8 = vadd.f32 %v8768_v9, %v8767_v22  ;;  %v8786_v22 = vsel %vm14710_vm7, %v8729_v18, 0.0  ;;  %v8732_v9 = vmul.f32 %v14009_v54, %v14009_v54  ;;  %vm14722_vm7 = vmmov %vm14666_vm0 }
 0x909   : > { %v8771_v57 = vadd.f32 %v8770_v42, %v8769_v8  ;;  %v8788_v8 = vsel %vm14711_vm15, %v8730_v25, 0.0  ;;  %v8790_v42 = vsel %vm14666_vm0, %v8731_v13, 0.0  ;;  %vm14723_vm15 = vmmov %vm14666_vm0 }
 0x90b   : > { %v8773_v10 = vadd.f32 %v8772_v32, %v8771_v57  ;;  %v8792_v32 = vsel %vm14712_vm1, %v8732_v9, 0.0  ;;  %vm14724_vm1 = vmmov %vm14666_vm0 }
 0x90d   : > { %v8775_v15 = vadd.f32 %v8774_v45, %v8773_v10 }
 0x90f   : > { %v8777_v21 = vadd.f32 %v8776_v34, %v8775_v15 }
 0x911   : > { %v8779_v44 = vadd.f32 %v8778_v55, %v8777_v21 }
 0x913   : > { %v8781_v27 = vadd.f32 %v8780_v24, %v8779_v44 }
 0x915   : > { %v8783_v58 = vadd.f32 %v8782_v23, %v8781_v27 }
 0x917   : > { %v8785_v19 = vadd.f32 %v8784_v0, %v8783_v58 }
 0x919   : > { %v8787_v62 = vadd.f32 %v8786_v22, %v8785_v19 }
 0x91b   : > { %v8789_v6 = vadd.f32 %v8788_v8, %v8787_v62 }
 0x91d   : > { %v8791_v57 = vadd.f32 %v8790_v42, %v8789_v6  ;;  %v9422_v6 = vld [vmem:[%s9561_s28] sm:$0xff]  ;;  %v9424_v42 = vld [vmem:[%s9561_s28 + $0x10] sm:$0xff] }
 0x91f   : > { %v8793_v10 = vadd.f32 %v8792_v32, %v8791_v57 }
 0x921   : > { %v8795_v40 = vadd.f32 %v8794_v3, %v8793_v10  ;;  %v9427_v3 = vld [vmem:[%s9561_s28 + $0x28] sm:$0xff] }
 0x923   : > { %v8797_v45 = vadd.f32 %v8796_v59, %v8795_v40  ;;  %v9428_v59 = vld [vmem:[%s9561_s28 + $0x30] sm:$0xff] }
 0x925   : > { %v8798_v15 = vrot.slane %v8797_v45, 4 }
 0x927   : > { %v8799_v7 = vadd.f32 %v8798_v15, %v8797_v45  ;;  %v9429_v15 = vld [vmem:[%s9561_s28 + $0x38] sm:$0xff] }
 0x929   : > { %v8800_v34 = vrot.slane %v8799_v7, 2 }
 0x92b   : > { %v8801_v21 = vadd.f32 %v8800_v34, %v8799_v7  ;;  %v9430_v34 = vld [vmem:[%s9561_s28 + $0x40] sm:$0xff] }
 0x92d   : > { %v8802_v63 = vrot.slane %v8801_v21, 1 }
 0x92f   : > { %v8803_v55 = vadd.f32 %v8802_v63, %v8801_v21  ;;  %v9431_v63 = vld [vmem:[%s9561_s28 + $0x48] sm:$0xff] }
 0x931   : > { %v8804_v44 = vmul.f32 0.00390625, %v8803_v55 }
 0x933   : > { %v8805_v61 = vadd.f32 1e-05, %v8804_v44  ;;  %v9432_v44 = vld [vmem:[%s9561_s28 + $0x50] sm:$0xff] }
 0x935   : > { %9420 = vrsqrt.f32 %v8805_v61  ;;  %vm8812_vm6 = vweird.f32 %v8805_v61 }
 0x93b   : > { %v9421_v24 = vpop.eup %9420 }
 0x93c   : > { %v8807_v27 = vmul.f32 %v9421_v24, %v8805_v61  ;;  %vm8813_vm14 = vweird.f32 %v9421_v24 }
 0x93d   : > { %vm8814_vm8 = vmor %vm8812_vm6, %vm8813_vm14 }
 0x93e   : > { %v8808_v18 = vmul.f32 %v9421_v24, %v8807_v27  ;;  %vm14727_vm14 = vmmov %vm14666_vm0 }
 0x93f   : > { %vm14728_vm6 = vmmov %vm14666_vm0 }
 0x940   : > { %v8809_v23 = vmul.f32 0.5, %v8808_v18  ;;  %v9434_v18 = vld [vmem:[%s9561_s28 + $0x60] sm:$0xff] }
 0x942   : > { %v8810_v58 = vsub.f32 1.5, %v8809_v23 }
 0x944   : > { %v8811_v25 = vmul.f32 %v9421_v24, %v8810_v58  ;;  %v9435_v58 = vld [vmem:[%s9561_s28 + $0x68] sm:$0xff] }
 0x946   : > { %v14036_v0 = vsel %vm8814_vm8, %v9421_v24, %v8811_v25  ;;  %v9433_v24 = vld [vmem:[%s9561_s28 + $0x58] sm:$0xff]  ;;  %vm14729_vm8 = vmmov %vm14666_vm0 }
 0x947   : > { %v8816_v19 = vmul.f32 %v14036_v0, %v13814_v20  ;;  %v8817_v13 = vmul.f32 %v14036_v0, %v13818_v50  ;;  %v8818_v22 = vmul.f32 %v14036_v0, %v13822_v4  ;;  %v8819_v62 = vmul.f32 %v14036_v0, %v13826_v14 }
 0x948   : > { %v8820_v9 = vmul.f32 %v14036_v0, %v13834_v38  ;;  %v8821_v8 = vmul.f32 %v14036_v0, %v13840_v48  ;;  %v8822_v20 = vmul.f32 %v14036_v0, %v13848_v17  ;;  %v8823_v57 = vmul.f32 %v14036_v0, %v13855_v33  ;;  %v9425_v38 = vld [vmem:[%s9561_s28 + $0x18] sm:$0xff]  ;;  %v9426_v17 = vld [vmem:[%s9561_s28 + $0x20] sm:$0xff] }
 0x949   : > { %v8848_v50 = vadd.f32 %v9422_v6, %v8816_v19  ;;  %v8849_v4 = vadd.f32 %v9423_v5, %v8817_v13  ;;  %v8850_v14 = vadd.f32 %v9424_v42, %v8818_v22  ;;  %v8851_v2 = vadd.f32 %v9425_v38, %v8819_v62  ;;  %v9436_v19 = vld [vmem:[%s9561_s28 + $0x70] sm:$0xff]  ;;  %v9437_v22 = vld [vmem:[%s9561_s28 + $0x78] sm:$0xff]  ;;  %v9443_v38 = vld [vmem:[%s9561_s28 + $0xa8] sm:$0xff] }
 0x94a   : > { %v8824_v48 = vmul.f32 %v14036_v0, %v13862_v52  ;;  %v8852_v32 = vadd.f32 %v9426_v17, %v8820_v9  ;;  %v8825_v10 = vmul.f32 %v14036_v0, %v13869_v49  ;;  %v8853_v40 = vadd.f32 %v9427_v3, %v8821_v8  ;;  %v9438_v9 = vld [vmem:[%s9561_s28 + $0x80] sm:$0xff] }
 0x94b   : > { %8880 = vst.msk [vmem:[%s9561_s28] sm:$0xff] %vm14715_vm9, %v8848_v50  ;;  %v8826_v33 = vmul.f32 %v14036_v0, %v13876_v11  ;;  %v8854_v52 = vadd.f32 %v9428_v59, %v8822_v20  ;;  %v8827_v45 = vmul.f32 %v14036_v0, %v13883_v41  ;;  %v8855_v49 = vadd.f32 %v9429_v15, %v8823_v57  ;;  %v9439_v20 = vld [vmem:[%s9561_s28 + $0x88] sm:$0xff]  ;;  %v9440_v50 = vld [vmem:[%s9561_s28 + $0x90] sm:$0xff]  ;;  %vm14730_vm9 = vmmov %vm14666_vm0 }
 0x94c   : > { %8881 = vst.msk [vmem:[%s9561_s28 + $0x8] sm:$0xff] %vm14716_vm11, %v8849_v4  ;;  %v8828_v7 = vmul.f32 %v14036_v0, %v13890_v56  ;;  %v8856_v11 = vadd.f32 %v9430_v34, %v8824_v48  ;;  %v8829_v21 = vmul.f32 %v14036_v0, %v13897_v1  ;;  %v8857_v41 = vadd.f32 %v9431_v63, %v8825_v10  ;;  %v9441_v4 = vld [vmem:[%s9561_s28 + $0x98] sm:$0xff]  ;;  %vm14731_vm11 = vmmov %vm14666_vm0  ;;  %v9444_v48 = vld [vmem:[%s9561_s28 + $0xb0] sm:$0xff] }
 0x94d   : > { %8882 = vst.msk [vmem:[%s9561_s28 + $0x10] sm:$0xff] %vm14717_vm4, %v8850_v14  ;;  %v8830_v55 = vmul.f32 %v14036_v0, %v13904_v60  ;;  %v8858_v56 = vadd.f32 %v9432_v44, %v8826_v33  ;;  %v8831_v61 = vmul.f32 %v14036_v0, %v13911_v35  ;;  %v8859_v1 = vadd.f32 %v9433_v24, %v8827_v45  ;;  %v9442_v14 = vld [vmem:[%s9561_s28 + $0xa0] sm:$0xff]  ;;  %vm14732_vm4 = vmmov %vm14666_vm0 }
 0x94e   : > { %8883 = vst.msk [vmem:[%s9561_s28 + $0x18] sm:$0xff] %vm14718_vm12, %v8851_v2  ;;  %v8832_v27 = vmul.f32 %v14036_v0, %v13918_v12  ;;  %v8860_v60 = vadd.f32 %v9434_v18, %v8828_v7  ;;  %v8833_v23 = vmul.f32 %v14036_v0, %v13925_v39  ;;  %v8861_v35 = vadd.f32 %v9435_v58, %v8829_v21  ;;  %vm14733_vm12 = vmmov %vm14666_vm0  ;;  %v9451_v7 = vld [vmem:[%s9561_s28 + $0xe8] sm:$0xff] }
 0x94f   : > { %8884 = vst.msk [vmem:[%s9561_s28 + $0x20] sm:$0xff] %vm14719_vm5, %v8852_v32  ;;  %v8834_v25 = vmul.f32 %v14036_v0, %v13932_v29  ;;  %v8862_v12 = vadd.f32 %v9436_v19, %v8830_v55  ;;  %v8835_v13 = vmul.f32 %v14036_v0, %v13939_v36  ;;  %v8863_v39 = vadd.f32 %v9437_v22, %v8831_v61  ;;  %v9445_v32 = vld [vmem:[%s9561_s28 + $0xb8] sm:$0xff]  ;;  %vm14734_vm5 = vmmov %vm14666_vm0 }
 0x950   : > { %8885 = vst.msk [vmem:[%s9561_s28 + $0x28] sm:$0xff] %vm14720_vm13, %v8853_v40  ;;  %v8836_v62 = vmul.f32 %v14036_v0, %v13946_v43  ;;  %v8864_v29 = vadd.f32 %v9438_v9, %v8832_v27  ;;  %v8837_v8 = vmul.f32 %v14036_v0, %v13953_v26  ;;  %v8865_v36 = vadd.f32 %v9439_v20, %v8833_v23  ;;  %vm14735_vm13 = vmmov %vm14666_vm0 }
 0x951   : > { %8886 = vst.msk [vmem:[%s9561_s28 + $0x30] sm:$0xff] %vm14721_vm2, %v8854_v52  ;;  %v8838_v6 = vmul.f32 %v14036_v0, %v13960_v28  ;;  %v8866_v43 = vadd.f32 %v9440_v50, %v8834_v25  ;;  %v8839_v5 = vmul.f32 %v14036_v0, %v13967_v16  ;;  %v8867_v26 = vadd.f32 %v9441_v4, %v8835_v13  ;;  %vm14736_vm2 = vmmov %vm14666_vm0 }
 0x952   : > { %8887 = vst.msk [vmem:[%s9561_s28 + $0x38] sm:$0xff] %vm14722_vm7, %v8855_v49  ;;  %v8840_v42 = vmul.f32 %v14036_v0, %v13974_v46  ;;  %v8868_v28 = vadd.f32 %v9442_v14, %v8836_v62  ;;  %v8841_v57 = vmul.f32 %v14036_v0, %v13981_v31  ;;  %v8869_v16 = vadd.f32 %v9443_v38, %v8837_v8  ;;  %vm14737_vm7 = vmmov %vm14666_vm0  ;;  %v9450_v49 = vld [vmem:[%s9561_s28 + $0xe0] sm:$0xff] }
 0x953   : > { %8888 = vst.msk [vmem:[%s9561_s28 + $0x40] sm:$0xff] %vm14723_vm15, %v8856_v11  ;;  %v8842_v2 = vmul.f32 %v14036_v0, %v13988_v30  ;;  %v8870_v46 = vadd.f32 %v9444_v48, %v8838_v6  ;;  %v8843_v17 = vmul.f32 %v14036_v0, %v13995_v47  ;;  %v8871_v31 = vadd.f32 %v9445_v32, %v8839_v5  ;;  %v9446_v30 = vld [vmem:[%s9561_s28 + $0xc0] sm:$0xff]  ;;  %v9447_v47 = vld [vmem:[%s9561_s28 + $0xc8] sm:$0xff]  ;;  %vm14738_vm15 = vmmov %vm14666_vm0 }
 0x954   : > { %8889 = vst.msk [vmem:[%s9561_s28 + $0x48] sm:$0xff] %vm14666_vm0, %v8857_v41  ;;  %v8844_v10 = vmul.f32 %v14036_v0, %v14002_v51  ;;  %v8872_v3 = vadd.f32 %v9446_v30, %v8840_v42  ;;  %v8845_v40 = vmul.f32 %v14036_v0, %v14009_v54  ;;  %v8873_v33 = vadd.f32 %v9447_v47, %v8841_v57  ;;  %v9448_v51 = vld [vmem:[%s9561_s28 + $0xd0] sm:$0xff]  ;;  %v9449_v54 = vld [vmem:[%s9561_s28 + $0xd8] sm:$0xff] }
 0x955   : > { %8890 = vst.msk [vmem:[%s9561_s28 + $0x50] sm:$0xff] %vm14724_vm1, %v8858_v56  ;;  %v8846_v59 = vmul.f32 %v14036_v0, %v14016_v53  ;;  %v8874_v52 = vadd.f32 %v9448_v51, %v8842_v2  ;;  %v8847_v45 = vmul.f32 %v14036_v0, %v14023_v37  ;;  %v8875_v15 = vadd.f32 %v9449_v54, %v8843_v17  ;;  %v9452_v11 = vld [vmem:[%s9561_s28 + $0xf0] sm:$0xff]  ;;  %vm14739_vm1 = vmmov %vm14666_vm0  ;;  %v9453_v37 = vld [vmem:[%s9561_s28 + $0xf8] sm:$0xff] }
 0x956   : > { %8891 = vst.msk [vmem:[%s9561_s28 + $0x58] sm:$0xff] %vm14725_vm10, %v8859_v1  ;;  %v8876_v53 = vadd.f32 %v9450_v49, %v8844_v10  ;;  %v8877_v34 = vadd.f32 %v9451_v7, %v8845_v40  ;;  %vm14740_vm10 = vmmov %vm14666_vm0 }
 0x957   : > { %8892 = vst.msk [vmem:[%s9561_s28 + $0x60] sm:$0xff] %vm14726_vm3, %v8860_v60  ;;  %v8878_v21 = vadd.f32 %v9452_v11, %v8846_v59  ;;  %v8879_v0 = vadd.f32 %v9453_v37, %v8847_v45  ;;  %vm14741_vm3 = vmmov %vm14666_vm0 }
 0x958   : > { %8893 = vst.msk [vmem:[%s9561_s28 + $0x68] sm:$0xff] %vm14727_vm14, %v8861_v35  ;;  %vm14742_vm14 = vmmov %vm14666_vm0 }
 0x959   : > { %8894 = vst.msk [vmem:[%s9561_s28 + $0x70] sm:$0xff] %vm14728_vm6, %v8862_v12  ;;  %vm14743_vm6 = vmmov %vm14666_vm0 }
 0x95a   : > { %8895 = vst.msk [vmem:[%s9561_s28 + $0x78] sm:$0xff] %vm14729_vm8, %v8863_v39  ;;  %vm14744_vm8 = vmmov %vm14666_vm0 }
 0x95b   : > { %8896 = vst.msk [vmem:[%s9561_s28 + $0x80] sm:$0xff] %vm14730_vm9, %v8864_v29 }
 0x95c   : > { %8897 = vst.msk [vmem:[%s9561_s28 + $0x88] sm:$0xff] %vm14731_vm11, %v8865_v36 }
 0x95d   : > { %8898 = vst.msk [vmem:[%s9561_s28 + $0x90] sm:$0xff] %vm14732_vm4, %v8866_v43 }
 0x95e   : > { %8899 = vst.msk [vmem:[%s9561_s28 + $0x98] sm:$0xff] %vm14733_vm12, %v8867_v26 }
 0x95f   : > { %8900 = vst.msk [vmem:[%s9561_s28 + $0xa0] sm:$0xff] %vm14734_vm5, %v8868_v28 }
 0x960   : > { %8901 = vst.msk [vmem:[%s9561_s28 + $0xa8] sm:$0xff] %vm14735_vm13, %v8869_v16 }
 0x961   : > { %8902 = vst.msk [vmem:[%s9561_s28 + $0xb0] sm:$0xff] %vm14736_vm2, %v8870_v46 }
 0x962   : > { %8903 = vst.msk [vmem:[%s9561_s28 + $0xb8] sm:$0xff] %vm14737_vm7, %v8871_v31 }
 0x963   : > { %8904 = vst.msk [vmem:[%s9561_s28 + $0xc0] sm:$0xff] %vm14738_vm15, %v8872_v3 }
 0x964   : > { %8905 = vst.msk [vmem:[%s9561_s28 + $0xc8] sm:$0xff] %vm14666_vm0, %v8873_v33 }
 0x965   : > { %8906 = vst.msk [vmem:[%s9561_s28 + $0xd0] sm:$0xff] %vm14739_vm1, %v8874_v52 }
 0x966   : > { %8907 = vst.msk [vmem:[%s9561_s28 + $0xd8] sm:$0xff] %vm14740_vm10, %v8875_v15 }
 0x967   : > { %8908 = vst.msk [vmem:[%s9561_s28 + $0xe0] sm:$0xff] %vm14741_vm3, %v8876_v53 }
 0x968   : > { %8909 = vst.msk [vmem:[%s9561_s28 + $0xe8] sm:$0xff] %vm14742_vm14, %v8877_v34 }
 0x969   : > { %8910 = vst.msk [vmem:[%s9561_s28 + $0xf0] sm:$0xff] %vm14743_vm6, %v8878_v21 }
 0x96a   : > { %8911 = vst.msk [vmem:[%s9561_s28 + $0xf8] sm:$0xff] %vm14744_vm8, %v8879_v0 }
 0x96b PF: > { %s13_s16 = sadd.s32 1, %s9492_s16   ;;  %s14745_s12 = smov %s9484_s14 }
 0x96c   : > { %p10_p8 = scmp.ge.s32.totalorder %s13_s16, 6   ;;  %s14746_s13 = smov %s9488_s15 }
 0x96d   : > { %s14747_s14 = smov %s14750_s17  ;;  %s14748_s15 = smov %s14754_s18 }
 0x96e   :  { %12 = sbr.rel (!%p10_p8) target bundleno = 3 (0x3), region = 77 }

</bundles_post_ra>
